<compile_context>
chip_gen: v7x
topology: tpu7x:2x2x1
jax: 0.10.0
libtpu: 0.0.40
codegen_flags: <defaults>
</compile_context>

<pallas_src>
import functools
import math

import numpy as np
import jax
import jax.numpy as jnp
from jax import lax
from jax.experimental import pallas as pl
from jax.experimental.pallas import tpu as pltpu

# ----------------------------- small config (scaled-down) -----------------------------
B = 4            # batch
ST = 16          # text sequence length   (orig 256)
SV = 8           # frame sequence length  (orig 32)
H = 32           # hidden size            (orig 768)
NH = 4           # attention heads        (orig 12)
FF = 64          # feed-forward size      (orig 3072 / 2048)
VOCAB = 64       # vocab size             (orig 21128)
NCLS = 8         # len(CATEGORY_ID_LIST)
N_BERT_LAYERS = 2     # orig 6
N_CROSS_LAYERS = 2    # orig 6
N_VIDEO_LAYERS = 2    # orig 2
MASK_TOKEN_ID = VOCAB - 1
EPS_BERT = 1e-12
EPS_TORCH = 1e-5
NEG_INF = -1e9

MATMUL_DTYPE = jnp.bfloat16   # MXU input dtype; accumulation stays f32
W_DTYPE = MATMUL_DTYPE        # matmul weights stored bf16 in HBM (converted once at init)


# ------------------------ generation-aware tiling / VMEM budget ------------------------
def _tpu_vmem_bytes():
    try:
        return int(pltpu.get_tpu_info().vmem_capacity_bytes)
    except Exception:
        return 64 << 20      # conservative fallback (v7x per-TC VMEM)


_VMEM_BYTES = _tpu_vmem_bytes()
if _VMEM_BYTES >= (100 << 20):            # v5e / v6e: 128 MiB VMEM -> large tiles, full-K
    TM_TARGET, TN_TARGET, TK_TARGET = 1024, 1024, 1024
else:                                     # v7x: 64 MiB per TC -> keep double-buffering room
    TM_TARGET, TN_TARGET, TK_TARGET = 256, 512, 512
VMEM_LIMIT = int(min(_VMEM_BYTES * 3 // 4, 96 << 20))


def _mosaic_params(*semantics):
    return pltpu.CompilerParams(dimension_semantics=semantics,
                                vmem_limit_bytes=VMEM_LIMIT)


# ----------------------------------- helpers -----------------------------------
def _apply_act(y, activation):
    if activation == "gelu":
        # TODO(synk): PyTorch GELU uses erf; tanh approximation used here for Mosaic lowering.
        c = math.sqrt(2.0 / math.pi)
        return 0.5 * y * (1.0 + jnp.tanh(c * (y + 0.044715 * y * y * y)))
    if activation == "relu":
        return jnp.maximum(y, 0.0)
    if activation == "tanh":
        return jnp.tanh(y)
    return y


def _pick_tile(dim, target, quantum):
    """Largest divisor of `dim` that is a multiple of `quantum` and <= target; full dim if small."""
    if dim <= target:
        return dim
    t = (target // quantum) * quantum
    while t >= quantum:
        if dim % t == 0:
            return t
        t -= quantum
    return dim


# ----------------------------------- fused linear kernel -----------------------------------
def _linear_kernel(*refs, activation, has_residual, has_ln, ln_eps, act_before_ln):
    # refs layout: x, w, b, [residual], [ln_g, ln_b], out, acc
    x_ref, w_ref, b_ref = refs[0], refs[1], refs[2]
    idx = 3
    res_ref = None
    g_ref = beta_ref = None
    if has_residual:
        res_ref = refs[idx]
        idx += 1
    if has_ln:
        g_ref, beta_ref = refs[idx], refs[idx + 1]
        idx += 2
    o_ref = refs[idx]
    acc_ref = refs[idx + 1]

    k = pl.program_id(2)

    @pl.when(k == 0)
    def _():
        acc_ref[...] = jnp.zeros_like(acc_ref)

    acc_ref[...] += jnp.dot(
        x_ref[...].astype(MATMUL_DTYPE),
        w_ref[...].astype(MATMUL_DTYPE),
        preferred_element_type=jnp.float32,
    )

    @pl.when(k == pl.num_programs(2) - 1)
    def _():
        y = acc_ref[...] + b_ref[...]
        if has_residual:
            y = y + res_ref[...].astype(jnp.float32)
        if has_ln and act_before_ln:
            y = _apply_act(y, activation)
        if has_ln:
            mu = jnp.mean(y, axis=-1, keepdims=True)
            var = jnp.mean((y - mu) ** 2, axis=-1, keepdims=True)
            y = (y - mu) * lax.rsqrt(var + ln_eps)
            y = y * g_ref[...] + beta_ref[...]
        if (not has_ln) or (not act_before_ln):
            y = _apply_act(y, activation)
        o_ref[...] = y.astype(o_ref.dtype)


def linear(x, w, b, *, activation=None, residual=None, ln=None, act_before_ln=False,
           out_dtype=jnp.float32, tm_target=None, tn_target=None, tk_target=None):
    """y = epilogue(x @ w + b).

    epilogue = [+ residual] -> [LayerNorm(g, beta, eps)] -> activation
               (activation before LN if act_before_ln, as in the MLM head).
    Tiled over (M, N, K) with an f32 accumulator; bf16 MXU inputs; out_dtype controls the
    HBM writeback dtype (bf16 for matmul-only consumers, f32 for the residual/LN stream).
    """
    tm_target = TM_TARGET if tm_target is None else tm_target
    tn_target = TN_TARGET if tn_target is None else tn_target
    tk_target = TK_TARGET if tk_target is None else tk_target

    orig_shape = x.shape
    K = orig_shape[-1]
    M = int(np.prod(orig_shape[:-1]))
    x2 = x.reshape(M, K)

    N = w.shape[1]
    n_out = N
    # If a large N with no 128-divisor must be tiled (e.g. VOCAB=21128 at production scale),
    # pad it to a 128-multiple instead of falling back to a single over-VMEM full-N block.
    if ln is None and residual is None and N > tn_target and N % 128 != 0:
        n_pad = (-N) % 128
        w = jnp.pad(w, ((0, 0), (0, n_pad)))
        b = jnp.pad(b, (0, n_pad))
        N = N + n_pad

    tm = _pick_tile(M, tm_target, 16)       # bf16 packs 16 rows per sublane group
    tk = _pick_tile(K, tk_target, 128)
    tn = N if ln is not None else _pick_tile(N, tn_target, 128)   # LN needs the full row
    grid = (M // tm, N // tn, K // tk)

    args = [x2, w, b.reshape(1, N)]
    in_specs = [
        pl.BlockSpec((tm, tk), lambda i, j, k: (i, k)),
        pl.BlockSpec((tk, tn), lambda i, j, k: (k, j)),
        pl.BlockSpec((1, tn), lambda i, j, k: (0, j)),
    ]
    ln_eps = 0.0
    if residual is not None:
        args.append(residual.reshape(M, N))
        in_specs.append(pl.BlockSpec((tm, tn), lambda i, j, k: (i, j)))
    if ln is not None:
        g, beta, ln_eps = ln
        args += [g.reshape(1, N), beta.reshape(1, N)]
        in_specs += [pl.BlockSpec((1, tn), lambda i, j, k: (0, j)),
                     pl.BlockSpec((1, tn), lambda i, j, k: (0, j))]

    kernel = functools.partial(
        _linear_kernel,
        activation=activation,
        has_residual=residual is not None,
        has_ln=ln is not None,
        ln_eps=float(ln_eps),
        act_before_ln=act_before_ln,
    )
    bytes_acc = (x2.dtype.itemsize * M * K + w.dtype.itemsize * K * N
                 + jnp.dtype(out_dtype).itemsize * M * N)
    if residual is not None:
        bytes_acc += 4 * M * N
    transc = M * N if activation in ("gelu", "tanh") else 0
    out = pl.pallas_call(
        kernel,
        grid=grid,
        in_specs=in_specs,
        out_specs=pl.BlockSpec((tm, tn), lambda i, j, k: (i, j)),
        out_shape=jax.ShapeDtypeStruct((M, N), out_dtype),
        scratch_shapes=[pltpu.VMEM((tm, tn), jnp.float32)],
        compiler_params=_mosaic_params("parallel", "parallel", "arbitrary"),
        cost_estimate=pl.CostEstimate(
            flops=2 * M * N * K,
            transcendentals=transc,
            bytes_accessed=bytes_acc),
    )(*args)
    if N != n_out:
        out = out[:, :n_out]
    return out.reshape(orig_shape[:-1] + (n_out,))


def dense_small(x, w, b, *, activation=None, ln=None, act_before_ln=False):
    """Tiny head matmuls (rows == batch, N <= H) stay in plain XLA: Pallas launch /
    grid-step overhead dwarfs a (B, H) x (H, *) matmul and small-N outputs are fully
    masked lane stores."""
    y = jnp.dot(x.astype(jnp.float32), w.astype(jnp.float32)) + b
    if ln is not None and act_before_ln:
        y = _apply_act(y, activation)
    if ln is not None:
        g, beta, eps = ln
        mu = jnp.mean(y, axis=-1, keepdims=True)
        var = jnp.mean((y - mu) ** 2, axis=-1, keepdims=True)
        y = (y - mu) * lax.rsqrt(var + eps) * g + beta
    if (ln is None) or (not act_before_ln):
        y = _apply_act(y, activation)
    return y


# ----------------------------------- layernorm kernels -----------------------------------
def _layernorm_kernel(x_ref, g_ref, b_ref, o_ref, *, eps):
    x = x_ref[...]
    mu = jnp.mean(x, axis=-1, keepdims=True)
    var = jnp.mean((x - mu) ** 2, axis=-1, keepdims=True)
    y = (x - mu) * lax.rsqrt(var + eps)
    o_ref[...] = (y * g_ref[...] + b_ref[...]).astype(o_ref.dtype)


def layernorm(x, g, b, eps=EPS_TORCH):
    """LayerNorm over the last dim (used only where there is no preceding matmul to fuse into)."""
    orig_shape = x.shape
    N = orig_shape[-1]
    M = int(np.prod(orig_shape[:-1]))
    tm = _pick_tile(M, 256, 8)
    out = pl.pallas_call(
        functools.partial(_layernorm_kernel, eps=eps),
        grid=(M // tm,),
        in_specs=[
            pl.BlockSpec((tm, N), lambda i: (i, 0)),
            pl.BlockSpec((1, N), lambda i: (0, 0)),
            pl.BlockSpec((1, N), lambda i: (0, 0)),
        ],
        out_specs=pl.BlockSpec((tm, N), lambda i: (i, 0)),
        out_shape=jax.ShapeDtypeStruct((M, N), jnp.float32),
        compiler_params=_mosaic_params("parallel"),
    )(x.reshape(M, N), g.reshape(1, N), b.reshape(1, N))
    return out.reshape(orig_shape)


def _layernorm2d_kernel(x_ref, g_ref, b_ref, o_ref, *, eps):
    x = x_ref[0]
    mu = jnp.mean(x, axis=(0, 1), keepdims=True)
    var = jnp.mean((x - mu) ** 2, axis=(0, 1), keepdims=True)
    y = (x - mu) * lax.rsqrt(var + eps)
    o_ref[0] = (y * g_ref[...] + b_ref[...]).astype(o_ref.dtype)


def layernorm_2d(x, g, b, eps=EPS_TORCH):
    """nn.LayerNorm([S, H]) semantics: normalize jointly over (seq, hidden) per batch element."""
    Bb, S, Hh = x.shape
    return pl.pallas_call(
        functools.partial(_layernorm2d_kernel, eps=eps),
        grid=(Bb,),
        in_specs=[
            pl.BlockSpec((1, S, Hh), lambda i: (i, 0, 0)),
            pl.BlockSpec((S, Hh), lambda i: (0, 0)),
            pl.BlockSpec((S, Hh), lambda i: (0, 0)),
        ],
        out_specs=pl.BlockSpec((1, S, Hh), lambda i: (i, 0, 0)),
        out_shape=jax.ShapeDtypeStruct((Bb, S, Hh), jnp.float32),
        compiler_params=_mosaic_params("parallel"),
    )(x, g, b)


# ----------------------------------- attention kernels -----------------------------------
def _mha_core(q, k, v, m, scale):
    """q: (NH, Sq, dh) bf16; k/v: (NH, Sk, dh) bf16; m: (1, Sk) additive f32 mask.
    Heads are processed as the batch dim of ONE batched dot_general; returns (NH, Sq, dh) f32."""
    s = lax.dot_general(q, k, (((2,), (2,)), ((0,), (0,))),
                        preferred_element_type=jnp.float32) * scale      # (NH, Sq, Sk)
    s = s + m[None]
    s = s - jnp.max(s, axis=-1, keepdims=True)
    p = jnp.exp(s)
    inv = pl.reciprocal(jnp.sum(p, axis=-1, keepdims=True), approx=True)
    p = (p * inv).astype(v.dtype)
    return lax.dot_general(p, v, (((2,), (1,)), ((0,), (0,))),
                           preferred_element_type=jnp.float32)           # (NH, Sq, dh)


def _merge_heads(o):
    # Merge (NH, Sq, dh) -> (Sq, NH*dh) in-kernel so the HBM store is a single lane-dense slab.
    return jnp.concatenate([o[h] for h in range(o.shape[0])], axis=-1)


def _self_attn_kernel(qkv_ref, m_ref, o_ref, *, scale):
    # qkv_ref: (1, 3, NH, S, dh) packed [Q|K|V] per head; m_ref: (1, 1, S); o_ref: (1, S, H).
    o = _mha_core(qkv_ref[0, 0], qkv_ref[0, 1], qkv_ref[0, 2], m_ref[0], scale)
    o_ref[0] = _merge_heads(o).astype(o_ref.dtype)


def _cross_attn_kernel(q_ref, kv_ref, m_ref, o_ref, *, scale):
    # q_ref: (1, NH, Sq, dh); kv_ref: (1, 2, NH, Sk, dh) packed [K|V]; m_ref: (1, 1, Sk).
    o = _mha_core(q_ref[0], kv_ref[0, 0], kv_ref[0, 1], m_ref[0], scale)
    o_ref[0] = _merge_heads(o).astype(o_ref.dtype)


def self_attention(x, mask_add, p, num_heads=NH):
    """x: (B, S, H); mask_add: additive (B, 1, S); fused bf16 QKV projection + per-batch
    head-batched attention with a lane-dense (S, H) output store."""
    Bb, S, Hh = x.shape
    dh = Hh // num_heads
    # TODO(synk): fusing the QKV matmul into the attention kernel would remove this HBM
    # round trip entirely; emitting it in bf16 halves it instead.
    qkv = linear(x, p["w_qkv"], p["b_qkv"], out_dtype=MATMUL_DTYPE)          # (B, S, 3H)
    qkv = qkv.reshape(Bb, S, 3, num_heads, dh).transpose(0, 2, 3, 1, 4)      # (B, 3, NH, S, dh)
    scale = 1.0 / math.sqrt(dh)
    return pl.pallas_call(
        functools.partial(_self_attn_kernel, scale=scale),
        grid=(Bb,),
        in_specs=[
            pl.BlockSpec((1, 3, num_heads, S, dh), lambda b: (b, 0, 0, 0, 0)),
            pl.BlockSpec((1, 1, S), lambda b: (b, 0, 0)),   # mask aliased per batch, no head copy
        ],
        out_specs=pl.BlockSpec((1, S, Hh), lambda b: (b, 0, 0)),
        out_shape=jax.ShapeDtypeStruct((Bb, S, Hh), MATMUL_DTYPE),
        compiler_params=_mosaic_params("parallel"),
    )(qkv, mask_add)


def cross_attention(x, y, mask_add, p, num_heads=NH):
    """queries from x (B,Sq,H), keys/values from y (B,Sk,H); mask_add: additive (B,1,Sk)."""
    Bb, Sq, Hh = x.shape
    Sk = y.shape[1]
    dh = Hh // num_heads
    q = linear(x, p["w_qkv"][:, :Hh], p["b_qkv"][:Hh], out_dtype=MATMUL_DTYPE)
    kv = linear(y, p["w_qkv"][:, Hh:], p["b_qkv"][Hh:], out_dtype=MATMUL_DTYPE)   # fused K|V
    q = q.reshape(Bb, Sq, num_heads, dh).transpose(0, 2, 1, 3)                    # (B, NH, Sq, dh)
    kv = kv.reshape(Bb, Sk, 2, num_heads, dh).transpose(0, 2, 3, 1, 4)            # (B, 2, NH, Sk, dh)
    scale = 1.0 / math.sqrt(dh)
    return pl.pallas_call(
        functools.partial(_cross_attn_kernel, scale=scale),
        grid=(Bb,),
        in_specs=[
            pl.BlockSpec((1, num_heads, Sq, dh), lambda b: (b, 0, 0, 0)),
            pl.BlockSpec((1, 2, num_heads, Sk, dh), lambda b: (b, 0, 0, 0, 0)),
            pl.BlockSpec((1, 1, Sk), lambda b: (b, 0, 0)),
        ],
        out_specs=pl.BlockSpec((1, Sq, Hh), lambda b: (b, 0, 0)),
        out_shape=jax.ShapeDtypeStruct((Bb, Sq, Hh), MATMUL_DTYPE),
        compiler_params=_mosaic_params("parallel"),
    )(q, kv, mask_add)


# ----------------------------------- model building blocks -----------------------------------
def bert_attention_block(x, mask_add, p, eps=EPS_BERT):
    ctx = self_attention(x, mask_add, p["attn"])
    # output projection with fused bias + residual + LayerNorm (f32 residual stream)
    return linear(ctx, p["out_w"], p["out_b"], residual=x, ln=(p["ln_g"], p["ln_b"], eps))


def bert_cross_attention_block(x, y, mask_add, p, eps=EPS_BERT):
    ctx = cross_attention(x, y, mask_add, p["attn"])
    return linear(ctx, p["out_w"], p["out_b"], residual=x, ln=(p["ln_g"], p["ln_b"], eps))


def bert_ffn_block(x, p, eps=EPS_BERT):
    inter = linear(x, p["wi"], p["bi"], activation="gelu", out_dtype=MATMUL_DTYPE)
    return linear(inter, p["wo"], p["bo"], residual=x, ln=(p["ln_g"], p["ln_b"], eps))


def bert_layer(x, mask_add, p):
    x = bert_attention_block(x, mask_add, p["attn"])
    return bert_ffn_block(x, p["ffn"])


def bert_cross_layer(x, y, self_mask, cross_mask, p):
    # BertCrossLayer: self-attention -> cross-attention -> feed-forward (each with residual + LN)
    x = bert_attention_block(x, self_mask, p["self"])
    x = bert_cross_attention_block(x, y, cross_mask, p["cross"])
    return bert_ffn_block(x, p["ffn"])


def bert_encoder(input_ids, attention_mask, p):
    Bb, S = input_ids.shape
    emb = p["word_emb"][input_ids] + p["pos_emb"][:S][None] + p["type_emb"][0][None, None]
    x = layernorm(emb, p["emb_ln_g"], p["emb_ln_b"], eps=EPS_BERT)
    mask_add = (1.0 - attention_mask.astype(jnp.float32))[:, None, :] * NEG_INF   # (B, 1, S)
    for lp in p["layers"]:
        x = bert_layer(x, mask_add, lp)
    return x


def torch_transformer_encoder_layer(x, mask_add, p, eps=EPS_TORCH):
    # nn.TransformerEncoderLayer defaults: post-norm, ReLU feed-forward.
    ctx = self_attention(x, mask_add, p["attn"])
    x = linear(ctx, p["out_w"], p["out_b"], residual=x, ln=(p["ln1_g"], p["ln1_b"], eps))
    f = linear(x, p["w1"], p["b1"], activation="relu", out_dtype=MATMUL_DTYPE)
    return linear(f, p["w2"], p["b2"], residual=x, ln=(p["ln2_g"], p["ln2_b"], eps))


# ----------------------------------- parameter init -----------------------------------
class KeyGen:
    def __init__(self, key):
        self._key = key

    def __call__(self):
        self._key, sub = jax.random.split(self._key)
        return sub


def normal(key, shape, std=0.02, dtype=jnp.float32):
    return (std * jax.random.normal(key, shape, dtype=jnp.float32)).astype(dtype)


def init_attn_params(kg, d):
    # fused QKV projection: columns are [Wq | Wk | Wv]
    return {"w_qkv": normal(kg(), (d, 3 * d), dtype=W_DTYPE), "b_qkv": jnp.zeros((3 * d,))}


def init_attn_block(kg, d):
    return {
        "attn": init_attn_params(kg, d),
        "out_w": normal(kg(), (d, d), dtype=W_DTYPE), "out_b": jnp.zeros((d,)),
        "ln_g": jnp.ones((d,)), "ln_b": jnp.zeros((d,)),
    }


def init_ffn_block(kg, d, dff):
    return {
        "wi": normal(kg(), (d, dff), dtype=W_DTYPE), "bi": jnp.zeros((dff,)),
        "wo": normal(kg(), (dff, d), dtype=W_DTYPE), "bo": jnp.zeros((d,)),
        "ln_g": jnp.ones((d,)), "ln_b": jnp.zeros((d,)),
    }


def init_bert_layer(kg, d, dff):
    return {"attn": init_attn_block(kg, d), "ffn": init_ffn_block(kg, d, dff)}


def init_cross_layer(kg, d, dff):
    return {"self": init_attn_block(kg, d), "cross": init_attn_block(kg, d),
            "ffn": init_ffn_block(kg, d, dff)}


def init_torch_encoder_layer(kg, d, dff):
    return {
        "attn": init_attn_params(kg, d),
        "out_w": normal(kg(), (d, d), dtype=W_DTYPE), "out_b": jnp.zeros((d,)),
        "ln1_g": jnp.ones((d,)), "ln1_b": jnp.zeros((d,)),
        "w1": normal(kg(), (d, dff), dtype=W_DTYPE), "b1": jnp.zeros((dff,)),
        "w2": normal(kg(), (dff, d), dtype=W_DTYPE), "b2": jnp.zeros((d,)),
        "ln2_g": jnp.ones((d,)), "ln2_b": jnp.zeros((d,)),
    }


def init_params(key):
    kg = KeyGen(key)
    p = {}
    # self.bert (pretrained BertModel stand-in, deterministically initialized)
    p["bert"] = {
        "word_emb": normal(kg(), (VOCAB, H)),
        "pos_emb": normal(kg(), (ST, H)),
        "type_emb": normal(kg(), (2, H)),
        "emb_ln_g": jnp.ones((H,)), "emb_ln_b": jnp.zeros((H,)),
        "layers": [init_bert_layer(kg, H, FF) for _ in range(N_BERT_LAYERS)],
    }
    # layernorm_text / layernorm_image  (nn.LayerNorm([S, H]))
    p["ln_text_g"] = jnp.ones((ST, H)); p["ln_text_b"] = jnp.zeros((ST, H))
    p["ln_image_g"] = jnp.ones((SV, H)); p["ln_image_b"] = jnp.zeros((SV, H))
    # self.nextvlad = TransformerEncoder(num_layers=2)
    p["nextvlad"] = [init_torch_encoder_layer(kg, H, FF) for _ in range(N_VIDEO_LAYERS)]
    # cross-modal transforms
    p["text_transform_w"] = normal(kg(), (H, H), dtype=W_DTYPE)
    p["text_transform_b"] = jnp.zeros((H,))
    p["image_transform_w"] = normal(kg(), (H, H), dtype=W_DTYPE)
    p["image_transform_b"] = jnp.zeros((H,))
    p["token_type_emb"] = normal(kg(), (2, H))
    p["cross_text"] = [init_cross_layer(kg, H, FF) for _ in range(N_CROSS_LAYERS)]
    p["cross_image"] = [init_cross_layer(kg, H, FF) for _ in range(N_CROSS_LAYERS)]
    # poolers (dense + tanh on first token) -- tiny, stay in XLA, f32 weights
    p["text_pooler_w"] = normal(kg(), (H, H)); p["text_pooler_b"] = jnp.zeros((H,))
    p["image_pooler_w"] = normal(kg(), (H, H)); p["image_pooler_b"] = jnp.zeros((H,))
    # classifier: Linear(2H,H), LayerNorm(H), GELU, Linear(H, NCLS) -- tiny, stays in XLA
    p["cls_w1"] = normal(kg(), (2 * H, H)); p["cls_b1"] = jnp.zeros((H,))
    p["cls_ln_g"] = jnp.ones((H,)); p["cls_ln_b"] = jnp.zeros((H,))
    p["cls_w2"] = normal(kg(), (H, NCLS)); p["cls_b2"] = jnp.zeros((NCLS,))
    # MLM head: dense + gelu + LN + decoder(H, vocab) -- big at production scale, Pallas
    p["mlm_dense_w"] = normal(kg(), (H, H), dtype=W_DTYPE); p["mlm_dense_b"] = jnp.zeros((H,))
    p["mlm_ln_g"] = jnp.ones((H,)); p["mlm_ln_b"] = jnp.zeros((H,))
    p["mlm_dec_w"] = normal(kg(), (H, VOCAB), dtype=W_DTYPE); p["mlm_dec_b"] = jnp.zeros((VOCAB,))
    # ITM head.
    # TODO(synk): heads.ITMHead source unavailable; a single-logit Linear(2H, 1) is used so
    # BCEWithLogitsLoss(view(-1), label.view(-1)) is shape-consistent with a length-B label.
    p["itm_w"] = normal(kg(), (2 * H, 1)); p["itm_b"] = jnp.zeros((1,))
    return p


# ----------------------------------- losses -----------------------------------
def cross_entropy_ignore(logits, labels, ignore_index=-100):
    logits = logits.reshape(-1, logits.shape[-1])
    labels = labels.reshape(-1)
    valid = labels != ignore_index
    safe = jnp.where(valid, labels, 0)
    logz = jax.nn.logsumexp(logits, axis=-1)
    picked = jnp.take_along_axis(logits, safe[:, None], axis=-1)[:, 0]
    nll = jnp.where(valid, logz - picked, 0.0)
    return jnp.sum(nll) / jnp.maximum(jnp.sum(valid), 1)


def bce_with_logits(logits, targets):
    x = logits.reshape(-1)
    y = targets.reshape(-1)
    return jnp.mean(jnp.maximum(x, 0.0) - x * y + jnp.log1p(jnp.exp(-jnp.abs(x))))


# ----------------------------------- full forward -----------------------------------
def multimodal_forward(params, inputs, mlm_key):
    title_input = inputs["title_input"]
    title_mask = inputs["title_mask"]
    frame_input = inputs["frame_input"]
    frame_mask = inputs["frame_mask"]
    Bb = title_input.shape[0]

    # ---- do_mlm: MaskLM.torch_mask_tokens (80% MASK / 10% random / 10% keep) ----
    # TODO(synk): original uses a BertTokenizer for special-token masking and mask-token id;
    # here "special" := position 0 plus padding, mask token := MASK_TOKEN_ID.
    special = (jnp.arange(ST)[None, :] == 0) | (title_mask == 0)
    k1, k2, k3, k4 = jax.random.split(mlm_key, 4)
    prob = jnp.where(special, 0.0, 0.15)
    masked = jax.random.bernoulli(k1, prob)
    lm_label = jnp.where(masked, title_input, -100)
    replaced = jax.random.bernoulli(k2, 0.8, title_input.shape) & masked
    input_ids = jnp.where(replaced, MASK_TOKEN_ID, title_input)
    rand_pos = jax.random.bernoulli(k3, 0.5, title_input.shape) & masked & (~replaced)
    random_words = jax.random.randint(k4, title_input.shape, 0, VOCAB, dtype=jnp.int32)
    input_ids = jnp.where(rand_pos, random_words, input_ids)

    # ---- do_itm: ShuffleVideo.torch_shuf_video (deterministic) ----
    shuf_index = np.array(list(range(Bb // 2)) + list(range(Bb // 2, Bb))[::-1])
    video_text_match_label = jnp.asarray((np.arange(Bb) == shuf_index).astype(np.float32))
    image_embeds = frame_input[jnp.asarray(shuf_index)]

    # ---- text encoder (BERT) ----
    text_embeds = bert_encoder(input_ids, title_mask, params["bert"])
    text_embeds = layernorm_2d(text_embeds, params["ln_text_g"], params["ln_text_b"])
    image_embeds = layernorm_2d(image_embeds, params["ln_image_g"], params["ln_image_b"])

    # ---- additive key-padding masks, built once per modality (no per-head broadcast) ----
    extend_text_masks = (1.0 - title_mask.astype(jnp.float32))[:, None, :] * NEG_INF   # (B,1,ST)
    extend_image_masks = (1.0 - frame_mask.astype(jnp.float32))[:, None, :] * NEG_INF  # (B,1,SV)

    # ---- "nextvlad": 2-layer TransformerEncoder over frames ----
    for lp in params["nextvlad"]:
        image_embeds = torch_transformer_encoder_layer(image_embeds, extend_image_masks, lp)

    # ---- cross-modal transforms with token-type embedding folded into the bias ----
    text_embeds = linear(text_embeds, params["text_transform_w"],
                         params["text_transform_b"] + params["token_type_emb"][0])
    image_embeds = linear(image_embeds, params["image_transform_w"],
                          params["image_transform_b"] + params["token_type_emb"][1])

    # ---- co-attention stack ----
    x, y = text_embeds, image_embeds
    for tp, ip in zip(params["cross_text"], params["cross_image"]):
        x1 = bert_cross_layer(x, y, extend_text_masks, extend_image_masks, tp)
        y1 = bert_cross_layer(y, x, extend_image_masks, extend_text_masks, ip)
        x, y = x1, y1
    text_feats, image_feats = x, y

    # ---- poolers / classifier / ITM head: tiny matmuls stay in plain XLA ----
    cls_feats_text = dense_small(x[:, 0], params["text_pooler_w"], params["text_pooler_b"],
                                 activation="tanh")
    avg_image_feats = jnp.mean(image_feats, axis=1)          # AdaptiveAvgPool1d(1); tiny (B,H)
    cls_feats_image = dense_small(avg_image_feats, params["image_pooler_w"],
                                  params["image_pooler_b"], activation="tanh")
    final_embedding = jnp.concatenate([cls_feats_text, cls_feats_image], axis=-1)

    h = dense_small(final_embedding, params["cls_w1"], params["cls_b1"],
                    ln=(params["cls_ln_g"], params["cls_ln_b"], EPS_TORCH), activation="gelu")
    prediction = dense_small(h, params["cls_w2"], params["cls_b2"])

    # ---- MLM loss (dense + GELU + LayerNorm fused; decoder separately, padded-N tilable) ----
    mh = linear(text_feats, params["mlm_dense_w"], params["mlm_dense_b"],
                activation="gelu", act_before_ln=True,
                ln=(params["mlm_ln_g"], params["mlm_ln_b"], EPS_BERT),
                out_dtype=MATMUL_DTYPE)
    mlm_logits = linear(mh, params["mlm_dec_w"], params["mlm_dec_b"])
    mlm_loss = cross_entropy_ignore(mlm_logits, lm_label, ignore_index=-100)

    # ---- ITM loss ----
    itm_logits = dense_small(final_embedding, params["itm_w"], params["itm_b"])
    itm_loss = bce_with_logits(itm_logits, video_text_match_label)

    loss = mlm_loss + itm_loss
    return loss, mlm_loss, itm_loss, prediction


# ----------------------------------- main -----------------------------------
if __name__ == "__main__":
    root = jax.random.PRNGKey(0)
    k_param, k_title, k_frame, k_mlm = jax.random.split(root, 4)

    params = init_params(k_param)

    title_input = jax.random.randint(k_title, (B, ST), 1, VOCAB - 1, dtype=jnp.int32)
    title_lens = jnp.array([ST, 12, ST, 10])
    title_mask = (jnp.arange(ST)[None, :] < title_lens[:, None]).astype(jnp.int32)
    frame_input = jax.random.normal(k_frame, (B, SV, H), dtype=jnp.float32)
    frame_lens = jnp.array([SV, 6, SV, 5])
    frame_mask = (jnp.arange(SV)[None, :] < frame_lens[:, None]).astype(jnp.int32)

    inputs = {
        "title_input": title_input,
        "title_mask": title_mask,
        "frame_input": frame_input,
        "frame_mask": frame_mask,
    }

    fwd = jax.jit(multimodal_forward)
    loss, mlm_loss, itm_loss, prediction = fwd(params, inputs, k_mlm)
    jax.block_until_ready((loss, mlm_loss, itm_loss, prediction))
    assert np.isfinite(float(loss)) and prediction.shape == (B, NCLS)
    print("KERNEL_OK")
</pallas_src>

<mosaic_0001>
module attributes {stable_mosaic.version = 11 : i64} {
  func.func @_layernorm_kernel(%arg0: i32, %arg1: memref<64x32xf32, #tpu.memory_space<vmem>>, %arg2: memref<1x32xf32, #tpu.memory_space<vmem>>, %arg3: memref<1x32xf32, #tpu.memory_space<vmem>>, %arg4: memref<64x32xf32, #tpu.memory_space<vmem>>) attributes {dimension_semantics = [#tpu.dimension_semantics<parallel>], iteration_bounds = array<i64: 1>, scalar_prefetch = 0 : i64, scratch_operands = 0 : i64, tpu.core_type = #tpu.core_type<tc>, window_params = [{transform_indices = @transform_0, window_bounds = array<i64: 64, 32>}, {pipeline_mode = #tpu.pipeline_mode<synchronous>, transform_indices = @transform_1, window_bounds = array<i64: 1, 32>}, {pipeline_mode = #tpu.pipeline_mode<synchronous>, transform_indices = @transform_2, window_bounds = array<i64: 1, 32>}, {transform_indices = @transform_3, window_bounds = array<i64: 64, 32>}]} {
    %c0 = arith.constant 0 : index
    %c0_0 = arith.constant 0 : index
    %0 = vector.load %arg1[%c0, %c0_0] : memref<64x32xf32, #tpu.memory_space<vmem>>, vector<64x32xf32>
    %cst = arith.constant dense<0.000000e+00> : vector<64xf32>
    %1 = vector.multi_reduction <add>, %0, %cst [1] : vector<64x32xf32> to vector<64xf32>
    %2 = vector.shape_cast %1 : vector<64xf32> to vector<64x1xf32>
    %cst_1 = arith.constant 3.200000e+01 : f32
    %3 = vector.broadcast %cst_1 : f32 to vector<64x1xf32>
    %4 = arith.divf %2, %3 : vector<64x1xf32>
    %5 = vector.broadcast %4 : vector<64x1xf32> to vector<64x32xf32>
    %6 = arith.subf %0, %5 : vector<64x32xf32>
    %7 = arith.mulf %6, %6 : vector<64x32xf32>
    %cst_2 = arith.constant dense<0.000000e+00> : vector<64xf32>
    %8 = vector.multi_reduction <add>, %7, %cst_2 [1] : vector<64x32xf32> to vector<64xf32>
    %9 = vector.shape_cast %8 : vector<64xf32> to vector<64x1xf32>
    %cst_3 = arith.constant 3.200000e+01 : f32
    %10 = vector.broadcast %cst_3 : f32 to vector<64x1xf32>
    %11 = arith.divf %9, %10 : vector<64x1xf32>
    %12 = vector.broadcast %4 : vector<64x1xf32> to vector<64x32xf32>
    %13 = arith.subf %0, %12 : vector<64x32xf32>
    %cst_4 = arith.constant 9.99999996E-13 : f32
    %14 = vector.broadcast %cst_4 : f32 to vector<64x1xf32>
    %15 = arith.addf %11, %14 : vector<64x1xf32>
    %16 = math.rsqrt %15 : vector<64x1xf32>
    %17 = vector.broadcast %16 : vector<64x1xf32> to vector<64x32xf32>
    %18 = arith.mulf %13, %17 : vector<64x32xf32>
    %c0_5 = arith.constant 0 : index
    %c0_6 = arith.constant 0 : index
    %19 = vector.load %arg2[%c0_5, %c0_6] : memref<1x32xf32, #tpu.memory_space<vmem>>, vector<1x32xf32>
    %20 = vector.broadcast %19 : vector<1x32xf32> to vector<64x32xf32>
    %21 = arith.mulf %18, %20 : vector<64x32xf32>
    %c0_7 = arith.constant 0 : index
    %c0_8 = arith.constant 0 : index
    %22 = vector.load %arg3[%c0_7, %c0_8] : memref<1x32xf32, #tpu.memory_space<vmem>>, vector<1x32xf32>
    %23 = vector.broadcast %22 : vector<1x32xf32> to vector<64x32xf32>
    %24 = arith.addf %21, %23 : vector<64x32xf32>
    %c0_9 = arith.constant 0 : index
    %c0_10 = arith.constant 0 : index
    %25 = vector.load %arg4[%c0_9, %c0_10] : memref<64x32xf32, #tpu.memory_space<vmem>>, vector<64x32xf32>
    tpu.vector_store %arg4[%c0_9, %c0_10], %24 {strides = array<i32>} : memref<64x32xf32, #tpu.memory_space<vmem>>, vector<64x32xf32>,
    return
  }
  func.func @transform_0(%arg0: i32) -> (i32, i32) {
    %c0_i32 = arith.constant 0 : i32
    %c0_i32_0 = arith.constant 0 : i32
    return %arg0, %c0_i32 : i32, i32
  }
  func.func @transform_1(%arg0: i32) -> (i32, i32) {
    %c0_i32 = arith.constant 0 : i32
    %c0_i32_0 = arith.constant 0 : i32
    %c0_i32_1 = arith.constant 0 : i32
    return %c0_i32, %c0_i32_0 : i32, i32
  }
  func.func @transform_2(%arg0: i32) -> (i32, i32) {
    %c0_i32 = arith.constant 0 : i32
    %c0_i32_0 = arith.constant 0 : i32
    %c0_i32_1 = arith.constant 0 : i32
    return %c0_i32, %c0_i32_0 : i32, i32
  }
  func.func @transform_3(%arg0: i32) -> (i32, i32) {
    %c0_i32 = arith.constant 0 : i32
    %c0_i32_0 = arith.constant 0 : i32
    return %arg0, %c0_i32 : i32, i32
  }
}

module attributes {stable_mosaic.version = 11 : i64} {
  func.func @_linear_kernel(%arg0: i32, %arg1: i32, %arg2: i32, %arg3: memref<64x32xf32, #tpu.memory_space<vmem>>, %arg4: memref<32x96xbf16, #tpu.memory_space<vmem>>, %arg5: memref<1x96xf32, #tpu.memory_space<vmem>>, %arg6: memref<64x96xbf16, #tpu.memory_space<vmem>>, %arg7: memref<64x96xf32, #tpu.memory_space<vmem>>) attributes {dimension_semantics = [#tpu.dimension_semantics<parallel>, #tpu.dimension_semantics<parallel>, #tpu.dimension_semantics<arbitrary>], iteration_bounds = array<i64: 1, 1, 1>, scalar_prefetch = 0 : i64, scratch_operands = 1 : i64, tpu.core_type = #tpu.core_type<tc>, window_params = [{transform_indices = @transform_0, window_bounds = array<i64: 64, 32>}, {transform_indices = @transform_1, window_bounds = array<i64: 32, 96>}, {transform_indices = @transform_2, window_bounds = array<i64: 1, 96>}, {transform_indices = @transform_3, window_bounds = array<i64: 64, 96>}]} {
    %c0_i32 = arith.constant 0 : i32
    %0 = arith.cmpi eq, %arg2, %c0_i32 : i32
    %1 = arith.extui %0 : i1 to i32
    %c0_i32_0 = arith.constant 0 : i32
    %2 = arith.cmpi ne, %1, %c0_i32_0 : i32
    scf.if %2 {
      %cst_10 = arith.constant 0.000000e+00 : f32
      %13 = vector.broadcast %cst_10 : f32 to vector<64x96xf32>
      %c0_11 = arith.constant 0 : index
      %c0_12 = arith.constant 0 : index
      %14 = vector.load %arg7[%c0_11, %c0_12] : memref<64x96xf32, #tpu.memory_space<vmem>>, vector<64x96xf32>
      tpu.vector_store %arg7[%c0_11, %c0_12], %13 {strides = array<i32>} : memref<64x96xf32, #tpu.memory_space<vmem>>, vector<64x96xf32>,
    } else {
    }
    %c0 = arith.constant 0 : index
    %c0_1 = arith.constant 0 : index
    %3 = vector.load %arg7[%c0, %c0_1] : memref<64x96xf32, #tpu.memory_space<vmem>>, vector<64x96xf32>
    %c0_2 = arith.constant 0 : index
    %c0_3 = arith.constant 0 : index
    %4 = vector.load %arg3[%c0_2, %c0_3] : memref<64x32xf32, #tpu.memory_space<vmem>>, vector<64x32xf32>
    %5 = arith.truncf %4 : vector<64x32xf32> to vector<64x32xbf16>
    %c0_4 = arith.constant 0 : index
    %c0_5 = arith.constant 0 : index
    %6 = vector.load %arg4[%c0_4, %c0_5] : memref<32x96xbf16, #tpu.memory_space<vmem>>, vector<32x96xbf16>
    %cst = arith.constant dense<0.000000e+00> : vector<64x96xf32>
    %7 = tpu.matmul %5, %6, %cst {dimension_numbers = #tpu.dot_dimension_numbers<[1], [0], [0], [1], [0, 0, 1, 1], [], []>} : vector<64x32xbf16>, vector<32x96xbf16>, vector<64x96xf32> -> vector<64x96xf32>
    %8 = arith.addf %3, %7 : vector<64x96xf32>
    %c0_6 = arith.constant 0 : index
    %c0_7 = arith.constant 0 : index
    %9 = vector.load %arg7[%c0_6, %c0_7] : memref<64x96xf32, #tpu.memory_space<vmem>>, vector<64x96xf32>
    tpu.vector_store %arg7[%c0_6, %c0_7], %8 {strides = array<i32>} : memref<64x96xf32, #tpu.memory_space<vmem>>, vector<64x96xf32>,
    %c0_i32_8 = arith.constant 0 : i32
    %10 = arith.cmpi eq, %arg2, %c0_i32_8 : i32
    %11 = arith.extui %10 : i1 to i32
    %c0_i32_9 = arith.constant 0 : i32
    %12 = arith.cmpi ne, %11, %c0_i32_9 : i32
    scf.if %12 {
      %c0_10 = arith.constant 0 : index
      %c0_11 = arith.constant 0 : index
      %13 = vector.load %arg7[%c0_10, %c0_11] : memref<64x96xf32, #tpu.memory_space<vmem>>, vector<64x96xf32>
      %c0_12 = arith.constant 0 : index
      %c0_13 = arith.constant 0 : index
      %14 = vector.load %arg5[%c0_12, %c0_13] : memref<1x96xf32, #tpu.memory_space<vmem>>, vector<1x96xf32>
      %15 = vector.broadcast %14 : vector<1x96xf32> to vector<64x96xf32>
      %16 = arith.addf %13, %15 : vector<64x96xf32>
      %17 = arith.truncf %16 : vector<64x96xf32> to vector<64x96xbf16>
      %c0_14 = arith.constant 0 : index
      %c0_15 = arith.constant 0 : index
      %18 = vector.load %arg6[%c0_14, %c0_15] : memref<64x96xbf16, #tpu.memory_space<vmem>>, vector<64x96xbf16>
      tpu.vector_store %arg6[%c0_14, %c0_15], %17 {strides = array<i32>} : memref<64x96xbf16, #tpu.memory_space<vmem>>, vector<64x96xbf16>,
    } else {
    }
    return
  }
  func.func @transform_0(%arg0: i32, %arg1: i32, %arg2: i32) -> (i32, i32) {
    %c0_i32 = arith.constant 0 : i32
    return %arg0, %arg2 : i32, i32
  }
  func.func @transform_1(%arg0: i32, %arg1: i32, %arg2: i32) -> (i32, i32) {
    %c0_i32 = arith.constant 0 : i32
    return %arg2, %arg1 : i32, i32
  }
  func.func @transform_2(%arg0: i32, %arg1: i32, %arg2: i32) -> (i32, i32) {
    %c0_i32 = arith.constant 0 : i32
    %c0_i32_0 = arith.constant 0 : i32
    return %c0_i32, %arg1 : i32, i32
  }
  func.func @transform_3(%arg0: i32, %arg1: i32, %arg2: i32) -> (i32, i32) {
    %c0_i32 = arith.constant 0 : i32
    return %arg0, %arg1 : i32, i32
  }
}

module attributes {stable_mosaic.version = 11 : i64} {
  func.func @_self_attn_kernel(%arg0: i32, %arg1: memref<1x3x4x16x8xbf16, #tpu.memory_space<vmem>>, %arg2: memref<1x1x16xf32, #tpu.memory_space<vmem>>, %arg3: memref<1x16x32xbf16, #tpu.memory_space<vmem>>) attributes {dimension_semantics = [#tpu.dimension_semantics<parallel>], iteration_bounds = array<i64: 4>, scalar_prefetch = 0 : i64, scratch_operands = 0 : i64, tpu.core_type = #tpu.core_type<tc>, window_params = [{transform_indices = @transform_0, window_bounds = array<i64: 1, 3, 4, 16, 8>}, {transform_indices = @transform_1, window_bounds = array<i64: 1, 1, 16>}, {transform_indices = @transform_2, window_bounds = array<i64: 1, 16, 32>}]} {
    %c0 = arith.constant 0 : index
    %c0_0 = arith.constant 0 : index
    %c0_1 = arith.constant 0 : index
    %c0_2 = arith.constant 0 : index
    %c0_3 = arith.constant 0 : index
    %0 = vector.load %arg1[%c0, %c0_0, %c0_1, %c0_2, %c0_3] : memref<1x3x4x16x8xbf16, #tpu.memory_space<vmem>>, vector<1x1x4x16x8xbf16>
    %1 = vector.shape_cast %0 : vector<1x1x4x16x8xbf16> to vector<4x16x8xbf16>
    %c0_4 = arith.constant 0 : index
    %c1 = arith.constant 1 : index
    %c0_5 = arith.constant 0 : index
    %c0_6 = arith.constant 0 : index
    %c0_7 = arith.constant 0 : index
    %2 = vector.load %arg1[%c0_4, %c1, %c0_5, %c0_6, %c0_7] : memref<1x3x4x16x8xbf16, #tpu.memory_space<vmem>>, vector<1x1x4x16x8xbf16>
    %3 = vector.shape_cast %2 : vector<1x1x4x16x8xbf16> to vector<4x16x8xbf16>
    %c0_8 = arith.constant 0 : index
    %c2 = arith.constant 2 : index
    %c0_9 = arith.constant 0 : index
    %c0_10 = arith.constant 0 : index
    %c0_11 = arith.constant 0 : index
    %4 = vector.load %arg1[%c0_8, %c2, %c0_9, %c0_10, %c0_11] : memref<1x3x4x16x8xbf16, #tpu.memory_space<vmem>>, vector<1x1x4x16x8xbf16>
    %5 = vector.shape_cast %4 : vector<1x1x4x16x8xbf16> to vector<4x16x8xbf16>
    %c0_12 = arith.constant 0 : index
    %c0_13 = arith.constant 0 : index
    %c0_14 = arith.constant 0 : index
    %6 = vector.load %arg2[%c0_12, %c0_13, %c0_14] : memref<1x1x16xf32, #tpu.memory_space<vmem>>, vector<1x1x16xf32>
    %7 = vector.shape_cast %6 : vector<1x1x16xf32> to vector<1x16xf32>
    %cst = arith.constant dense<0.000000e+00> : vector<4x16x16xf32>
    %8 = tpu.matmul %1, %3, %cst {dimension_numbers = #tpu.dot_dimension_numbers<[2], [2], [1], [1], [0, 0, 0, 1, 1, 1], [0], [0]>} : vector<4x16x8xbf16>, vector<4x16x8xbf16>, vector<4x16x16xf32> -> vector<4x16x16xf32>
    %cst_15 = arith.constant 0.353553385 : f32
    %9 = vector.broadcast %cst_15 : f32 to vector<4x16x16xf32>
    %10 = arith.mulf %8, %9 : vector<4x16x16xf32>
    %11 = vector.shape_cast %7 : vector<1x16xf32> to vector<1x1x16xf32>
    %12 = vector.broadcast %11 : vector<1x1x16xf32> to vector<4x16x16xf32>
    %13 = arith.addf %10, %12 : vector<4x16x16xf32>
    %cst_16 = arith.constant dense<0xFF800000> : vector<4x16xf32>
    %14 = vector.multi_reduction <maximumf>, %13, %cst_16 [2] : vector<4x16x16xf32> to vector<4x16xf32>
    %15 = vector.shape_cast %14 : vector<4x16xf32> to vector<4x16x1xf32>
    %16 = vector.broadcast %15 : vector<4x16x1xf32> to vector<4x16x16xf32>
    %17 = arith.subf %13, %16 : vector<4x16x16xf32>
    %18 = math.exp %17 : vector<4x16x16xf32>
    %cst_17 = arith.constant dense<0.000000e+00> : vector<4x16xf32>
    %19 = vector.multi_reduction <add>, %18, %cst_17 [2] : vector<4x16x16xf32> to vector<4x16xf32>
    %20 = vector.shape_cast %19 : vector<4x16xf32> to vector<4x16x1xf32>
    %21 = tpu.reciprocal %20 {approx = true} : vector<4x16x1xf32> -> vector<4x16x1xf32>
    %22 = vector.broadcast %21 : vector<4x16x1xf32> to vector<4x16x16xf32>
    %23 = arith.mulf %18, %22 : vector<4x16x16xf32>
    %24 = arith.truncf %23 : vector<4x16x16xf32> to vector<4x16x16xbf16>
    %cst_18 = arith.constant dense<0.000000e+00> : vector<4x16x8xf32>
    %25 = tpu.matmul %24, %5, %cst_18 {dimension_numbers = #tpu.dot_dimension_numbers<[2], [1], [1], [2], [0, 0, 0, 1, 1, 2], [0], [0]>} : vector<4x16x16xbf16>, vector<4x16x8xbf16>, vector<4x16x8xf32> -> vector<4x16x8xf32>
    %26 = vector.extract_strided_slice %25 {offsets = [0, 0, 0], sizes = [1, 16, 8], strides = [1, 1, 1]} : vector<4x16x8xf32> to vector<1x16x8xf32>
    %27 = vector.shape_cast %26 : vector<1x16x8xf32> to vector<16x8xf32>
    %28 = vector.extract_strided_slice %25 {offsets = [1, 0, 0], sizes = [1, 16, 8], strides = [1, 1, 1]} : vector<4x16x8xf32> to vector<1x16x8xf32>
    %29 = vector.shape_cast %28 : vector<1x16x8xf32> to vector<16x8xf32>
    %30 = vector.extract_strided_slice %25 {offsets = [2, 0, 0], sizes = [1, 16, 8], strides = [1, 1, 1]} : vector<4x16x8xf32> to vector<1x16x8xf32>
    %31 = vector.shape_cast %30 : vector<1x16x8xf32> to vector<16x8xf32>
    %32 = vector.extract_strided_slice %25 {offsets = [3, 0, 0], sizes = [1, 16, 8], strides = [1, 1, 1]} : vector<4x16x8xf32> to vector<1x16x8xf32>
    %33 = vector.shape_cast %32 : vector<1x16x8xf32> to vector<16x8xf32>
    %34 = tpu.concatenate %27, %29, %31, %33 in 1 : vector<16x8xf32>, vector<16x8xf32>, vector<16x8xf32>, vector<16x8xf32> -> vector<16x32xf32>
    %35 = arith.truncf %34 : vector<16x32xf32> to vector<16x32xbf16>
    %c0_19 = arith.constant 0 : index
    %c0_20 = arith.constant 0 : index
    %c0_21 = arith.constant 0 : index
    %36 = vector.load %arg3[%c0_19, %c0_20, %c0_21] : memref<1x16x32xbf16, #tpu.memory_space<vmem>>, vector<1x16x32xbf16>
    %37 = vector.shape_cast %36 : vector<1x16x32xbf16> to vector<16x32xbf16>
    %38 = vector.shape_cast %35 : vector<16x32xbf16> to vector<1x16x32xbf16>
    tpu.vector_store %arg3[%c0_19, %c0_20, %c0_21], %38 {strides = array<i32>} : memref<1x16x32xbf16, #tpu.memory_space<vmem>>, vector<1x16x32xbf16>,
    return
  }
  func.func @transform_0(%arg0: i32) -> (i32, i32, i32, i32, i32) {
    %c0_i32 = arith.constant 0 : i32
    %c0_i32_0 = arith.constant 0 : i32
    %c0_i32_1 = arith.constant 0 : i32
    %c0_i32_2 = arith.constant 0 : i32
    %c0_i32_3 = arith.constant 0 : i32
    return %arg0, %c0_i32, %c0_i32_0, %c0_i32_1, %c0_i32_2 : i32, i32, i32, i32, i32
  }
  func.func @transform_1(%arg0: i32) -> (i32, i32, i32) {
    %c0_i32 = arith.constant 0 : i32
    %c0_i32_0 = arith.constant 0 : i32
    %c0_i32_1 = arith.constant 0 : i32
    return %arg0, %c0_i32, %c0_i32_0 : i32, i32, i32
  }
  func.func @transform_2(%arg0: i32) -> (i32, i32, i32) {
    %c0_i32 = arith.constant 0 : i32
    %c0_i32_0 = arith.constant 0 : i32
    %c0_i32_1 = arith.constant 0 : i32
    return %arg0, %c0_i32, %c0_i32_0 : i32, i32, i32
  }
}

module attributes {stable_mosaic.version = 11 : i64} {
  func.func @_linear_kernel(%arg0: i32, %arg1: i32, %arg2: i32, %arg3: memref<64x32xbf16, #tpu.memory_space<vmem>>, %arg4: memref<32x32xbf16, #tpu.memory_space<vmem>>, %arg5: memref<1x32xf32, #tpu.memory_space<vmem>>, %arg6: memref<64x32xf32, #tpu.memory_space<vmem>>, %arg7: memref<1x32xf32, #tpu.memory_space<vmem>>, %arg8: memref<1x32xf32, #tpu.memory_space<vmem>>, %arg9: memref<64x32xf32, #tpu.memory_space<vmem>>, %arg10: memref<64x32xf32, #tpu.memory_space<vmem>>) attributes {dimension_semantics = [#tpu.dimension_semantics<parallel>, #tpu.dimension_semantics<parallel>, #tpu.dimension_semantics<arbitrary>], iteration_bounds = array<i64: 1, 1, 1>, scalar_prefetch = 0 : i64, scratch_operands = 1 : i64, tpu.core_type = #tpu.core_type<tc>, window_params = [{transform_indices = @transform_0, window_bounds = array<i64: 64, 32>}, {transform_indices = @transform_1, window_bounds = array<i64: 32, 32>}, {transform_indices = @transform_2, window_bounds = array<i64: 1, 32>}, {transform_indices = @transform_3, window_bounds = array<i64: 64, 32>}, {transform_indices = @transform_4, window_bounds = array<i64: 1, 32>}, {transform_indices = @transform_5, window_bounds = array<i64: 1, 32>}, {transform_indices = @transform_6, window_bounds = array<i64: 64, 32>}]} {
    %c0_i32 = arith.constant 0 : i32
    %0 = arith.cmpi eq, %arg2, %c0_i32 : i32
    %1 = arith.extui %0 : i1 to i32
    %c0_i32_0 = arith.constant 0 : i32
    %2 = arith.cmpi ne, %1, %c0_i32_0 : i32
    scf.if %2 {
      %cst_10 = arith.constant 0.000000e+00 : f32
      %12 = vector.broadcast %cst_10 : f32 to vector<64x32xf32>
      %c0_11 = arith.constant 0 : index
      %c0_12 = arith.constant 0 : index
      %13 = vector.load %arg10[%c0_11, %c0_12] : memref<64x32xf32, #tpu.memory_space<vmem>>, vector<64x32xf32>
      tpu.vector_store %arg10[%c0_11, %c0_12], %12 {strides = array<i32>} : memref<64x32xf32, #tpu.memory_space<vmem>>, vector<64x32xf32>,
    } else {
    }
    %c0 = arith.constant 0 : index
    %c0_1 = arith.constant 0 : index
    %3 = vector.load %arg10[%c0, %c0_1] : memref<64x32xf32, #tpu.memory_space<vmem>>, vector<64x32xf32>
    %c0_2 = arith.constant 0 : index
    %c0_3 = arith.constant 0 : index
    %4 = vector.load %arg3[%c0_2, %c0_3] : memref<64x32xbf16, #tpu.memory_space<vmem>>, vector<64x32xbf16>
    %c0_4 = arith.constant 0 : index
    %c0_5 = arith.constant 0 : index
    %5 = vector.load %arg4[%c0_4, %c0_5] : memref<32x32xbf16, #tpu.memory_space<vmem>>, vector<32x32xbf16>
    %cst = arith.constant dense<0.000000e+00> : vector<64x32xf32>
    %6 = tpu.matmul %4, %5, %cst {dimension_numbers = #tpu.dot_dimension_numbers<[1], [0], [0], [1], [0, 0, 1, 1], [], []>} : vector<64x32xbf16>, vector<32x32xbf16>, vector<64x32xf32> -> vector<64x32xf32>
    %7 = arith.addf %3, %6 : vector<64x32xf32>
    %c0_6 = arith.constant 0 : index
    %c0_7 = arith.constant 0 : index
    %8 = vector.load %arg10[%c0_6, %c0_7] : memref<64x32xf32, #tpu.memory_space<vmem>>, vector<64x32xf32>
    tpu.vector_store %arg10[%c0_6, %c0_7], %7 {strides = array<i32>} : memref<64x32xf32, #tpu.memory_space<vmem>>, vector<64x32xf32>,
    %c0_i32_8 = arith.constant 0 : i32
    %9 = arith.cmpi eq, %arg2, %c0_i32_8 : i32
    %10 = arith.extui %9 : i1 to i32
    %c0_i32_9 = arith.constant 0 : i32
    %11 = arith.cmpi ne, %10, %c0_i32_9 : i32
    scf.if %11 {
      %c0_10 = arith.constant 0 : index
      %c0_11 = arith.constant 0 : index
      %12 = vector.load %arg10[%c0_10, %c0_11] : memref<64x32xf32, #tpu.memory_space<vmem>>, vector<64x32xf32>
      %c0_12 = arith.constant 0 : index
      %c0_13 = arith.constant 0 : index
      %13 = vector.load %arg5[%c0_12, %c0_13] : memref<1x32xf32, #tpu.memory_space<vmem>>, vector<1x32xf32>
      %14 = vector.broadcast %13 : vector<1x32xf32> to vector<64x32xf32>
      %15 = arith.addf %12, %14 : vector<64x32xf32>
      %c0_14 = arith.constant 0 : index
      %c0_15 = arith.constant 0 : index
      %16 = vector.load %arg6[%c0_14, %c0_15] : memref<64x32xf32, #tpu.memory_space<vmem>>, vector<64x32xf32>
      %17 = arith.addf %15, %16 : vector<64x32xf32>
      %cst_16 = arith.constant dense<0.000000e+00> : vector<64xf32>
      %18 = vector.multi_reduction <add>, %17, %cst_16 [1] : vector<64x32xf32> to vector<64xf32>
      %19 = vector.shape_cast %18 : vector<64xf32> to vector<64x1xf32>
      %cst_17 = arith.constant 3.200000e+01 : f32
      %20 = vector.broadcast %cst_17 : f32 to vector<64x1xf32>
      %21 = arith.divf %19, %20 : vector<64x1xf32>
      %22 = vector.broadcast %21 : vector<64x1xf32> to vector<64x32xf32>
      %23 = arith.subf %17, %22 : vector<64x32xf32>
      %24 = arith.mulf %23, %23 : vector<64x32xf32>
      %cst_18 = arith.constant dense<0.000000e+00> : vector<64xf32>
      %25 = vector.multi_reduction <add>, %24, %cst_18 [1] : vector<64x32xf32> to vector<64xf32>
      %26 = vector.shape_cast %25 : vector<64xf32> to vector<64x1xf32>
      %cst_19 = arith.constant 3.200000e+01 : f32
      %27 = vector.broadcast %cst_19 : f32 to vector<64x1xf32>
      %28 = arith.divf %26, %27 : vector<64x1xf32>
      %29 = vector.broadcast %21 : vector<64x1xf32> to vector<64x32xf32>
      %30 = arith.subf %17, %29 : vector<64x32xf32>
      %cst_20 = arith.constant 9.99999996E-13 : f32
      %31 = vector.broadcast %cst_20 : f32 to vector<64x1xf32>
      %32 = arith.addf %28, %31 : vector<64x1xf32>
      %33 = math.rsqrt %32 : vector<64x1xf32>
      %34 = vector.broadcast %33 : vector<64x1xf32> to vector<64x32xf32>
      %35 = arith.mulf %30, %34 : vector<64x32xf32>
      %c0_21 = arith.constant 0 : index
      %c0_22 = arith.constant 0 : index
      %36 = vector.load %arg7[%c0_21, %c0_22] : memref<1x32xf32, #tpu.memory_space<vmem>>, vector<1x32xf32>
      %37 = vector.broadcast %36 : vector<1x32xf32> to vector<64x32xf32>
      %38 = arith.mulf %35, %37 : vector<64x32xf32>
      %c0_23 = arith.constant 0 : index
      %c0_24 = arith.constant 0 : index
      %39 = vector.load %arg8[%c0_23, %c0_24] : memref<1x32xf32, #tpu.memory_space<vmem>>, vector<1x32xf32>
      %40 = vector.broadcast %39 : vector<1x32xf32> to vector<64x32xf32>
      %41 = arith.addf %38, %40 : vector<64x32xf32>
      %c0_25 = arith.constant 0 : index
      %c0_26 = arith.constant 0 : index
      %42 = vector.load %arg9[%c0_25, %c0_26] : memref<64x32xf32, #tpu.memory_space<vmem>>, vector<64x32xf32>
      tpu.vector_store %arg9[%c0_25, %c0_26], %41 {strides = array<i32>} : memref<64x32xf32, #tpu.memory_space<vmem>>, vector<64x32xf32>,
    } else {
    }
    return
  }
  func.func @transform_0(%arg0: i32, %arg1: i32, %arg2: i32) -> (i32, i32) {
    %c0_i32 = arith.constant 0 : i32
    return %arg0, %arg2 : i32, i32
  }
  func.func @transform_1(%arg0: i32, %arg1: i32, %arg2: i32) -> (i32, i32) {
    %c0_i32 = arith.constant 0 : i32
    return %arg2, %arg1 : i32, i32
  }
  func.func @transform_2(%arg0: i32, %arg1: i32, %arg2: i32) -> (i32, i32) {
    %c0_i32 = arith.constant 0 : i32
    %c0_i32_0 = arith.constant 0 : i32
    return %c0_i32, %arg1 : i32, i32
  }
  func.func @transform_3(%arg0: i32, %arg1: i32, %arg2: i32) -> (i32, i32) {
    %c0_i32 = arith.constant 0 : i32
    return %arg0, %arg1 : i32, i32
  }
  func.func @transform_4(%arg0: i32, %arg1: i32, %arg2: i32) -> (i32, i32) {
    %c0_i32 = arith.constant 0 : i32
    %c0_i32_0 = arith.constant 0 : i32
    return %c0_i32, %arg1 : i32, i32
  }
  func.func @transform_5(%arg0: i32, %arg1: i32, %arg2: i32) -> (i32, i32) {
    %c0_i32 = arith.constant 0 : i32
    %c0_i32_0 = arith.constant 0 : i32
    return %c0_i32, %arg1 : i32, i32
  }
  func.func @transform_6(%arg0: i32, %arg1: i32, %arg2: i32) -> (i32, i32) {
    %c0_i32 = arith.constant 0 : i32
    return %arg0, %arg1 : i32, i32
  }
}

module attributes {stable_mosaic.version = 11 : i64} {
  func.func @_linear_kernel(%arg0: i32, %arg1: i32, %arg2: i32, %arg3: memref<64x32xf32, #tpu.memory_space<vmem>>, %arg4: memref<32x64xbf16, #tpu.memory_space<vmem>>, %arg5: memref<1x64xf32, #tpu.memory_space<vmem>>, %arg6: memref<64x64xbf16, #tpu.memory_space<vmem>>, %arg7: memref<64x64xf32, #tpu.memory_space<vmem>>) attributes {dimension_semantics = [#tpu.dimension_semantics<parallel>, #tpu.dimension_semantics<parallel>, #tpu.dimension_semantics<arbitrary>], iteration_bounds = array<i64: 1, 1, 1>, scalar_prefetch = 0 : i64, scratch_operands = 1 : i64, tpu.core_type = #tpu.core_type<tc>, window_params = [{transform_indices = @transform_0, window_bounds = array<i64: 64, 32>}, {transform_indices = @transform_1, window_bounds = array<i64: 32, 64>}, {transform_indices = @transform_2, window_bounds = array<i64: 1, 64>}, {transform_indices = @transform_3, window_bounds = array<i64: 64, 64>}]} {
    %c0_i32 = arith.constant 0 : i32
    %0 = arith.cmpi eq, %arg2, %c0_i32 : i32
    %1 = arith.extui %0 : i1 to i32
    %c0_i32_0 = arith.constant 0 : i32
    %2 = arith.cmpi ne, %1, %c0_i32_0 : i32
    scf.if %2 {
      %cst_10 = arith.constant 0.000000e+00 : f32
      %13 = vector.broadcast %cst_10 : f32 to vector<64x64xf32>
      %c0_11 = arith.constant 0 : index
      %c0_12 = arith.constant 0 : index
      %14 = vector.load %arg7[%c0_11, %c0_12] : memref<64x64xf32, #tpu.memory_space<vmem>>, vector<64x64xf32>
      tpu.vector_store %arg7[%c0_11, %c0_12], %13 {strides = array<i32>} : memref<64x64xf32, #tpu.memory_space<vmem>>, vector<64x64xf32>,
    } else {
    }
    %c0 = arith.constant 0 : index
    %c0_1 = arith.constant 0 : index
    %3 = vector.load %arg7[%c0, %c0_1] : memref<64x64xf32, #tpu.memory_space<vmem>>, vector<64x64xf32>
    %c0_2 = arith.constant 0 : index
    %c0_3 = arith.constant 0 : index
    %4 = vector.load %arg3[%c0_2, %c0_3] : memref<64x32xf32, #tpu.memory_space<vmem>>, vector<64x32xf32>
    %5 = arith.truncf %4 : vector<64x32xf32> to vector<64x32xbf16>
    %c0_4 = arith.constant 0 : index
    %c0_5 = arith.constant 0 : index
    %6 = vector.load %arg4[%c0_4, %c0_5] : memref<32x64xbf16, #tpu.memory_space<vmem>>, vector<32x64xbf16>
    %cst = arith.constant dense<0.000000e+00> : vector<64x64xf32>
    %7 = tpu.matmul %5, %6, %cst {dimension_numbers = #tpu.dot_dimension_numbers<[1], [0], [0], [1], [0, 0, 1, 1], [], []>} : vector<64x32xbf16>, vector<32x64xbf16>, vector<64x64xf32> -> vector<64x64xf32>
    %8 = arith.addf %3, %7 : vector<64x64xf32>
    %c0_6 = arith.constant 0 : index
    %c0_7 = arith.constant 0 : index
    %9 = vector.load %arg7[%c0_6, %c0_7] : memref<64x64xf32, #tpu.memory_space<vmem>>, vector<64x64xf32>
    tpu.vector_store %arg7[%c0_6, %c0_7], %8 {strides = array<i32>} : memref<64x64xf32, #tpu.memory_space<vmem>>, vector<64x64xf32>,
    %c0_i32_8 = arith.constant 0 : i32
    %10 = arith.cmpi eq, %arg2, %c0_i32_8 : i32
    %11 = arith.extui %10 : i1 to i32
    %c0_i32_9 = arith.constant 0 : i32
    %12 = arith.cmpi ne, %11, %c0_i32_9 : i32
    scf.if %12 {
      %c0_10 = arith.constant 0 : index
      %c0_11 = arith.constant 0 : index
      %13 = vector.load %arg7[%c0_10, %c0_11] : memref<64x64xf32, #tpu.memory_space<vmem>>, vector<64x64xf32>
      %c0_12 = arith.constant 0 : index
      %c0_13 = arith.constant 0 : index
      %14 = vector.load %arg5[%c0_12, %c0_13] : memref<1x64xf32, #tpu.memory_space<vmem>>, vector<1x64xf32>
      %15 = vector.broadcast %14 : vector<1x64xf32> to vector<64x64xf32>
      %16 = arith.addf %13, %15 : vector<64x64xf32>
      %cst_14 = arith.constant 5.000000e-01 : f32
      %17 = vector.broadcast %cst_14 : f32 to vector<64x64xf32>
      %18 = arith.mulf %17, %16 : vector<64x64xf32>
      %cst_15 = arith.constant 4.471500e-02 : f32
      %19 = vector.broadcast %cst_15 : f32 to vector<64x64xf32>
      %20 = arith.mulf %19, %16 : vector<64x64xf32>
      %21 = arith.mulf %20, %16 : vector<64x64xf32>
      %22 = arith.mulf %21, %16 : vector<64x64xf32>
      %23 = arith.addf %16, %22 : vector<64x64xf32>
      %cst_16 = arith.constant 0.797884583 : f32
      %24 = vector.broadcast %cst_16 : f32 to vector<64x64xf32>
      %25 = arith.mulf %24, %23 : vector<64x64xf32>
      %26 = math.tanh %25 : vector<64x64xf32>
      %cst_17 = arith.constant 1.000000e+00 : f32
      %27 = vector.broadcast %cst_17 : f32 to vector<64x64xf32>
      %28 = arith.addf %27, %26 : vector<64x64xf32>
      %29 = arith.mulf %18, %28 : vector<64x64xf32>
      %30 = arith.truncf %29 : vector<64x64xf32> to vector<64x64xbf16>
      %c0_18 = arith.constant 0 : index
      %c0_19 = arith.constant 0 : index
      %31 = vector.load %arg6[%c0_18, %c0_19] : memref<64x64xbf16, #tpu.memory_space<vmem>>, vector<64x64xbf16>
      tpu.vector_store %arg6[%c0_18, %c0_19], %30 {strides = array<i32>} : memref<64x64xbf16, #tpu.memory_space<vmem>>, vector<64x64xbf16>,
    } else {
    }
    return
  }
  func.func @transform_0(%arg0: i32, %arg1: i32, %arg2: i32) -> (i32, i32) {
    %c0_i32 = arith.constant 0 : i32
    return %arg0, %arg2 : i32, i32
  }
  func.func @transform_1(%arg0: i32, %arg1: i32, %arg2: i32) -> (i32, i32) {
    %c0_i32 = arith.constant 0 : i32
    return %arg2, %arg1 : i32, i32
  }
  func.func @transform_2(%arg0: i32, %arg1: i32, %arg2: i32) -> (i32, i32) {
    %c0_i32 = arith.constant 0 : i32
    %c0_i32_0 = arith.constant 0 : i32
    return %c0_i32, %arg1 : i32, i32
  }
  func.func @transform_3(%arg0: i32, %arg1: i32, %arg2: i32) -> (i32, i32) {
    %c0_i32 = arith.constant 0 : i32
    return %arg0, %arg1 : i32, i32
  }
}

module attributes {stable_mosaic.version = 11 : i64} {
  func.func @_layernorm2d_kernel(%arg0: i32, %arg1: memref<1x16x32xf32, #tpu.memory_space<vmem>>, %arg2: memref<16x32xf32, #tpu.memory_space<vmem>>, %arg3: memref<16x32xf32, #tpu.memory_space<vmem>>, %arg4: memref<1x16x32xf32, #tpu.memory_space<vmem>>) attributes {dimension_semantics = [#tpu.dimension_semantics<parallel>], iteration_bounds = array<i64: 4>, scalar_prefetch = 0 : i64, scratch_operands = 0 : i64, tpu.core_type = #tpu.core_type<tc>, window_params = [{transform_indices = @transform_0, window_bounds = array<i64: 1, 16, 32>}, {pipeline_mode = #tpu.pipeline_mode<synchronous>, transform_indices = @transform_1, window_bounds = array<i64: 16, 32>}, {pipeline_mode = #tpu.pipeline_mode<synchronous>, transform_indices = @transform_2, window_bounds = array<i64: 16, 32>}, {transform_indices = @transform_3, window_bounds = array<i64: 1, 16, 32>}]} {
    %c0 = arith.constant 0 : index
    %c0_0 = arith.constant 0 : index
    %c0_1 = arith.constant 0 : index
    %0 = vector.load %arg1[%c0, %c0_0, %c0_1] : memref<1x16x32xf32, #tpu.memory_space<vmem>>, vector<1x16x32xf32>
    %1 = vector.shape_cast %0 : vector<1x16x32xf32> to vector<16x32xf32>
    %2 = vector.shape_cast %1 : vector<16x32xf32> to vector<1x16x32xf32>
    %cst = arith.constant dense<0.000000e+00> : vector<1xf32>
    %3 = vector.multi_reduction <add>, %2, %cst [1, 2] : vector<1x16x32xf32> to vector<1xf32>
    %4 = vector.shape_cast %3 : vector<1xf32> to vector<1x1x1xf32>
    %5 = vector.extract %4[0, 0, 0] : f32 from vector<1x1x1xf32>
    %6 = vector.broadcast %5 : f32 to vector<1x1xf32>
    %cst_2 = arith.constant 5.120000e+02 : f32
    %7 = vector.broadcast %cst_2 : f32 to vector<1x1xf32>
    %8 = arith.divf %6, %7 : vector<1x1xf32>
    %9 = vector.broadcast %8 : vector<1x1xf32> to vector<16x32xf32>
    %10 = arith.subf %1, %9 : vector<16x32xf32>
    %11 = arith.mulf %10, %10 : vector<16x32xf32>
    %12 = vector.shape_cast %11 : vector<16x32xf32> to vector<1x16x32xf32>
    %cst_3 = arith.constant dense<0.000000e+00> : vector<1xf32>
    %13 = vector.multi_reduction <add>, %12, %cst_3 [1, 2] : vector<1x16x32xf32> to vector<1xf32>
    %14 = vector.shape_cast %13 : vector<1xf32> to vector<1x1x1xf32>
    %15 = vector.extract %14[0, 0, 0] : f32 from vector<1x1x1xf32>
    %16 = vector.broadcast %15 : f32 to vector<1x1xf32>
    %cst_4 = arith.constant 5.120000e+02 : f32
    %17 = vector.broadcast %cst_4 : f32 to vector<1x1xf32>
    %18 = arith.divf %16, %17 : vector<1x1xf32>
    %19 = vector.broadcast %8 : vector<1x1xf32> to vector<16x32xf32>
    %20 = arith.subf %1, %19 : vector<16x32xf32>
    %cst_5 = arith.constant 9.99999974E-6 : f32
    %21 = vector.broadcast %cst_5 : f32 to vector<1x1xf32>
    %22 = arith.addf %18, %21 : vector<1x1xf32>
    %23 = math.rsqrt %22 : vector<1x1xf32>
    %24 = vector.broadcast %23 : vector<1x1xf32> to vector<16x32xf32>
    %25 = arith.mulf %20, %24 : vector<16x32xf32>
    %c0_6 = arith.constant 0 : index
    %c0_7 = arith.constant 0 : index
    %26 = vector.load %arg2[%c0_6, %c0_7] : memref<16x32xf32, #tpu.memory_space<vmem>>, vector<16x32xf32>
    %27 = arith.mulf %25, %26 : vector<16x32xf32>
    %c0_8 = arith.constant 0 : index
    %c0_9 = arith.constant 0 : index
    %28 = vector.load %arg3[%c0_8, %c0_9] : memref<16x32xf32, #tpu.memory_space<vmem>>, vector<16x32xf32>
    %29 = arith.addf %27, %28 : vector<16x32xf32>
    %c0_10 = arith.constant 0 : index
    %c0_11 = arith.constant 0 : index
    %c0_12 = arith.constant 0 : index
    %30 = vector.load %arg4[%c0_10, %c0_11, %c0_12] : memref<1x16x32xf32, #tpu.memory_space<vmem>>, vector<1x16x32xf32>
    %31 = vector.shape_cast %30 : vector<1x16x32xf32> to vector<16x32xf32>
    %32 = vector.shape_cast %29 : vector<16x32xf32> to vector<1x16x32xf32>
    tpu.vector_store %arg4[%c0_10, %c0_11, %c0_12], %32 {strides = array<i32>} : memref<1x16x32xf32, #tpu.memory_space<vmem>>, vector<1x16x32xf32>,
    return
  }
  func.func @transform_0(%arg0: i32) -> (i32, i32, i32) {
    %c0_i32 = arith.constant 0 : i32
    %c0_i32_0 = arith.constant 0 : i32
    %c0_i32_1 = arith.constant 0 : i32
    return %arg0, %c0_i32, %c0_i32_0 : i32, i32, i32
  }
  func.func @transform_1(%arg0: i32) -> (i32, i32) {
    %c0_i32 = arith.constant 0 : i32
    %c0_i32_0 = arith.constant 0 : i32
    %c0_i32_1 = arith.constant 0 : i32
    return %c0_i32, %c0_i32_0 : i32, i32
  }
  func.func @transform_2(%arg0: i32) -> (i32, i32) {
    %c0_i32 = arith.constant 0 : i32
    %c0_i32_0 = arith.constant 0 : i32
    %c0_i32_1 = arith.constant 0 : i32
    return %c0_i32, %c0_i32_0 : i32, i32
  }
  func.func @transform_3(%arg0: i32) -> (i32, i32, i32) {
    %c0_i32 = arith.constant 0 : i32
    %c0_i32_0 = arith.constant 0 : i32
    %c0_i32_1 = arith.constant 0 : i32
    return %arg0, %c0_i32, %c0_i32_0 : i32, i32, i32
  }
}

module attributes {stable_mosaic.version = 11 : i64} {
  func.func @_linear_kernel(%arg0: i32, %arg1: i32, %arg2: i32, %arg3: memref<64x64xbf16, #tpu.memory_space<vmem>>, %arg4: memref<64x32xbf16, #tpu.memory_space<vmem>>, %arg5: memref<1x32xf32, #tpu.memory_space<vmem>>, %arg6: memref<64x32xf32, #tpu.memory_space<vmem>>, %arg7: memref<1x32xf32, #tpu.memory_space<vmem>>, %arg8: memref<1x32xf32, #tpu.memory_space<vmem>>, %arg9: memref<64x32xf32, #tpu.memory_space<vmem>>, %arg10: memref<64x32xf32, #tpu.memory_space<vmem>>) attributes {dimension_semantics = [#tpu.dimension_semantics<parallel>, #tpu.dimension_semantics<parallel>, #tpu.dimension_semantics<arbitrary>], iteration_bounds = array<i64: 1, 1, 1>, scalar_prefetch = 0 : i64, scratch_operands = 1 : i64, tpu.core_type = #tpu.core_type<tc>, window_params = [{transform_indices = @transform_0, window_bounds = array<i64: 64, 64>}, {transform_indices = @transform_1, window_bounds = array<i64: 64, 32>}, {transform_indices = @transform_2, window_bounds = array<i64: 1, 32>}, {transform_indices = @transform_3, window_bounds = array<i64: 64, 32>}, {transform_indices = @transform_4, window_bounds = array<i64: 1, 32>}, {transform_indices = @transform_5, window_bounds = array<i64: 1, 32>}, {transform_indices = @transform_6, window_bounds = array<i64: 64, 32>}]} {
    %c0_i32 = arith.constant 0 : i32
    %0 = arith.cmpi eq, %arg2, %c0_i32 : i32
    %1 = arith.extui %0 : i1 to i32
    %c0_i32_0 = arith.constant 0 : i32
    %2 = arith.cmpi ne, %1, %c0_i32_0 : i32
    scf.if %2 {
      %cst_10 = arith.constant 0.000000e+00 : f32
      %12 = vector.broadcast %cst_10 : f32 to vector<64x32xf32>
      %c0_11 = arith.constant 0 : index
      %c0_12 = arith.constant 0 : index
      %13 = vector.load %arg10[%c0_11, %c0_12] : memref<64x32xf32, #tpu.memory_space<vmem>>, vector<64x32xf32>
      tpu.vector_store %arg10[%c0_11, %c0_12], %12 {strides = array<i32>} : memref<64x32xf32, #tpu.memory_space<vmem>>, vector<64x32xf32>,
    } else {
    }
    %c0 = arith.constant 0 : index
    %c0_1 = arith.constant 0 : index
    %3 = vector.load %arg10[%c0, %c0_1] : memref<64x32xf32, #tpu.memory_space<vmem>>, vector<64x32xf32>
    %c0_2 = arith.constant 0 : index
    %c0_3 = arith.constant 0 : index
    %4 = vector.load %arg3[%c0_2, %c0_3] : memref<64x64xbf16, #tpu.memory_space<vmem>>, vector<64x64xbf16>
    %c0_4 = arith.constant 0 : index
    %c0_5 = arith.constant 0 : index
    %5 = vector.load %arg4[%c0_4, %c0_5] : memref<64x32xbf16, #tpu.memory_space<vmem>>, vector<64x32xbf16>
    %cst = arith.constant dense<0.000000e+00> : vector<64x32xf32>
    %6 = tpu.matmul %4, %5, %cst {dimension_numbers = #tpu.dot_dimension_numbers<[1], [0], [0], [1], [0, 0, 1, 1], [], []>} : vector<64x64xbf16>, vector<64x32xbf16>, vector<64x32xf32> -> vector<64x32xf32>
    %7 = arith.addf %3, %6 : vector<64x32xf32>
    %c0_6 = arith.constant 0 : index
    %c0_7 = arith.constant 0 : index
    %8 = vector.load %arg10[%c0_6, %c0_7] : memref<64x32xf32, #tpu.memory_space<vmem>>, vector<64x32xf32>
    tpu.vector_store %arg10[%c0_6, %c0_7], %7 {strides = array<i32>} : memref<64x32xf32, #tpu.memory_space<vmem>>, vector<64x32xf32>,
    %c0_i32_8 = arith.constant 0 : i32
    %9 = arith.cmpi eq, %arg2, %c0_i32_8 : i32
    %10 = arith.extui %9 : i1 to i32
    %c0_i32_9 = arith.constant 0 : i32
    %11 = arith.cmpi ne, %10, %c0_i32_9 : i32
    scf.if %11 {
      %c0_10 = arith.constant 0 : index
      %c0_11 = arith.constant 0 : index
      %12 = vector.load %arg10[%c0_10, %c0_11] : memref<64x32xf32, #tpu.memory_space<vmem>>, vector<64x32xf32>
      %c0_12 = arith.constant 0 : index
      %c0_13 = arith.constant 0 : index
      %13 = vector.load %arg5[%c0_12, %c0_13] : memref<1x32xf32, #tpu.memory_space<vmem>>, vector<1x32xf32>
      %14 = vector.broadcast %13 : vector<1x32xf32> to vector<64x32xf32>
      %15 = arith.addf %12, %14 : vector<64x32xf32>
      %c0_14 = arith.constant 0 : index
      %c0_15 = arith.constant 0 : index
      %16 = vector.load %arg6[%c0_14, %c0_15] : memref<64x32xf32, #tpu.memory_space<vmem>>, vector<64x32xf32>
      %17 = arith.addf %15, %16 : vector<64x32xf32>
      %cst_16 = arith.constant dense<0.000000e+00> : vector<64xf32>
      %18 = vector.multi_reduction <add>, %17, %cst_16 [1] : vector<64x32xf32> to vector<64xf32>
      %19 = vector.shape_cast %18 : vector<64xf32> to vector<64x1xf32>
      %cst_17 = arith.constant 3.200000e+01 : f32
      %20 = vector.broadcast %cst_17 : f32 to vector<64x1xf32>
      %21 = arith.divf %19, %20 : vector<64x1xf32>
      %22 = vector.broadcast %21 : vector<64x1xf32> to vector<64x32xf32>
      %23 = arith.subf %17, %22 : vector<64x32xf32>
      %24 = arith.mulf %23, %23 : vector<64x32xf32>
      %cst_18 = arith.constant dense<0.000000e+00> : vector<64xf32>
      %25 = vector.multi_reduction <add>, %24, %cst_18 [1] : vector<64x32xf32> to vector<64xf32>
      %26 = vector.shape_cast %25 : vector<64xf32> to vector<64x1xf32>
      %cst_19 = arith.constant 3.200000e+01 : f32
      %27 = vector.broadcast %cst_19 : f32 to vector<64x1xf32>
      %28 = arith.divf %26, %27 : vector<64x1xf32>
      %29 = vector.broadcast %21 : vector<64x1xf32> to vector<64x32xf32>
      %30 = arith.subf %17, %29 : vector<64x32xf32>
      %cst_20 = arith.constant 9.99999996E-13 : f32
      %31 = vector.broadcast %cst_20 : f32 to vector<64x1xf32>
      %32 = arith.addf %28, %31 : vector<64x1xf32>
      %33 = math.rsqrt %32 : vector<64x1xf32>
      %34 = vector.broadcast %33 : vector<64x1xf32> to vector<64x32xf32>
      %35 = arith.mulf %30, %34 : vector<64x32xf32>
      %c0_21 = arith.constant 0 : index
      %c0_22 = arith.constant 0 : index
      %36 = vector.load %arg7[%c0_21, %c0_22] : memref<1x32xf32, #tpu.memory_space<vmem>>, vector<1x32xf32>
      %37 = vector.broadcast %36 : vector<1x32xf32> to vector<64x32xf32>
      %38 = arith.mulf %35, %37 : vector<64x32xf32>
      %c0_23 = arith.constant 0 : index
      %c0_24 = arith.constant 0 : index
      %39 = vector.load %arg8[%c0_23, %c0_24] : memref<1x32xf32, #tpu.memory_space<vmem>>, vector<1x32xf32>
      %40 = vector.broadcast %39 : vector<1x32xf32> to vector<64x32xf32>
      %41 = arith.addf %38, %40 : vector<64x32xf32>
      %c0_25 = arith.constant 0 : index
      %c0_26 = arith.constant 0 : index
      %42 = vector.load %arg9[%c0_25, %c0_26] : memref<64x32xf32, #tpu.memory_space<vmem>>, vector<64x32xf32>
      tpu.vector_store %arg9[%c0_25, %c0_26], %41 {strides = array<i32>} : memref<64x32xf32, #tpu.memory_space<vmem>>, vector<64x32xf32>,
    } else {
    }
    return
  }
  func.func @transform_0(%arg0: i32, %arg1: i32, %arg2: i32) -> (i32, i32) {
    %c0_i32 = arith.constant 0 : i32
    return %arg0, %arg2 : i32, i32
  }
  func.func @transform_1(%arg0: i32, %arg1: i32, %arg2: i32) -> (i32, i32) {
    %c0_i32 = arith.constant 0 : i32
    return %arg2, %arg1 : i32, i32
  }
  func.func @transform_2(%arg0: i32, %arg1: i32, %arg2: i32) -> (i32, i32) {
    %c0_i32 = arith.constant 0 : i32
    %c0_i32_0 = arith.constant 0 : i32
    return %c0_i32, %arg1 : i32, i32
  }
  func.func @transform_3(%arg0: i32, %arg1: i32, %arg2: i32) -> (i32, i32) {
    %c0_i32 = arith.constant 0 : i32
    return %arg0, %arg1 : i32, i32
  }
  func.func @transform_4(%arg0: i32, %arg1: i32, %arg2: i32) -> (i32, i32) {
    %c0_i32 = arith.constant 0 : i32
    %c0_i32_0 = arith.constant 0 : i32
    return %c0_i32, %arg1 : i32, i32
  }
  func.func @transform_5(%arg0: i32, %arg1: i32, %arg2: i32) -> (i32, i32) {
    %c0_i32 = arith.constant 0 : i32
    %c0_i32_0 = arith.constant 0 : i32
    return %c0_i32, %arg1 : i32, i32
  }
  func.func @transform_6(%arg0: i32, %arg1: i32, %arg2: i32) -> (i32, i32) {
    %c0_i32 = arith.constant 0 : i32
    return %arg0, %arg1 : i32, i32
  }
}

module attributes {stable_mosaic.version = 11 : i64} {
  func.func @_linear_kernel(%arg0: i32, %arg1: i32, %arg2: i32, %arg3: memref<64x32xf32, #tpu.memory_space<vmem>>, %arg4: memref<32x32xbf16, #tpu.memory_space<vmem>>, %arg5: memref<1x32xf32, #tpu.memory_space<vmem>>, %arg6: memref<64x32xf32, #tpu.memory_space<vmem>>, %arg7: memref<64x32xf32, #tpu.memory_space<vmem>>) attributes {dimension_semantics = [#tpu.dimension_semantics<parallel>, #tpu.dimension_semantics<parallel>, #tpu.dimension_semantics<arbitrary>], iteration_bounds = array<i64: 1, 1, 1>, scalar_prefetch = 0 : i64, scratch_operands = 1 : i64, tpu.core_type = #tpu.core_type<tc>, window_params = [{transform_indices = @transform_0, window_bounds = array<i64: 64, 32>}, {transform_indices = @transform_1, window_bounds = array<i64: 32, 32>}, {transform_indices = @transform_2, window_bounds = array<i64: 1, 32>}, {transform_indices = @transform_3, window_bounds = array<i64: 64, 32>}]} {
    %c0_i32 = arith.constant 0 : i32
    %0 = arith.cmpi eq, %arg2, %c0_i32 : i32
    %1 = arith.extui %0 : i1 to i32
    %c0_i32_0 = arith.constant 0 : i32
    %2 = arith.cmpi ne, %1, %c0_i32_0 : i32
    scf.if %2 {
      %cst_10 = arith.constant 0.000000e+00 : f32
      %13 = vector.broadcast %cst_10 : f32 to vector<64x32xf32>
      %c0_11 = arith.constant 0 : index
      %c0_12 = arith.constant 0 : index
      %14 = vector.load %arg7[%c0_11, %c0_12] : memref<64x32xf32, #tpu.memory_space<vmem>>, vector<64x32xf32>
      tpu.vector_store %arg7[%c0_11, %c0_12], %13 {strides = array<i32>} : memref<64x32xf32, #tpu.memory_space<vmem>>, vector<64x32xf32>,
    } else {
    }
    %c0 = arith.constant 0 : index
    %c0_1 = arith.constant 0 : index
    %3 = vector.load %arg7[%c0, %c0_1] : memref<64x32xf32, #tpu.memory_space<vmem>>, vector<64x32xf32>
    %c0_2 = arith.constant 0 : index
    %c0_3 = arith.constant 0 : index
    %4 = vector.load %arg3[%c0_2, %c0_3] : memref<64x32xf32, #tpu.memory_space<vmem>>, vector<64x32xf32>
    %5 = arith.truncf %4 : vector<64x32xf32> to vector<64x32xbf16>
    %c0_4 = arith.constant 0 : index
    %c0_5 = arith.constant 0 : index
    %6 = vector.load %arg4[%c0_4, %c0_5] : memref<32x32xbf16, #tpu.memory_space<vmem>>, vector<32x32xbf16>
    %cst = arith.constant dense<0.000000e+00> : vector<64x32xf32>
    %7 = tpu.matmul %5, %6, %cst {dimension_numbers = #tpu.dot_dimension_numbers<[1], [0], [0], [1], [0, 0, 1, 1], [], []>} : vector<64x32xbf16>, vector<32x32xbf16>, vector<64x32xf32> -> vector<64x32xf32>
    %8 = arith.addf %3, %7 : vector<64x32xf32>
    %c0_6 = arith.constant 0 : index
    %c0_7 = arith.constant 0 : index
    %9 = vector.load %arg7[%c0_6, %c0_7] : memref<64x32xf32, #tpu.memory_space<vmem>>, vector<64x32xf32>
    tpu.vector_store %arg7[%c0_6, %c0_7], %8 {strides = array<i32>} : memref<64x32xf32, #tpu.memory_space<vmem>>, vector<64x32xf32>,
    %c0_i32_8 = arith.constant 0 : i32
    %10 = arith.cmpi eq, %arg2, %c0_i32_8 : i32
    %11 = arith.extui %10 : i1 to i32
    %c0_i32_9 = arith.constant 0 : i32
    %12 = arith.cmpi ne, %11, %c0_i32_9 : i32
    scf.if %12 {
      %c0_10 = arith.constant 0 : index
      %c0_11 = arith.constant 0 : index
      %13 = vector.load %arg7[%c0_10, %c0_11] : memref<64x32xf32, #tpu.memory_space<vmem>>, vector<64x32xf32>
      %c0_12 = arith.constant 0 : index
      %c0_13 = arith.constant 0 : index
      %14 = vector.load %arg5[%c0_12, %c0_13] : memref<1x32xf32, #tpu.memory_space<vmem>>, vector<1x32xf32>
      %15 = vector.broadcast %14 : vector<1x32xf32> to vector<64x32xf32>
      %16 = arith.addf %13, %15 : vector<64x32xf32>
      %c0_14 = arith.constant 0 : index
      %c0_15 = arith.constant 0 : index
      %17 = vector.load %arg6[%c0_14, %c0_15] : memref<64x32xf32, #tpu.memory_space<vmem>>, vector<64x32xf32>
      tpu.vector_store %arg6[%c0_14, %c0_15], %16 {strides = array<i32>} : memref<64x32xf32, #tpu.memory_space<vmem>>, vector<64x32xf32>,
    } else {
    }
    return
  }
  func.func @transform_0(%arg0: i32, %arg1: i32, %arg2: i32) -> (i32, i32) {
    %c0_i32 = arith.constant 0 : i32
    return %arg0, %arg2 : i32, i32
  }
  func.func @transform_1(%arg0: i32, %arg1: i32, %arg2: i32) -> (i32, i32) {
    %c0_i32 = arith.constant 0 : i32
    return %arg2, %arg1 : i32, i32
  }
  func.func @transform_2(%arg0: i32, %arg1: i32, %arg2: i32) -> (i32, i32) {
    %c0_i32 = arith.constant 0 : i32
    %c0_i32_0 = arith.constant 0 : i32
    return %c0_i32, %arg1 : i32, i32
  }
  func.func @transform_3(%arg0: i32, %arg1: i32, %arg2: i32) -> (i32, i32) {
    %c0_i32 = arith.constant 0 : i32
    return %arg0, %arg1 : i32, i32
  }
}

module attributes {stable_mosaic.version = 11 : i64} {
  func.func @_linear_kernel(%arg0: i32, %arg1: i32, %arg2: i32, %arg3: memref<64x32xf32, #tpu.memory_space<vmem>>, %arg4: memref<32x32xbf16, #tpu.memory_space<vmem>>, %arg5: memref<1x32xf32, #tpu.memory_space<vmem>>, %arg6: memref<64x32xbf16, #tpu.memory_space<vmem>>, %arg7: memref<64x32xf32, #tpu.memory_space<vmem>>) attributes {dimension_semantics = [#tpu.dimension_semantics<parallel>, #tpu.dimension_semantics<parallel>, #tpu.dimension_semantics<arbitrary>], iteration_bounds = array<i64: 1, 1, 1>, scalar_prefetch = 0 : i64, scratch_operands = 1 : i64, tpu.core_type = #tpu.core_type<tc>, window_params = [{transform_indices = @transform_0, window_bounds = array<i64: 64, 32>}, {transform_indices = @transform_1, window_bounds = array<i64: 32, 32>}, {transform_indices = @transform_2, window_bounds = array<i64: 1, 32>}, {transform_indices = @transform_3, window_bounds = array<i64: 64, 32>}]} {
    %c0_i32 = arith.constant 0 : i32
    %0 = arith.cmpi eq, %arg2, %c0_i32 : i32
    %1 = arith.extui %0 : i1 to i32
    %c0_i32_0 = arith.constant 0 : i32
    %2 = arith.cmpi ne, %1, %c0_i32_0 : i32
    scf.if %2 {
      %cst_10 = arith.constant 0.000000e+00 : f32
      %13 = vector.broadcast %cst_10 : f32 to vector<64x32xf32>
      %c0_11 = arith.constant 0 : index
      %c0_12 = arith.constant 0 : index
      %14 = vector.load %arg7[%c0_11, %c0_12] : memref<64x32xf32, #tpu.memory_space<vmem>>, vector<64x32xf32>
      tpu.vector_store %arg7[%c0_11, %c0_12], %13 {strides = array<i32>} : memref<64x32xf32, #tpu.memory_space<vmem>>, vector<64x32xf32>,
    } else {
    }
    %c0 = arith.constant 0 : index
    %c0_1 = arith.constant 0 : index
    %3 = vector.load %arg7[%c0, %c0_1] : memref<64x32xf32, #tpu.memory_space<vmem>>, vector<64x32xf32>
    %c0_2 = arith.constant 0 : index
    %c0_3 = arith.constant 0 : index
    %4 = vector.load %arg3[%c0_2, %c0_3] : memref<64x32xf32, #tpu.memory_space<vmem>>, vector<64x32xf32>
    %5 = arith.truncf %4 : vector<64x32xf32> to vector<64x32xbf16>
    %c0_4 = arith.constant 0 : index
    %c0_5 = arith.constant 0 : index
    %6 = vector.load %arg4[%c0_4, %c0_5] : memref<32x32xbf16, #tpu.memory_space<vmem>>, vector<32x32xbf16>
    %cst = arith.constant dense<0.000000e+00> : vector<64x32xf32>
    %7 = tpu.matmul %5, %6, %cst {dimension_numbers = #tpu.dot_dimension_numbers<[1], [0], [0], [1], [0, 0, 1, 1], [], []>} : vector<64x32xbf16>, vector<32x32xbf16>, vector<64x32xf32> -> vector<64x32xf32>
    %8 = arith.addf %3, %7 : vector<64x32xf32>
    %c0_6 = arith.constant 0 : index
    %c0_7 = arith.constant 0 : index
    %9 = vector.load %arg7[%c0_6, %c0_7] : memref<64x32xf32, #tpu.memory_space<vmem>>, vector<64x32xf32>
    tpu.vector_store %arg7[%c0_6, %c0_7], %8 {strides = array<i32>} : memref<64x32xf32, #tpu.memory_space<vmem>>, vector<64x32xf32>,
    %c0_i32_8 = arith.constant 0 : i32
    %10 = arith.cmpi eq, %arg2, %c0_i32_8 : i32
    %11 = arith.extui %10 : i1 to i32
    %c0_i32_9 = arith.constant 0 : i32
    %12 = arith.cmpi ne, %11, %c0_i32_9 : i32
    scf.if %12 {
      %c0_10 = arith.constant 0 : index
      %c0_11 = arith.constant 0 : index
      %13 = vector.load %arg7[%c0_10, %c0_11] : memref<64x32xf32, #tpu.memory_space<vmem>>, vector<64x32xf32>
      %c0_12 = arith.constant 0 : index
      %c0_13 = arith.constant 0 : index
      %14 = vector.load %arg5[%c0_12, %c0_13] : memref<1x32xf32, #tpu.memory_space<vmem>>, vector<1x32xf32>
      %15 = vector.broadcast %14 : vector<1x32xf32> to vector<64x32xf32>
      %16 = arith.addf %13, %15 : vector<64x32xf32>
      %17 = arith.truncf %16 : vector<64x32xf32> to vector<64x32xbf16>
      %c0_14 = arith.constant 0 : index
      %c0_15 = arith.constant 0 : index
      %18 = vector.load %arg6[%c0_14, %c0_15] : memref<64x32xbf16, #tpu.memory_space<vmem>>, vector<64x32xbf16>
      tpu.vector_store %arg6[%c0_14, %c0_15], %17 {strides = array<i32>} : memref<64x32xbf16, #tpu.memory_space<vmem>>, vector<64x32xbf16>,
    } else {
    }
    return
  }
  func.func @transform_0(%arg0: i32, %arg1: i32, %arg2: i32) -> (i32, i32) {
    %c0_i32 = arith.constant 0 : i32
    return %arg0, %arg2 : i32, i32
  }
  func.func @transform_1(%arg0: i32, %arg1: i32, %arg2: i32) -> (i32, i32) {
    %c0_i32 = arith.constant 0 : i32
    return %arg2, %arg1 : i32, i32
  }
  func.func @transform_2(%arg0: i32, %arg1: i32, %arg2: i32) -> (i32, i32) {
    %c0_i32 = arith.constant 0 : i32
    %c0_i32_0 = arith.constant 0 : i32
    return %c0_i32, %arg1 : i32, i32
  }
  func.func @transform_3(%arg0: i32, %arg1: i32, %arg2: i32) -> (i32, i32) {
    %c0_i32 = arith.constant 0 : i32
    return %arg0, %arg1 : i32, i32
  }
}

module attributes {stable_mosaic.version = 11 : i64} {
  func.func @_linear_kernel(%arg0: i32, %arg1: i32, %arg2: i32, %arg3: memref<32x32xf32, #tpu.memory_space<vmem>>, %arg4: memref<32x96xbf16, #tpu.memory_space<vmem>>, %arg5: memref<1x96xf32, #tpu.memory_space<vmem>>, %arg6: memref<32x96xbf16, #tpu.memory_space<vmem>>, %arg7: memref<32x96xf32, #tpu.memory_space<vmem>>) attributes {dimension_semantics = [#tpu.dimension_semantics<parallel>, #tpu.dimension_semantics<parallel>, #tpu.dimension_semantics<arbitrary>], iteration_bounds = array<i64: 1, 1, 1>, scalar_prefetch = 0 : i64, scratch_operands = 1 : i64, tpu.core_type = #tpu.core_type<tc>, window_params = [{transform_indices = @transform_0, window_bounds = array<i64: 32, 32>}, {transform_indices = @transform_1, window_bounds = array<i64: 32, 96>}, {transform_indices = @transform_2, window_bounds = array<i64: 1, 96>}, {transform_indices = @transform_3, window_bounds = array<i64: 32, 96>}]} {
    %c0_i32 = arith.constant 0 : i32
    %0 = arith.cmpi eq, %arg2, %c0_i32 : i32
    %1 = arith.extui %0 : i1 to i32
    %c0_i32_0 = arith.constant 0 : i32
    %2 = arith.cmpi ne, %1, %c0_i32_0 : i32
    scf.if %2 {
      %cst_10 = arith.constant 0.000000e+00 : f32
      %13 = vector.broadcast %cst_10 : f32 to vector<32x96xf32>
      %c0_11 = arith.constant 0 : index
      %c0_12 = arith.constant 0 : index
      %14 = vector.load %arg7[%c0_11, %c0_12] : memref<32x96xf32, #tpu.memory_space<vmem>>, vector<32x96xf32>
      tpu.vector_store %arg7[%c0_11, %c0_12], %13 {strides = array<i32>} : memref<32x96xf32, #tpu.memory_space<vmem>>, vector<32x96xf32>,
    } else {
    }
    %c0 = arith.constant 0 : index
    %c0_1 = arith.constant 0 : index
    %3 = vector.load %arg7[%c0, %c0_1] : memref<32x96xf32, #tpu.memory_space<vmem>>, vector<32x96xf32>
    %c0_2 = arith.constant 0 : index
    %c0_3 = arith.constant 0 : index
    %4 = vector.load %arg3[%c0_2, %c0_3] : memref<32x32xf32, #tpu.memory_space<vmem>>, vector<32x32xf32>
    %5 = arith.truncf %4 : vector<32x32xf32> to vector<32x32xbf16>
    %c0_4 = arith.constant 0 : index
    %c0_5 = arith.constant 0 : index
    %6 = vector.load %arg4[%c0_4, %c0_5] : memref<32x96xbf16, #tpu.memory_space<vmem>>, vector<32x96xbf16>
    %cst = arith.constant dense<0.000000e+00> : vector<32x96xf32>
    %7 = tpu.matmul %5, %6, %cst {dimension_numbers = #tpu.dot_dimension_numbers<[1], [0], [0], [1], [0, 0, 1, 1], [], []>} : vector<32x32xbf16>, vector<32x96xbf16>, vector<32x96xf32> -> vector<32x96xf32>
    %8 = arith.addf %3, %7 : vector<32x96xf32>
    %c0_6 = arith.constant 0 : index
    %c0_7 = arith.constant 0 : index
    %9 = vector.load %arg7[%c0_6, %c0_7] : memref<32x96xf32, #tpu.memory_space<vmem>>, vector<32x96xf32>
    tpu.vector_store %arg7[%c0_6, %c0_7], %8 {strides = array<i32>} : memref<32x96xf32, #tpu.memory_space<vmem>>, vector<32x96xf32>,
    %c0_i32_8 = arith.constant 0 : i32
    %10 = arith.cmpi eq, %arg2, %c0_i32_8 : i32
    %11 = arith.extui %10 : i1 to i32
    %c0_i32_9 = arith.constant 0 : i32
    %12 = arith.cmpi ne, %11, %c0_i32_9 : i32
    scf.if %12 {
      %c0_10 = arith.constant 0 : index
      %c0_11 = arith.constant 0 : index
      %13 = vector.load %arg7[%c0_10, %c0_11] : memref<32x96xf32, #tpu.memory_space<vmem>>, vector<32x96xf32>
      %c0_12 = arith.constant 0 : index
      %c0_13 = arith.constant 0 : index
      %14 = vector.load %arg5[%c0_12, %c0_13] : memref<1x96xf32, #tpu.memory_space<vmem>>, vector<1x96xf32>
      %15 = vector.broadcast %14 : vector<1x96xf32> to vector<32x96xf32>
      %16 = arith.addf %13, %15 : vector<32x96xf32>
      %17 = arith.truncf %16 : vector<32x96xf32> to vector<32x96xbf16>
      %c0_14 = arith.constant 0 : index
      %c0_15 = arith.constant 0 : index
      %18 = vector.load %arg6[%c0_14, %c0_15] : memref<32x96xbf16, #tpu.memory_space<vmem>>, vector<32x96xbf16>
      tpu.vector_store %arg6[%c0_14, %c0_15], %17 {strides = array<i32>} : memref<32x96xbf16, #tpu.memory_space<vmem>>, vector<32x96xbf16>,
    } else {
    }
    return
  }
  func.func @transform_0(%arg0: i32, %arg1: i32, %arg2: i32) -> (i32, i32) {
    %c0_i32 = arith.constant 0 : i32
    return %arg0, %arg2 : i32, i32
  }
  func.func @transform_1(%arg0: i32, %arg1: i32, %arg2: i32) -> (i32, i32) {
    %c0_i32 = arith.constant 0 : i32
    return %arg2, %arg1 : i32, i32
  }
  func.func @transform_2(%arg0: i32, %arg1: i32, %arg2: i32) -> (i32, i32) {
    %c0_i32 = arith.constant 0 : i32
    %c0_i32_0 = arith.constant 0 : i32
    return %c0_i32, %arg1 : i32, i32
  }
  func.func @transform_3(%arg0: i32, %arg1: i32, %arg2: i32) -> (i32, i32) {
    %c0_i32 = arith.constant 0 : i32
    return %arg0, %arg1 : i32, i32
  }
}

module attributes {stable_mosaic.version = 11 : i64} {
  func.func @_layernorm2d_kernel(%arg0: i32, %arg1: memref<1x8x32xf32, #tpu.memory_space<vmem>>, %arg2: memref<8x32xf32, #tpu.memory_space<vmem>>, %arg3: memref<8x32xf32, #tpu.memory_space<vmem>>, %arg4: memref<1x8x32xf32, #tpu.memory_space<vmem>>) attributes {dimension_semantics = [#tpu.dimension_semantics<parallel>], iteration_bounds = array<i64: 4>, scalar_prefetch = 0 : i64, scratch_operands = 0 : i64, tpu.core_type = #tpu.core_type<tc>, window_params = [{transform_indices = @transform_0, window_bounds = array<i64: 1, 8, 32>}, {pipeline_mode = #tpu.pipeline_mode<synchronous>, transform_indices = @transform_1, window_bounds = array<i64: 8, 32>}, {pipeline_mode = #tpu.pipeline_mode<synchronous>, transform_indices = @transform_2, window_bounds = array<i64: 8, 32>}, {transform_indices = @transform_3, window_bounds = array<i64: 1, 8, 32>}]} {
    %c0 = arith.constant 0 : index
    %c0_0 = arith.constant 0 : index
    %c0_1 = arith.constant 0 : index
    %0 = vector.load %arg1[%c0, %c0_0, %c0_1] : memref<1x8x32xf32, #tpu.memory_space<vmem>>, vector<1x8x32xf32>
    %1 = vector.shape_cast %0 : vector<1x8x32xf32> to vector<8x32xf32>
    %2 = vector.shape_cast %1 : vector<8x32xf32> to vector<1x8x32xf32>
    %cst = arith.constant dense<0.000000e+00> : vector<1xf32>
    %3 = vector.multi_reduction <add>, %2, %cst [1, 2] : vector<1x8x32xf32> to vector<1xf32>
    %4 = vector.shape_cast %3 : vector<1xf32> to vector<1x1x1xf32>
    %5 = vector.extract %4[0, 0, 0] : f32 from vector<1x1x1xf32>
    %6 = vector.broadcast %5 : f32 to vector<1x1xf32>
    %cst_2 = arith.constant 2.560000e+02 : f32
    %7 = vector.broadcast %cst_2 : f32 to vector<1x1xf32>
    %8 = arith.divf %6, %7 : vector<1x1xf32>
    %9 = vector.broadcast %8 : vector<1x1xf32> to vector<8x32xf32>
    %10 = arith.subf %1, %9 : vector<8x32xf32>
    %11 = arith.mulf %10, %10 : vector<8x32xf32>
    %12 = vector.shape_cast %11 : vector<8x32xf32> to vector<1x8x32xf32>
    %cst_3 = arith.constant dense<0.000000e+00> : vector<1xf32>
    %13 = vector.multi_reduction <add>, %12, %cst_3 [1, 2] : vector<1x8x32xf32> to vector<1xf32>
    %14 = vector.shape_cast %13 : vector<1xf32> to vector<1x1x1xf32>
    %15 = vector.extract %14[0, 0, 0] : f32 from vector<1x1x1xf32>
    %16 = vector.broadcast %15 : f32 to vector<1x1xf32>
    %cst_4 = arith.constant 2.560000e+02 : f32
    %17 = vector.broadcast %cst_4 : f32 to vector<1x1xf32>
    %18 = arith.divf %16, %17 : vector<1x1xf32>
    %19 = vector.broadcast %8 : vector<1x1xf32> to vector<8x32xf32>
    %20 = arith.subf %1, %19 : vector<8x32xf32>
    %cst_5 = arith.constant 9.99999974E-6 : f32
    %21 = vector.broadcast %cst_5 : f32 to vector<1x1xf32>
    %22 = arith.addf %18, %21 : vector<1x1xf32>
    %23 = math.rsqrt %22 : vector<1x1xf32>
    %24 = vector.broadcast %23 : vector<1x1xf32> to vector<8x32xf32>
    %25 = arith.mulf %20, %24 : vector<8x32xf32>
    %c0_6 = arith.constant 0 : index
    %c0_7 = arith.constant 0 : index
    %26 = vector.load %arg2[%c0_6, %c0_7] : memref<8x32xf32, #tpu.memory_space<vmem>>, vector<8x32xf32>
    %27 = arith.mulf %25, %26 : vector<8x32xf32>
    %c0_8 = arith.constant 0 : index
    %c0_9 = arith.constant 0 : index
    %28 = vector.load %arg3[%c0_8, %c0_9] : memref<8x32xf32, #tpu.memory_space<vmem>>, vector<8x32xf32>
    %29 = arith.addf %27, %28 : vector<8x32xf32>
    %c0_10 = arith.constant 0 : index
    %c0_11 = arith.constant 0 : index
    %c0_12 = arith.constant 0 : index
    %30 = vector.load %arg4[%c0_10, %c0_11, %c0_12] : memref<1x8x32xf32, #tpu.memory_space<vmem>>, vector<1x8x32xf32>
    %31 = vector.shape_cast %30 : vector<1x8x32xf32> to vector<8x32xf32>
    %32 = vector.shape_cast %29 : vector<8x32xf32> to vector<1x8x32xf32>
    tpu.vector_store %arg4[%c0_10, %c0_11, %c0_12], %32 {strides = array<i32>} : memref<1x8x32xf32, #tpu.memory_space<vmem>>, vector<1x8x32xf32>,
    return
  }
  func.func @transform_0(%arg0: i32) -> (i32, i32, i32) {
    %c0_i32 = arith.constant 0 : i32
    %c0_i32_0 = arith.constant 0 : i32
    %c0_i32_1 = arith.constant 0 : i32
    return %arg0, %c0_i32, %c0_i32_0 : i32, i32, i32
  }
  func.func @transform_1(%arg0: i32) -> (i32, i32) {
    %c0_i32 = arith.constant 0 : i32
    %c0_i32_0 = arith.constant 0 : i32
    %c0_i32_1 = arith.constant 0 : i32
    return %c0_i32, %c0_i32_0 : i32, i32
  }
  func.func @transform_2(%arg0: i32) -> (i32, i32) {
    %c0_i32 = arith.constant 0 : i32
    %c0_i32_0 = arith.constant 0 : i32
    %c0_i32_1 = arith.constant 0 : i32
    return %c0_i32, %c0_i32_0 : i32, i32
  }
  func.func @transform_3(%arg0: i32) -> (i32, i32, i32) {
    %c0_i32 = arith.constant 0 : i32
    %c0_i32_0 = arith.constant 0 : i32
    %c0_i32_1 = arith.constant 0 : i32
    return %arg0, %c0_i32, %c0_i32_0 : i32, i32, i32
  }
}

module attributes {stable_mosaic.version = 11 : i64} {
  func.func @_linear_kernel(%arg0: i32, %arg1: i32, %arg2: i32, %arg3: memref<32x32xbf16, #tpu.memory_space<vmem>>, %arg4: memref<32x32xbf16, #tpu.memory_space<vmem>>, %arg5: memref<1x32xf32, #tpu.memory_space<vmem>>, %arg6: memref<32x32xf32, #tpu.memory_space<vmem>>, %arg7: memref<1x32xf32, #tpu.memory_space<vmem>>, %arg8: memref<1x32xf32, #tpu.memory_space<vmem>>, %arg9: memref<32x32xf32, #tpu.memory_space<vmem>>, %arg10: memref<32x32xf32, #tpu.memory_space<vmem>>) attributes {dimension_semantics = [#tpu.dimension_semantics<parallel>, #tpu.dimension_semantics<parallel>, #tpu.dimension_semantics<arbitrary>], iteration_bounds = array<i64: 1, 1, 1>, scalar_prefetch = 0 : i64, scratch_operands = 1 : i64, tpu.core_type = #tpu.core_type<tc>, window_params = [{transform_indices = @transform_0, window_bounds = array<i64: 32, 32>}, {transform_indices = @transform_1, window_bounds = array<i64: 32, 32>}, {transform_indices = @transform_2, window_bounds = array<i64: 1, 32>}, {transform_indices = @transform_3, window_bounds = array<i64: 32, 32>}, {transform_indices = @transform_4, window_bounds = array<i64: 1, 32>}, {transform_indices = @transform_5, window_bounds = array<i64: 1, 32>}, {transform_indices = @transform_6, window_bounds = array<i64: 32, 32>}]} {
    %c0_i32 = arith.constant 0 : i32
    %0 = arith.cmpi eq, %arg2, %c0_i32 : i32
    %1 = arith.extui %0 : i1 to i32
    %c0_i32_0 = arith.constant 0 : i32
    %2 = arith.cmpi ne, %1, %c0_i32_0 : i32
    scf.if %2 {
      %cst_10 = arith.constant 0.000000e+00 : f32
      %12 = vector.broadcast %cst_10 : f32 to vector<32x32xf32>
      %c0_11 = arith.constant 0 : index
      %c0_12 = arith.constant 0 : index
      %13 = vector.load %arg10[%c0_11, %c0_12] : memref<32x32xf32, #tpu.memory_space<vmem>>, vector<32x32xf32>
      tpu.vector_store %arg10[%c0_11, %c0_12], %12 {strides = array<i32>} : memref<32x32xf32, #tpu.memory_space<vmem>>, vector<32x32xf32>,
    } else {
    }
    %c0 = arith.constant 0 : index
    %c0_1 = arith.constant 0 : index
    %3 = vector.load %arg10[%c0, %c0_1] : memref<32x32xf32, #tpu.memory_space<vmem>>, vector<32x32xf32>
    %c0_2 = arith.constant 0 : index
    %c0_3 = arith.constant 0 : index
    %4 = vector.load %arg3[%c0_2, %c0_3] : memref<32x32xbf16, #tpu.memory_space<vmem>>, vector<32x32xbf16>
    %c0_4 = arith.constant 0 : index
    %c0_5 = arith.constant 0 : index
    %5 = vector.load %arg4[%c0_4, %c0_5] : memref<32x32xbf16, #tpu.memory_space<vmem>>, vector<32x32xbf16>
    %cst = arith.constant dense<0.000000e+00> : vector<32x32xf32>
    %6 = tpu.matmul %4, %5, %cst {dimension_numbers = #tpu.dot_dimension_numbers<[1], [0], [0], [1], [0, 0, 1, 1], [], []>} : vector<32x32xbf16>, vector<32x32xbf16>, vector<32x32xf32> -> vector<32x32xf32>
    %7 = arith.addf %3, %6 : vector<32x32xf32>
    %c0_6 = arith.constant 0 : index
    %c0_7 = arith.constant 0 : index
    %8 = vector.load %arg10[%c0_6, %c0_7] : memref<32x32xf32, #tpu.memory_space<vmem>>, vector<32x32xf32>
    tpu.vector_store %arg10[%c0_6, %c0_7], %7 {strides = array<i32>} : memref<32x32xf32, #tpu.memory_space<vmem>>, vector<32x32xf32>,
    %c0_i32_8 = arith.constant 0 : i32
    %9 = arith.cmpi eq, %arg2, %c0_i32_8 : i32
    %10 = arith.extui %9 : i1 to i32
    %c0_i32_9 = arith.constant 0 : i32
    %11 = arith.cmpi ne, %10, %c0_i32_9 : i32
    scf.if %11 {
      %c0_10 = arith.constant 0 : index
      %c0_11 = arith.constant 0 : index
      %12 = vector.load %arg10[%c0_10, %c0_11] : memref<32x32xf32, #tpu.memory_space<vmem>>, vector<32x32xf32>
      %c0_12 = arith.constant 0 : index
      %c0_13 = arith.constant 0 : index
      %13 = vector.load %arg5[%c0_12, %c0_13] : memref<1x32xf32, #tpu.memory_space<vmem>>, vector<1x32xf32>
      %14 = vector.broadcast %13 : vector<1x32xf32> to vector<32x32xf32>
      %15 = arith.addf %12, %14 : vector<32x32xf32>
      %c0_14 = arith.constant 0 : index
      %c0_15 = arith.constant 0 : index
      %16 = vector.load %arg6[%c0_14, %c0_15] : memref<32x32xf32, #tpu.memory_space<vmem>>, vector<32x32xf32>
      %17 = arith.addf %15, %16 : vector<32x32xf32>
      %cst_16 = arith.constant dense<0.000000e+00> : vector<32xf32>
      %18 = vector.multi_reduction <add>, %17, %cst_16 [1] : vector<32x32xf32> to vector<32xf32>
      %19 = vector.shape_cast %18 : vector<32xf32> to vector<32x1xf32>
      %cst_17 = arith.constant 3.200000e+01 : f32
      %20 = vector.broadcast %cst_17 : f32 to vector<32x1xf32>
      %21 = arith.divf %19, %20 : vector<32x1xf32>
      %22 = vector.broadcast %21 : vector<32x1xf32> to vector<32x32xf32>
      %23 = arith.subf %17, %22 : vector<32x32xf32>
      %24 = arith.mulf %23, %23 : vector<32x32xf32>
      %cst_18 = arith.constant dense<0.000000e+00> : vector<32xf32>
      %25 = vector.multi_reduction <add>, %24, %cst_18 [1] : vector<32x32xf32> to vector<32xf32>
      %26 = vector.shape_cast %25 : vector<32xf32> to vector<32x1xf32>
      %cst_19 = arith.constant 3.200000e+01 : f32
      %27 = vector.broadcast %cst_19 : f32 to vector<32x1xf32>
      %28 = arith.divf %26, %27 : vector<32x1xf32>
      %29 = vector.broadcast %21 : vector<32x1xf32> to vector<32x32xf32>
      %30 = arith.subf %17, %29 : vector<32x32xf32>
      %cst_20 = arith.constant 9.99999974E-6 : f32
      %31 = vector.broadcast %cst_20 : f32 to vector<32x1xf32>
      %32 = arith.addf %28, %31 : vector<32x1xf32>
      %33 = math.rsqrt %32 : vector<32x1xf32>
      %34 = vector.broadcast %33 : vector<32x1xf32> to vector<32x32xf32>
      %35 = arith.mulf %30, %34 : vector<32x32xf32>
      %c0_21 = arith.constant 0 : index
      %c0_22 = arith.constant 0 : index
      %36 = vector.load %arg7[%c0_21, %c0_22] : memref<1x32xf32, #tpu.memory_space<vmem>>, vector<1x32xf32>
      %37 = vector.broadcast %36 : vector<1x32xf32> to vector<32x32xf32>
      %38 = arith.mulf %35, %37 : vector<32x32xf32>
      %c0_23 = arith.constant 0 : index
      %c0_24 = arith.constant 0 : index
      %39 = vector.load %arg8[%c0_23, %c0_24] : memref<1x32xf32, #tpu.memory_space<vmem>>, vector<1x32xf32>
      %40 = vector.broadcast %39 : vector<1x32xf32> to vector<32x32xf32>
      %41 = arith.addf %38, %40 : vector<32x32xf32>
      %c0_25 = arith.constant 0 : index
      %c0_26 = arith.constant 0 : index
      %42 = vector.load %arg9[%c0_25, %c0_26] : memref<32x32xf32, #tpu.memory_space<vmem>>, vector<32x32xf32>
      tpu.vector_store %arg9[%c0_25, %c0_26], %41 {strides = array<i32>} : memref<32x32xf32, #tpu.memory_space<vmem>>, vector<32x32xf32>,
    } else {
    }
    return
  }
  func.func @transform_0(%arg0: i32, %arg1: i32, %arg2: i32) -> (i32, i32) {
    %c0_i32 = arith.constant 0 : i32
    return %arg0, %arg2 : i32, i32
  }
  func.func @transform_1(%arg0: i32, %arg1: i32, %arg2: i32) -> (i32, i32) {
    %c0_i32 = arith.constant 0 : i32
    return %arg2, %arg1 : i32, i32
  }
  func.func @transform_2(%arg0: i32, %arg1: i32, %arg2: i32) -> (i32, i32) {
    %c0_i32 = arith.constant 0 : i32
    %c0_i32_0 = arith.constant 0 : i32
    return %c0_i32, %arg1 : i32, i32
  }
  func.func @transform_3(%arg0: i32, %arg1: i32, %arg2: i32) -> (i32, i32) {
    %c0_i32 = arith.constant 0 : i32
    return %arg0, %arg1 : i32, i32
  }
  func.func @transform_4(%arg0: i32, %arg1: i32, %arg2: i32) -> (i32, i32) {
    %c0_i32 = arith.constant 0 : i32
    %c0_i32_0 = arith.constant 0 : i32
    return %c0_i32, %arg1 : i32, i32
  }
  func.func @transform_5(%arg0: i32, %arg1: i32, %arg2: i32) -> (i32, i32) {
    %c0_i32 = arith.constant 0 : i32
    %c0_i32_0 = arith.constant 0 : i32
    return %c0_i32, %arg1 : i32, i32
  }
  func.func @transform_6(%arg0: i32, %arg1: i32, %arg2: i32) -> (i32, i32) {
    %c0_i32 = arith.constant 0 : i32
    return %arg0, %arg1 : i32, i32
  }
}

module attributes {stable_mosaic.version = 11 : i64} {
  func.func @_self_attn_kernel(%arg0: i32, %arg1: memref<1x3x4x8x8xbf16, #tpu.memory_space<vmem>>, %arg2: memref<1x1x8xf32, #tpu.memory_space<vmem>>, %arg3: memref<1x8x32xbf16, #tpu.memory_space<vmem>>) attributes {dimension_semantics = [#tpu.dimension_semantics<parallel>], iteration_bounds = array<i64: 4>, scalar_prefetch = 0 : i64, scratch_operands = 0 : i64, tpu.core_type = #tpu.core_type<tc>, window_params = [{transform_indices = @transform_0, window_bounds = array<i64: 1, 3, 4, 8, 8>}, {transform_indices = @transform_1, window_bounds = array<i64: 1, 1, 8>}, {transform_indices = @transform_2, window_bounds = array<i64: 1, 8, 32>}]} {
    %c0 = arith.constant 0 : index
    %c0_0 = arith.constant 0 : index
    %c0_1 = arith.constant 0 : index
    %c0_2 = arith.constant 0 : index
    %c0_3 = arith.constant 0 : index
    %0 = vector.load %arg1[%c0, %c0_0, %c0_1, %c0_2, %c0_3] : memref<1x3x4x8x8xbf16, #tpu.memory_space<vmem>>, vector<1x1x4x8x8xbf16>
    %1 = vector.shape_cast %0 : vector<1x1x4x8x8xbf16> to vector<4x8x8xbf16>
    %c0_4 = arith.constant 0 : index
    %c1 = arith.constant 1 : index
    %c0_5 = arith.constant 0 : index
    %c0_6 = arith.constant 0 : index
    %c0_7 = arith.constant 0 : index
    %2 = vector.load %arg1[%c0_4, %c1, %c0_5, %c0_6, %c0_7] : memref<1x3x4x8x8xbf16, #tpu.memory_space<vmem>>, vector<1x1x4x8x8xbf16>
    %3 = vector.shape_cast %2 : vector<1x1x4x8x8xbf16> to vector<4x8x8xbf16>
    %c0_8 = arith.constant 0 : index
    %c2 = arith.constant 2 : index
    %c0_9 = arith.constant 0 : index
    %c0_10 = arith.constant 0 : index
    %c0_11 = arith.constant 0 : index
    %4 = vector.load %arg1[%c0_8, %c2, %c0_9, %c0_10, %c0_11] : memref<1x3x4x8x8xbf16, #tpu.memory_space<vmem>>, vector<1x1x4x8x8xbf16>
    %5 = vector.shape_cast %4 : vector<1x1x4x8x8xbf16> to vector<4x8x8xbf16>
    %c0_12 = arith.constant 0 : index
    %c0_13 = arith.constant 0 : index
    %c0_14 = arith.constant 0 : index
    %6 = vector.load %arg2[%c0_12, %c0_13, %c0_14] : memref<1x1x8xf32, #tpu.memory_space<vmem>>, vector<1x1x8xf32>
    %7 = vector.shape_cast %6 : vector<1x1x8xf32> to vector<1x8xf32>
    %cst = arith.constant dense<0.000000e+00> : vector<4x8x8xf32>
    %8 = tpu.matmul %1, %3, %cst {dimension_numbers = #tpu.dot_dimension_numbers<[2], [2], [1], [1], [0, 0, 0, 1, 1, 1], [0], [0]>} : vector<4x8x8xbf16>, vector<4x8x8xbf16>, vector<4x8x8xf32> -> vector<4x8x8xf32>
    %cst_15 = arith.constant 0.353553385 : f32
    %9 = vector.broadcast %cst_15 : f32 to vector<4x8x8xf32>
    %10 = arith.mulf %8, %9 : vector<4x8x8xf32>
    %11 = vector.shape_cast %7 : vector<1x8xf32> to vector<1x1x8xf32>
    %12 = vector.broadcast %11 : vector<1x1x8xf32> to vector<4x8x8xf32>
    %13 = arith.addf %10, %12 : vector<4x8x8xf32>
    %cst_16 = arith.constant dense<0xFF800000> : vector<4x8xf32>
    %14 = vector.multi_reduction <maximumf>, %13, %cst_16 [2] : vector<4x8x8xf32> to vector<4x8xf32>
    %15 = vector.shape_cast %14 : vector<4x8xf32> to vector<4x8x1xf32>
    %16 = vector.broadcast %15 : vector<4x8x1xf32> to vector<4x8x8xf32>
    %17 = arith.subf %13, %16 : vector<4x8x8xf32>
    %18 = math.exp %17 : vector<4x8x8xf32>
    %cst_17 = arith.constant dense<0.000000e+00> : vector<4x8xf32>
    %19 = vector.multi_reduction <add>, %18, %cst_17 [2] : vector<4x8x8xf32> to vector<4x8xf32>
    %20 = vector.shape_cast %19 : vector<4x8xf32> to vector<4x8x1xf32>
    %21 = tpu.reciprocal %20 {approx = true} : vector<4x8x1xf32> -> vector<4x8x1xf32>
    %22 = vector.broadcast %21 : vector<4x8x1xf32> to vector<4x8x8xf32>
    %23 = arith.mulf %18, %22 : vector<4x8x8xf32>
    %24 = arith.truncf %23 : vector<4x8x8xf32> to vector<4x8x8xbf16>
    %cst_18 = arith.constant dense<0.000000e+00> : vector<4x8x8xf32>
    %25 = tpu.matmul %24, %5, %cst_18 {dimension_numbers = #tpu.dot_dimension_numbers<[2], [1], [1], [2], [0, 0, 0, 1, 1, 2], [0], [0]>} : vector<4x8x8xbf16>, vector<4x8x8xbf16>, vector<4x8x8xf32> -> vector<4x8x8xf32>
    %26 = vector.extract_strided_slice %25 {offsets = [0, 0, 0], sizes = [1, 8, 8], strides = [1, 1, 1]} : vector<4x8x8xf32> to vector<1x8x8xf32>
    %27 = vector.shape_cast %26 : vector<1x8x8xf32> to vector<8x8xf32>
    %28 = vector.extract_strided_slice %25 {offsets = [1, 0, 0], sizes = [1, 8, 8], strides = [1, 1, 1]} : vector<4x8x8xf32> to vector<1x8x8xf32>
    %29 = vector.shape_cast %28 : vector<1x8x8xf32> to vector<8x8xf32>
    %30 = vector.extract_strided_slice %25 {offsets = [2, 0, 0], sizes = [1, 8, 8], strides = [1, 1, 1]} : vector<4x8x8xf32> to vector<1x8x8xf32>
    %31 = vector.shape_cast %30 : vector<1x8x8xf32> to vector<8x8xf32>
    %32 = vector.extract_strided_slice %25 {offsets = [3, 0, 0], sizes = [1, 8, 8], strides = [1, 1, 1]} : vector<4x8x8xf32> to vector<1x8x8xf32>
    %33 = vector.shape_cast %32 : vector<1x8x8xf32> to vector<8x8xf32>
    %34 = tpu.concatenate %27, %29, %31, %33 in 1 : vector<8x8xf32>, vector<8x8xf32>, vector<8x8xf32>, vector<8x8xf32> -> vector<8x32xf32>
    %35 = arith.truncf %34 : vector<8x32xf32> to vector<8x32xbf16>
    %c0_19 = arith.constant 0 : index
    %c0_20 = arith.constant 0 : index
    %c0_21 = arith.constant 0 : index
    %36 = vector.load %arg3[%c0_19, %c0_20, %c0_21] : memref<1x8x32xbf16, #tpu.memory_space<vmem>>, vector<1x8x32xbf16>
    %37 = vector.shape_cast %36 : vector<1x8x32xbf16> to vector<8x32xbf16>
    %38 = vector.shape_cast %35 : vector<8x32xbf16> to vector<1x8x32xbf16>
    tpu.vector_store %arg3[%c0_19, %c0_20, %c0_21], %38 {strides = array<i32>} : memref<1x8x32xbf16, #tpu.memory_space<vmem>>, vector<1x8x32xbf16>,
    return
  }
  func.func @transform_0(%arg0: i32) -> (i32, i32, i32, i32, i32) {
    %c0_i32 = arith.constant 0 : i32
    %c0_i32_0 = arith.constant 0 : i32
    %c0_i32_1 = arith.constant 0 : i32
    %c0_i32_2 = arith.constant 0 : i32
    %c0_i32_3 = arith.constant 0 : i32
    return %arg0, %c0_i32, %c0_i32_0, %c0_i32_1, %c0_i32_2 : i32, i32, i32, i32, i32
  }
  func.func @transform_1(%arg0: i32) -> (i32, i32, i32) {
    %c0_i32 = arith.constant 0 : i32
    %c0_i32_0 = arith.constant 0 : i32
    %c0_i32_1 = arith.constant 0 : i32
    return %arg0, %c0_i32, %c0_i32_0 : i32, i32, i32
  }
  func.func @transform_2(%arg0: i32) -> (i32, i32, i32) {
    %c0_i32 = arith.constant 0 : i32
    %c0_i32_0 = arith.constant 0 : i32
    %c0_i32_1 = arith.constant 0 : i32
    return %arg0, %c0_i32, %c0_i32_0 : i32, i32, i32
  }
}

module attributes {stable_mosaic.version = 11 : i64} {
  func.func @_linear_kernel(%arg0: i32, %arg1: i32, %arg2: i32, %arg3: memref<32x32xf32, #tpu.memory_space<vmem>>, %arg4: memref<32x64xbf16, #tpu.memory_space<vmem>>, %arg5: memref<1x64xf32, #tpu.memory_space<vmem>>, %arg6: memref<32x64xbf16, #tpu.memory_space<vmem>>, %arg7: memref<32x64xf32, #tpu.memory_space<vmem>>) attributes {dimension_semantics = [#tpu.dimension_semantics<parallel>, #tpu.dimension_semantics<parallel>, #tpu.dimension_semantics<arbitrary>], iteration_bounds = array<i64: 1, 1, 1>, scalar_prefetch = 0 : i64, scratch_operands = 1 : i64, tpu.core_type = #tpu.core_type<tc>, window_params = [{transform_indices = @transform_0, window_bounds = array<i64: 32, 32>}, {transform_indices = @transform_1, window_bounds = array<i64: 32, 64>}, {transform_indices = @transform_2, window_bounds = array<i64: 1, 64>}, {transform_indices = @transform_3, window_bounds = array<i64: 32, 64>}]} {
    %c0_i32 = arith.constant 0 : i32
    %0 = arith.cmpi eq, %arg2, %c0_i32 : i32
    %1 = arith.extui %0 : i1 to i32
    %c0_i32_0 = arith.constant 0 : i32
    %2 = arith.cmpi ne, %1, %c0_i32_0 : i32
    scf.if %2 {
      %cst_10 = arith.constant 0.000000e+00 : f32
      %13 = vector.broadcast %cst_10 : f32 to vector<32x64xf32>
      %c0_11 = arith.constant 0 : index
      %c0_12 = arith.constant 0 : index
      %14 = vector.load %arg7[%c0_11, %c0_12] : memref<32x64xf32, #tpu.memory_space<vmem>>, vector<32x64xf32>
      tpu.vector_store %arg7[%c0_11, %c0_12], %13 {strides = array<i32>} : memref<32x64xf32, #tpu.memory_space<vmem>>, vector<32x64xf32>,
    } else {
    }
    %c0 = arith.constant 0 : index
    %c0_1 = arith.constant 0 : index
    %3 = vector.load %arg7[%c0, %c0_1] : memref<32x64xf32, #tpu.memory_space<vmem>>, vector<32x64xf32>
    %c0_2 = arith.constant 0 : index
    %c0_3 = arith.constant 0 : index
    %4 = vector.load %arg3[%c0_2, %c0_3] : memref<32x32xf32, #tpu.memory_space<vmem>>, vector<32x32xf32>
    %5 = arith.truncf %4 : vector<32x32xf32> to vector<32x32xbf16>
    %c0_4 = arith.constant 0 : index
    %c0_5 = arith.constant 0 : index
    %6 = vector.load %arg4[%c0_4, %c0_5] : memref<32x64xbf16, #tpu.memory_space<vmem>>, vector<32x64xbf16>
    %cst = arith.constant dense<0.000000e+00> : vector<32x64xf32>
    %7 = tpu.matmul %5, %6, %cst {dimension_numbers = #tpu.dot_dimension_numbers<[1], [0], [0], [1], [0, 0, 1, 1], [], []>} : vector<32x32xbf16>, vector<32x64xbf16>, vector<32x64xf32> -> vector<32x64xf32>
    %8 = arith.addf %3, %7 : vector<32x64xf32>
    %c0_6 = arith.constant 0 : index
    %c0_7 = arith.constant 0 : index
    %9 = vector.load %arg7[%c0_6, %c0_7] : memref<32x64xf32, #tpu.memory_space<vmem>>, vector<32x64xf32>
    tpu.vector_store %arg7[%c0_6, %c0_7], %8 {strides = array<i32>} : memref<32x64xf32, #tpu.memory_space<vmem>>, vector<32x64xf32>,
    %c0_i32_8 = arith.constant 0 : i32
    %10 = arith.cmpi eq, %arg2, %c0_i32_8 : i32
    %11 = arith.extui %10 : i1 to i32
    %c0_i32_9 = arith.constant 0 : i32
    %12 = arith.cmpi ne, %11, %c0_i32_9 : i32
    scf.if %12 {
      %c0_10 = arith.constant 0 : index
      %c0_11 = arith.constant 0 : index
      %13 = vector.load %arg7[%c0_10, %c0_11] : memref<32x64xf32, #tpu.memory_space<vmem>>, vector<32x64xf32>
      %c0_12 = arith.constant 0 : index
      %c0_13 = arith.constant 0 : index
      %14 = vector.load %arg5[%c0_12, %c0_13] : memref<1x64xf32, #tpu.memory_space<vmem>>, vector<1x64xf32>
      %15 = vector.broadcast %14 : vector<1x64xf32> to vector<32x64xf32>
      %16 = arith.addf %13, %15 : vector<32x64xf32>
      %cst_14 = arith.constant 0.000000e+00 : f32
      %17 = vector.broadcast %cst_14 : f32 to vector<32x64xf32>
      %18 = arith.maximumf %16, %17 : vector<32x64xf32>
      %19 = arith.truncf %18 : vector<32x64xf32> to vector<32x64xbf16>
      %c0_15 = arith.constant 0 : index
      %c0_16 = arith.constant 0 : index
      %20 = vector.load %arg6[%c0_15, %c0_16] : memref<32x64xbf16, #tpu.memory_space<vmem>>, vector<32x64xbf16>
      tpu.vector_store %arg6[%c0_15, %c0_16], %19 {strides = array<i32>} : memref<32x64xbf16, #tpu.memory_space<vmem>>, vector<32x64xbf16>,
    } else {
    }
    return
  }
  func.func @transform_0(%arg0: i32, %arg1: i32, %arg2: i32) -> (i32, i32) {
    %c0_i32 = arith.constant 0 : i32
    return %arg0, %arg2 : i32, i32
  }
  func.func @transform_1(%arg0: i32, %arg1: i32, %arg2: i32) -> (i32, i32) {
    %c0_i32 = arith.constant 0 : i32
    return %arg2, %arg1 : i32, i32
  }
  func.func @transform_2(%arg0: i32, %arg1: i32, %arg2: i32) -> (i32, i32) {
    %c0_i32 = arith.constant 0 : i32
    %c0_i32_0 = arith.constant 0 : i32
    return %c0_i32, %arg1 : i32, i32
  }
  func.func @transform_3(%arg0: i32, %arg1: i32, %arg2: i32) -> (i32, i32) {
    %c0_i32 = arith.constant 0 : i32
    return %arg0, %arg1 : i32, i32
  }
}

module attributes {stable_mosaic.version = 11 : i64} {
  func.func @_linear_kernel(%arg0: i32, %arg1: i32, %arg2: i32, %arg3: memref<32x64xbf16, #tpu.memory_space<vmem>>, %arg4: memref<64x32xbf16, #tpu.memory_space<vmem>>, %arg5: memref<1x32xf32, #tpu.memory_space<vmem>>, %arg6: memref<32x32xf32, #tpu.memory_space<vmem>>, %arg7: memref<1x32xf32, #tpu.memory_space<vmem>>, %arg8: memref<1x32xf32, #tpu.memory_space<vmem>>, %arg9: memref<32x32xf32, #tpu.memory_space<vmem>>, %arg10: memref<32x32xf32, #tpu.memory_space<vmem>>) attributes {dimension_semantics = [#tpu.dimension_semantics<parallel>, #tpu.dimension_semantics<parallel>, #tpu.dimension_semantics<arbitrary>], iteration_bounds = array<i64: 1, 1, 1>, scalar_prefetch = 0 : i64, scratch_operands = 1 : i64, tpu.core_type = #tpu.core_type<tc>, window_params = [{transform_indices = @transform_0, window_bounds = array<i64: 32, 64>}, {transform_indices = @transform_1, window_bounds = array<i64: 64, 32>}, {transform_indices = @transform_2, window_bounds = array<i64: 1, 32>}, {transform_indices = @transform_3, window_bounds = array<i64: 32, 32>}, {transform_indices = @transform_4, window_bounds = array<i64: 1, 32>}, {transform_indices = @transform_5, window_bounds = array<i64: 1, 32>}, {transform_indices = @transform_6, window_bounds = array<i64: 32, 32>}]} {
    %c0_i32 = arith.constant 0 : i32
    %0 = arith.cmpi eq, %arg2, %c0_i32 : i32
    %1 = arith.extui %0 : i1 to i32
    %c0_i32_0 = arith.constant 0 : i32
    %2 = arith.cmpi ne, %1, %c0_i32_0 : i32
    scf.if %2 {
      %cst_10 = arith.constant 0.000000e+00 : f32
      %12 = vector.broadcast %cst_10 : f32 to vector<32x32xf32>
      %c0_11 = arith.constant 0 : index
      %c0_12 = arith.constant 0 : index
      %13 = vector.load %arg10[%c0_11, %c0_12] : memref<32x32xf32, #tpu.memory_space<vmem>>, vector<32x32xf32>
      tpu.vector_store %arg10[%c0_11, %c0_12], %12 {strides = array<i32>} : memref<32x32xf32, #tpu.memory_space<vmem>>, vector<32x32xf32>,
    } else {
    }
    %c0 = arith.constant 0 : index
    %c0_1 = arith.constant 0 : index
    %3 = vector.load %arg10[%c0, %c0_1] : memref<32x32xf32, #tpu.memory_space<vmem>>, vector<32x32xf32>
    %c0_2 = arith.constant 0 : index
    %c0_3 = arith.constant 0 : index
    %4 = vector.load %arg3[%c0_2, %c0_3] : memref<32x64xbf16, #tpu.memory_space<vmem>>, vector<32x64xbf16>
    %c0_4 = arith.constant 0 : index
    %c0_5 = arith.constant 0 : index
    %5 = vector.load %arg4[%c0_4, %c0_5] : memref<64x32xbf16, #tpu.memory_space<vmem>>, vector<64x32xbf16>
    %cst = arith.constant dense<0.000000e+00> : vector<32x32xf32>
    %6 = tpu.matmul %4, %5, %cst {dimension_numbers = #tpu.dot_dimension_numbers<[1], [0], [0], [1], [0, 0, 1, 1], [], []>} : vector<32x64xbf16>, vector<64x32xbf16>, vector<32x32xf32> -> vector<32x32xf32>
    %7 = arith.addf %3, %6 : vector<32x32xf32>
    %c0_6 = arith.constant 0 : index
    %c0_7 = arith.constant 0 : index
    %8 = vector.load %arg10[%c0_6, %c0_7] : memref<32x32xf32, #tpu.memory_space<vmem>>, vector<32x32xf32>
    tpu.vector_store %arg10[%c0_6, %c0_7], %7 {strides = array<i32>} : memref<32x32xf32, #tpu.memory_space<vmem>>, vector<32x32xf32>,
    %c0_i32_8 = arith.constant 0 : i32
    %9 = arith.cmpi eq, %arg2, %c0_i32_8 : i32
    %10 = arith.extui %9 : i1 to i32
    %c0_i32_9 = arith.constant 0 : i32
    %11 = arith.cmpi ne, %10, %c0_i32_9 : i32
    scf.if %11 {
      %c0_10 = arith.constant 0 : index
      %c0_11 = arith.constant 0 : index
      %12 = vector.load %arg10[%c0_10, %c0_11] : memref<32x32xf32, #tpu.memory_space<vmem>>, vector<32x32xf32>
      %c0_12 = arith.constant 0 : index
      %c0_13 = arith.constant 0 : index
      %13 = vector.load %arg5[%c0_12, %c0_13] : memref<1x32xf32, #tpu.memory_space<vmem>>, vector<1x32xf32>
      %14 = vector.broadcast %13 : vector<1x32xf32> to vector<32x32xf32>
      %15 = arith.addf %12, %14 : vector<32x32xf32>
      %c0_14 = arith.constant 0 : index
      %c0_15 = arith.constant 0 : index
      %16 = vector.load %arg6[%c0_14, %c0_15] : memref<32x32xf32, #tpu.memory_space<vmem>>, vector<32x32xf32>
      %17 = arith.addf %15, %16 : vector<32x32xf32>
      %cst_16 = arith.constant dense<0.000000e+00> : vector<32xf32>
      %18 = vector.multi_reduction <add>, %17, %cst_16 [1] : vector<32x32xf32> to vector<32xf32>
      %19 = vector.shape_cast %18 : vector<32xf32> to vector<32x1xf32>
      %cst_17 = arith.constant 3.200000e+01 : f32
      %20 = vector.broadcast %cst_17 : f32 to vector<32x1xf32>
      %21 = arith.divf %19, %20 : vector<32x1xf32>
      %22 = vector.broadcast %21 : vector<32x1xf32> to vector<32x32xf32>
      %23 = arith.subf %17, %22 : vector<32x32xf32>
      %24 = arith.mulf %23, %23 : vector<32x32xf32>
      %cst_18 = arith.constant dense<0.000000e+00> : vector<32xf32>
      %25 = vector.multi_reduction <add>, %24, %cst_18 [1] : vector<32x32xf32> to vector<32xf32>
      %26 = vector.shape_cast %25 : vector<32xf32> to vector<32x1xf32>
      %cst_19 = arith.constant 3.200000e+01 : f32
      %27 = vector.broadcast %cst_19 : f32 to vector<32x1xf32>
      %28 = arith.divf %26, %27 : vector<32x1xf32>
      %29 = vector.broadcast %21 : vector<32x1xf32> to vector<32x32xf32>
      %30 = arith.subf %17, %29 : vector<32x32xf32>
      %cst_20 = arith.constant 9.99999974E-6 : f32
      %31 = vector.broadcast %cst_20 : f32 to vector<32x1xf32>
      %32 = arith.addf %28, %31 : vector<32x1xf32>
      %33 = math.rsqrt %32 : vector<32x1xf32>
      %34 = vector.broadcast %33 : vector<32x1xf32> to vector<32x32xf32>
      %35 = arith.mulf %30, %34 : vector<32x32xf32>
      %c0_21 = arith.constant 0 : index
      %c0_22 = arith.constant 0 : index
      %36 = vector.load %arg7[%c0_21, %c0_22] : memref<1x32xf32, #tpu.memory_space<vmem>>, vector<1x32xf32>
      %37 = vector.broadcast %36 : vector<1x32xf32> to vector<32x32xf32>
      %38 = arith.mulf %35, %37 : vector<32x32xf32>
      %c0_23 = arith.constant 0 : index
      %c0_24 = arith.constant 0 : index
      %39 = vector.load %arg8[%c0_23, %c0_24] : memref<1x32xf32, #tpu.memory_space<vmem>>, vector<1x32xf32>
      %40 = vector.broadcast %39 : vector<1x32xf32> to vector<32x32xf32>
      %41 = arith.addf %38, %40 : vector<32x32xf32>
      %c0_25 = arith.constant 0 : index
      %c0_26 = arith.constant 0 : index
      %42 = vector.load %arg9[%c0_25, %c0_26] : memref<32x32xf32, #tpu.memory_space<vmem>>, vector<32x32xf32>
      tpu.vector_store %arg9[%c0_25, %c0_26], %41 {strides = array<i32>} : memref<32x32xf32, #tpu.memory_space<vmem>>, vector<32x32xf32>,
    } else {
    }
    return
  }
  func.func @transform_0(%arg0: i32, %arg1: i32, %arg2: i32) -> (i32, i32) {
    %c0_i32 = arith.constant 0 : i32
    return %arg0, %arg2 : i32, i32
  }
  func.func @transform_1(%arg0: i32, %arg1: i32, %arg2: i32) -> (i32, i32) {
    %c0_i32 = arith.constant 0 : i32
    return %arg2, %arg1 : i32, i32
  }
  func.func @transform_2(%arg0: i32, %arg1: i32, %arg2: i32) -> (i32, i32) {
    %c0_i32 = arith.constant 0 : i32
    %c0_i32_0 = arith.constant 0 : i32
    return %c0_i32, %arg1 : i32, i32
  }
  func.func @transform_3(%arg0: i32, %arg1: i32, %arg2: i32) -> (i32, i32) {
    %c0_i32 = arith.constant 0 : i32
    return %arg0, %arg1 : i32, i32
  }
  func.func @transform_4(%arg0: i32, %arg1: i32, %arg2: i32) -> (i32, i32) {
    %c0_i32 = arith.constant 0 : i32
    %c0_i32_0 = arith.constant 0 : i32
    return %c0_i32, %arg1 : i32, i32
  }
  func.func @transform_5(%arg0: i32, %arg1: i32, %arg2: i32) -> (i32, i32) {
    %c0_i32 = arith.constant 0 : i32
    %c0_i32_0 = arith.constant 0 : i32
    return %c0_i32, %arg1 : i32, i32
  }
  func.func @transform_6(%arg0: i32, %arg1: i32, %arg2: i32) -> (i32, i32) {
    %c0_i32 = arith.constant 0 : i32
    return %arg0, %arg1 : i32, i32
  }
}

module attributes {stable_mosaic.version = 11 : i64} {
  func.func @_linear_kernel(%arg0: i32, %arg1: i32, %arg2: i32, %arg3: memref<32x32xf32, #tpu.memory_space<vmem>>, %arg4: memref<32x32xbf16, #tpu.memory_space<vmem>>, %arg5: memref<1x32xf32, #tpu.memory_space<vmem>>, %arg6: memref<32x32xf32, #tpu.memory_space<vmem>>, %arg7: memref<32x32xf32, #tpu.memory_space<vmem>>) attributes {dimension_semantics = [#tpu.dimension_semantics<parallel>, #tpu.dimension_semantics<parallel>, #tpu.dimension_semantics<arbitrary>], iteration_bounds = array<i64: 1, 1, 1>, scalar_prefetch = 0 : i64, scratch_operands = 1 : i64, tpu.core_type = #tpu.core_type<tc>, window_params = [{transform_indices = @transform_0, window_bounds = array<i64: 32, 32>}, {transform_indices = @transform_1, window_bounds = array<i64: 32, 32>}, {transform_indices = @transform_2, window_bounds = array<i64: 1, 32>}, {transform_indices = @transform_3, window_bounds = array<i64: 32, 32>}]} {
    %c0_i32 = arith.constant 0 : i32
    %0 = arith.cmpi eq, %arg2, %c0_i32 : i32
    %1 = arith.extui %0 : i1 to i32
    %c0_i32_0 = arith.constant 0 : i32
    %2 = arith.cmpi ne, %1, %c0_i32_0 : i32
    scf.if %2 {
      %cst_10 = arith.constant 0.000000e+00 : f32
      %13 = vector.broadcast %cst_10 : f32 to vector<32x32xf32>
      %c0_11 = arith.constant 0 : index
      %c0_12 = arith.constant 0 : index
      %14 = vector.load %arg7[%c0_11, %c0_12] : memref<32x32xf32, #tpu.memory_space<vmem>>, vector<32x32xf32>
      tpu.vector_store %arg7[%c0_11, %c0_12], %13 {strides = array<i32>} : memref<32x32xf32, #tpu.memory_space<vmem>>, vector<32x32xf32>,
    } else {
    }
    %c0 = arith.constant 0 : index
    %c0_1 = arith.constant 0 : index
    %3 = vector.load %arg7[%c0, %c0_1] : memref<32x32xf32, #tpu.memory_space<vmem>>, vector<32x32xf32>
    %c0_2 = arith.constant 0 : index
    %c0_3 = arith.constant 0 : index
    %4 = vector.load %arg3[%c0_2, %c0_3] : memref<32x32xf32, #tpu.memory_space<vmem>>, vector<32x32xf32>
    %5 = arith.truncf %4 : vector<32x32xf32> to vector<32x32xbf16>
    %c0_4 = arith.constant 0 : index
    %c0_5 = arith.constant 0 : index
    %6 = vector.load %arg4[%c0_4, %c0_5] : memref<32x32xbf16, #tpu.memory_space<vmem>>, vector<32x32xbf16>
    %cst = arith.constant dense<0.000000e+00> : vector<32x32xf32>
    %7 = tpu.matmul %5, %6, %cst {dimension_numbers = #tpu.dot_dimension_numbers<[1], [0], [0], [1], [0, 0, 1, 1], [], []>} : vector<32x32xbf16>, vector<32x32xbf16>, vector<32x32xf32> -> vector<32x32xf32>
    %8 = arith.addf %3, %7 : vector<32x32xf32>
    %c0_6 = arith.constant 0 : index
    %c0_7 = arith.constant 0 : index
    %9 = vector.load %arg7[%c0_6, %c0_7] : memref<32x32xf32, #tpu.memory_space<vmem>>, vector<32x32xf32>
    tpu.vector_store %arg7[%c0_6, %c0_7], %8 {strides = array<i32>} : memref<32x32xf32, #tpu.memory_space<vmem>>, vector<32x32xf32>,
    %c0_i32_8 = arith.constant 0 : i32
    %10 = arith.cmpi eq, %arg2, %c0_i32_8 : i32
    %11 = arith.extui %10 : i1 to i32
    %c0_i32_9 = arith.constant 0 : i32
    %12 = arith.cmpi ne, %11, %c0_i32_9 : i32
    scf.if %12 {
      %c0_10 = arith.constant 0 : index
      %c0_11 = arith.constant 0 : index
      %13 = vector.load %arg7[%c0_10, %c0_11] : memref<32x32xf32, #tpu.memory_space<vmem>>, vector<32x32xf32>
      %c0_12 = arith.constant 0 : index
      %c0_13 = arith.constant 0 : index
      %14 = vector.load %arg5[%c0_12, %c0_13] : memref<1x32xf32, #tpu.memory_space<vmem>>, vector<1x32xf32>
      %15 = vector.broadcast %14 : vector<1x32xf32> to vector<32x32xf32>
      %16 = arith.addf %13, %15 : vector<32x32xf32>
      %c0_14 = arith.constant 0 : index
      %c0_15 = arith.constant 0 : index
      %17 = vector.load %arg6[%c0_14, %c0_15] : memref<32x32xf32, #tpu.memory_space<vmem>>, vector<32x32xf32>
      tpu.vector_store %arg6[%c0_14, %c0_15], %16 {strides = array<i32>} : memref<32x32xf32, #tpu.memory_space<vmem>>, vector<32x32xf32>,
    } else {
    }
    return
  }
  func.func @transform_0(%arg0: i32, %arg1: i32, %arg2: i32) -> (i32, i32) {
    %c0_i32 = arith.constant 0 : i32
    return %arg0, %arg2 : i32, i32
  }
  func.func @transform_1(%arg0: i32, %arg1: i32, %arg2: i32) -> (i32, i32) {
    %c0_i32 = arith.constant 0 : i32
    return %arg2, %arg1 : i32, i32
  }
  func.func @transform_2(%arg0: i32, %arg1: i32, %arg2: i32) -> (i32, i32) {
    %c0_i32 = arith.constant 0 : i32
    %c0_i32_0 = arith.constant 0 : i32
    return %c0_i32, %arg1 : i32, i32
  }
  func.func @transform_3(%arg0: i32, %arg1: i32, %arg2: i32) -> (i32, i32) {
    %c0_i32 = arith.constant 0 : i32
    return %arg0, %arg1 : i32, i32
  }
}

module attributes {stable_mosaic.version = 11 : i64} {
  func.func @_linear_kernel(%arg0: i32, %arg1: i32, %arg2: i32, %arg3: memref<32x32xf32, #tpu.memory_space<vmem>>, %arg4: memref<32x64xbf16, #tpu.memory_space<vmem>>, %arg5: memref<1x64xf32, #tpu.memory_space<vmem>>, %arg6: memref<32x64xbf16, #tpu.memory_space<vmem>>, %arg7: memref<32x64xf32, #tpu.memory_space<vmem>>) attributes {dimension_semantics = [#tpu.dimension_semantics<parallel>, #tpu.dimension_semantics<parallel>, #tpu.dimension_semantics<arbitrary>], iteration_bounds = array<i64: 1, 1, 1>, scalar_prefetch = 0 : i64, scratch_operands = 1 : i64, tpu.core_type = #tpu.core_type<tc>, window_params = [{transform_indices = @transform_0, window_bounds = array<i64: 32, 32>}, {transform_indices = @transform_1, window_bounds = array<i64: 32, 64>}, {transform_indices = @transform_2, window_bounds = array<i64: 1, 64>}, {transform_indices = @transform_3, window_bounds = array<i64: 32, 64>}]} {
    %c0_i32 = arith.constant 0 : i32
    %0 = arith.cmpi eq, %arg2, %c0_i32 : i32
    %1 = arith.extui %0 : i1 to i32
    %c0_i32_0 = arith.constant 0 : i32
    %2 = arith.cmpi ne, %1, %c0_i32_0 : i32
    scf.if %2 {
      %cst_10 = arith.constant 0.000000e+00 : f32
      %13 = vector.broadcast %cst_10 : f32 to vector<32x64xf32>
      %c0_11 = arith.constant 0 : index
      %c0_12 = arith.constant 0 : index
      %14 = vector.load %arg7[%c0_11, %c0_12] : memref<32x64xf32, #tpu.memory_space<vmem>>, vector<32x64xf32>
      tpu.vector_store %arg7[%c0_11, %c0_12], %13 {strides = array<i32>} : memref<32x64xf32, #tpu.memory_space<vmem>>, vector<32x64xf32>,
    } else {
    }
    %c0 = arith.constant 0 : index
    %c0_1 = arith.constant 0 : index
    %3 = vector.load %arg7[%c0, %c0_1] : memref<32x64xf32, #tpu.memory_space<vmem>>, vector<32x64xf32>
    %c0_2 = arith.constant 0 : index
    %c0_3 = arith.constant 0 : index
    %4 = vector.load %arg3[%c0_2, %c0_3] : memref<32x32xf32, #tpu.memory_space<vmem>>, vector<32x32xf32>
    %5 = arith.truncf %4 : vector<32x32xf32> to vector<32x32xbf16>
    %c0_4 = arith.constant 0 : index
    %c0_5 = arith.constant 0 : index
    %6 = vector.load %arg4[%c0_4, %c0_5] : memref<32x64xbf16, #tpu.memory_space<vmem>>, vector<32x64xbf16>
    %cst = arith.constant dense<0.000000e+00> : vector<32x64xf32>
    %7 = tpu.matmul %5, %6, %cst {dimension_numbers = #tpu.dot_dimension_numbers<[1], [0], [0], [1], [0, 0, 1, 1], [], []>} : vector<32x32xbf16>, vector<32x64xbf16>, vector<32x64xf32> -> vector<32x64xf32>
    %8 = arith.addf %3, %7 : vector<32x64xf32>
    %c0_6 = arith.constant 0 : index
    %c0_7 = arith.constant 0 : index
    %9 = vector.load %arg7[%c0_6, %c0_7] : memref<32x64xf32, #tpu.memory_space<vmem>>, vector<32x64xf32>
    tpu.vector_store %arg7[%c0_6, %c0_7], %8 {strides = array<i32>} : memref<32x64xf32, #tpu.memory_space<vmem>>, vector<32x64xf32>,
    %c0_i32_8 = arith.constant 0 : i32
    %10 = arith.cmpi eq, %arg2, %c0_i32_8 : i32
    %11 = arith.extui %10 : i1 to i32
    %c0_i32_9 = arith.constant 0 : i32
    %12 = arith.cmpi ne, %11, %c0_i32_9 : i32
    scf.if %12 {
      %c0_10 = arith.constant 0 : index
      %c0_11 = arith.constant 0 : index
      %13 = vector.load %arg7[%c0_10, %c0_11] : memref<32x64xf32, #tpu.memory_space<vmem>>, vector<32x64xf32>
      %c0_12 = arith.constant 0 : index
      %c0_13 = arith.constant 0 : index
      %14 = vector.load %arg5[%c0_12, %c0_13] : memref<1x64xf32, #tpu.memory_space<vmem>>, vector<1x64xf32>
      %15 = vector.broadcast %14 : vector<1x64xf32> to vector<32x64xf32>
      %16 = arith.addf %13, %15 : vector<32x64xf32>
      %17 = arith.truncf %16 : vector<32x64xf32> to vector<32x64xbf16>
      %c0_14 = arith.constant 0 : index
      %c0_15 = arith.constant 0 : index
      %18 = vector.load %arg6[%c0_14, %c0_15] : memref<32x64xbf16, #tpu.memory_space<vmem>>, vector<32x64xbf16>
      tpu.vector_store %arg6[%c0_14, %c0_15], %17 {strides = array<i32>} : memref<32x64xbf16, #tpu.memory_space<vmem>>, vector<32x64xbf16>,
    } else {
    }
    return
  }
  func.func @transform_0(%arg0: i32, %arg1: i32, %arg2: i32) -> (i32, i32) {
    %c0_i32 = arith.constant 0 : i32
    return %arg0, %arg2 : i32, i32
  }
  func.func @transform_1(%arg0: i32, %arg1: i32, %arg2: i32) -> (i32, i32) {
    %c0_i32 = arith.constant 0 : i32
    return %arg2, %arg1 : i32, i32
  }
  func.func @transform_2(%arg0: i32, %arg1: i32, %arg2: i32) -> (i32, i32) {
    %c0_i32 = arith.constant 0 : i32
    %c0_i32_0 = arith.constant 0 : i32
    return %c0_i32, %arg1 : i32, i32
  }
  func.func @transform_3(%arg0: i32, %arg1: i32, %arg2: i32) -> (i32, i32) {
    %c0_i32 = arith.constant 0 : i32
    return %arg0, %arg1 : i32, i32
  }
}

module attributes {stable_mosaic.version = 11 : i64} {
  func.func @_linear_kernel(%arg0: i32, %arg1: i32, %arg2: i32, %arg3: memref<32x32xbf16, #tpu.memory_space<vmem>>, %arg4: memref<32x32xbf16, #tpu.memory_space<vmem>>, %arg5: memref<1x32xf32, #tpu.memory_space<vmem>>, %arg6: memref<32x32xf32, #tpu.memory_space<vmem>>, %arg7: memref<1x32xf32, #tpu.memory_space<vmem>>, %arg8: memref<1x32xf32, #tpu.memory_space<vmem>>, %arg9: memref<32x32xf32, #tpu.memory_space<vmem>>, %arg10: memref<32x32xf32, #tpu.memory_space<vmem>>) attributes {dimension_semantics = [#tpu.dimension_semantics<parallel>, #tpu.dimension_semantics<parallel>, #tpu.dimension_semantics<arbitrary>], iteration_bounds = array<i64: 1, 1, 1>, scalar_prefetch = 0 : i64, scratch_operands = 1 : i64, tpu.core_type = #tpu.core_type<tc>, window_params = [{transform_indices = @transform_0, window_bounds = array<i64: 32, 32>}, {transform_indices = @transform_1, window_bounds = array<i64: 32, 32>}, {transform_indices = @transform_2, window_bounds = array<i64: 1, 32>}, {transform_indices = @transform_3, window_bounds = array<i64: 32, 32>}, {transform_indices = @transform_4, window_bounds = array<i64: 1, 32>}, {transform_indices = @transform_5, window_bounds = array<i64: 1, 32>}, {transform_indices = @transform_6, window_bounds = array<i64: 32, 32>}]} {
    %c0_i32 = arith.constant 0 : i32
    %0 = arith.cmpi eq, %arg2, %c0_i32 : i32
    %1 = arith.extui %0 : i1 to i32
    %c0_i32_0 = arith.constant 0 : i32
    %2 = arith.cmpi ne, %1, %c0_i32_0 : i32
    scf.if %2 {
      %cst_10 = arith.constant 0.000000e+00 : f32
      %12 = vector.broadcast %cst_10 : f32 to vector<32x32xf32>
      %c0_11 = arith.constant 0 : index
      %c0_12 = arith.constant 0 : index
      %13 = vector.load %arg10[%c0_11, %c0_12] : memref<32x32xf32, #tpu.memory_space<vmem>>, vector<32x32xf32>
      tpu.vector_store %arg10[%c0_11, %c0_12], %12 {strides = array<i32>} : memref<32x32xf32, #tpu.memory_space<vmem>>, vector<32x32xf32>,
    } else {
    }
    %c0 = arith.constant 0 : index
    %c0_1 = arith.constant 0 : index
    %3 = vector.load %arg10[%c0, %c0_1] : memref<32x32xf32, #tpu.memory_space<vmem>>, vector<32x32xf32>
    %c0_2 = arith.constant 0 : index
    %c0_3 = arith.constant 0 : index
    %4 = vector.load %arg3[%c0_2, %c0_3] : memref<32x32xbf16, #tpu.memory_space<vmem>>, vector<32x32xbf16>
    %c0_4 = arith.constant 0 : index
    %c0_5 = arith.constant 0 : index
    %5 = vector.load %arg4[%c0_4, %c0_5] : memref<32x32xbf16, #tpu.memory_space<vmem>>, vector<32x32xbf16>
    %cst = arith.constant dense<0.000000e+00> : vector<32x32xf32>
    %6 = tpu.matmul %4, %5, %cst {dimension_numbers = #tpu.dot_dimension_numbers<[1], [0], [0], [1], [0, 0, 1, 1], [], []>} : vector<32x32xbf16>, vector<32x32xbf16>, vector<32x32xf32> -> vector<32x32xf32>
    %7 = arith.addf %3, %6 : vector<32x32xf32>
    %c0_6 = arith.constant 0 : index
    %c0_7 = arith.constant 0 : index
    %8 = vector.load %arg10[%c0_6, %c0_7] : memref<32x32xf32, #tpu.memory_space<vmem>>, vector<32x32xf32>
    tpu.vector_store %arg10[%c0_6, %c0_7], %7 {strides = array<i32>} : memref<32x32xf32, #tpu.memory_space<vmem>>, vector<32x32xf32>,
    %c0_i32_8 = arith.constant 0 : i32
    %9 = arith.cmpi eq, %arg2, %c0_i32_8 : i32
    %10 = arith.extui %9 : i1 to i32
    %c0_i32_9 = arith.constant 0 : i32
    %11 = arith.cmpi ne, %10, %c0_i32_9 : i32
    scf.if %11 {
      %c0_10 = arith.constant 0 : index
      %c0_11 = arith.constant 0 : index
      %12 = vector.load %arg10[%c0_10, %c0_11] : memref<32x32xf32, #tpu.memory_space<vmem>>, vector<32x32xf32>
      %c0_12 = arith.constant 0 : index
      %c0_13 = arith.constant 0 : index
      %13 = vector.load %arg5[%c0_12, %c0_13] : memref<1x32xf32, #tpu.memory_space<vmem>>, vector<1x32xf32>
      %14 = vector.broadcast %13 : vector<1x32xf32> to vector<32x32xf32>
      %15 = arith.addf %12, %14 : vector<32x32xf32>
      %c0_14 = arith.constant 0 : index
      %c0_15 = arith.constant 0 : index
      %16 = vector.load %arg6[%c0_14, %c0_15] : memref<32x32xf32, #tpu.memory_space<vmem>>, vector<32x32xf32>
      %17 = arith.addf %15, %16 : vector<32x32xf32>
      %cst_16 = arith.constant dense<0.000000e+00> : vector<32xf32>
      %18 = vector.multi_reduction <add>, %17, %cst_16 [1] : vector<32x32xf32> to vector<32xf32>
      %19 = vector.shape_cast %18 : vector<32xf32> to vector<32x1xf32>
      %cst_17 = arith.constant 3.200000e+01 : f32
      %20 = vector.broadcast %cst_17 : f32 to vector<32x1xf32>
      %21 = arith.divf %19, %20 : vector<32x1xf32>
      %22 = vector.broadcast %21 : vector<32x1xf32> to vector<32x32xf32>
      %23 = arith.subf %17, %22 : vector<32x32xf32>
      %24 = arith.mulf %23, %23 : vector<32x32xf32>
      %cst_18 = arith.constant dense<0.000000e+00> : vector<32xf32>
      %25 = vector.multi_reduction <add>, %24, %cst_18 [1] : vector<32x32xf32> to vector<32xf32>
      %26 = vector.shape_cast %25 : vector<32xf32> to vector<32x1xf32>
      %cst_19 = arith.constant 3.200000e+01 : f32
      %27 = vector.broadcast %cst_19 : f32 to vector<32x1xf32>
      %28 = arith.divf %26, %27 : vector<32x1xf32>
      %29 = vector.broadcast %21 : vector<32x1xf32> to vector<32x32xf32>
      %30 = arith.subf %17, %29 : vector<32x32xf32>
      %cst_20 = arith.constant 9.99999996E-13 : f32
      %31 = vector.broadcast %cst_20 : f32 to vector<32x1xf32>
      %32 = arith.addf %28, %31 : vector<32x1xf32>
      %33 = math.rsqrt %32 : vector<32x1xf32>
      %34 = vector.broadcast %33 : vector<32x1xf32> to vector<32x32xf32>
      %35 = arith.mulf %30, %34 : vector<32x32xf32>
      %c0_21 = arith.constant 0 : index
      %c0_22 = arith.constant 0 : index
      %36 = vector.load %arg7[%c0_21, %c0_22] : memref<1x32xf32, #tpu.memory_space<vmem>>, vector<1x32xf32>
      %37 = vector.broadcast %36 : vector<1x32xf32> to vector<32x32xf32>
      %38 = arith.mulf %35, %37 : vector<32x32xf32>
      %c0_23 = arith.constant 0 : index
      %c0_24 = arith.constant 0 : index
      %39 = vector.load %arg8[%c0_23, %c0_24] : memref<1x32xf32, #tpu.memory_space<vmem>>, vector<1x32xf32>
      %40 = vector.broadcast %39 : vector<1x32xf32> to vector<32x32xf32>
      %41 = arith.addf %38, %40 : vector<32x32xf32>
      %c0_25 = arith.constant 0 : index
      %c0_26 = arith.constant 0 : index
      %42 = vector.load %arg9[%c0_25, %c0_26] : memref<32x32xf32, #tpu.memory_space<vmem>>, vector<32x32xf32>
      tpu.vector_store %arg9[%c0_25, %c0_26], %41 {strides = array<i32>} : memref<32x32xf32, #tpu.memory_space<vmem>>, vector<32x32xf32>,
    } else {
    }
    return
  }
  func.func @transform_0(%arg0: i32, %arg1: i32, %arg2: i32) -> (i32, i32) {
    %c0_i32 = arith.constant 0 : i32
    return %arg0, %arg2 : i32, i32
  }
  func.func @transform_1(%arg0: i32, %arg1: i32, %arg2: i32) -> (i32, i32) {
    %c0_i32 = arith.constant 0 : i32
    return %arg2, %arg1 : i32, i32
  }
  func.func @transform_2(%arg0: i32, %arg1: i32, %arg2: i32) -> (i32, i32) {
    %c0_i32 = arith.constant 0 : i32
    %c0_i32_0 = arith.constant 0 : i32
    return %c0_i32, %arg1 : i32, i32
  }
  func.func @transform_3(%arg0: i32, %arg1: i32, %arg2: i32) -> (i32, i32) {
    %c0_i32 = arith.constant 0 : i32
    return %arg0, %arg1 : i32, i32
  }
  func.func @transform_4(%arg0: i32, %arg1: i32, %arg2: i32) -> (i32, i32) {
    %c0_i32 = arith.constant 0 : i32
    %c0_i32_0 = arith.constant 0 : i32
    return %c0_i32, %arg1 : i32, i32
  }
  func.func @transform_5(%arg0: i32, %arg1: i32, %arg2: i32) -> (i32, i32) {
    %c0_i32 = arith.constant 0 : i32
    %c0_i32_0 = arith.constant 0 : i32
    return %c0_i32, %arg1 : i32, i32
  }
  func.func @transform_6(%arg0: i32, %arg1: i32, %arg2: i32) -> (i32, i32) {
    %c0_i32 = arith.constant 0 : i32
    return %arg0, %arg1 : i32, i32
  }
}

module attributes {stable_mosaic.version = 11 : i64} {
  func.func @_cross_attn_kernel(%arg0: i32, %arg1: memref<1x4x16x8xbf16, #tpu.memory_space<vmem>>, %arg2: memref<1x2x4x8x8xbf16, #tpu.memory_space<vmem>>, %arg3: memref<1x1x8xf32, #tpu.memory_space<vmem>>, %arg4: memref<1x16x32xbf16, #tpu.memory_space<vmem>>) attributes {dimension_semantics = [#tpu.dimension_semantics<parallel>], iteration_bounds = array<i64: 4>, scalar_prefetch = 0 : i64, scratch_operands = 0 : i64, tpu.core_type = #tpu.core_type<tc>, window_params = [{transform_indices = @transform_0, window_bounds = array<i64: 1, 4, 16, 8>}, {transform_indices = @transform_1, window_bounds = array<i64: 1, 2, 4, 8, 8>}, {transform_indices = @transform_2, window_bounds = array<i64: 1, 1, 8>}, {transform_indices = @transform_3, window_bounds = array<i64: 1, 16, 32>}]} {
    %c0 = arith.constant 0 : index
    %c0_0 = arith.constant 0 : index
    %c0_1 = arith.constant 0 : index
    %c0_2 = arith.constant 0 : index
    %0 = vector.load %arg1[%c0, %c0_0, %c0_1, %c0_2] : memref<1x4x16x8xbf16, #tpu.memory_space<vmem>>, vector<1x4x16x8xbf16>
    %1 = vector.shape_cast %0 : vector<1x4x16x8xbf16> to vector<4x16x8xbf16>
    %c0_3 = arith.constant 0 : index
    %c0_4 = arith.constant 0 : index
    %c0_5 = arith.constant 0 : index
    %c0_6 = arith.constant 0 : index
    %c0_7 = arith.constant 0 : index
    %2 = vector.load %arg2[%c0_3, %c0_4, %c0_5, %c0_6, %c0_7] : memref<1x2x4x8x8xbf16, #tpu.memory_space<vmem>>, vector<1x1x4x8x8xbf16>
    %3 = vector.shape_cast %2 : vector<1x1x4x8x8xbf16> to vector<4x8x8xbf16>
    %c0_8 = arith.constant 0 : index
    %c1 = arith.constant 1 : index
    %c0_9 = arith.constant 0 : index
    %c0_10 = arith.constant 0 : index
    %c0_11 = arith.constant 0 : index
    %4 = vector.load %arg2[%c0_8, %c1, %c0_9, %c0_10, %c0_11] : memref<1x2x4x8x8xbf16, #tpu.memory_space<vmem>>, vector<1x1x4x8x8xbf16>
    %5 = vector.shape_cast %4 : vector<1x1x4x8x8xbf16> to vector<4x8x8xbf16>
    %c0_12 = arith.constant 0 : index
    %c0_13 = arith.constant 0 : index
    %c0_14 = arith.constant 0 : index
    %6 = vector.load %arg3[%c0_12, %c0_13, %c0_14] : memref<1x1x8xf32, #tpu.memory_space<vmem>>, vector<1x1x8xf32>
    %7 = vector.shape_cast %6 : vector<1x1x8xf32> to vector<1x8xf32>
    %cst = arith.constant dense<0.000000e+00> : vector<4x16x8xf32>
    %8 = tpu.matmul %1, %3, %cst {dimension_numbers = #tpu.dot_dimension_numbers<[2], [2], [1], [1], [0, 0, 0, 1, 1, 1], [0], [0]>} : vector<4x16x8xbf16>, vector<4x8x8xbf16>, vector<4x16x8xf32> -> vector<4x16x8xf32>
    %cst_15 = arith.constant 0.353553385 : f32
    %9 = vector.broadcast %cst_15 : f32 to vector<4x16x8xf32>
    %10 = arith.mulf %8, %9 : vector<4x16x8xf32>
    %11 = vector.shape_cast %7 : vector<1x8xf32> to vector<1x1x8xf32>
    %12 = vector.broadcast %11 : vector<1x1x8xf32> to vector<4x16x8xf32>
    %13 = arith.addf %10, %12 : vector<4x16x8xf32>
    %cst_16 = arith.constant dense<0xFF800000> : vector<4x16xf32>
    %14 = vector.multi_reduction <maximumf>, %13, %cst_16 [2] : vector<4x16x8xf32> to vector<4x16xf32>
    %15 = vector.shape_cast %14 : vector<4x16xf32> to vector<4x16x1xf32>
    %16 = vector.broadcast %15 : vector<4x16x1xf32> to vector<4x16x8xf32>
    %17 = arith.subf %13, %16 : vector<4x16x8xf32>
    %18 = math.exp %17 : vector<4x16x8xf32>
    %cst_17 = arith.constant dense<0.000000e+00> : vector<4x16xf32>
    %19 = vector.multi_reduction <add>, %18, %cst_17 [2] : vector<4x16x8xf32> to vector<4x16xf32>
    %20 = vector.shape_cast %19 : vector<4x16xf32> to vector<4x16x1xf32>
    %21 = tpu.reciprocal %20 {approx = true} : vector<4x16x1xf32> -> vector<4x16x1xf32>
    %22 = vector.broadcast %21 : vector<4x16x1xf32> to vector<4x16x8xf32>
    %23 = arith.mulf %18, %22 : vector<4x16x8xf32>
    %24 = arith.truncf %23 : vector<4x16x8xf32> to vector<4x16x8xbf16>
    %cst_18 = arith.constant dense<0.000000e+00> : vector<4x16x8xf32>
    %25 = tpu.matmul %24, %5, %cst_18 {dimension_numbers = #tpu.dot_dimension_numbers<[2], [1], [1], [2], [0, 0, 0, 1, 1, 2], [0], [0]>} : vector<4x16x8xbf16>, vector<4x8x8xbf16>, vector<4x16x8xf32> -> vector<4x16x8xf32>
    %26 = vector.extract_strided_slice %25 {offsets = [0, 0, 0], sizes = [1, 16, 8], strides = [1, 1, 1]} : vector<4x16x8xf32> to vector<1x16x8xf32>
    %27 = vector.shape_cast %26 : vector<1x16x8xf32> to vector<16x8xf32>
    %28 = vector.extract_strided_slice %25 {offsets = [1, 0, 0], sizes = [1, 16, 8], strides = [1, 1, 1]} : vector<4x16x8xf32> to vector<1x16x8xf32>
    %29 = vector.shape_cast %28 : vector<1x16x8xf32> to vector<16x8xf32>
    %30 = vector.extract_strided_slice %25 {offsets = [2, 0, 0], sizes = [1, 16, 8], strides = [1, 1, 1]} : vector<4x16x8xf32> to vector<1x16x8xf32>
    %31 = vector.shape_cast %30 : vector<1x16x8xf32> to vector<16x8xf32>
    %32 = vector.extract_strided_slice %25 {offsets = [3, 0, 0], sizes = [1, 16, 8], strides = [1, 1, 1]} : vector<4x16x8xf32> to vector<1x16x8xf32>
    %33 = vector.shape_cast %32 : vector<1x16x8xf32> to vector<16x8xf32>
    %34 = tpu.concatenate %27, %29, %31, %33 in 1 : vector<16x8xf32>, vector<16x8xf32>, vector<16x8xf32>, vector<16x8xf32> -> vector<16x32xf32>
    %35 = arith.truncf %34 : vector<16x32xf32> to vector<16x32xbf16>
    %c0_19 = arith.constant 0 : index
    %c0_20 = arith.constant 0 : index
    %c0_21 = arith.constant 0 : index
    %36 = vector.load %arg4[%c0_19, %c0_20, %c0_21] : memref<1x16x32xbf16, #tpu.memory_space<vmem>>, vector<1x16x32xbf16>
    %37 = vector.shape_cast %36 : vector<1x16x32xbf16> to vector<16x32xbf16>
    %38 = vector.shape_cast %35 : vector<16x32xbf16> to vector<1x16x32xbf16>
    tpu.vector_store %arg4[%c0_19, %c0_20, %c0_21], %38 {strides = array<i32>} : memref<1x16x32xbf16, #tpu.memory_space<vmem>>, vector<1x16x32xbf16>,
    return
  }
  func.func @transform_0(%arg0: i32) -> (i32, i32, i32, i32) {
    %c0_i32 = arith.constant 0 : i32
    %c0_i32_0 = arith.constant 0 : i32
    %c0_i32_1 = arith.constant 0 : i32
    %c0_i32_2 = arith.constant 0 : i32
    return %arg0, %c0_i32, %c0_i32_0, %c0_i32_1 : i32, i32, i32, i32
  }
  func.func @transform_1(%arg0: i32) -> (i32, i32, i32, i32, i32) {
    %c0_i32 = arith.constant 0 : i32
    %c0_i32_0 = arith.constant 0 : i32
    %c0_i32_1 = arith.constant 0 : i32
    %c0_i32_2 = arith.constant 0 : i32
    %c0_i32_3 = arith.constant 0 : i32
    return %arg0, %c0_i32, %c0_i32_0, %c0_i32_1, %c0_i32_2 : i32, i32, i32, i32, i32
  }
  func.func @transform_2(%arg0: i32) -> (i32, i32, i32) {
    %c0_i32 = arith.constant 0 : i32
    %c0_i32_0 = arith.constant 0 : i32
    %c0_i32_1 = arith.constant 0 : i32
    return %arg0, %c0_i32, %c0_i32_0 : i32, i32, i32
  }
  func.func @transform_3(%arg0: i32) -> (i32, i32, i32) {
    %c0_i32 = arith.constant 0 : i32
    %c0_i32_0 = arith.constant 0 : i32
    %c0_i32_1 = arith.constant 0 : i32
    return %arg0, %c0_i32, %c0_i32_0 : i32, i32, i32
  }
}

module attributes {stable_mosaic.version = 11 : i64} {
  func.func @_linear_kernel(%arg0: i32, %arg1: i32, %arg2: i32, %arg3: memref<32x32xf32, #tpu.memory_space<vmem>>, %arg4: memref<32x32xbf16, #tpu.memory_space<vmem>>, %arg5: memref<1x32xf32, #tpu.memory_space<vmem>>, %arg6: memref<32x32xbf16, #tpu.memory_space<vmem>>, %arg7: memref<32x32xf32, #tpu.memory_space<vmem>>) attributes {dimension_semantics = [#tpu.dimension_semantics<parallel>, #tpu.dimension_semantics<parallel>, #tpu.dimension_semantics<arbitrary>], iteration_bounds = array<i64: 1, 1, 1>, scalar_prefetch = 0 : i64, scratch_operands = 1 : i64, tpu.core_type = #tpu.core_type<tc>, window_params = [{transform_indices = @transform_0, window_bounds = array<i64: 32, 32>}, {transform_indices = @transform_1, window_bounds = array<i64: 32, 32>}, {transform_indices = @transform_2, window_bounds = array<i64: 1, 32>}, {transform_indices = @transform_3, window_bounds = array<i64: 32, 32>}]} {
    %c0_i32 = arith.constant 0 : i32
    %0 = arith.cmpi eq, %arg2, %c0_i32 : i32
    %1 = arith.extui %0 : i1 to i32
    %c0_i32_0 = arith.constant 0 : i32
    %2 = arith.cmpi ne, %1, %c0_i32_0 : i32
    scf.if %2 {
      %cst_10 = arith.constant 0.000000e+00 : f32
      %13 = vector.broadcast %cst_10 : f32 to vector<32x32xf32>
      %c0_11 = arith.constant 0 : index
      %c0_12 = arith.constant 0 : index
      %14 = vector.load %arg7[%c0_11, %c0_12] : memref<32x32xf32, #tpu.memory_space<vmem>>, vector<32x32xf32>
      tpu.vector_store %arg7[%c0_11, %c0_12], %13 {strides = array<i32>} : memref<32x32xf32, #tpu.memory_space<vmem>>, vector<32x32xf32>,
    } else {
    }
    %c0 = arith.constant 0 : index
    %c0_1 = arith.constant 0 : index
    %3 = vector.load %arg7[%c0, %c0_1] : memref<32x32xf32, #tpu.memory_space<vmem>>, vector<32x32xf32>
    %c0_2 = arith.constant 0 : index
    %c0_3 = arith.constant 0 : index
    %4 = vector.load %arg3[%c0_2, %c0_3] : memref<32x32xf32, #tpu.memory_space<vmem>>, vector<32x32xf32>
    %5 = arith.truncf %4 : vector<32x32xf32> to vector<32x32xbf16>
    %c0_4 = arith.constant 0 : index
    %c0_5 = arith.constant 0 : index
    %6 = vector.load %arg4[%c0_4, %c0_5] : memref<32x32xbf16, #tpu.memory_space<vmem>>, vector<32x32xbf16>
    %cst = arith.constant dense<0.000000e+00> : vector<32x32xf32>
    %7 = tpu.matmul %5, %6, %cst {dimension_numbers = #tpu.dot_dimension_numbers<[1], [0], [0], [1], [0, 0, 1, 1], [], []>} : vector<32x32xbf16>, vector<32x32xbf16>, vector<32x32xf32> -> vector<32x32xf32>
    %8 = arith.addf %3, %7 : vector<32x32xf32>
    %c0_6 = arith.constant 0 : index
    %c0_7 = arith.constant 0 : index
    %9 = vector.load %arg7[%c0_6, %c0_7] : memref<32x32xf32, #tpu.memory_space<vmem>>, vector<32x32xf32>
    tpu.vector_store %arg7[%c0_6, %c0_7], %8 {strides = array<i32>} : memref<32x32xf32, #tpu.memory_space<vmem>>, vector<32x32xf32>,
    %c0_i32_8 = arith.constant 0 : i32
    %10 = arith.cmpi eq, %arg2, %c0_i32_8 : i32
    %11 = arith.extui %10 : i1 to i32
    %c0_i32_9 = arith.constant 0 : i32
    %12 = arith.cmpi ne, %11, %c0_i32_9 : i32
    scf.if %12 {
      %c0_10 = arith.constant 0 : index
      %c0_11 = arith.constant 0 : index
      %13 = vector.load %arg7[%c0_10, %c0_11] : memref<32x32xf32, #tpu.memory_space<vmem>>, vector<32x32xf32>
      %c0_12 = arith.constant 0 : index
      %c0_13 = arith.constant 0 : index
      %14 = vector.load %arg5[%c0_12, %c0_13] : memref<1x32xf32, #tpu.memory_space<vmem>>, vector<1x32xf32>
      %15 = vector.broadcast %14 : vector<1x32xf32> to vector<32x32xf32>
      %16 = arith.addf %13, %15 : vector<32x32xf32>
      %17 = arith.truncf %16 : vector<32x32xf32> to vector<32x32xbf16>
      %c0_14 = arith.constant 0 : index
      %c0_15 = arith.constant 0 : index
      %18 = vector.load %arg6[%c0_14, %c0_15] : memref<32x32xbf16, #tpu.memory_space<vmem>>, vector<32x32xbf16>
      tpu.vector_store %arg6[%c0_14, %c0_15], %17 {strides = array<i32>} : memref<32x32xbf16, #tpu.memory_space<vmem>>, vector<32x32xbf16>,
    } else {
    }
    return
  }
  func.func @transform_0(%arg0: i32, %arg1: i32, %arg2: i32) -> (i32, i32) {
    %c0_i32 = arith.constant 0 : i32
    return %arg0, %arg2 : i32, i32
  }
  func.func @transform_1(%arg0: i32, %arg1: i32, %arg2: i32) -> (i32, i32) {
    %c0_i32 = arith.constant 0 : i32
    return %arg2, %arg1 : i32, i32
  }
  func.func @transform_2(%arg0: i32, %arg1: i32, %arg2: i32) -> (i32, i32) {
    %c0_i32 = arith.constant 0 : i32
    %c0_i32_0 = arith.constant 0 : i32
    return %c0_i32, %arg1 : i32, i32
  }
  func.func @transform_3(%arg0: i32, %arg1: i32, %arg2: i32) -> (i32, i32) {
    %c0_i32 = arith.constant 0 : i32
    return %arg0, %arg1 : i32, i32
  }
}

module attributes {stable_mosaic.version = 11 : i64} {
  func.func @_linear_kernel(%arg0: i32, %arg1: i32, %arg2: i32, %arg3: memref<64x32xf32, #tpu.memory_space<vmem>>, %arg4: memref<32x64xbf16, #tpu.memory_space<vmem>>, %arg5: memref<1x64xf32, #tpu.memory_space<vmem>>, %arg6: memref<64x64xbf16, #tpu.memory_space<vmem>>, %arg7: memref<64x64xf32, #tpu.memory_space<vmem>>) attributes {dimension_semantics = [#tpu.dimension_semantics<parallel>, #tpu.dimension_semantics<parallel>, #tpu.dimension_semantics<arbitrary>], iteration_bounds = array<i64: 1, 1, 1>, scalar_prefetch = 0 : i64, scratch_operands = 1 : i64, tpu.core_type = #tpu.core_type<tc>, window_params = [{transform_indices = @transform_0, window_bounds = array<i64: 64, 32>}, {transform_indices = @transform_1, window_bounds = array<i64: 32, 64>}, {transform_indices = @transform_2, window_bounds = array<i64: 1, 64>}, {transform_indices = @transform_3, window_bounds = array<i64: 64, 64>}]} {
    %c0_i32 = arith.constant 0 : i32
    %0 = arith.cmpi eq, %arg2, %c0_i32 : i32
    %1 = arith.extui %0 : i1 to i32
    %c0_i32_0 = arith.constant 0 : i32
    %2 = arith.cmpi ne, %1, %c0_i32_0 : i32
    scf.if %2 {
      %cst_10 = arith.constant 0.000000e+00 : f32
      %13 = vector.broadcast %cst_10 : f32 to vector<64x64xf32>
      %c0_11 = arith.constant 0 : index
      %c0_12 = arith.constant 0 : index
      %14 = vector.load %arg7[%c0_11, %c0_12] : memref<64x64xf32, #tpu.memory_space<vmem>>, vector<64x64xf32>
      tpu.vector_store %arg7[%c0_11, %c0_12], %13 {strides = array<i32>} : memref<64x64xf32, #tpu.memory_space<vmem>>, vector<64x64xf32>,
    } else {
    }
    %c0 = arith.constant 0 : index
    %c0_1 = arith.constant 0 : index
    %3 = vector.load %arg7[%c0, %c0_1] : memref<64x64xf32, #tpu.memory_space<vmem>>, vector<64x64xf32>
    %c0_2 = arith.constant 0 : index
    %c0_3 = arith.constant 0 : index
    %4 = vector.load %arg3[%c0_2, %c0_3] : memref<64x32xf32, #tpu.memory_space<vmem>>, vector<64x32xf32>
    %5 = arith.truncf %4 : vector<64x32xf32> to vector<64x32xbf16>
    %c0_4 = arith.constant 0 : index
    %c0_5 = arith.constant 0 : index
    %6 = vector.load %arg4[%c0_4, %c0_5] : memref<32x64xbf16, #tpu.memory_space<vmem>>, vector<32x64xbf16>
    %cst = arith.constant dense<0.000000e+00> : vector<64x64xf32>
    %7 = tpu.matmul %5, %6, %cst {dimension_numbers = #tpu.dot_dimension_numbers<[1], [0], [0], [1], [0, 0, 1, 1], [], []>} : vector<64x32xbf16>, vector<32x64xbf16>, vector<64x64xf32> -> vector<64x64xf32>
    %8 = arith.addf %3, %7 : vector<64x64xf32>
    %c0_6 = arith.constant 0 : index
    %c0_7 = arith.constant 0 : index
    %9 = vector.load %arg7[%c0_6, %c0_7] : memref<64x64xf32, #tpu.memory_space<vmem>>, vector<64x64xf32>
    tpu.vector_store %arg7[%c0_6, %c0_7], %8 {strides = array<i32>} : memref<64x64xf32, #tpu.memory_space<vmem>>, vector<64x64xf32>,
    %c0_i32_8 = arith.constant 0 : i32
    %10 = arith.cmpi eq, %arg2, %c0_i32_8 : i32
    %11 = arith.extui %10 : i1 to i32
    %c0_i32_9 = arith.constant 0 : i32
    %12 = arith.cmpi ne, %11, %c0_i32_9 : i32
    scf.if %12 {
      %c0_10 = arith.constant 0 : index
      %c0_11 = arith.constant 0 : index
      %13 = vector.load %arg7[%c0_10, %c0_11] : memref<64x64xf32, #tpu.memory_space<vmem>>, vector<64x64xf32>
      %c0_12 = arith.constant 0 : index
      %c0_13 = arith.constant 0 : index
      %14 = vector.load %arg5[%c0_12, %c0_13] : memref<1x64xf32, #tpu.memory_space<vmem>>, vector<1x64xf32>
      %15 = vector.broadcast %14 : vector<1x64xf32> to vector<64x64xf32>
      %16 = arith.addf %13, %15 : vector<64x64xf32>
      %17 = arith.truncf %16 : vector<64x64xf32> to vector<64x64xbf16>
      %c0_14 = arith.constant 0 : index
      %c0_15 = arith.constant 0 : index
      %18 = vector.load %arg6[%c0_14, %c0_15] : memref<64x64xbf16, #tpu.memory_space<vmem>>, vector<64x64xbf16>
      tpu.vector_store %arg6[%c0_14, %c0_15], %17 {strides = array<i32>} : memref<64x64xbf16, #tpu.memory_space<vmem>>, vector<64x64xbf16>,
    } else {
    }
    return
  }
  func.func @transform_0(%arg0: i32, %arg1: i32, %arg2: i32) -> (i32, i32) {
    %c0_i32 = arith.constant 0 : i32
    return %arg0, %arg2 : i32, i32
  }
  func.func @transform_1(%arg0: i32, %arg1: i32, %arg2: i32) -> (i32, i32) {
    %c0_i32 = arith.constant 0 : i32
    return %arg2, %arg1 : i32, i32
  }
  func.func @transform_2(%arg0: i32, %arg1: i32, %arg2: i32) -> (i32, i32) {
    %c0_i32 = arith.constant 0 : i32
    %c0_i32_0 = arith.constant 0 : i32
    return %c0_i32, %arg1 : i32, i32
  }
  func.func @transform_3(%arg0: i32, %arg1: i32, %arg2: i32) -> (i32, i32) {
    %c0_i32 = arith.constant 0 : i32
    return %arg0, %arg1 : i32, i32
  }
}

module attributes {stable_mosaic.version = 11 : i64} {
  func.func @_cross_attn_kernel(%arg0: i32, %arg1: memref<1x4x8x8xbf16, #tpu.memory_space<vmem>>, %arg2: memref<1x2x4x16x8xbf16, #tpu.memory_space<vmem>>, %arg3: memref<1x1x16xf32, #tpu.memory_space<vmem>>, %arg4: memref<1x8x32xbf16, #tpu.memory_space<vmem>>) attributes {dimension_semantics = [#tpu.dimension_semantics<parallel>], iteration_bounds = array<i64: 4>, scalar_prefetch = 0 : i64, scratch_operands = 0 : i64, tpu.core_type = #tpu.core_type<tc>, window_params = [{transform_indices = @transform_0, window_bounds = array<i64: 1, 4, 8, 8>}, {transform_indices = @transform_1, window_bounds = array<i64: 1, 2, 4, 16, 8>}, {transform_indices = @transform_2, window_bounds = array<i64: 1, 1, 16>}, {transform_indices = @transform_3, window_bounds = array<i64: 1, 8, 32>}]} {
    %c0 = arith.constant 0 : index
    %c0_0 = arith.constant 0 : index
    %c0_1 = arith.constant 0 : index
    %c0_2 = arith.constant 0 : index
    %0 = vector.load %arg1[%c0, %c0_0, %c0_1, %c0_2] : memref<1x4x8x8xbf16, #tpu.memory_space<vmem>>, vector<1x4x8x8xbf16>
    %1 = vector.shape_cast %0 : vector<1x4x8x8xbf16> to vector<4x8x8xbf16>
    %c0_3 = arith.constant 0 : index
    %c0_4 = arith.constant 0 : index
    %c0_5 = arith.constant 0 : index
    %c0_6 = arith.constant 0 : index
    %c0_7 = arith.constant 0 : index
    %2 = vector.load %arg2[%c0_3, %c0_4, %c0_5, %c0_6, %c0_7] : memref<1x2x4x16x8xbf16, #tpu.memory_space<vmem>>, vector<1x1x4x16x8xbf16>
    %3 = vector.shape_cast %2 : vector<1x1x4x16x8xbf16> to vector<4x16x8xbf16>
    %c0_8 = arith.constant 0 : index
    %c1 = arith.constant 1 : index
    %c0_9 = arith.constant 0 : index
    %c0_10 = arith.constant 0 : index
    %c0_11 = arith.constant 0 : index
    %4 = vector.load %arg2[%c0_8, %c1, %c0_9, %c0_10, %c0_11] : memref<1x2x4x16x8xbf16, #tpu.memory_space<vmem>>, vector<1x1x4x16x8xbf16>
    %5 = vector.shape_cast %4 : vector<1x1x4x16x8xbf16> to vector<4x16x8xbf16>
    %c0_12 = arith.constant 0 : index
    %c0_13 = arith.constant 0 : index
    %c0_14 = arith.constant 0 : index
    %6 = vector.load %arg3[%c0_12, %c0_13, %c0_14] : memref<1x1x16xf32, #tpu.memory_space<vmem>>, vector<1x1x16xf32>
    %7 = vector.shape_cast %6 : vector<1x1x16xf32> to vector<1x16xf32>
    %cst = arith.constant dense<0.000000e+00> : vector<4x8x16xf32>
    %8 = tpu.matmul %1, %3, %cst {dimension_numbers = #tpu.dot_dimension_numbers<[2], [2], [1], [1], [0, 0, 0, 1, 1, 1], [0], [0]>} : vector<4x8x8xbf16>, vector<4x16x8xbf16>, vector<4x8x16xf32> -> vector<4x8x16xf32>
    %cst_15 = arith.constant 0.353553385 : f32
    %9 = vector.broadcast %cst_15 : f32 to vector<4x8x16xf32>
    %10 = arith.mulf %8, %9 : vector<4x8x16xf32>
    %11 = vector.shape_cast %7 : vector<1x16xf32> to vector<1x1x16xf32>
    %12 = vector.broadcast %11 : vector<1x1x16xf32> to vector<4x8x16xf32>
    %13 = arith.addf %10, %12 : vector<4x8x16xf32>
    %cst_16 = arith.constant dense<0xFF800000> : vector<4x8xf32>
    %14 = vector.multi_reduction <maximumf>, %13, %cst_16 [2] : vector<4x8x16xf32> to vector<4x8xf32>
    %15 = vector.shape_cast %14 : vector<4x8xf32> to vector<4x8x1xf32>
    %16 = vector.broadcast %15 : vector<4x8x1xf32> to vector<4x8x16xf32>
    %17 = arith.subf %13, %16 : vector<4x8x16xf32>
    %18 = math.exp %17 : vector<4x8x16xf32>
    %cst_17 = arith.constant dense<0.000000e+00> : vector<4x8xf32>
    %19 = vector.multi_reduction <add>, %18, %cst_17 [2] : vector<4x8x16xf32> to vector<4x8xf32>
    %20 = vector.shape_cast %19 : vector<4x8xf32> to vector<4x8x1xf32>
    %21 = tpu.reciprocal %20 {approx = true} : vector<4x8x1xf32> -> vector<4x8x1xf32>
    %22 = vector.broadcast %21 : vector<4x8x1xf32> to vector<4x8x16xf32>
    %23 = arith.mulf %18, %22 : vector<4x8x16xf32>
    %24 = arith.truncf %23 : vector<4x8x16xf32> to vector<4x8x16xbf16>
    %cst_18 = arith.constant dense<0.000000e+00> : vector<4x8x8xf32>
    %25 = tpu.matmul %24, %5, %cst_18 {dimension_numbers = #tpu.dot_dimension_numbers<[2], [1], [1], [2], [0, 0, 0, 1, 1, 2], [0], [0]>} : vector<4x8x16xbf16>, vector<4x16x8xbf16>, vector<4x8x8xf32> -> vector<4x8x8xf32>
    %26 = vector.extract_strided_slice %25 {offsets = [0, 0, 0], sizes = [1, 8, 8], strides = [1, 1, 1]} : vector<4x8x8xf32> to vector<1x8x8xf32>
    %27 = vector.shape_cast %26 : vector<1x8x8xf32> to vector<8x8xf32>
    %28 = vector.extract_strided_slice %25 {offsets = [1, 0, 0], sizes = [1, 8, 8], strides = [1, 1, 1]} : vector<4x8x8xf32> to vector<1x8x8xf32>
    %29 = vector.shape_cast %28 : vector<1x8x8xf32> to vector<8x8xf32>
    %30 = vector.extract_strided_slice %25 {offsets = [2, 0, 0], sizes = [1, 8, 8], strides = [1, 1, 1]} : vector<4x8x8xf32> to vector<1x8x8xf32>
    %31 = vector.shape_cast %30 : vector<1x8x8xf32> to vector<8x8xf32>
    %32 = vector.extract_strided_slice %25 {offsets = [3, 0, 0], sizes = [1, 8, 8], strides = [1, 1, 1]} : vector<4x8x8xf32> to vector<1x8x8xf32>
    %33 = vector.shape_cast %32 : vector<1x8x8xf32> to vector<8x8xf32>
    %34 = tpu.concatenate %27, %29, %31, %33 in 1 : vector<8x8xf32>, vector<8x8xf32>, vector<8x8xf32>, vector<8x8xf32> -> vector<8x32xf32>
    %35 = arith.truncf %34 : vector<8x32xf32> to vector<8x32xbf16>
    %c0_19 = arith.constant 0 : index
    %c0_20 = arith.constant 0 : index
    %c0_21 = arith.constant 0 : index
    %36 = vector.load %arg4[%c0_19, %c0_20, %c0_21] : memref<1x8x32xbf16, #tpu.memory_space<vmem>>, vector<1x8x32xbf16>
    %37 = vector.shape_cast %36 : vector<1x8x32xbf16> to vector<8x32xbf16>
    %38 = vector.shape_cast %35 : vector<8x32xbf16> to vector<1x8x32xbf16>
    tpu.vector_store %arg4[%c0_19, %c0_20, %c0_21], %38 {strides = array<i32>} : memref<1x8x32xbf16, #tpu.memory_space<vmem>>, vector<1x8x32xbf16>,
    return
  }
  func.func @transform_0(%arg0: i32) -> (i32, i32, i32, i32) {
    %c0_i32 = arith.constant 0 : i32
    %c0_i32_0 = arith.constant 0 : i32
    %c0_i32_1 = arith.constant 0 : i32
    %c0_i32_2 = arith.constant 0 : i32
    return %arg0, %c0_i32, %c0_i32_0, %c0_i32_1 : i32, i32, i32, i32
  }
  func.func @transform_1(%arg0: i32) -> (i32, i32, i32, i32, i32) {
    %c0_i32 = arith.constant 0 : i32
    %c0_i32_0 = arith.constant 0 : i32
    %c0_i32_1 = arith.constant 0 : i32
    %c0_i32_2 = arith.constant 0 : i32
    %c0_i32_3 = arith.constant 0 : i32
    return %arg0, %c0_i32, %c0_i32_0, %c0_i32_1, %c0_i32_2 : i32, i32, i32, i32, i32
  }
  func.func @transform_2(%arg0: i32) -> (i32, i32, i32) {
    %c0_i32 = arith.constant 0 : i32
    %c0_i32_0 = arith.constant 0 : i32
    %c0_i32_1 = arith.constant 0 : i32
    return %arg0, %c0_i32, %c0_i32_0 : i32, i32, i32
  }
  func.func @transform_3(%arg0: i32) -> (i32, i32, i32) {
    %c0_i32 = arith.constant 0 : i32
    %c0_i32_0 = arith.constant 0 : i32
    %c0_i32_1 = arith.constant 0 : i32
    return %arg0, %c0_i32, %c0_i32_0 : i32, i32, i32
  }
}

module attributes {stable_mosaic.version = 11 : i64} {
  func.func @_linear_kernel(%arg0: i32, %arg1: i32, %arg2: i32, %arg3: memref<32x64xbf16, #tpu.memory_space<vmem>>, %arg4: memref<64x32xbf16, #tpu.memory_space<vmem>>, %arg5: memref<1x32xf32, #tpu.memory_space<vmem>>, %arg6: memref<32x32xf32, #tpu.memory_space<vmem>>, %arg7: memref<1x32xf32, #tpu.memory_space<vmem>>, %arg8: memref<1x32xf32, #tpu.memory_space<vmem>>, %arg9: memref<32x32xf32, #tpu.memory_space<vmem>>, %arg10: memref<32x32xf32, #tpu.memory_space<vmem>>) attributes {dimension_semantics = [#tpu.dimension_semantics<parallel>, #tpu.dimension_semantics<parallel>, #tpu.dimension_semantics<arbitrary>], iteration_bounds = array<i64: 1, 1, 1>, scalar_prefetch = 0 : i64, scratch_operands = 1 : i64, tpu.core_type = #tpu.core_type<tc>, window_params = [{transform_indices = @transform_0, window_bounds = array<i64: 32, 64>}, {transform_indices = @transform_1, window_bounds = array<i64: 64, 32>}, {transform_indices = @transform_2, window_bounds = array<i64: 1, 32>}, {transform_indices = @transform_3, window_bounds = array<i64: 32, 32>}, {transform_indices = @transform_4, window_bounds = array<i64: 1, 32>}, {transform_indices = @transform_5, window_bounds = array<i64: 1, 32>}, {transform_indices = @transform_6, window_bounds = array<i64: 32, 32>}]} {
    %c0_i32 = arith.constant 0 : i32
    %0 = arith.cmpi eq, %arg2, %c0_i32 : i32
    %1 = arith.extui %0 : i1 to i32
    %c0_i32_0 = arith.constant 0 : i32
    %2 = arith.cmpi ne, %1, %c0_i32_0 : i32
    scf.if %2 {
      %cst_10 = arith.constant 0.000000e+00 : f32
      %12 = vector.broadcast %cst_10 : f32 to vector<32x32xf32>
      %c0_11 = arith.constant 0 : index
      %c0_12 = arith.constant 0 : index
      %13 = vector.load %arg10[%c0_11, %c0_12] : memref<32x32xf32, #tpu.memory_space<vmem>>, vector<32x32xf32>
      tpu.vector_store %arg10[%c0_11, %c0_12], %12 {strides = array<i32>} : memref<32x32xf32, #tpu.memory_space<vmem>>, vector<32x32xf32>,
    } else {
    }
    %c0 = arith.constant 0 : index
    %c0_1 = arith.constant 0 : index
    %3 = vector.load %arg10[%c0, %c0_1] : memref<32x32xf32, #tpu.memory_space<vmem>>, vector<32x32xf32>
    %c0_2 = arith.constant 0 : index
    %c0_3 = arith.constant 0 : index
    %4 = vector.load %arg3[%c0_2, %c0_3] : memref<32x64xbf16, #tpu.memory_space<vmem>>, vector<32x64xbf16>
    %c0_4 = arith.constant 0 : index
    %c0_5 = arith.constant 0 : index
    %5 = vector.load %arg4[%c0_4, %c0_5] : memref<64x32xbf16, #tpu.memory_space<vmem>>, vector<64x32xbf16>
    %cst = arith.constant dense<0.000000e+00> : vector<32x32xf32>
    %6 = tpu.matmul %4, %5, %cst {dimension_numbers = #tpu.dot_dimension_numbers<[1], [0], [0], [1], [0, 0, 1, 1], [], []>} : vector<32x64xbf16>, vector<64x32xbf16>, vector<32x32xf32> -> vector<32x32xf32>
    %7 = arith.addf %3, %6 : vector<32x32xf32>
    %c0_6 = arith.constant 0 : index
    %c0_7 = arith.constant 0 : index
    %8 = vector.load %arg10[%c0_6, %c0_7] : memref<32x32xf32, #tpu.memory_space<vmem>>, vector<32x32xf32>
    tpu.vector_store %arg10[%c0_6, %c0_7], %7 {strides = array<i32>} : memref<32x32xf32, #tpu.memory_space<vmem>>, vector<32x32xf32>,
    %c0_i32_8 = arith.constant 0 : i32
    %9 = arith.cmpi eq, %arg2, %c0_i32_8 : i32
    %10 = arith.extui %9 : i1 to i32
    %c0_i32_9 = arith.constant 0 : i32
    %11 = arith.cmpi ne, %10, %c0_i32_9 : i32
    scf.if %11 {
      %c0_10 = arith.constant 0 : index
      %c0_11 = arith.constant 0 : index
      %12 = vector.load %arg10[%c0_10, %c0_11] : memref<32x32xf32, #tpu.memory_space<vmem>>, vector<32x32xf32>
      %c0_12 = arith.constant 0 : index
      %c0_13 = arith.constant 0 : index
      %13 = vector.load %arg5[%c0_12, %c0_13] : memref<1x32xf32, #tpu.memory_space<vmem>>, vector<1x32xf32>
      %14 = vector.broadcast %13 : vector<1x32xf32> to vector<32x32xf32>
      %15 = arith.addf %12, %14 : vector<32x32xf32>
      %c0_14 = arith.constant 0 : index
      %c0_15 = arith.constant 0 : index
      %16 = vector.load %arg6[%c0_14, %c0_15] : memref<32x32xf32, #tpu.memory_space<vmem>>, vector<32x32xf32>
      %17 = arith.addf %15, %16 : vector<32x32xf32>
      %cst_16 = arith.constant dense<0.000000e+00> : vector<32xf32>
      %18 = vector.multi_reduction <add>, %17, %cst_16 [1] : vector<32x32xf32> to vector<32xf32>
      %19 = vector.shape_cast %18 : vector<32xf32> to vector<32x1xf32>
      %cst_17 = arith.constant 3.200000e+01 : f32
      %20 = vector.broadcast %cst_17 : f32 to vector<32x1xf32>
      %21 = arith.divf %19, %20 : vector<32x1xf32>
      %22 = vector.broadcast %21 : vector<32x1xf32> to vector<32x32xf32>
      %23 = arith.subf %17, %22 : vector<32x32xf32>
      %24 = arith.mulf %23, %23 : vector<32x32xf32>
      %cst_18 = arith.constant dense<0.000000e+00> : vector<32xf32>
      %25 = vector.multi_reduction <add>, %24, %cst_18 [1] : vector<32x32xf32> to vector<32xf32>
      %26 = vector.shape_cast %25 : vector<32xf32> to vector<32x1xf32>
      %cst_19 = arith.constant 3.200000e+01 : f32
      %27 = vector.broadcast %cst_19 : f32 to vector<32x1xf32>
      %28 = arith.divf %26, %27 : vector<32x1xf32>
      %29 = vector.broadcast %21 : vector<32x1xf32> to vector<32x32xf32>
      %30 = arith.subf %17, %29 : vector<32x32xf32>
      %cst_20 = arith.constant 9.99999996E-13 : f32
      %31 = vector.broadcast %cst_20 : f32 to vector<32x1xf32>
      %32 = arith.addf %28, %31 : vector<32x1xf32>
      %33 = math.rsqrt %32 : vector<32x1xf32>
      %34 = vector.broadcast %33 : vector<32x1xf32> to vector<32x32xf32>
      %35 = arith.mulf %30, %34 : vector<32x32xf32>
      %c0_21 = arith.constant 0 : index
      %c0_22 = arith.constant 0 : index
      %36 = vector.load %arg7[%c0_21, %c0_22] : memref<1x32xf32, #tpu.memory_space<vmem>>, vector<1x32xf32>
      %37 = vector.broadcast %36 : vector<1x32xf32> to vector<32x32xf32>
      %38 = arith.mulf %35, %37 : vector<32x32xf32>
      %c0_23 = arith.constant 0 : index
      %c0_24 = arith.constant 0 : index
      %39 = vector.load %arg8[%c0_23, %c0_24] : memref<1x32xf32, #tpu.memory_space<vmem>>, vector<1x32xf32>
      %40 = vector.broadcast %39 : vector<1x32xf32> to vector<32x32xf32>
      %41 = arith.addf %38, %40 : vector<32x32xf32>
      %c0_25 = arith.constant 0 : index
      %c0_26 = arith.constant 0 : index
      %42 = vector.load %arg9[%c0_25, %c0_26] : memref<32x32xf32, #tpu.memory_space<vmem>>, vector<32x32xf32>
      tpu.vector_store %arg9[%c0_25, %c0_26], %41 {strides = array<i32>} : memref<32x32xf32, #tpu.memory_space<vmem>>, vector<32x32xf32>,
    } else {
    }
    return
  }
  func.func @transform_0(%arg0: i32, %arg1: i32, %arg2: i32) -> (i32, i32) {
    %c0_i32 = arith.constant 0 : i32
    return %arg0, %arg2 : i32, i32
  }
  func.func @transform_1(%arg0: i32, %arg1: i32, %arg2: i32) -> (i32, i32) {
    %c0_i32 = arith.constant 0 : i32
    return %arg2, %arg1 : i32, i32
  }
  func.func @transform_2(%arg0: i32, %arg1: i32, %arg2: i32) -> (i32, i32) {
    %c0_i32 = arith.constant 0 : i32
    %c0_i32_0 = arith.constant 0 : i32
    return %c0_i32, %arg1 : i32, i32
  }
  func.func @transform_3(%arg0: i32, %arg1: i32, %arg2: i32) -> (i32, i32) {
    %c0_i32 = arith.constant 0 : i32
    return %arg0, %arg1 : i32, i32
  }
  func.func @transform_4(%arg0: i32, %arg1: i32, %arg2: i32) -> (i32, i32) {
    %c0_i32 = arith.constant 0 : i32
    %c0_i32_0 = arith.constant 0 : i32
    return %c0_i32, %arg1 : i32, i32
  }
  func.func @transform_5(%arg0: i32, %arg1: i32, %arg2: i32) -> (i32, i32) {
    %c0_i32 = arith.constant 0 : i32
    %c0_i32_0 = arith.constant 0 : i32
    return %c0_i32, %arg1 : i32, i32
  }
  func.func @transform_6(%arg0: i32, %arg1: i32, %arg2: i32) -> (i32, i32) {
    %c0_i32 = arith.constant 0 : i32
    return %arg0, %arg1 : i32, i32
  }
}

module attributes {stable_mosaic.version = 11 : i64} {
  func.func @_linear_kernel(%arg0: i32, %arg1: i32, %arg2: i32, %arg3: memref<32x32xf32, #tpu.memory_space<vmem>>, %arg4: memref<32x64xbf16, #tpu.memory_space<vmem>>, %arg5: memref<1x64xf32, #tpu.memory_space<vmem>>, %arg6: memref<32x64xbf16, #tpu.memory_space<vmem>>, %arg7: memref<32x64xf32, #tpu.memory_space<vmem>>) attributes {dimension_semantics = [#tpu.dimension_semantics<parallel>, #tpu.dimension_semantics<parallel>, #tpu.dimension_semantics<arbitrary>], iteration_bounds = array<i64: 1, 1, 1>, scalar_prefetch = 0 : i64, scratch_operands = 1 : i64, tpu.core_type = #tpu.core_type<tc>, window_params = [{transform_indices = @transform_0, window_bounds = array<i64: 32, 32>}, {transform_indices = @transform_1, window_bounds = array<i64: 32, 64>}, {transform_indices = @transform_2, window_bounds = array<i64: 1, 64>}, {transform_indices = @transform_3, window_bounds = array<i64: 32, 64>}]} {
    %c0_i32 = arith.constant 0 : i32
    %0 = arith.cmpi eq, %arg2, %c0_i32 : i32
    %1 = arith.extui %0 : i1 to i32
    %c0_i32_0 = arith.constant 0 : i32
    %2 = arith.cmpi ne, %1, %c0_i32_0 : i32
    scf.if %2 {
      %cst_10 = arith.constant 0.000000e+00 : f32
      %13 = vector.broadcast %cst_10 : f32 to vector<32x64xf32>
      %c0_11 = arith.constant 0 : index
      %c0_12 = arith.constant 0 : index
      %14 = vector.load %arg7[%c0_11, %c0_12] : memref<32x64xf32, #tpu.memory_space<vmem>>, vector<32x64xf32>
      tpu.vector_store %arg7[%c0_11, %c0_12], %13 {strides = array<i32>} : memref<32x64xf32, #tpu.memory_space<vmem>>, vector<32x64xf32>,
    } else {
    }
    %c0 = arith.constant 0 : index
    %c0_1 = arith.constant 0 : index
    %3 = vector.load %arg7[%c0, %c0_1] : memref<32x64xf32, #tpu.memory_space<vmem>>, vector<32x64xf32>
    %c0_2 = arith.constant 0 : index
    %c0_3 = arith.constant 0 : index
    %4 = vector.load %arg3[%c0_2, %c0_3] : memref<32x32xf32, #tpu.memory_space<vmem>>, vector<32x32xf32>
    %5 = arith.truncf %4 : vector<32x32xf32> to vector<32x32xbf16>
    %c0_4 = arith.constant 0 : index
    %c0_5 = arith.constant 0 : index
    %6 = vector.load %arg4[%c0_4, %c0_5] : memref<32x64xbf16, #tpu.memory_space<vmem>>, vector<32x64xbf16>
    %cst = arith.constant dense<0.000000e+00> : vector<32x64xf32>
    %7 = tpu.matmul %5, %6, %cst {dimension_numbers = #tpu.dot_dimension_numbers<[1], [0], [0], [1], [0, 0, 1, 1], [], []>} : vector<32x32xbf16>, vector<32x64xbf16>, vector<32x64xf32> -> vector<32x64xf32>
    %8 = arith.addf %3, %7 : vector<32x64xf32>
    %c0_6 = arith.constant 0 : index
    %c0_7 = arith.constant 0 : index
    %9 = vector.load %arg7[%c0_6, %c0_7] : memref<32x64xf32, #tpu.memory_space<vmem>>, vector<32x64xf32>
    tpu.vector_store %arg7[%c0_6, %c0_7], %8 {strides = array<i32>} : memref<32x64xf32, #tpu.memory_space<vmem>>, vector<32x64xf32>,
    %c0_i32_8 = arith.constant 0 : i32
    %10 = arith.cmpi eq, %arg2, %c0_i32_8 : i32
    %11 = arith.extui %10 : i1 to i32
    %c0_i32_9 = arith.constant 0 : i32
    %12 = arith.cmpi ne, %11, %c0_i32_9 : i32
    scf.if %12 {
      %c0_10 = arith.constant 0 : index
      %c0_11 = arith.constant 0 : index
      %13 = vector.load %arg7[%c0_10, %c0_11] : memref<32x64xf32, #tpu.memory_space<vmem>>, vector<32x64xf32>
      %c0_12 = arith.constant 0 : index
      %c0_13 = arith.constant 0 : index
      %14 = vector.load %arg5[%c0_12, %c0_13] : memref<1x64xf32, #tpu.memory_space<vmem>>, vector<1x64xf32>
      %15 = vector.broadcast %14 : vector<1x64xf32> to vector<32x64xf32>
      %16 = arith.addf %13, %15 : vector<32x64xf32>
      %cst_14 = arith.constant 5.000000e-01 : f32
      %17 = vector.broadcast %cst_14 : f32 to vector<32x64xf32>
      %18 = arith.mulf %17, %16 : vector<32x64xf32>
      %cst_15 = arith.constant 4.471500e-02 : f32
      %19 = vector.broadcast %cst_15 : f32 to vector<32x64xf32>
      %20 = arith.mulf %19, %16 : vector<32x64xf32>
      %21 = arith.mulf %20, %16 : vector<32x64xf32>
      %22 = arith.mulf %21, %16 : vector<32x64xf32>
      %23 = arith.addf %16, %22 : vector<32x64xf32>
      %cst_16 = arith.constant 0.797884583 : f32
      %24 = vector.broadcast %cst_16 : f32 to vector<32x64xf32>
      %25 = arith.mulf %24, %23 : vector<32x64xf32>
      %26 = math.tanh %25 : vector<32x64xf32>
      %cst_17 = arith.constant 1.000000e+00 : f32
      %27 = vector.broadcast %cst_17 : f32 to vector<32x64xf32>
      %28 = arith.addf %27, %26 : vector<32x64xf32>
      %29 = arith.mulf %18, %28 : vector<32x64xf32>
      %30 = arith.truncf %29 : vector<32x64xf32> to vector<32x64xbf16>
      %c0_18 = arith.constant 0 : index
      %c0_19 = arith.constant 0 : index
      %31 = vector.load %arg6[%c0_18, %c0_19] : memref<32x64xbf16, #tpu.memory_space<vmem>>, vector<32x64xbf16>
      tpu.vector_store %arg6[%c0_18, %c0_19], %30 {strides = array<i32>} : memref<32x64xbf16, #tpu.memory_space<vmem>>, vector<32x64xbf16>,
    } else {
    }
    return
  }
  func.func @transform_0(%arg0: i32, %arg1: i32, %arg2: i32) -> (i32, i32) {
    %c0_i32 = arith.constant 0 : i32
    return %arg0, %arg2 : i32, i32
  }
  func.func @transform_1(%arg0: i32, %arg1: i32, %arg2: i32) -> (i32, i32) {
    %c0_i32 = arith.constant 0 : i32
    return %arg2, %arg1 : i32, i32
  }
  func.func @transform_2(%arg0: i32, %arg1: i32, %arg2: i32) -> (i32, i32) {
    %c0_i32 = arith.constant 0 : i32
    %c0_i32_0 = arith.constant 0 : i32
    return %c0_i32, %arg1 : i32, i32
  }
  func.func @transform_3(%arg0: i32, %arg1: i32, %arg2: i32) -> (i32, i32) {
    %c0_i32 = arith.constant 0 : i32
    return %arg0, %arg1 : i32, i32
  }
}

module attributes {stable_mosaic.version = 11 : i64} {
  func.func @_linear_kernel(%arg0: i32, %arg1: i32, %arg2: i32, %arg3: memref<64x32xf32, #tpu.memory_space<vmem>>, %arg4: memref<32x32xbf16, #tpu.memory_space<vmem>>, %arg5: memref<1x32xf32, #tpu.memory_space<vmem>>, %arg6: memref<1x32xf32, #tpu.memory_space<vmem>>, %arg7: memref<1x32xf32, #tpu.memory_space<vmem>>, %arg8: memref<64x32xbf16, #tpu.memory_space<vmem>>, %arg9: memref<64x32xf32, #tpu.memory_space<vmem>>) attributes {dimension_semantics = [#tpu.dimension_semantics<parallel>, #tpu.dimension_semantics<parallel>, #tpu.dimension_semantics<arbitrary>], iteration_bounds = array<i64: 1, 1, 1>, scalar_prefetch = 0 : i64, scratch_operands = 1 : i64, tpu.core_type = #tpu.core_type<tc>, window_params = [{transform_indices = @transform_0, window_bounds = array<i64: 64, 32>}, {transform_indices = @transform_1, window_bounds = array<i64: 32, 32>}, {transform_indices = @transform_2, window_bounds = array<i64: 1, 32>}, {transform_indices = @transform_3, window_bounds = array<i64: 1, 32>}, {transform_indices = @transform_4, window_bounds = array<i64: 1, 32>}, {transform_indices = @transform_5, window_bounds = array<i64: 64, 32>}]} {
    %c0_i32 = arith.constant 0 : i32
    %0 = arith.cmpi eq, %arg2, %c0_i32 : i32
    %1 = arith.extui %0 : i1 to i32
    %c0_i32_0 = arith.constant 0 : i32
    %2 = arith.cmpi ne, %1, %c0_i32_0 : i32
    scf.if %2 {
      %cst_10 = arith.constant 0.000000e+00 : f32
      %13 = vector.broadcast %cst_10 : f32 to vector<64x32xf32>
      %c0_11 = arith.constant 0 : index
      %c0_12 = arith.constant 0 : index
      %14 = vector.load %arg9[%c0_11, %c0_12] : memref<64x32xf32, #tpu.memory_space<vmem>>, vector<64x32xf32>
      tpu.vector_store %arg9[%c0_11, %c0_12], %13 {strides = array<i32>} : memref<64x32xf32, #tpu.memory_space<vmem>>, vector<64x32xf32>,
    } else {
    }
    %c0 = arith.constant 0 : index
    %c0_1 = arith.constant 0 : index
    %3 = vector.load %arg9[%c0, %c0_1] : memref<64x32xf32, #tpu.memory_space<vmem>>, vector<64x32xf32>
    %c0_2 = arith.constant 0 : index
    %c0_3 = arith.constant 0 : index
    %4 = vector.load %arg3[%c0_2, %c0_3] : memref<64x32xf32, #tpu.memory_space<vmem>>, vector<64x32xf32>
    %5 = arith.truncf %4 : vector<64x32xf32> to vector<64x32xbf16>
    %c0_4 = arith.constant 0 : index
    %c0_5 = arith.constant 0 : index
    %6 = vector.load %arg4[%c0_4, %c0_5] : memref<32x32xbf16, #tpu.memory_space<vmem>>, vector<32x32xbf16>
    %cst = arith.constant dense<0.000000e+00> : vector<64x32xf32>
    %7 = tpu.matmul %5, %6, %cst {dimension_numbers = #tpu.dot_dimension_numbers<[1], [0], [0], [1], [0, 0, 1, 1], [], []>} : vector<64x32xbf16>, vector<32x32xbf16>, vector<64x32xf32> -> vector<64x32xf32>
    %8 = arith.addf %3, %7 : vector<64x32xf32>
    %c0_6 = arith.constant 0 : index
    %c0_7 = arith.constant 0 : index
    %9 = vector.load %arg9[%c0_6, %c0_7] : memref<64x32xf32, #tpu.memory_space<vmem>>, vector<64x32xf32>
    tpu.vector_store %arg9[%c0_6, %c0_7], %8 {strides = array<i32>} : memref<64x32xf32, #tpu.memory_space<vmem>>, vector<64x32xf32>,
    %c0_i32_8 = arith.constant 0 : i32
    %10 = arith.cmpi eq, %arg2, %c0_i32_8 : i32
    %11 = arith.extui %10 : i1 to i32
    %c0_i32_9 = arith.constant 0 : i32
    %12 = arith.cmpi ne, %11, %c0_i32_9 : i32
    scf.if %12 {
      %c0_10 = arith.constant 0 : index
      %c0_11 = arith.constant 0 : index
      %13 = vector.load %arg9[%c0_10, %c0_11] : memref<64x32xf32, #tpu.memory_space<vmem>>, vector<64x32xf32>
      %c0_12 = arith.constant 0 : index
      %c0_13 = arith.constant 0 : index
      %14 = vector.load %arg5[%c0_12, %c0_13] : memref<1x32xf32, #tpu.memory_space<vmem>>, vector<1x32xf32>
      %15 = vector.broadcast %14 : vector<1x32xf32> to vector<64x32xf32>
      %16 = arith.addf %13, %15 : vector<64x32xf32>
      %cst_14 = arith.constant 5.000000e-01 : f32
      %17 = vector.broadcast %cst_14 : f32 to vector<64x32xf32>
      %18 = arith.mulf %17, %16 : vector<64x32xf32>
      %cst_15 = arith.constant 4.471500e-02 : f32
      %19 = vector.broadcast %cst_15 : f32 to vector<64x32xf32>
      %20 = arith.mulf %19, %16 : vector<64x32xf32>
      %21 = arith.mulf %20, %16 : vector<64x32xf32>
      %22 = arith.mulf %21, %16 : vector<64x32xf32>
      %23 = arith.addf %16, %22 : vector<64x32xf32>
      %cst_16 = arith.constant 0.797884583 : f32
      %24 = vector.broadcast %cst_16 : f32 to vector<64x32xf32>
      %25 = arith.mulf %24, %23 : vector<64x32xf32>
      %26 = math.tanh %25 : vector<64x32xf32>
      %cst_17 = arith.constant 1.000000e+00 : f32
      %27 = vector.broadcast %cst_17 : f32 to vector<64x32xf32>
      %28 = arith.addf %27, %26 : vector<64x32xf32>
      %29 = arith.mulf %18, %28 : vector<64x32xf32>
      %cst_18 = arith.constant dense<0.000000e+00> : vector<64xf32>
      %30 = vector.multi_reduction <add>, %29, %cst_18 [1] : vector<64x32xf32> to vector<64xf32>
      %31 = vector.shape_cast %30 : vector<64xf32> to vector<64x1xf32>
      %cst_19 = arith.constant 3.200000e+01 : f32
      %32 = vector.broadcast %cst_19 : f32 to vector<64x1xf32>
      %33 = arith.divf %31, %32 : vector<64x1xf32>
      %34 = vector.broadcast %33 : vector<64x1xf32> to vector<64x32xf32>
      %35 = arith.subf %29, %34 : vector<64x32xf32>
      %36 = arith.mulf %35, %35 : vector<64x32xf32>
      %cst_20 = arith.constant dense<0.000000e+00> : vector<64xf32>
      %37 = vector.multi_reduction <add>, %36, %cst_20 [1] : vector<64x32xf32> to vector<64xf32>
      %38 = vector.shape_cast %37 : vector<64xf32> to vector<64x1xf32>
      %cst_21 = arith.constant 3.200000e+01 : f32
      %39 = vector.broadcast %cst_21 : f32 to vector<64x1xf32>
      %40 = arith.divf %38, %39 : vector<64x1xf32>
      %41 = vector.broadcast %33 : vector<64x1xf32> to vector<64x32xf32>
      %42 = arith.subf %29, %41 : vector<64x32xf32>
      %cst_22 = arith.constant 9.99999996E-13 : f32
      %43 = vector.broadcast %cst_22 : f32 to vector<64x1xf32>
      %44 = arith.addf %40, %43 : vector<64x1xf32>
      %45 = math.rsqrt %44 : vector<64x1xf32>
      %46 = vector.broadcast %45 : vector<64x1xf32> to vector<64x32xf32>
      %47 = arith.mulf %42, %46 : vector<64x32xf32>
      %c0_23 = arith.constant 0 : index
      %c0_24 = arith.constant 0 : index
      %48 = vector.load %arg6[%c0_23, %c0_24] : memref<1x32xf32, #tpu.memory_space<vmem>>, vector<1x32xf32>
      %49 = vector.broadcast %48 : vector<1x32xf32> to vector<64x32xf32>
      %50 = arith.mulf %47, %49 : vector<64x32xf32>
      %c0_25 = arith.constant 0 : index
      %c0_26 = arith.constant 0 : index
      %51 = vector.load %arg7[%c0_25, %c0_26] : memref<1x32xf32, #tpu.memory_space<vmem>>, vector<1x32xf32>
      %52 = vector.broadcast %51 : vector<1x32xf32> to vector<64x32xf32>
      %53 = arith.addf %50, %52 : vector<64x32xf32>
      %54 = arith.truncf %53 : vector<64x32xf32> to vector<64x32xbf16>
      %c0_27 = arith.constant 0 : index
      %c0_28 = arith.constant 0 : index
      %55 = vector.load %arg8[%c0_27, %c0_28] : memref<64x32xbf16, #tpu.memory_space<vmem>>, vector<64x32xbf16>
      tpu.vector_store %arg8[%c0_27, %c0_28], %54 {strides = array<i32>} : memref<64x32xbf16, #tpu.memory_space<vmem>>, vector<64x32xbf16>,
    } else {
    }
    return
  }
  func.func @transform_0(%arg0: i32, %arg1: i32, %arg2: i32) -> (i32, i32) {
    %c0_i32 = arith.constant 0 : i32
    return %arg0, %arg2 : i32, i32
  }
  func.func @transform_1(%arg0: i32, %arg1: i32, %arg2: i32) -> (i32, i32) {
    %c0_i32 = arith.constant 0 : i32
    return %arg2, %arg1 : i32, i32
  }
  func.func @transform_2(%arg0: i32, %arg1: i32, %arg2: i32) -> (i32, i32) {
    %c0_i32 = arith.constant 0 : i32
    %c0_i32_0 = arith.constant 0 : i32
    return %c0_i32, %arg1 : i32, i32
  }
  func.func @transform_3(%arg0: i32, %arg1: i32, %arg2: i32) -> (i32, i32) {
    %c0_i32 = arith.constant 0 : i32
    %c0_i32_0 = arith.constant 0 : i32
    return %c0_i32, %arg1 : i32, i32
  }
  func.func @transform_4(%arg0: i32, %arg1: i32, %arg2: i32) -> (i32, i32) {
    %c0_i32 = arith.constant 0 : i32
    %c0_i32_0 = arith.constant 0 : i32
    return %c0_i32, %arg1 : i32, i32
  }
  func.func @transform_5(%arg0: i32, %arg1: i32, %arg2: i32) -> (i32, i32) {
    %c0_i32 = arith.constant 0 : i32
    return %arg0, %arg1 : i32, i32
  }
}

module attributes {stable_mosaic.version = 11 : i64} {
  func.func @_linear_kernel(%arg0: i32, %arg1: i32, %arg2: i32, %arg3: memref<64x32xbf16, #tpu.memory_space<vmem>>, %arg4: memref<32x64xbf16, #tpu.memory_space<vmem>>, %arg5: memref<1x64xf32, #tpu.memory_space<vmem>>, %arg6: memref<64x64xf32, #tpu.memory_space<vmem>>, %arg7: memref<64x64xf32, #tpu.memory_space<vmem>>) attributes {dimension_semantics = [#tpu.dimension_semantics<parallel>, #tpu.dimension_semantics<parallel>, #tpu.dimension_semantics<arbitrary>], iteration_bounds = array<i64: 1, 1, 1>, scalar_prefetch = 0 : i64, scratch_operands = 1 : i64, tpu.core_type = #tpu.core_type<tc>, window_params = [{transform_indices = @transform_0, window_bounds = array<i64: 64, 32>}, {transform_indices = @transform_1, window_bounds = array<i64: 32, 64>}, {transform_indices = @transform_2, window_bounds = array<i64: 1, 64>}, {transform_indices = @transform_3, window_bounds = array<i64: 64, 64>}]} {
    %c0_i32 = arith.constant 0 : i32
    %0 = arith.cmpi eq, %arg2, %c0_i32 : i32
    %1 = arith.extui %0 : i1 to i32
    %c0_i32_0 = arith.constant 0 : i32
    %2 = arith.cmpi ne, %1, %c0_i32_0 : i32
    scf.if %2 {
      %cst_10 = arith.constant 0.000000e+00 : f32
      %12 = vector.broadcast %cst_10 : f32 to vector<64x64xf32>
      %c0_11 = arith.constant 0 : index
      %c0_12 = arith.constant 0 : index
      %13 = vector.load %arg7[%c0_11, %c0_12] : memref<64x64xf32, #tpu.memory_space<vmem>>, vector<64x64xf32>
      tpu.vector_store %arg7[%c0_11, %c0_12], %12 {strides = array<i32>} : memref<64x64xf32, #tpu.memory_space<vmem>>, vector<64x64xf32>,
    } else {
    }
    %c0 = arith.constant 0 : index
    %c0_1 = arith.constant 0 : index
    %3 = vector.load %arg7[%c0, %c0_1] : memref<64x64xf32, #tpu.memory_space<vmem>>, vector<64x64xf32>
    %c0_2 = arith.constant 0 : index
    %c0_3 = arith.constant 0 : index
    %4 = vector.load %arg3[%c0_2, %c0_3] : memref<64x32xbf16, #tpu.memory_space<vmem>>, vector<64x32xbf16>
    %c0_4 = arith.constant 0 : index
    %c0_5 = arith.constant 0 : index
    %5 = vector.load %arg4[%c0_4, %c0_5] : memref<32x64xbf16, #tpu.memory_space<vmem>>, vector<32x64xbf16>
    %cst = arith.constant dense<0.000000e+00> : vector<64x64xf32>
    %6 = tpu.matmul %4, %5, %cst {dimension_numbers = #tpu.dot_dimension_numbers<[1], [0], [0], [1], [0, 0, 1, 1], [], []>} : vector<64x32xbf16>, vector<32x64xbf16>, vector<64x64xf32> -> vector<64x64xf32>
    %7 = arith.addf %3, %6 : vector<64x64xf32>
    %c0_6 = arith.constant 0 : index
    %c0_7 = arith.constant 0 : index
    %8 = vector.load %arg7[%c0_6, %c0_7] : memref<64x64xf32, #tpu.memory_space<vmem>>, vector<64x64xf32>
    tpu.vector_store %arg7[%c0_6, %c0_7], %7 {strides = array<i32>} : memref<64x64xf32, #tpu.memory_space<vmem>>, vector<64x64xf32>,
    %c0_i32_8 = arith.constant 0 : i32
    %9 = arith.cmpi eq, %arg2, %c0_i32_8 : i32
    %10 = arith.extui %9 : i1 to i32
    %c0_i32_9 = arith.constant 0 : i32
    %11 = arith.cmpi ne, %10, %c0_i32_9 : i32
    scf.if %11 {
      %c0_10 = arith.constant 0 : index
      %c0_11 = arith.constant 0 : index
      %12 = vector.load %arg7[%c0_10, %c0_11] : memref<64x64xf32, #tpu.memory_space<vmem>>, vector<64x64xf32>
      %c0_12 = arith.constant 0 : index
      %c0_13 = arith.constant 0 : index
      %13 = vector.load %arg5[%c0_12, %c0_13] : memref<1x64xf32, #tpu.memory_space<vmem>>, vector<1x64xf32>
      %14 = vector.broadcast %13 : vector<1x64xf32> to vector<64x64xf32>
      %15 = arith.addf %12, %14 : vector<64x64xf32>
      %c0_14 = arith.constant 0 : index
      %c0_15 = arith.constant 0 : index
      %16 = vector.load %arg6[%c0_14, %c0_15] : memref<64x64xf32, #tpu.memory_space<vmem>>, vector<64x64xf32>
      tpu.vector_store %arg6[%c0_14, %c0_15], %15 {strides = array<i32>} : memref<64x64xf32, #tpu.memory_space<vmem>>, vector<64x64xf32>,
    } else {
    }
    return
  }
  func.func @transform_0(%arg0: i32, %arg1: i32, %arg2: i32) -> (i32, i32) {
    %c0_i32 = arith.constant 0 : i32
    return %arg0, %arg2 : i32, i32
  }
  func.func @transform_1(%arg0: i32, %arg1: i32, %arg2: i32) -> (i32, i32) {
    %c0_i32 = arith.constant 0 : i32
    return %arg2, %arg1 : i32, i32
  }
  func.func @transform_2(%arg0: i32, %arg1: i32, %arg2: i32) -> (i32, i32) {
    %c0_i32 = arith.constant 0 : i32
    %c0_i32_0 = arith.constant 0 : i32
    return %c0_i32, %arg1 : i32, i32
  }
  func.func @transform_3(%arg0: i32, %arg1: i32, %arg2: i32) -> (i32, i32) {
    %c0_i32 = arith.constant 0 : i32
    return %arg0, %arg1 : i32, i32
  }
}

</mosaic_0001>

<bundles_post_ra>
// kernel: multimodal_forward.65
= control target key start
LH: loop header
LB: loop body
LE: loop exit
PB: predicated region body
PF: predicated region fallthrough
CT: control target
= control target key end

     0   :  { %vm22_vm0 = vcmask 261120   ;;  %s326_s0 = inlined_call_operand.vmem [shape: f32[64,32], index: 0, kind: input, shape index: {}]   ;;  %s327_s1 = inlined_call_operand.vmem [shape: f32[1,32], index: 1, kind: input, shape index: {}]   ;;  %s328_s2 = inlined_call_operand.vmem [shape: f32[1,32], index: 2, kind: input, shape index: {}]   ;;  %s329_s3 = inlined_call_operand.vmem [shape: f32[64,32], index: 3, kind: output, shape index: {}]  }
   0x1   :  { %v14_v0 = vld [vmem:[%s326_s0] sm:$0xff]  ;;  %v16_v1 = vld [vmem:[%s326_s0 + $0x10] sm:$0xff]  ;;  %v15_v2 = vld [vmem:[%s326_s0 + $0x8] sm:$0xff] }
   0x2   :  { %v23_v3 = vsel %vm22_vm0, %v14_v0, 0.0  ;;  %v29_v4 = vsel %vm22_vm0, %v16_v1, 0.0  ;;  %v17_v5 = vld [vmem:[%s326_s0 + $0x18] sm:$0xff]  ;;  %v26_v6 = vsel %vm22_vm0, %v15_v2, 0.0  ;;  %v18_v8 = vld [vmem:[%s326_s0 + $0x20] sm:$0xff]  ;;  %v19_v9 = vld [vmem:[%s326_s0 + $0x28] sm:$0xff] }
   0x3   :  { %24 = vadd.xlane.f32.xlu0 %v23_v3  ;;  %30 = vadd.xlane.f32.xlu1 %v29_v4  ;;  %v32_v7 = vsel %vm22_vm0, %v17_v5, 0.0  ;;  %v35_v10 = vsel %vm22_vm0, %v18_v8, 0.0  ;;  %v38_v11 = vsel %vm22_vm0, %v19_v9, 0.0  ;;  %v20_v12 = vld [vmem:[%s326_s0 + $0x30] sm:$0xff]  ;;  %v21_v13 = vld [vmem:[%s326_s0 + $0x38] sm:$0xff] }
   0x4   :  { %v41_v14 = vsel %vm22_vm0, %v20_v12, 0.0  ;;  %v44_v15 = vsel %vm22_vm0, %v21_v13, 0.0 }
   0x7   :  { %27 = vadd.xlane.f32.xlu0 %v26_v6  ;;  %33 = vadd.xlane.f32.xlu1 %v32_v7 }
   0xb   :  { %36 = vadd.xlane.f32.xlu0 %v35_v10  ;;  %39 = vadd.xlane.f32.xlu1 %v38_v11 }
   0xf   :  { %42 = vadd.xlane.f32.xlu0 %v41_v14  ;;  %45 = vadd.xlane.f32.xlu1 %v44_v15 }
  0x90   :  { %v25_v16 = vpop.xlane.xlu0 %24  ;;  %v31_v17 = vpop.xlane.xlu1 %30 }
  0x91   :  { %v48_v18 = vmul.f32 0.03125, %v25_v16  ;;  %v50_v19 = vmul.f32 0.03125, %v31_v17  ;;  %v171_v17 = vld [vmem:[%s328_s2] ss:$0 sm:$0xff] }
  0x93   :  { %v240_v20 = vsub.f32 %v14_v0, %v48_v18  ;;  %v242_v21 = vsub.f32 %v16_v1, %v50_v19 }
  0x94   :  { %v28_v22 = vpop.xlane.xlu0 %27  ;;  %v34_v23 = vpop.xlane.xlu1 %33 }
  0x95   :  { %v49_v24 = vmul.f32 0.03125, %v28_v22  ;;  %v51_v25 = vmul.f32 0.03125, %v34_v23  ;;  %v64_v26 = vmul.f32 %v240_v20, %v240_v20  ;;  %v66_v27 = vmul.f32 %v242_v21, %v242_v21 }
  0x97   :  { %v248_v28 = vsub.f32 %v15_v2, %v49_v24  ;;  %v250_v29 = vsub.f32 %v17_v5, %v51_v25  ;;  %v72_v30 = vsel %vm22_vm0, %v64_v26, 0.0  ;;  %v78_v33 = vsel %vm22_vm0, %v66_v27, 0.0 }
  0x98   :  { %73 = vadd.xlane.f32.xlu0 %v72_v30  ;;  %v37_v31 = vpop.xlane.xlu0 %36  ;;  %v40_v32 = vpop.xlane.xlu1 %39 }
  0x99   :  { %v52_v34 = vmul.f32 0.03125, %v37_v31  ;;  %v53_v35 = vmul.f32 0.03125, %v40_v32  ;;  %v65_v36 = vmul.f32 %v248_v28, %v248_v28  ;;  %v67_v37 = vmul.f32 %v250_v29, %v250_v29 }
  0x9b   :  { %v258_v38 = vsub.f32 %v18_v8, %v52_v34  ;;  %v260_v39 = vsub.f32 %v19_v9, %v53_v35  ;;  %v75_v40 = vsel %vm22_vm0, %v65_v36, 0.0  ;;  %v81_v43 = vsel %vm22_vm0, %v67_v37, 0.0 }
  0x9c   :  { %79 = vadd.xlane.f32.xlu0 %v78_v33  ;;  %76 = vadd.xlane.f32.xlu1 %v75_v40  ;;  %v43_v41 = vpop.xlane.xlu0 %42  ;;  %v46_v42 = vpop.xlane.xlu1 %45 }
  0x9d   :  { %v54_v44 = vmul.f32 0.03125, %v43_v41  ;;  %v55_v45 = vmul.f32 0.03125, %v46_v42  ;;  %v68_v46 = vmul.f32 %v258_v38, %v258_v38  ;;  %v69_v47 = vmul.f32 %v260_v39, %v260_v39 }
  0x9f   :  { %v268_v48 = vsub.f32 %v20_v12, %v54_v44  ;;  %v270_v49 = vsub.f32 %v21_v13, %v55_v45  ;;  %v84_v50 = vsel %vm22_vm0, %v68_v46, 0.0  ;;  %v87_v51 = vsel %vm22_vm0, %v69_v47, 0.0  ;;  %v170_v12 = vld [vmem:[%s327_s1] ss:$0 sm:$0xff] }
  0xa0   :  { %82 = vadd.xlane.f32.xlu1 %v81_v43  ;;  %85 = vadd.xlane.f32.xlu0 %v84_v50 }
  0xa1   :  { %v70_v52 = vmul.f32 %v268_v48, %v268_v48  ;;  %v71_v53 = vmul.f32 %v270_v49, %v270_v49 }
  0xa3   :  { %v90_v54 = vsel %vm22_vm0, %v70_v52, 0.0  ;;  %v93_v55 = vsel %vm22_vm0, %v71_v53, 0.0 }
  0xa4   :  { %88 = vadd.xlane.f32.xlu1 %v87_v51  ;;  %91 = vadd.xlane.f32.xlu0 %v90_v54 }
  0xa8   :  { %94 = vadd.xlane.f32.xlu1 %v93_v55 }
 0x125   :  { %v74_v56 = vpop.xlane.xlu0 %73 }
 0x126   :  { %v96_v57 = vmul.f32 0.03125, %v74_v56 }
 0x128   :  { %v104_v58 = vadd.f32 1e-12, %v96_v57 }
 0x129   :  { %v77_v59 = vpop.xlane.xlu1 %76  ;;  %v80_v60 = vpop.xlane.xlu0 %79 }
 0x12a   :  { %172 = vrsqrt.f32 %v104_v58  ;;  %v97_v61 = vmul.f32 0.03125, %v77_v59  ;;  %v98_v62 = vmul.f32 0.03125, %v80_v60 }
 0x12c   :  { %v105_v63 = vadd.f32 1e-12, %v97_v61  ;;  %v106_v0 = vadd.f32 1e-12, %v98_v62 }
 0x12d   :  { %v83_v1 = vpop.xlane.xlu1 %82  ;;  %v86_v2 = vpop.xlane.xlu0 %85 }
 0x12e   :  { %174 = vrsqrt.f32 %v105_v63  ;;  %v99_v3 = vmul.f32 0.03125, %v83_v1  ;;  %v100_v4 = vmul.f32 0.03125, %v86_v2 }
 0x12f   :  { %176 = vrsqrt.f32 %v106_v0 }
 0x130   :  { %v107_v5 = vadd.f32 1e-12, %v99_v3  ;;  %v108_v6 = vadd.f32 1e-12, %v100_v4 }
 0x131   :  { %v89_v7 = vpop.xlane.xlu1 %88  ;;  %v92_v8 = vpop.xlane.xlu0 %91 }
 0x132   :  { %178 = vrsqrt.f32 %v107_v5  ;;  %v101_v9 = vmul.f32 0.03125, %v89_v7  ;;  %v102_v10 = vmul.f32 0.03125, %v92_v8 }
 0x133   :  { %180 = vrsqrt.f32 %v108_v6 }
 0x134   :  { %v173_v11 = vpop.eup %172  ;;  %v109_v13 = vadd.f32 1e-12, %v101_v9  ;;  %v110_v14 = vadd.f32 1e-12, %v102_v10 }
 0x135   :  { %v120_v15 = vmul.f32 %v173_v11, %v240_v20  ;;  %v95_v16 = vpop.xlane.xlu1 %94 }
 0x136   :  { %182 = vrsqrt.f32 %v109_v13  ;;  %v103_v18 = vmul.f32 0.03125, %v95_v16 }
 0x137   :  { %v135_v19 = vmul.f32 %v170_v12, %v120_v15  ;;  %184 = vrsqrt.f32 %v110_v14 }
 0x138   :  { %v175_v22 = vpop.eup %174  ;;  %v111_v23 = vadd.f32 1e-12, %v103_v18 }
 0x139   :  { %v177_v24 = vpop.eup %176  ;;  %v150_v25 = vadd.f32 %v171_v17, %v135_v19  ;;  %v121_v26 = vmul.f32 %v175_v22, %v248_v28 }
 0x13a   :  { %v122_v27 = vmul.f32 %v177_v24, %v242_v21  ;;  %186 = vrsqrt.f32 %v111_v23 }
 0x13b   :  { %158 = vst.msk [vmem:[%s329_s3] sm:$0xff] %vm22_vm0, %v150_v25  ;;  %v136_v20 = vmul.f32 %v170_v12, %v121_v26 }
 0x13c   :  { %v179_v30 = vpop.eup %178  ;;  %v137_v31 = vmul.f32 %v170_v12, %v122_v27 }
 0x13d   :  { %v181_v32 = vpop.eup %180  ;;  %v151_v33 = vadd.f32 %v171_v17, %v136_v20  ;;  %v123_v34 = vmul.f32 %v179_v30, %v250_v29 }
 0x13e   :  { %v152_v35 = vadd.f32 %v171_v17, %v137_v31  ;;  %v124_v36 = vmul.f32 %v181_v32, %v258_v38 }
 0x13f   :  { %159 = vst.msk [vmem:[%s329_s3 + $0x8] sm:$0xff] %vm22_vm0, %v151_v33  ;;  %v138_v21 = vmul.f32 %v170_v12, %v123_v34 }
 0x140   :  { %v183_v28 = vpop.eup %182  ;;  %160 = vst.msk [vmem:[%s329_s3 + $0x10] sm:$0xff] %vm22_vm0, %v152_v35  ;;  %v139_v37 = vmul.f32 %v170_v12, %v124_v36 }
 0x141   :  { %v185_v40 = vpop.eup %184  ;;  %v153_v41 = vadd.f32 %v171_v17, %v138_v21  ;;  %v125_v29 = vmul.f32 %v183_v28, %v260_v39 }
 0x142   :  { %v154_v42 = vadd.f32 %v171_v17, %v139_v37  ;;  %v126_v38 = vmul.f32 %v185_v40, %v268_v48 }
 0x143   :  { %161 = vst.msk [vmem:[%s329_s3 + $0x18] sm:$0xff] %vm22_vm0, %v153_v41  ;;  %v140_v43 = vmul.f32 %v170_v12, %v125_v29 }
 0x144   :  { %v187_v44 = vpop.eup %186  ;;  %162 = vst.msk [vmem:[%s329_s3 + $0x20] sm:$0xff] %vm22_vm0, %v154_v42  ;;  %v141_v45 = vmul.f32 %v170_v12, %v126_v38 }
 0x145   :  { %v155_v46 = vadd.f32 %v171_v17, %v140_v43  ;;  %v127_v47 = vmul.f32 %v187_v44, %v270_v49 }
 0x146   :  { %v156_v39 = vadd.f32 %v171_v17, %v141_v45 }
 0x147   :  { %163 = vst.msk [vmem:[%s329_s3 + $0x28] sm:$0xff] %vm22_vm0, %v155_v46  ;;  %v142_v48 = vmul.f32 %v170_v12, %v127_v47 }
 0x148   :  { %164 = vst.msk [vmem:[%s329_s3 + $0x30] sm:$0xff] %vm22_vm0, %v156_v39 }
 0x149   :  { %v157_v50 = vadd.f32 %v171_v17, %v142_v48 }
 0x14b   :  { %165 = vst.msk [vmem:[%s329_s3 + $0x38] sm:$0xff] %vm22_vm0, %v157_v50 }

// kernel: multimodal_forward.66
= control target key start
LH: loop header
LB: loop body
LE: loop exit
PB: predicated region body
PF: predicated region fallthrough
CT: control target
= control target key end

     0   :  { %vm19_vm0 = vcmask 785408   ;;  %v278_v1 = vmov 0.0   ;;  %vm64_vm1 = vcmask 261120   ;;  %vm217_vm2 = vcmask 781312   ;;  %s384_s1 = inlined_call_operand.vmem [shape: bf16[32,96], index: 1, kind: input, shape index: {}]   ;;  %s385_s0 = inlined_call_operand.vmem [shape: f32[64,32], index: 0, kind: input, shape index: {}]   ;;  %s386_s2 = inlined_call_operand.vmem [shape: f32[1,96], index: 2, kind: input, shape index: {}]   ;;  %s387_s3 = inlined_call_operand.vmem [shape: bf16[64,96], index: 3, kind: output, shape index: {}]  }
   0x1   :  { %v276_v0 = vld [vmem:[%s384_s1] sm:$0xff]   ;;  %22 = vst.msk [vmem:[#allocation2 + $0x10] sm:$0xff] %vm19_vm0, %v278_v1  ;;  %20 = vst.msk [vmem:[#allocation2] sm:$0xff] %vm19_vm0, %v278_v1  ;;  %v277_v2 = vld [vmem:[%s384_s1 + $0x8] sm:$0xff]  }
   0x2   :  { %21 = vst.msk [vmem:[#allocation2 + $0x8] sm:$0xff] %vm19_vm0, %v278_v1  ;;  %23 = vst.msk [vmem:[#allocation2 + $0x18] sm:$0xff] %vm19_vm0, %v278_v1  ;;  %259 = vmatprep.subr.bf16.mxu0 %v276_v0  ;;  %271 = vmatprep.subr.bf16.mxu1 %v276_v0  ;;  %v36_v3 = vld [vmem:[%s385_s0] sm:$0xff]  ;;  %v37_v4 = vld [vmem:[%s385_s0 + $0x8] sm:$0xff] }
   0x3   :  { %24 = vst.msk [vmem:[#allocation2 + $0x20] sm:$0xff] %vm19_vm0, %v278_v1  ;;  %25 = vst.msk [vmem:[#allocation2 + $0x28] sm:$0xff] %vm19_vm0, %v278_v1  ;;  %v40_v5 = vld [vmem:[%s385_s0 + $0x20] sm:$0xff]  ;;  %260 = vmatpush3.bf16.msra.mxu0 %v276_v0  ;;  %273 = vmatpush3.bf16.msra.mxu1 %v276_v0  ;;  %v44_v6 = vpack.c.bf16 %v37_v4, %v36_v3  ;;  %v41_v7 = vld [vmem:[%s385_s0 + $0x28] sm:$0xff] }
   0x4   :  { %26 = vst.msk [vmem:[#allocation2 + $0x30] sm:$0xff] %vm19_vm0, %v278_v1  ;;  %27 = vst.msk [vmem:[#allocation2 + $0x38] sm:$0xff] %vm19_vm0, %v278_v1  ;;  %v38_v8 = vld [vmem:[%s385_s0 + $0x10] sm:$0xff]  ;;  %v39_v9 = vld [vmem:[%s385_s0 + $0x18] sm:$0xff]  ;;  %261 = vmatprep.subr.bf16.mxu0 %v277_v2  ;;  %272 = vmatprep.subr.bf16.mxu1 %v277_v2  ;;  %v46_v10 = vpack.c.bf16 %v41_v7, %v40_v5 }
   0x5   :  { %v42_v11 = vld [vmem:[%s385_s0 + $0x30] sm:$0xff]  ;;  %v43_v12 = vld [vmem:[%s385_s0 + $0x38] sm:$0xff]  ;;  %263 = vmatprep.mubr.msk.bf16.mxu0 %vm64_vm1, %v44_v6  ;;  %v45_v13 = vpack.c.bf16 %v39_v9, %v38_v8  ;;  %v236_v39 = vld [vmem:[%s386_s2] ss:$0 sm:$0xff] }
   0x6   :  { %267 = vmatprep.mubr.msk.bf16.mxu1 %vm64_vm1, %v46_v10  ;;  %v47_v14 = vpack.c.bf16 %v43_v12, %v42_v11 }
   0x7   :  { %262 = vmatpush3.bf16.msra.mxu0 %v277_v2  ;;  %274 = vmatpush3.bf16.msra.mxu1 %v277_v2 }
   0x8   :  { %v30_v15 = vld [vmem:[#allocation2 + $0x10] sm:$0xff]  ;;  %v28_v17 = vld [vmem:[#allocation2] sm:$0xff] }
   0x9   :  { %v31_v21 = vld [vmem:[#allocation2 + $0x18] sm:$0xff]  ;;  %v29_v27 = vld [vmem:[#allocation2 + $0x8] sm:$0xff] }
   0xa   :  { %264 = vmatmul.mubr.msk.bf16.vlgmr.msra.gmra.mrb[0].mxu0 %vm64_vm1, %v45_v13  ;;  %268 = vmatmul.mubr.msk.bf16.vlgmr.msra.gmra.mrb[0].mxu1 %vm64_vm1, %v47_v14  ;;  %v32_v18 = vld [vmem:[#allocation2 + $0x20] sm:$0xff]  ;;  %v33_v28 = vld [vmem:[#allocation2 + $0x28] sm:$0xff] }
   0xb   :  { %v34_v16 = vld [vmem:[#allocation2 + $0x30] sm:$0xff]  ;;  %v35_v22 = vld [vmem:[#allocation2 + $0x38] sm:$0xff] }
  0xdd   :  { %v265_v19 = vpop.f32.mrb[0].mxu0  ;;  %v269_v20 = vpop.f32.mrb[0].mxu1 }
  0xde   :  { %v144_v23 = vadd.f32 %v265_v19, %v30_v15  ;;  %v148_v24 = vadd.f32 %v269_v20, %v34_v16  ;;  %v111_v25 = vpop.f32.mrb[1].mxu0  ;;  %v127_v26 = vpop.f32.mrb[1].mxu1 }
  0xdf   :  { %v142_v29 = vadd.f32 %v111_v25, %v28_v17  ;;  %v146_v30 = vadd.f32 %v127_v26, %v32_v18  ;;  %v266_v31 = vpop.f32.mrb[2].mxu0  ;;  %v270_v32 = vpop.f32.mrb[2].mxu1 }
  0xe0   :  { %153 = vst.msk [vmem:[#allocation2 + $0x10] sm:$0xff] %vm19_vm0, %v144_v23  ;;  %157 = vst.msk [vmem:[#allocation2 + $0x30] sm:$0xff] %vm19_vm0, %v148_v24  ;;  %v145_v33 = vadd.f32 %v266_v31, %v31_v21  ;;  %v149_v34 = vadd.f32 %v270_v32, %v35_v22  ;;  %v114_v35 = vpop.f32.mrb[3].mxu0  ;;  %v130_v36 = vpop.f32.mrb[3].mxu1 }
  0xe1   :  { %151 = vst.msk [vmem:[#allocation2] sm:$0xff] %vm19_vm0, %v142_v29  ;;  %155 = vst.msk [vmem:[#allocation2 + $0x20] sm:$0xff] %vm19_vm0, %v146_v30  ;;  %v143_v37 = vadd.f32 %v114_v35, %v29_v27  ;;  %v147_v38 = vadd.f32 %v130_v36, %v33_v28 }
  0xe2   :  { %154 = vst.msk [vmem:[#allocation2 + $0x18] sm:$0xff] %vm19_vm0, %v145_v33  ;;  %158 = vst.msk [vmem:[#allocation2 + $0x38] sm:$0xff] %vm19_vm0, %v149_v34 }
  0xe3   :  { %152 = vst.msk [vmem:[#allocation2 + $0x8] sm:$0xff] %vm19_vm0, %v143_v37  ;;  %156 = vst.msk [vmem:[#allocation2 + $0x28] sm:$0xff] %vm19_vm0, %v147_v38 }
  0xe7   :  { %v164_v40 = vld [vmem:[#allocation2 + $0x10] sm:$0xff] }
  0xe8   :  { %v168_v41 = vld [vmem:[#allocation2 + $0x30] sm:$0xff]  ;;  %v179_v42 = vadd.f32 %v236_v39, %v164_v40  ;;  %v162_v44 = vld [vmem:[#allocation2] sm:$0xff] }
  0xe9   :  { %v183_v43 = vadd.f32 %v236_v39, %v168_v41  ;;  %v166_v45 = vld [vmem:[#allocation2 + $0x20] sm:$0xff]  ;;  %v177_v46 = vadd.f32 %v236_v39, %v162_v44  ;;  %v165_v48 = vld [vmem:[#allocation2 + $0x18] sm:$0xff] }
  0xea   :  { %v181_v47 = vadd.f32 %v236_v39, %v166_v45  ;;  %v169_v49 = vld [vmem:[#allocation2 + $0x38] sm:$0xff]  ;;  %v247_v50 = vpack.c.bf16 %v179_v42, %v179_v42  ;;  %v180_v52 = vadd.f32 %v236_v39, %v165_v48  ;;  %v163_v54 = vld [vmem:[#allocation2 + $0x8] sm:$0xff] }
  0xeb   :  { %v251_v51 = vpack.c.bf16 %v183_v43, %v183_v43  ;;  %v184_v53 = vadd.f32 %v236_v39, %v169_v49  ;;  %v167_v55 = vld [vmem:[#allocation2 + $0x28] sm:$0xff]  ;;  %v245_v56 = vpack.c.bf16 %v177_v46, %v177_v46  ;;  %v178_v58 = vadd.f32 %v236_v39, %v163_v54 }
  0xec   :  { %v249_v57 = vpack.c.bf16 %v181_v47, %v181_v47  ;;  %v182_v59 = vadd.f32 %v236_v39, %v167_v55  ;;  %220 = vst.msk [vmem:[%s387_s3 + $0x8] sm:$0xf] %vm217_vm2, %v247_v50  ;;  %v248_v60 = vpack.c.bf16 %v180_v52, %v180_v52 }
  0xed   :  { %224 = vst.msk [vmem:[%s387_s3 + $0x18] sm:$0xf] %vm217_vm2, %v251_v51  ;;  %v252_v61 = vpack.c.bf16 %v184_v53, %v184_v53  ;;  %218 = vst.msk [vmem:[%s387_s3] sm:$0xf] %vm217_vm2, %v245_v56  ;;  %v246_v62 = vpack.c.bf16 %v178_v58, %v178_v58 }
  0xee   :  { %222 = vst.msk [vmem:[%s387_s3 + $0x10] sm:$0xf] %vm217_vm2, %v249_v57  ;;  %v250_v63 = vpack.c.bf16 %v182_v59, %v182_v59  ;;  %221 = vst.msk [vmem:[%s387_s3 + $0xc] sm:$0xf] %vm217_vm2, %v248_v60 }
  0xef   :  { %225 = vst.msk [vmem:[%s387_s3 + $0x1c] sm:$0xf] %vm217_vm2, %v252_v61  ;;  %219 = vst.msk [vmem:[%s387_s3 + $0x4] sm:$0xf] %vm217_vm2, %v246_v62 }
  0xf0   :  { %223 = vst.msk [vmem:[%s387_s3 + $0x14] sm:$0xf] %vm217_vm2, %v250_v63 }

// kernel: multimodal_forward.67
= control target key start
LH: loop header
LB: loop body
LE: loop exit
PB: predicated region body
PF: predicated region fallthrough
CT: control target
= control target key end

     0   :  { %s1053_s9 = smov 0   ;;  %s1148_s0 = inlined_call_operand.vmem [shape: bf16[4,3,4,16,8], index: 0, kind: input, shape index: {}]   ;;  %s1149_s1 = inlined_call_operand.vmem [shape: f32[4,1,16], index: 1, kind: input, shape index: {}]   ;;  %s1150_s2 = inlined_call_operand.vmem [shape: bf16[4,16,32], index: 2, kind: output, shape index: {}]  }
   0x1 LB: > { %s836_s10 = sadd.s32 4294967295, %s1031_s9   ;;  %p840_p0 = scmp.ge.s32.totalorder %s1031_s9, 1  ;;  %s1031_s9 = sphi %s1053_s9, %s12_s9  }
   0x2   : > { %p120_p1 = scmp.lt.s32.totalorder %s1031_s9, 5 }
   0x4   : > { %p121_p2 = pnand %p840_p0, %p120_p1 }
   0x5   : > { %p145_p3 = scmp.lt.s32.totalorder (!%p121_p2), %s836_s10, 3  ;;  %v1033_v0 = vmov (!%p121_p2), 0.0   ;;  %vm1034_vm0 = vmmov (!%p121_p2), 0   ;;  %vm196_vm1 = vcmask (!%p121_p2), 64512   ;;  %vm437_vm2 = vcmask (!%p121_p2), 130048   ;;  %s1035_s18 = smov (!%p121_p2), 8  }
   0x6   : > { %124 = sbr.rel (%p121_p2) target bundleno = 911 (0x38f), region = 28  ;;  %904 = vmatprep.subr.bf16.mxu0 (!%p121_p2), %v1033_v0  ;;  %910 = vmatprep.subr.bf16.mxu1 (!%p121_p2), %v1033_v0  ;;  %s1036_s19 = smov (!%p121_p2), 16   ;;  %vm758_vm3 = vcmask (!%p121_p2), 195584   ;;  %vm769_vm4 = vcmask (!%p121_p2), 257024  }
   0x7   : > { %906 = vmatprep.mubr.msk.bf16.mxu0 (!%p121_p2), %vm1034_vm0, %v1033_v0  ;;  %912 = vmatprep.mubr.msk.bf16.mxu1 (!%p121_p2), %vm1034_vm0, %v1033_v0  ;;  %s1037_s20 = smov (!%p121_p2), 24  }
   0xd   : > { %s1152_s10 = smov (!%p145_p3, %s836_s10), 3 }
   0xe   : > { %s952_s11 = smul.u32 96, %s1152_s10  ;;  %s152_s17 = scalar_lea.vmem %s1149_s1, %s1152_s10 }
   0xf   : > { %v872_v14 = vld [vmem:[%s152_s17] ss:$0 sm:$0xff]  ;;  %s885_s21 = sshll.u32 %s1152_s10, 3 }
  0x10   : > { %s1073_s14 = scalar_lea.vmem %s1148_s0, %s952_s11  ;;  %s157_s24 = scalar_lea.vmem %s1150_s2, %s885_s21 }
  0x11   : > { %v981_v1 = vld [vmem:[%s1073_s14 + $0x20] sm:$0xff]   ;;  %v982_v2 = vld [vmem:[%s1073_s14 + $0x28] sm:$0xff]   ;;  %v985_v6 = vld [vmem:[%s1073_s14 + $0x30] sm:$0xff]  }
  0x12   : > { %v201_v3 = vsel %vm196_vm1, %v981_v1, 0  ;;  %v258_v4 = vsel %vm196_vm1, %v982_v2, 0  ;;  %v983_v5 = vld [vmem:[%s1073_s14] sm:$0xff]   ;;  %v986_v7 = vld [vmem:[%s1073_s14 + $0x38] sm:$0xff]   ;;  %v984_v8 = vld [vmem:[%s1073_s14 + $0x8] sm:$0xff]   ;;  %v315_v9 = vsel %vm196_vm1, %v985_v6, 0 }
  0x13   : > { %905 = vmatpush3.bf16.xpose.msra.mxu0 %v201_v3  ;;  %911 = vmatpush3.bf16.xpose.msra.mxu1 %v258_v4  ;;  %v372_v10 = vsel %vm196_vm1, %v986_v7, 0  ;;  %v987_v11 = vld [vmem:[%s1073_s14 + $0x10] sm:$0xff]   ;;  %v988_v12 = vld [vmem:[%s1073_s14 + $0x18] sm:$0xff]  }
  0x14   : > { %916 = vmatprep.subr.bf16.mxu0 %v1033_v0  ;;  %922 = vmatprep.subr.bf16.mxu1 %v1033_v0 }
  0x1a   : > { %907 = vmatmul.mubr.msk.bf16.vlgmr.msra.gmra.mrb[0].mxu0 %vm196_vm1, %v983_v5  ;;  %913 = vmatmul.mubr.msk.bf16.vlgmr.msra.gmra.mrb[0].mxu1 %vm196_vm1, %v984_v8 }
  0x1b   : > { %917 = vmatpush3.bf16.xpose.msra.mxu0 %v315_v9  ;;  %923 = vmatpush3.bf16.xpose.msra.mxu1 %v372_v10 }
  0x1c   : > { %918 = vmatprep.mubr.msk.bf16.mxu0 %vm1034_vm0, %v1033_v0  ;;  %924 = vmatprep.mubr.msk.bf16.mxu1 %vm1034_vm0, %v1033_v0 }
  0x1d   : > { %928 = vmatprep.subr.bf16.mxu0 %v1033_v0  ;;  %934 = vmatprep.subr.bf16.mxu1 %v1033_v0 }
  0x22   : > { %919 = vmatmul.mubr.msk.bf16.vlgmr.msra.gmra.mrb[4].mxu0 %vm196_vm1, %v987_v11  ;;  %925 = vmatmul.mubr.msk.bf16.vlgmr.msra.gmra.mrb[4].mxu1 %vm196_vm1, %v988_v12 }
  0x23   : > { %930 = vmatprep.mubr.msk.bf16.mxu0 %vm1034_vm0, %v1033_v0  ;;  %936 = vmatprep.mubr.msk.bf16.mxu1 %vm1034_vm0, %v1033_v0 }
  0xed   : > { %v237_v13 = vpop.f32.mrb[0].mxu0  ;;  %v294_v16 = vpop.f32.mrb[0].mxu1 }
  0xee   : > { %v415_v15 = vmul.f32 0.35355338, %v237_v13  ;;  %v908_v17 = vpop.f32.mrb[1].mxu0  ;;  %v417_v18 = vmul.f32 0.35355338, %v294_v16  ;;  %v914_v20 = vpop.f32.mrb[1].mxu1 }
  0xef   : > { %v240_v19 = vpop.f32.mrb[2].mxu0  ;;  %v297_v23 = vpop.f32.mrb[2].mxu1 }
  0xf0   : > { %v416_v21 = vmul.f32 0.35355338, %v240_v19  ;;  %v909_v22 = vpop.f32.mrb[3].mxu0  ;;  %v429_v24 = vadd.f32 %v872_v14, %v415_v15  ;;  %v418_v25 = vmul.f32 0.35355338, %v297_v23  ;;  %v915_v26 = vpop.f32.mrb[3].mxu1  ;;  %v431_v27 = vadd.f32 %v872_v14, %v417_v18 }
  0xf2   : > { %v438_v28 = vsel %vm437_vm2, %v429_v24, -inf  ;;  %v430_v29 = vadd.f32 %v872_v14, %v416_v21  ;;  %v444_v30 = vsel %vm437_vm2, %v431_v27, -inf  ;;  %v432_v31 = vadd.f32 %v872_v14, %v418_v25 }
  0xf3   : > { %439 = vmax.xlane.f32.xlu0 %v438_v28  ;;  %445 = vmax.xlane.f32.xlu1 %v444_v30 }
  0xf4   : > { %v447_v33 = vsel %vm437_vm2, %v432_v31, -inf  ;;  %v441_v36 = vsel %vm437_vm2, %v430_v29, -inf }
  0xf5   : > { %v351_v32 = vpop.f32.mrb[4].mxu0  ;;  %v408_v37 = vpop.f32.mrb[4].mxu1 }
  0xf6   : > { %v419_v34 = vmul.f32 0.35355338, %v351_v32  ;;  %v920_v35 = vpop.f32.mrb[5].mxu0  ;;  %v421_v39 = vmul.f32 0.35355338, %v408_v37  ;;  %v926_v40 = vpop.f32.mrb[5].mxu1 }
  0xf7   : > { %442 = vmax.xlane.f32.xlu0 %v441_v36  ;;  %v354_v38 = vpop.f32.mrb[6].mxu0  ;;  %448 = vmax.xlane.f32.xlu1 %v447_v33  ;;  %v411_v43 = vpop.f32.mrb[6].mxu1  ;;  %v990_v32 = vld [vmem:[%s1073_s14 + $0x48] sm:$0xff]  }
  0xf8   : > { %v420_v41 = vmul.f32 0.35355338, %v354_v38  ;;  %v921_v42 = vpop.f32.mrb[7].mxu0  ;;  %v433_v44 = vadd.f32 %v872_v14, %v419_v34  ;;  %v422_v45 = vmul.f32 0.35355338, %v411_v43  ;;  %v927_v46 = vpop.f32.mrb[7].mxu1  ;;  %v435_v47 = vadd.f32 %v872_v14, %v421_v39  ;;  %935 = vmatpush3.bf16.msra.mxu1 %v990_v32 }
  0xf9   : > { %946 = vmatprep.subr.bf16.mxu1 %v1033_v0  ;;  %v991_v46 = vld [vmem:[%s1073_s14 + $0x50] sm:$0xff]  }
  0xfa   : > { %v450_v48 = vsel %vm437_vm2, %v433_v44, -inf  ;;  %v434_v49 = vadd.f32 %v872_v14, %v420_v41  ;;  %v436_v50 = vadd.f32 %v872_v14, %v422_v45  ;;  %v456_v52 = vsel %vm437_vm2, %v435_v47, -inf }
  0xfb   : > { %451 = vmax.xlane.f32.xlu0 %v450_v48 }
  0xfc   : > { %v453_v51 = vsel %vm437_vm2, %v434_v49, -inf  ;;  %v459_v53 = vsel %vm437_vm2, %v436_v50, -inf }
  0xfd   : > { %454 = vmax.xlane.f32.xlu1 %v453_v51 }
  0xff   : > { %457 = vmax.xlane.f32.xlu0 %v456_v52  ;;  %v992_v52 = vld [vmem:[%s1073_s14 + $0x58] sm:$0xff]  }
 0x101   : > { %460 = vmax.xlane.f32.xlu1 %v459_v53 }
 0x180   : > { %v440_v54 = vpop.xlane.xlu0 %439  ;;  %v446_v55 = vpop.xlane.xlu1 %445 }
 0x181   : > { %v462_v56 = vsub.f32 %v429_v24, %v440_v54  ;;  %v464_v57 = vsub.f32 %v431_v27, %v446_v55 }
 0x183   : > { %v470_v58 = vmul.f32 1.442695, %v462_v56  ;;  %v474_v59 = vmul.f32 1.442695, %v464_v57 }
 0x184   : > { %v443_v60 = vpop.xlane.xlu0 %442  ;;  %v449_v61 = vpop.xlane.xlu1 %448 }
 0x185   : > { %993 = vpow2.f32 %v470_v58  ;;  %v463_v62 = vsub.f32 %v430_v29, %v443_v60  ;;  %v465_v63 = vsub.f32 %v432_v31, %v449_v61  ;;  %v989_v31 = vld [vmem:[%s1073_s14 + $0x40] sm:$0xff]  }
 0x186   : > { %995 = vpow2.f32 %v474_v59  ;;  %929 = vmatpush3.bf16.msra.mxu0 %v989_v31 }
 0x187   : > { %v472_v1 = vmul.f32 1.442695, %v463_v62  ;;  %v476_v2 = vmul.f32 1.442695, %v465_v63  ;;  %940 = vmatprep.subr.bf16.mxu0 %v1033_v0 }
 0x188   : > { %v452_v3 = vpop.xlane.xlu0 %451 }
 0x189   : > { %997 = vpow2.f32 %v472_v1  ;;  %v466_v4 = vsub.f32 %v433_v44, %v452_v3 }
 0x18a   : > { %v455_v5 = vpop.xlane.xlu1 %454  ;;  %999 = vpow2.f32 %v476_v2 }
 0x18b   : > { %v478_v6 = vmul.f32 1.442695, %v466_v4  ;;  %v467_v7 = vsub.f32 %v434_v49, %v455_v5 }
 0x18c   : > { %v458_v8 = vpop.xlane.xlu0 %457 }
 0x18d   : > { %1001 = vpow2.f32 %v478_v6  ;;  %v480_v9 = vmul.f32 1.442695, %v467_v7  ;;  %v468_v10 = vsub.f32 %v435_v47, %v458_v8 }
 0x18e   : > { %v461_v11 = vpop.xlane.xlu1 %460 }
 0x18f   : > { %v994_v12 = vpop.eup %993  ;;  %1003 = vpow2.f32 %v480_v9  ;;  %v482_v13 = vmul.f32 1.442695, %v468_v10  ;;  %v469_v14 = vsub.f32 %v436_v50, %v461_v11 }
 0x190   : > { %v486_v15 = vsel %vm437_vm2, %v994_v12, 0.0  ;;  %v996_v16 = vpop.eup %995 }
 0x191   : > { %1005 = vpow2.f32 %v482_v13  ;;  %v484_v17 = vmul.f32 1.442695, %v469_v14  ;;  %487 = vadd.xlane.f32.xlu0 %v486_v15  ;;  %v492_v19 = vsel %vm437_vm2, %v996_v16, 0.0 }
 0x193   : > { %v998_v18 = vpop.eup %997  ;;  %1007 = vpow2.f32 %v484_v17 }
 0x194   : > { %v489_v20 = vsel %vm437_vm2, %v998_v18, 0.0  ;;  %v1000_v21 = vpop.eup %999 }
 0x195   : > { %493 = vadd.xlane.f32.xlu0 %v492_v19  ;;  %490 = vadd.xlane.f32.xlu1 %v489_v20  ;;  %v495_v24 = vsel %vm437_vm2, %v1000_v21, 0.0 }
 0x197   : > { %v1002_v22 = vpop.eup %1001 }
 0x198   : > { %v498_v23 = vsel %vm437_vm2, %v1002_v22, 0.0 }
 0x199   : > { %v1004_v25 = vpop.eup %1003  ;;  %499 = vadd.xlane.f32.xlu0 %v498_v23  ;;  %496 = vadd.xlane.f32.xlu1 %v495_v24 }
 0x19a   : > { %v501_v28 = vsel %vm437_vm2, %v1004_v25, 0.0 }
 0x19b   : > { %v1006_v26 = vpop.eup %1005 }
 0x19c   : > { %v504_v27 = vsel %vm437_vm2, %v1006_v26, 0.0 }
 0x19d   : > { %v1008_v29 = vpop.eup %1007  ;;  %505 = vadd.xlane.f32.xlu0 %v504_v27  ;;  %502 = vadd.xlane.f32.xlu1 %v501_v28 }
 0x19e   : > { %v507_v30 = vsel %vm437_vm2, %v1008_v29, 0.0 }
 0x1a1   : > { %508 = vadd.xlane.f32.xlu1 %v507_v30 }
 0x21e   : > { %v488_v33 = vpop.xlane.xlu0 %487 }
 0x21f   : > { %1009 = vrcp.f32 %v488_v33 }
 0x222   : > { %v494_v34 = vpop.xlane.xlu0 %493  ;;  %v491_v35 = vpop.xlane.xlu1 %490 }
 0x223   : > { %1011 = vrcp.f32 %v491_v35 }
 0x224   : > { %1013 = vrcp.f32 %v494_v34 }
 0x226   : > { %v500_v36 = vpop.xlane.xlu0 %499  ;;  %v497_v37 = vpop.xlane.xlu1 %496 }
 0x227   : > { %1015 = vrcp.f32 %v497_v37 }
 0x228   : > { %1017 = vrcp.f32 %v500_v36 }
 0x229   : > { %v1010_v40 = vpop.eup %1009 }
 0x22a   : > { %v506_v38 = vpop.xlane.xlu0 %505  ;;  %v503_v39 = vpop.xlane.xlu1 %502  ;;  %v518_v43 = vmul.f32 %v1010_v40, %v994_v12 }
 0x22b   : > { %1019 = vrcp.f32 %v503_v39 }
 0x22c   : > { %1021 = vrcp.f32 %v506_v38 }
 0x22d   : > { %v1012_v41 = vpop.eup %1011 }
 0x22e   : > { %v509_v42 = vpop.xlane.xlu1 %508  ;;  %v519_v44 = vmul.f32 %v1012_v41, %v998_v18  ;;  %v1014_v45 = vpop.eup %1013 }
 0x22f   : > { %1023 = vrcp.f32 %v509_v42  ;;  %v520_v49 = vmul.f32 %v1014_v45, %v996_v16 }
 0x230   : > { %v526_v47 = vpack.c.bf16 %v519_v44, %v518_v43 }
 0x231   : > { %v1016_v48 = vpop.eup %1015 }
 0x232   : > { %v521_v50 = vmul.f32 %v1016_v48, %v1000_v21  ;;  %931 = vmatmul.mubr.msk.bf16.vlgmr.msra.gmra.mrb[8].mxu0 %vm437_vm2, %v526_v47  ;;  %v1018_v51 = vpop.eup %1017 }
 0x233   : > { %941 = vmatpush3.bf16.msra.mxu0 %v991_v46  ;;  %942 = vmatprep.mubr.msk.bf16.mxu0 %vm1034_vm0, %v1033_v0  ;;  %v522_v56 = vmul.f32 %v1018_v51, %v1002_v22 }
 0x234   : > { %v527_v53 = vpack.c.bf16 %v521_v50, %v520_v49 }
 0x235   : > { %v1020_v54 = vpop.eup %1019 }
 0x236   : > { %v1022_v55 = vpop.eup %1021  ;;  %v523_v57 = vmul.f32 %v1020_v54, %v1004_v25  ;;  %937 = vmatmul.mubr.msk.bf16.vlgmr.msra.gmra.mrb[8].mxu1 %vm437_vm2, %v527_v53 }
 0x237   : > { %947 = vmatpush3.bf16.msra.mxu1 %v992_v52  ;;  %948 = vmatprep.mubr.msk.bf16.mxu1 %vm1034_vm0, %v1033_v0  ;;  %v524_v60 = vmul.f32 %v1022_v55, %v1006_v26 }
 0x238   : > { %v528_v59 = vpack.c.bf16 %v523_v57, %v522_v56 }
 0x239   : > { %v1024_v58 = vpop.eup %1023 }
 0x23a   : > { %v525_v61 = vmul.f32 %v1024_v58, %v1008_v29  ;;  %943 = vmatmul.mubr.msk.bf16.vlgmr.msra.gmra.mrb[12].mxu0 %vm437_vm2, %v528_v59 }
 0x23c   : > { %v529_v62 = vpack.c.bf16 %v525_v61, %v524_v60 }
 0x23e   : > { %949 = vmatmul.mubr.msk.bf16.vlgmr.msra.gmra.mrb[12].mxu1 %vm437_vm2, %v529_v62 }
 0x305   : > { %v573_v63 = vpop.f32.mrb[8].mxu0 }
 0x306   : > { %v932_v1 = vpop.f32.mrb[9].mxu0 }
 0x307   : > { %v576_v2 = vpop.f32.mrb[10].mxu0 }
 0x308   : > { %v933_v3 = vpop.f32.mrb[11].mxu0 }
 0x309   : > { %v623_v4 = vpop.f32.mrb[8].mxu1 }
 0x30a   : > { %v938_v5 = vpop.f32.mrb[9].mxu1 }
 0x30b   : > { %v626_v6 = vpop.f32.mrb[10].mxu1 }
 0x30c   : > { %v966_v7 = vpack.i.bf16 %v626_v6, %v623_v4  ;;  %v939_v8 = vpop.f32.mrb[11].mxu1 }
 0x30d   : > { %v673_v9 = vpop.f32.mrb[12].mxu0 }
 0x30e   : > { %967 = vrot.lane.b32.xlu0 %v966_v7, %s1035_s18  ;;  %v944_v0 = vpop.f32.mrb[13].mxu0 }
 0x30f   : > { %v676_v10 = vpop.f32.mrb[14].mxu0 }
 0x310   : > { %v971_v11 = vpack.i.bf16 %v676_v10, %v673_v9  ;;  %v945_v12 = vpop.f32.mrb[15].mxu0 }
 0x311   : > { %v723_v13 = vpop.f32.mrb[12].mxu1 }
 0x312   : > { %v950_v14 = vpop.f32.mrb[13].mxu1  ;;  %972 = vrot.lane.b32.xlu1 %v971_v11, %s1036_s19 }
 0x313   : > { %v726_v15 = vpop.f32.mrb[14].mxu1 }
 0x314   : > { %v976_v16 = vpack.i.bf16 %v726_v15, %v723_v13  ;;  %v951_v17 = vpop.f32.mrb[15].mxu1 }
 0x316   : > { %977 = vrot.lane.b32.xlu1 %v976_v16, %s1037_s20 }
 0x380   : > { %v968_v18 = vpop.permute.xlu0 %967 }
 0x381   : > { %v970_v20 = vunpack.i.h.bf16 %v968_v18  ;;  %v969_v21 = vunpack.i.l.bf16 %v968_v18 }
 0x383   : > { %v754_v25 = vsel %vm196_vm1, %v573_v63, %v969_v21  ;;  %v755_v26 = vsel %vm196_vm1, %v576_v2, %v970_v20 }
 0x384   : > { %v973_v19 = vpop.permute.xlu1 %972 }
 0x385   : > { %v975_v22 = vunpack.i.h.bf16 %v973_v19  ;;  %v974_v23 = vunpack.i.l.bf16 %v973_v19 }
 0x387   : > { %v757_v29 = vsel %vm437_vm2, %v755_v26, %v975_v22  ;;  %v756_v30 = vsel %vm437_vm2, %v754_v25, %v974_v23 }
 0x388   : > { %v978_v24 = vpop.permute.xlu1 %977 }
 0x389   : > { %v980_v27 = vunpack.i.h.bf16 %v978_v24  ;;  %v979_v28 = vunpack.i.l.bf16 %v978_v24 }
 0x38b   : > { %v759_v31 = vsel %vm758_vm3, %v756_v30, %v979_v28  ;;  %v760_v32 = vsel %vm758_vm3, %v757_v29, %v980_v27 }
 0x38c   : > { %v886_v33 = vpack.c.bf16 %v759_v31, %v759_v31  ;;  %v887_v34 = vpack.c.bf16 %v760_v32, %v760_v32 }
 0x38e   : > { %770 = vst.msk [vmem:[%s157_s24] sm:$0xf] %vm769_vm4, %v886_v33  ;;  %771 = vst.msk [vmem:[%s157_s24 + $0x4] sm:$0xf] %vm769_vm4, %v887_v34 }
 0x38f PF: > { %s12_s9 = sadd.s32 1, %s1031_s9  }
 0x390   : > { %p9_p4 = scmp.ge.s32.totalorder %s12_s9, 6  }
 0x392   :  { %11 = sbr.rel (!%p9_p4) target bundleno = 1 (0x1), region = 63 }

// kernel: multimodal_forward.68
= control target key start
LH: loop header
LB: loop body
LE: loop exit
PB: predicated region body
PF: predicated region fallthrough
CT: control target
= control target key end

     0   :  { %vm28_vm0 = vcmask 261120   ;;  %v430_v1 = vmov 0.0   ;;  %s625_s1 = inlined_call_operand.vmem [shape: bf16[32,32], index: 1, kind: input, shape index: {}]   ;;  %s626_s0 = inlined_call_operand.vmem [shape: bf16[64,32], index: 0, kind: input, shape index: {}]   ;;  %s627_s2 = inlined_call_operand.vmem [shape: f32[1,32], index: 2, kind: input, shape index: {}]   ;;  %s628_s3 = inlined_call_operand.vmem [shape: f32[64,32], index: 3, kind: input, shape index: {}]   ;;  %s629_s4 = inlined_call_operand.vmem [shape: f32[1,32], index: 4, kind: input, shape index: {}]   ;;  %s630_s5 = inlined_call_operand.vmem [shape: f32[1,32], index: 5, kind: input, shape index: {}]   ;;  %s631_s6 = inlined_call_operand.vmem [shape: f32[64,32], index: 6, kind: output, shape index: {}]  }
   0x1   :  { %v408_v0 = vld [vmem:[%s625_s1] sm:$0xff]   ;;  %31 = vst.msk [vmem:[#allocation2 + $0x10] sm:$0xff] %vm28_vm0, %v430_v1  ;;  %29 = vst.msk [vmem:[#allocation2] sm:$0xff] %vm28_vm0, %v430_v1  ;;  %v409_v2 = vld [vmem:[%s625_s1 + $0x8] sm:$0xff]  }
   0x2   :  { %30 = vst.msk [vmem:[#allocation2 + $0x8] sm:$0xff] %vm28_vm0, %v430_v1  ;;  %32 = vst.msk [vmem:[#allocation2 + $0x18] sm:$0xff] %vm28_vm0, %v430_v1  ;;  %391 = vmatprep.subr.bf16.mxu0 %v408_v0  ;;  %403 = vmatprep.subr.bf16.mxu1 %v408_v0  ;;  %v410_v3 = vld [vmem:[%s626_s0] sm:$0xff]   ;;  %v412_v4 = vld [vmem:[%s626_s0 + $0x10] sm:$0xff]  }
   0x3   :  { %33 = vst.msk [vmem:[#allocation2 + $0x20] sm:$0xff] %vm28_vm0, %v430_v1  ;;  %34 = vst.msk [vmem:[#allocation2 + $0x28] sm:$0xff] %vm28_vm0, %v430_v1  ;;  %392 = vmatpush3.bf16.msra.mxu0 %v408_v0  ;;  %405 = vmatpush3.bf16.msra.mxu1 %v408_v0  ;;  %v411_v5 = vld [vmem:[%s626_s0 + $0x8] sm:$0xff]   ;;  %v413_v6 = vld [vmem:[%s626_s0 + $0x18] sm:$0xff]  }
   0x4   :  { %35 = vst.msk [vmem:[#allocation2 + $0x30] sm:$0xff] %vm28_vm0, %v430_v1  ;;  %36 = vst.msk [vmem:[#allocation2 + $0x38] sm:$0xff] %vm28_vm0, %v430_v1  ;;  %393 = vmatprep.subr.bf16.mxu0 %v409_v2  ;;  %404 = vmatprep.subr.bf16.mxu1 %v409_v2  ;;  %v382_v31 = vld [vmem:[%s627_s2] ss:$0 sm:$0xff]  ;;  %v211_v33 = vld [vmem:[%s628_s3 + $0x10] sm:$0xff] }
   0x5   :  { %395 = vmatprep.mubr.msk.bf16.mxu0 %vm28_vm0, %v410_v3  ;;  %399 = vmatprep.mubr.msk.bf16.mxu1 %vm28_vm0, %v412_v4  ;;  %v209_v34 = vld [vmem:[%s628_s3] sm:$0xff]  ;;  %v212_v41 = vld [vmem:[%s628_s3 + $0x18] sm:$0xff]  ;;  %v214_v53 = vld [vmem:[%s628_s3 + $0x28] sm:$0xff] }
   0x6   :  { %v213_v38 = vld [vmem:[%s628_s3 + $0x20] sm:$0xff]  ;;  %v210_v56 = vld [vmem:[%s628_s3 + $0x8] sm:$0xff]  ;;  %v216_v63 = vld [vmem:[%s628_s3 + $0x38] sm:$0xff] }
   0x7   :  { %394 = vmatpush3.bf16.msra.mxu0 %v409_v2  ;;  %406 = vmatpush3.bf16.msra.mxu1 %v409_v2  ;;  %v215_v1 = vld [vmem:[%s628_s3 + $0x30] sm:$0xff] }
   0x8   :  { %v39_v7 = vld [vmem:[#allocation2 + $0x10] sm:$0xff]  ;;  %v37_v9 = vld [vmem:[#allocation2] sm:$0xff] }
   0x9   :  { %v40_v13 = vld [vmem:[#allocation2 + $0x18] sm:$0xff]  ;;  %v38_v19 = vld [vmem:[#allocation2 + $0x8] sm:$0xff] }
   0xa   :  { %396 = vmatmul.mubr.msk.bf16.vlgmr.msra.gmra.mrb[0].mxu0 %vm28_vm0, %v411_v5  ;;  %400 = vmatmul.mubr.msk.bf16.vlgmr.msra.gmra.mrb[0].mxu1 %vm28_vm0, %v413_v6  ;;  %v41_v10 = vld [vmem:[#allocation2 + $0x20] sm:$0xff]  ;;  %v42_v20 = vld [vmem:[#allocation2 + $0x28] sm:$0xff] }
   0xb   :  { %v43_v8 = vld [vmem:[#allocation2 + $0x30] sm:$0xff]  ;;  %v44_v14 = vld [vmem:[#allocation2 + $0x38] sm:$0xff] }
  0xdd   :  { %v397_v11 = vpop.f32.mrb[0].mxu0  ;;  %v401_v12 = vpop.f32.mrb[0].mxu1 }
  0xde   :  { %v169_v15 = vadd.f32 %v397_v11, %v39_v7  ;;  %v136_v16 = vpop.f32.mrb[1].mxu0  ;;  %v173_v17 = vadd.f32 %v401_v12, %v43_v8  ;;  %v152_v18 = vpop.f32.mrb[1].mxu1 }
  0xdf   :  { %v167_v21 = vadd.f32 %v136_v16, %v37_v9  ;;  %v398_v22 = vpop.f32.mrb[2].mxu0  ;;  %v171_v23 = vadd.f32 %v152_v18, %v41_v10  ;;  %v402_v24 = vpop.f32.mrb[2].mxu1 }
  0xe0   :  { %177 = vst.msk [vmem:[#allocation2 + $0x10] sm:$0xff] %vm28_vm0, %v169_v15  ;;  %181 = vst.msk [vmem:[#allocation2 + $0x30] sm:$0xff] %vm28_vm0, %v173_v17  ;;  %v170_v25 = vadd.f32 %v398_v22, %v40_v13  ;;  %v139_v26 = vpop.f32.mrb[3].mxu0  ;;  %v174_v27 = vadd.f32 %v402_v24, %v44_v14  ;;  %v155_v28 = vpop.f32.mrb[3].mxu1 }
  0xe1   :  { %175 = vst.msk [vmem:[#allocation2] sm:$0xff] %vm28_vm0, %v167_v21  ;;  %179 = vst.msk [vmem:[#allocation2 + $0x20] sm:$0xff] %vm28_vm0, %v171_v23  ;;  %v168_v29 = vadd.f32 %v139_v26, %v38_v19  ;;  %v172_v30 = vadd.f32 %v155_v28, %v42_v20 }
  0xe2   :  { %178 = vst.msk [vmem:[#allocation2 + $0x18] sm:$0xff] %vm28_vm0, %v170_v25  ;;  %182 = vst.msk [vmem:[#allocation2 + $0x38] sm:$0xff] %vm28_vm0, %v174_v27 }
  0xe3   :  { %176 = vst.msk [vmem:[#allocation2 + $0x8] sm:$0xff] %vm28_vm0, %v168_v29  ;;  %180 = vst.msk [vmem:[#allocation2 + $0x28] sm:$0xff] %vm28_vm0, %v172_v30 }
  0xe7   :  { %v188_v32 = vld [vmem:[#allocation2 + $0x10] sm:$0xff] }
  0xe8   :  { %v203_v35 = vadd.f32 %v382_v31, %v188_v32  ;;  %v186_v36 = vld [vmem:[#allocation2] sm:$0xff]  ;;  %v192_v57 = vld [vmem:[#allocation2 + $0x30] sm:$0xff] }
  0xe9   :  { %v190_v37 = vld [vmem:[#allocation2 + $0x20] sm:$0xff]  ;;  %v201_v39 = vadd.f32 %v382_v31, %v186_v36  ;;  %v189_v40 = vld [vmem:[#allocation2 + $0x18] sm:$0xff]  ;;  %v207_v0 = vadd.f32 %v382_v31, %v192_v57 }
  0xea   :  { %v205_v42 = vadd.f32 %v382_v31, %v190_v37  ;;  %v219_v43 = vadd.f32 %v211_v33, %v203_v35  ;;  %v204_v44 = vadd.f32 %v382_v31, %v189_v40  ;;  %v191_v45 = vld [vmem:[#allocation2 + $0x28] sm:$0xff]  ;;  %v193_v55 = vld [vmem:[#allocation2 + $0x38] sm:$0xff] }
  0xeb   :  { %v187_v46 = vld [vmem:[#allocation2 + $0x8] sm:$0xff]  ;;  %v217_v47 = vadd.f32 %v209_v34, %v201_v39  ;;  %v206_v51 = vadd.f32 %v382_v31, %v191_v45  ;;  %v208_v61 = vadd.f32 %v382_v31, %v193_v55  ;;  %v223_v5 = vadd.f32 %v215_v1, %v207_v0 }
  0xec   :  { %v221_v48 = vadd.f32 %v213_v38, %v205_v42  ;;  %v231_v49 = vsel %vm28_vm0, %v219_v43, 0.0  ;;  %v220_v50 = vadd.f32 %v212_v41, %v204_v44  ;;  %v202_v54 = vadd.f32 %v382_v31, %v187_v46 }
  0xed   :  { %232 = vadd.xlane.f32.xlu1 %v231_v49  ;;  %v225_v52 = vsel %vm28_vm0, %v217_v47, 0.0  ;;  %v222_v60 = vadd.f32 %v214_v53, %v206_v51  ;;  %v224_v3 = vadd.f32 %v216_v63, %v208_v61  ;;  %v243_v7 = vsel %vm28_vm0, %v223_v5, 0.0 }
  0xee   :  { %226 = vadd.xlane.f32.xlu0 %v225_v52  ;;  %v237_v58 = vsel %vm28_vm0, %v221_v48, 0.0  ;;  %v234_v59 = vsel %vm28_vm0, %v220_v50, 0.0  ;;  %v218_v62 = vadd.f32 %v210_v56, %v202_v54 }
  0xef   :  { %v240_v2 = vsel %vm28_vm0, %v222_v60, 0.0  ;;  %v246_v6 = vsel %vm28_vm0, %v224_v3, 0.0 }
  0xf0   :  { %v228_v4 = vsel %vm28_vm0, %v218_v62, 0.0 }
  0xf1   :  { %235 = vadd.xlane.f32.xlu1 %v234_v59 }
  0xf2   :  { %238 = vadd.xlane.f32.xlu0 %v237_v58 }
  0xf5   :  { %241 = vadd.xlane.f32.xlu1 %v240_v2 }
  0xf6   :  { %229 = vadd.xlane.f32.xlu0 %v228_v4  ;;  %v383_v4 = vld [vmem:[%s629_s4] ss:$0 sm:$0xff] }
  0xf9   :  { %247 = vadd.xlane.f32.xlu1 %v246_v6 }
  0xfa   :  { %244 = vadd.xlane.f32.xlu0 %v243_v7 }
 0x17a   :  { %v233_v8 = vpop.xlane.xlu1 %232 }
 0x17b   :  { %v252_v9 = vmul.f32 0.03125, %v233_v8  ;;  %v227_v10 = vpop.xlane.xlu0 %226  ;;  %v384_v8 = vld [vmem:[%s630_s5] ss:$0 sm:$0xff] }
 0x17c   :  { %v250_v11 = vmul.f32 0.03125, %v227_v10 }
 0x17d   :  { %v539_v12 = vsub.f32 %v219_v43, %v252_v9 }
 0x17e   :  { %v541_v13 = vsub.f32 %v217_v47, %v250_v11  ;;  %v236_v14 = vpop.xlane.xlu1 %235 }
 0x17f   :  { %v253_v15 = vmul.f32 0.03125, %v236_v14  ;;  %v239_v16 = vpop.xlane.xlu0 %238  ;;  %v268_v17 = vmul.f32 %v539_v12, %v539_v12 }
 0x180   :  { %v254_v18 = vmul.f32 0.03125, %v239_v16  ;;  %v266_v21 = vmul.f32 %v541_v13, %v541_v13 }
 0x181   :  { %v545_v19 = vsub.f32 %v220_v50, %v253_v15  ;;  %v280_v20 = vsel %vm28_vm0, %v268_v17, 0.0 }
 0x182   :  { %v550_v22 = vsub.f32 %v221_v48, %v254_v18  ;;  %v242_v23 = vpop.xlane.xlu1 %241  ;;  %281 = vadd.xlane.f32.xlu0 %v280_v20  ;;  %v274_v29 = vsel %vm28_vm0, %v266_v21, 0.0 }
 0x183   :  { %v255_v24 = vmul.f32 0.03125, %v242_v23  ;;  %v230_v25 = vpop.xlane.xlu0 %229  ;;  %v269_v26 = vmul.f32 %v545_v19, %v545_v19 }
 0x184   :  { %v251_v27 = vmul.f32 0.03125, %v230_v25  ;;  %v270_v30 = vmul.f32 %v550_v22, %v550_v22 }
 0x185   :  { %v283_v28 = vsel %vm28_vm0, %v269_v26, 0.0  ;;  %v558_v31 = vsub.f32 %v222_v60, %v255_v24 }
 0x186   :  { %v560_v32 = vsub.f32 %v218_v62, %v251_v27  ;;  %284 = vadd.xlane.f32.xlu1 %v283_v28  ;;  %v248_v33 = vpop.xlane.xlu1 %247  ;;  %275 = vadd.xlane.f32.xlu0 %v274_v29  ;;  %v286_v38 = vsel %vm28_vm0, %v270_v30, 0.0 }
 0x187   :  { %v257_v34 = vmul.f32 0.03125, %v248_v33  ;;  %v245_v35 = vpop.xlane.xlu0 %244  ;;  %v271_v42 = vmul.f32 %v558_v31, %v558_v31 }
 0x188   :  { %v256_v36 = vmul.f32 0.03125, %v245_v35  ;;  %v267_v37 = vmul.f32 %v560_v32, %v560_v32 }
 0x189   :  { %v565_v39 = vsub.f32 %v224_v3, %v257_v34  ;;  %v289_v44 = vsel %vm28_vm0, %v271_v42, 0.0 }
 0x18a   :  { %v567_v40 = vsub.f32 %v223_v5, %v256_v36  ;;  %287 = vadd.xlane.f32.xlu0 %v286_v38  ;;  %v277_v41 = vsel %vm28_vm0, %v267_v37, 0.0 }
 0x18b   :  { %278 = vadd.xlane.f32.xlu1 %v277_v41  ;;  %v273_v46 = vmul.f32 %v565_v39, %v565_v39 }
 0x18c   :  { %v272_v43 = vmul.f32 %v567_v40, %v567_v40 }
 0x18d   :  { %v295_v47 = vsel %vm28_vm0, %v273_v46, 0.0 }
 0x18e   :  { %v292_v45 = vsel %vm28_vm0, %v272_v43, 0.0 }
 0x18f   :  { %290 = vadd.xlane.f32.xlu1 %v289_v44  ;;  %293 = vadd.xlane.f32.xlu0 %v292_v45 }
 0x193   :  { %296 = vadd.xlane.f32.xlu1 %v295_v47 }
 0x20f   :  { %v282_v48 = vpop.xlane.xlu0 %281 }
 0x210   :  { %v300_v49 = vmul.f32 0.03125, %v282_v48 }
 0x212   :  { %v308_v50 = vadd.f32 1e-12, %v300_v49 }
 0x213   :  { %v285_v51 = vpop.xlane.xlu1 %284  ;;  %v276_v52 = vpop.xlane.xlu0 %275 }
 0x214   :  { %414 = vrsqrt.f32 %v308_v50  ;;  %v301_v53 = vmul.f32 0.03125, %v285_v51  ;;  %v298_v54 = vmul.f32 0.03125, %v276_v52 }
 0x216   :  { %v309_v55 = vadd.f32 1e-12, %v301_v53  ;;  %v306_v56 = vadd.f32 1e-12, %v298_v54 }
 0x217   :  { %v288_v57 = vpop.xlane.xlu0 %287 }
 0x218   :  { %416 = vrsqrt.f32 %v309_v55  ;;  %v302_v58 = vmul.f32 0.03125, %v288_v57  ;;  %v279_v59 = vpop.xlane.xlu1 %278 }
 0x219   :  { %418 = vrsqrt.f32 %v306_v56  ;;  %v299_v60 = vmul.f32 0.03125, %v279_v59 }
 0x21a   :  { %v310_v61 = vadd.f32 1e-12, %v302_v58 }
 0x21b   :  { %v307_v62 = vadd.f32 1e-12, %v299_v60 }
 0x21c   :  { %420 = vrsqrt.f32 %v310_v61  ;;  %v291_v63 = vpop.xlane.xlu1 %290  ;;  %v294_v0 = vpop.xlane.xlu0 %293 }
 0x21d   :  { %422 = vrsqrt.f32 %v307_v62  ;;  %v303_v1 = vmul.f32 0.03125, %v291_v63  ;;  %v304_v2 = vmul.f32 0.03125, %v294_v0 }
 0x21e   :  { %v415_v3 = vpop.eup %414 }
 0x21f   :  { %v324_v5 = vmul.f32 %v415_v3, %v539_v12  ;;  %v311_v6 = vadd.f32 1e-12, %v303_v1  ;;  %v312_v7 = vadd.f32 1e-12, %v304_v2 }
 0x220   :  { %v297_v9 = vpop.xlane.xlu1 %296 }
 0x221   :  { %v339_v10 = vmul.f32 %v383_v4, %v324_v5  ;;  %424 = vrsqrt.f32 %v311_v6  ;;  %v305_v11 = vmul.f32 0.03125, %v297_v9 }
 0x222   :  { %v417_v14 = vpop.eup %416  ;;  %426 = vrsqrt.f32 %v312_v7 }
 0x223   :  { %v419_v15 = vpop.eup %418  ;;  %v354_v16 = vadd.f32 %v384_v8, %v339_v10  ;;  %v325_v17 = vmul.f32 %v417_v14, %v545_v19  ;;  %v313_v18 = vadd.f32 1e-12, %v305_v11 }
 0x224   :  { %v322_v20 = vmul.f32 %v419_v15, %v541_v13 }
 0x225   :  { %362 = vst.msk [vmem:[%s631_s6 + $0x10] sm:$0xff] %vm28_vm0, %v354_v16  ;;  %v340_v12 = vmul.f32 %v383_v4, %v325_v17  ;;  %428 = vrsqrt.f32 %v313_v18 }
 0x226   :  { %v421_v21 = vpop.eup %420  ;;  %v337_v23 = vmul.f32 %v383_v4, %v322_v20 }
 0x227   :  { %v423_v24 = vpop.eup %422  ;;  %v355_v25 = vadd.f32 %v384_v8, %v340_v12  ;;  %v326_v26 = vmul.f32 %v421_v21, %v550_v22 }
 0x228   :  { %v352_v27 = vadd.f32 %v384_v8, %v337_v23  ;;  %v323_v28 = vmul.f32 %v423_v24, %v560_v32 }
 0x229   :  { %363 = vst.msk [vmem:[%s631_s6 + $0x18] sm:$0xff] %vm28_vm0, %v355_v25  ;;  %v341_v13 = vmul.f32 %v383_v4, %v326_v26 }
 0x22a   :  { %360 = vst.msk [vmem:[%s631_s6] sm:$0xff] %vm28_vm0, %v352_v27  ;;  %v338_v19 = vmul.f32 %v383_v4, %v323_v28 }
 0x22b   :  { %v425_v29 = vpop.eup %424  ;;  %v356_v30 = vadd.f32 %v384_v8, %v341_v13 }
 0x22c   :  { %v427_v33 = vpop.eup %426  ;;  %v353_v34 = vadd.f32 %v384_v8, %v338_v19  ;;  %v327_v22 = vmul.f32 %v425_v29, %v558_v31 }
 0x22d   :  { %364 = vst.msk [vmem:[%s631_s6 + $0x20] sm:$0xff] %vm28_vm0, %v356_v30  ;;  %v328_v32 = vmul.f32 %v427_v33, %v567_v40 }
 0x22e   :  { %361 = vst.msk [vmem:[%s631_s6 + $0x8] sm:$0xff] %vm28_vm0, %v353_v34  ;;  %v342_v35 = vmul.f32 %v383_v4, %v327_v22 }
 0x22f   :  { %v429_v36 = vpop.eup %428  ;;  %v343_v37 = vmul.f32 %v383_v4, %v328_v32 }
 0x230   :  { %v357_v38 = vadd.f32 %v384_v8, %v342_v35  ;;  %v329_v41 = vmul.f32 %v429_v36, %v565_v39 }
 0x231   :  { %v358_v42 = vadd.f32 %v384_v8, %v343_v37 }
 0x232   :  { %365 = vst.msk [vmem:[%s631_s6 + $0x28] sm:$0xff] %vm28_vm0, %v357_v38  ;;  %v344_v31 = vmul.f32 %v383_v4, %v329_v41 }
 0x233   :  { %366 = vst.msk [vmem:[%s631_s6 + $0x30] sm:$0xff] %vm28_vm0, %v358_v42 }
 0x234   :  { %v359_v40 = vadd.f32 %v384_v8, %v344_v31 }
 0x236   :  { %367 = vst.msk [vmem:[%s631_s6 + $0x38] sm:$0xff] %vm28_vm0, %v359_v40 }

// kernel: multimodal_forward.69
= control target key start
LH: loop header
LB: loop body
LE: loop exit
PB: predicated region body
PF: predicated region fallthrough
CT: control target
= control target key end

     0   :  { %vm19_vm0 = vcmask 523264   ;;  %v366_v1 = vmov 0.0   ;;  %vm64_vm1 = vcmask 261120   ;;  %vm289_vm2 = vcmask 519168   ;;  %s528_s1 = inlined_call_operand.vmem [shape: bf16[32,64], index: 1, kind: input, shape index: {}]   ;;  %s529_s0 = inlined_call_operand.vmem [shape: f32[64,32], index: 0, kind: input, shape index: {}]   ;;  %s530_s2 = inlined_call_operand.vmem [shape: f32[1,64], index: 2, kind: input, shape index: {}]   ;;  %s531_s3 = inlined_call_operand.vmem [shape: bf16[64,64], index: 3, kind: output, shape index: {}]  }
   0x1   :  { %v348_v0 = vld [vmem:[%s528_s1] sm:$0xff]   ;;  %22 = vst.msk [vmem:[#allocation2 + $0x10] sm:$0xff] %vm19_vm0, %v366_v1  ;;  %20 = vst.msk [vmem:[#allocation2] sm:$0xff] %vm19_vm0, %v366_v1  ;;  %v349_v2 = vld [vmem:[%s528_s1 + $0x8] sm:$0xff]  }
   0x2   :  { %21 = vst.msk [vmem:[#allocation2 + $0x8] sm:$0xff] %vm19_vm0, %v366_v1  ;;  %23 = vst.msk [vmem:[#allocation2 + $0x18] sm:$0xff] %vm19_vm0, %v366_v1  ;;  %331 = vmatprep.subr.bf16.mxu0 %v348_v0  ;;  %343 = vmatprep.subr.bf16.mxu1 %v348_v0  ;;  %v36_v3 = vld [vmem:[%s529_s0] sm:$0xff]  ;;  %v37_v4 = vld [vmem:[%s529_s0 + $0x8] sm:$0xff] }
   0x3   :  { %24 = vst.msk [vmem:[#allocation2 + $0x20] sm:$0xff] %vm19_vm0, %v366_v1  ;;  %25 = vst.msk [vmem:[#allocation2 + $0x28] sm:$0xff] %vm19_vm0, %v366_v1  ;;  %v40_v5 = vld [vmem:[%s529_s0 + $0x20] sm:$0xff]  ;;  %332 = vmatpush3.bf16.msra.mxu0 %v348_v0  ;;  %345 = vmatpush3.bf16.msra.mxu1 %v348_v0  ;;  %v44_v6 = vpack.c.bf16 %v37_v4, %v36_v3  ;;  %v41_v7 = vld [vmem:[%s529_s0 + $0x28] sm:$0xff] }
   0x4   :  { %26 = vst.msk [vmem:[#allocation2 + $0x30] sm:$0xff] %vm19_vm0, %v366_v1  ;;  %27 = vst.msk [vmem:[#allocation2 + $0x38] sm:$0xff] %vm19_vm0, %v366_v1  ;;  %v38_v8 = vld [vmem:[%s529_s0 + $0x10] sm:$0xff]  ;;  %v39_v9 = vld [vmem:[%s529_s0 + $0x18] sm:$0xff]  ;;  %333 = vmatprep.subr.bf16.mxu0 %v349_v2  ;;  %344 = vmatprep.subr.bf16.mxu1 %v349_v2  ;;  %v46_v10 = vpack.c.bf16 %v41_v7, %v40_v5 }
   0x5   :  { %v42_v11 = vld [vmem:[%s529_s0 + $0x30] sm:$0xff]  ;;  %v43_v12 = vld [vmem:[%s529_s0 + $0x38] sm:$0xff]  ;;  %335 = vmatprep.mubr.msk.bf16.mxu0 %vm64_vm1, %v44_v6  ;;  %v45_v13 = vpack.c.bf16 %v39_v9, %v38_v8  ;;  %v308_v39 = vld [vmem:[%s530_s2] ss:$0 sm:$0xff] }
   0x6   :  { %339 = vmatprep.mubr.msk.bf16.mxu1 %vm64_vm1, %v46_v10  ;;  %v47_v14 = vpack.c.bf16 %v43_v12, %v42_v11 }
   0x7   :  { %334 = vmatpush3.bf16.msra.mxu0 %v349_v2  ;;  %346 = vmatpush3.bf16.msra.mxu1 %v349_v2 }
   0x8   :  { %v30_v15 = vld [vmem:[#allocation2 + $0x10] sm:$0xff]  ;;  %v28_v17 = vld [vmem:[#allocation2] sm:$0xff] }
   0x9   :  { %v31_v21 = vld [vmem:[#allocation2 + $0x18] sm:$0xff]  ;;  %v29_v27 = vld [vmem:[#allocation2 + $0x8] sm:$0xff] }
   0xa   :  { %336 = vmatmul.mubr.msk.bf16.vlgmr.msra.gmra.mrb[0].mxu0 %vm64_vm1, %v45_v13  ;;  %340 = vmatmul.mubr.msk.bf16.vlgmr.msra.gmra.mrb[0].mxu1 %vm64_vm1, %v47_v14  ;;  %v32_v18 = vld [vmem:[#allocation2 + $0x20] sm:$0xff]  ;;  %v33_v28 = vld [vmem:[#allocation2 + $0x28] sm:$0xff] }
   0xb   :  { %v34_v16 = vld [vmem:[#allocation2 + $0x30] sm:$0xff]  ;;  %v35_v22 = vld [vmem:[#allocation2 + $0x38] sm:$0xff] }
  0xdd   :  { %v337_v19 = vpop.f32.mrb[0].mxu0  ;;  %v341_v20 = vpop.f32.mrb[0].mxu1 }
  0xde   :  { %v144_v23 = vadd.f32 %v337_v19, %v30_v15  ;;  %v148_v24 = vadd.f32 %v341_v20, %v34_v16  ;;  %v111_v25 = vpop.f32.mrb[1].mxu0  ;;  %v127_v26 = vpop.f32.mrb[1].mxu1 }
  0xdf   :  { %v142_v29 = vadd.f32 %v111_v25, %v28_v17  ;;  %v146_v30 = vadd.f32 %v127_v26, %v32_v18  ;;  %v338_v31 = vpop.f32.mrb[2].mxu0  ;;  %v342_v32 = vpop.f32.mrb[2].mxu1 }
  0xe0   :  { %153 = vst.msk [vmem:[#allocation2 + $0x10] sm:$0xff] %vm19_vm0, %v144_v23  ;;  %157 = vst.msk [vmem:[#allocation2 + $0x30] sm:$0xff] %vm19_vm0, %v148_v24  ;;  %v145_v33 = vadd.f32 %v338_v31, %v31_v21  ;;  %v149_v34 = vadd.f32 %v342_v32, %v35_v22  ;;  %v114_v35 = vpop.f32.mrb[3].mxu0  ;;  %v130_v36 = vpop.f32.mrb[3].mxu1 }
  0xe1   :  { %151 = vst.msk [vmem:[#allocation2] sm:$0xff] %vm19_vm0, %v142_v29  ;;  %155 = vst.msk [vmem:[#allocation2 + $0x20] sm:$0xff] %vm19_vm0, %v146_v30  ;;  %v143_v37 = vadd.f32 %v114_v35, %v29_v27  ;;  %v147_v38 = vadd.f32 %v130_v36, %v33_v28 }
  0xe2   :  { %154 = vst.msk [vmem:[#allocation2 + $0x18] sm:$0xff] %vm19_vm0, %v145_v33  ;;  %158 = vst.msk [vmem:[#allocation2 + $0x38] sm:$0xff] %vm19_vm0, %v149_v34 }
  0xe3   :  { %152 = vst.msk [vmem:[#allocation2 + $0x8] sm:$0xff] %vm19_vm0, %v143_v37  ;;  %156 = vst.msk [vmem:[#allocation2 + $0x28] sm:$0xff] %vm19_vm0, %v147_v38 }
  0xe7   :  { %v164_v40 = vld [vmem:[#allocation2 + $0x10] sm:$0xff] }
  0xe8   :  { %v168_v41 = vld [vmem:[#allocation2 + $0x30] sm:$0xff]  ;;  %v440_v42 = vadd.f32 %v308_v39, %v164_v40  ;;  %v162_v44 = vld [vmem:[#allocation2] sm:$0xff] }
  0xe9   :  { %v442_v43 = vadd.f32 %v308_v39, %v168_v41  ;;  %v166_v45 = vld [vmem:[#allocation2 + $0x20] sm:$0xff]  ;;  %v444_v46 = vadd.f32 %v308_v39, %v162_v44  ;;  %v165_v48 = vld [vmem:[#allocation2 + $0x18] sm:$0xff] }
  0xea   :  { %v446_v47 = vadd.f32 %v308_v39, %v166_v45  ;;  %v169_v49 = vld [vmem:[#allocation2 + $0x38] sm:$0xff]  ;;  %v195_v50 = vmul.f32 0.044715, %v440_v42  ;;  %v454_v56 = vadd.f32 %v308_v39, %v165_v48  ;;  %v163_v58 = vld [vmem:[#allocation2 + $0x8] sm:$0xff]  ;;  %v187_v34 = vmul.f32 0.5, %v440_v42 }
  0xeb   :  { %v199_v51 = vmul.f32 0.044715, %v442_v43  ;;  %v193_v52 = vmul.f32 0.044715, %v444_v46  ;;  %v456_v57 = vadd.f32 %v308_v39, %v169_v49  ;;  %v460_v61 = vadd.f32 %v308_v39, %v163_v58  ;;  %v167_v62 = vld [vmem:[#allocation2 + $0x28] sm:$0xff] }
  0xec   :  { %v197_v53 = vmul.f32 0.044715, %v446_v47  ;;  %v203_v54 = vmul.f32 %v195_v50, %v440_v42  ;;  %v196_v1 = vmul.f32 0.044715, %v454_v56  ;;  %v471_v8 = vadd.f32 %v308_v39, %v167_v62 }
  0xed   :  { %v207_v55 = vmul.f32 %v199_v51, %v442_v43  ;;  %v201_v59 = vmul.f32 %v193_v52, %v444_v46  ;;  %v200_v4 = vmul.f32 0.044715, %v456_v57  ;;  %v194_v12 = vmul.f32 0.044715, %v460_v61 }
  0xee   :  { %v205_v60 = vmul.f32 %v197_v53, %v446_v47  ;;  %v211_v63 = vmul.f32 %v203_v54, %v440_v42  ;;  %v204_v7 = vmul.f32 %v196_v1, %v454_v56  ;;  %v198_v21 = vmul.f32 0.044715, %v471_v8 }
  0xef   :  { %v215_v0 = vmul.f32 %v207_v55, %v442_v43  ;;  %v209_v2 = vmul.f32 %v201_v59, %v444_v46  ;;  %v208_v11 = vmul.f32 %v200_v4, %v456_v57  ;;  %v202_v19 = vmul.f32 %v194_v12, %v460_v61 }
  0xf0   :  { %v213_v3 = vmul.f32 %v205_v60, %v446_v47  ;;  %v219_v5 = vadd.f32 %v211_v63, %v440_v42  ;;  %v212_v15 = vmul.f32 %v204_v7, %v454_v56  ;;  %v206_v25 = vmul.f32 %v198_v21, %v471_v8 }
  0xf1   :  { %v223_v6 = vadd.f32 %v215_v0, %v442_v43  ;;  %v217_v9 = vadd.f32 %v209_v2, %v444_v46  ;;  %v216_v18 = vmul.f32 %v208_v11, %v456_v57  ;;  %v210_v23 = vmul.f32 %v202_v19, %v460_v61 }
  0xf2   :  { %v221_v10 = vadd.f32 %v213_v3, %v446_v47  ;;  %v227_v13 = vmul.f32 0.7978846, %v219_v5  ;;  %v220_v20 = vadd.f32 %v212_v15, %v454_v56  ;;  %v214_v28 = vmul.f32 %v206_v25, %v471_v8 }
  0xf3   :  { %v231_v14 = vmul.f32 0.7978846, %v223_v6  ;;  %v225_v16 = vmul.f32 0.7978846, %v217_v9  ;;  %v224_v22 = vadd.f32 %v216_v18, %v456_v57  ;;  %v218_v27 = vadd.f32 %v210_v23, %v460_v61 }
  0xf4   :  { %v229_v17 = vmul.f32 0.7978846, %v221_v10  ;;  %350 = vtanh.f32 %v227_v13  ;;  %v228_v24 = vmul.f32 0.7978846, %v220_v20  ;;  %v222_v30 = vadd.f32 %v214_v28, %v471_v8 }
  0xf5   :  { %352 = vtanh.f32 %v231_v14  ;;  %v232_v26 = vmul.f32 0.7978846, %v224_v22  ;;  %v226_v29 = vmul.f32 0.7978846, %v218_v27  ;;  %v191_v37 = vmul.f32 0.5, %v442_v43 }
  0xf6   :  { %354 = vtanh.f32 %v225_v16  ;;  %v230_v31 = vmul.f32 0.7978846, %v222_v30  ;;  %v185_v41 = vmul.f32 0.5, %v444_v46  ;;  %v189_v49 = vmul.f32 0.5, %v446_v47 }
  0xf7   :  { %356 = vtanh.f32 %v229_v17  ;;  %v188_v42 = vmul.f32 0.5, %v454_v56  ;;  %v192_v58 = vmul.f32 0.5, %v456_v57  ;;  %v186_v63 = vmul.f32 0.5, %v460_v61 }
  0xf8   :  { %358 = vtanh.f32 %v228_v24  ;;  %v190_v61 = vmul.f32 0.5, %v471_v8 }
  0xf9   :  { %360 = vtanh.f32 %v232_v26 }
  0xfa   :  { %362 = vtanh.f32 %v226_v29 }
  0xfb   :  { %364 = vtanh.f32 %v230_v31 }
  0xfe   :  { %v351_v32 = vpop.eup %350 }
  0xff   :  { %v353_v33 = vpop.eup %352  ;;  %v243_v35 = vadd.f32 1.0, %v351_v32 }
 0x100   :  { %v355_v36 = vpop.eup %354  ;;  %v247_v38 = vadd.f32 1.0, %v353_v33 }
 0x101   :  { %v357_v39 = vpop.eup %356  ;;  %v251_v40 = vmul.f32 %v243_v35, %v187_v34  ;;  %v241_v44 = vadd.f32 1.0, %v355_v36 }
 0x102   :  { %v359_v45 = vpop.eup %358  ;;  %v255_v48 = vmul.f32 %v247_v38, %v191_v37  ;;  %v245_v50 = vadd.f32 1.0, %v357_v39 }
 0x103   :  { %v361_v51 = vpop.eup %360  ;;  %v319_v52 = vpack.c.bf16 %v251_v40, %v251_v40  ;;  %v249_v53 = vmul.f32 %v241_v44, %v185_v41  ;;  %v244_v54 = vadd.f32 1.0, %v359_v45 }
 0x104   :  { %v323_v55 = vpack.c.bf16 %v255_v48, %v255_v48  ;;  %v253_v43 = vmul.f32 %v245_v50, %v189_v49  ;;  %v248_v59 = vadd.f32 1.0, %v361_v51  ;;  %v363_v60 = vpop.eup %362 }
 0x105   :  { %292 = vst.msk [vmem:[%s531_s3 + $0x8] sm:$0xf] %vm289_vm2, %v319_v52  ;;  %v317_v46 = vpack.c.bf16 %v249_v53, %v249_v53  ;;  %v252_v47 = vmul.f32 %v244_v54, %v188_v42  ;;  %v242_v0 = vadd.f32 1.0, %v363_v60  ;;  %v365_v1 = vpop.eup %364 }
 0x106   :  { %296 = vst.msk [vmem:[%s531_s3 + $0x18] sm:$0xf] %vm289_vm2, %v323_v55  ;;  %v321_v56 = vpack.c.bf16 %v253_v43, %v253_v43  ;;  %v256_v62 = vmul.f32 %v248_v59, %v192_v58  ;;  %v246_v4 = vadd.f32 1.0, %v365_v1 }
 0x107   :  { %290 = vst.msk [vmem:[%s531_s3] sm:$0xf] %vm289_vm2, %v317_v46  ;;  %v320_v57 = vpack.c.bf16 %v252_v47, %v252_v47  ;;  %v250_v3 = vmul.f32 %v242_v0, %v186_v63 }
 0x108   :  { %294 = vst.msk [vmem:[%s531_s3 + $0x10] sm:$0xf] %vm289_vm2, %v321_v56  ;;  %v324_v2 = vpack.c.bf16 %v256_v62, %v256_v62  ;;  %v254_v6 = vmul.f32 %v246_v4, %v190_v61 }
 0x109   :  { %293 = vst.msk [vmem:[%s531_s3 + $0xc] sm:$0xf] %vm289_vm2, %v320_v57  ;;  %v318_v5 = vpack.c.bf16 %v250_v3, %v250_v3 }
 0x10a   :  { %297 = vst.msk [vmem:[%s531_s3 + $0x1c] sm:$0xf] %vm289_vm2, %v324_v2  ;;  %v322_v7 = vpack.c.bf16 %v254_v6, %v254_v6 }
 0x10b   :  { %291 = vst.msk [vmem:[%s531_s3 + $0x4] sm:$0xf] %vm289_vm2, %v318_v5 }
 0x10c   :  { %295 = vst.msk [vmem:[%s531_s3 + $0x14] sm:$0xf] %vm289_vm2, %v322_v7 }

// kernel: multimodal_forward.76
= control target key start
LH: loop header
LB: loop body
LE: loop exit
PB: predicated region body
PF: predicated region fallthrough
CT: control target
= control target key end

     0   :  { %s331_s12 = smov 0   ;;  %s373_s0 = inlined_call_operand.vmem [shape: f32[4,16,32], index: 0, kind: input, shape index: {}]   ;;  %s374_s1 = inlined_call_operand.vmem [shape: f32[16,32], index: 1, kind: input, shape index: {}]   ;;  %s375_s2 = inlined_call_operand.vmem [shape: f32[16,32], index: 2, kind: input, shape index: {}]   ;;  %s376_s3 = inlined_call_operand.vmem [shape: f32[4,16,32], index: 3, kind: output, shape index: {}]  }
   0x1 LB: > { %s276_s13 = sadd.s32 4294967295, %s309_s12   ;;  %p280_p0 = scmp.ge.s32.totalorder %s309_s12, 1  ;;  %s309_s12 = sphi %s331_s12, %s13_s12  }
   0x2   : > { %p137_p1 = scmp.lt.s32.totalorder %s309_s12, 5 }
   0x4   : > { %p138_p2 = pnand %p280_p0, %p137_p1 }
   0x5   : > { %p161_p3 = scmp.lt.s32.totalorder (!%p138_p2), %s276_s13, 3  ;;  %vm173_vm0 = vcmask (!%p138_p2), 261120   ;;  %v211_v32 = vld [vmem:[%s374_s1] sm:$0xff] (!%p138_p2)  ;;  %v212_v33 = vld [vmem:[%s374_s1 + $0x8] sm:$0xff] (!%p138_p2) }
   0x6   : > { %141 = sbr.rel (%p138_p2) target bundleno = 461 (0x1cd), region = 32  ;;  %v215_v36 = vld [vmem:[%s375_s2] sm:$0xff] (!%p138_p2)  ;;  %v216_v37 = vld [vmem:[%s375_s2 + $0x8] sm:$0xff] (!%p138_p2) }
   0xd   : > { %s378_s13 = smov (!%p161_p3, %s276_s13), 3 }
   0xe   : > { %s287_s14 = sshll.u32 %s378_s13, 4 }
   0xf   : > { %s165_s17 = scalar_lea.vmem %s373_s0, %s287_s14  ;;  %s170_s30 = scalar_lea.vmem %s376_s3, %s287_s14 }
  0x10   : > { %v171_v0 = vld [vmem:[%s165_s17] sm:$0xff]  ;;  %v172_v1 = vld [vmem:[%s165_s17 + $0x8] sm:$0xff] }
  0x11   : > { %v174_v2 = vsel %vm173_vm0, %v171_v0, 0.0  ;;  %v175_v3 = vsel %vm173_vm0, %v172_v1, 0.0 }
  0x12   : > { %v176_v4 = vadd.f32 %v175_v3, %v174_v2 }
  0x14   : > { %177 = vadd.xlane.f32.xlu0 %v176_v4 }
  0xa1   : > { %v178_v5 = vpop.xlane.xlu0 %177 }
  0xa2   : > { %v179_v6 = vrot.slane %v178_v5, 4 }
  0xa4   : > { %v180_v7 = vadd.f32 %v179_v6, %v178_v5 }
  0xa6   : > { %v181_v8 = vrot.slane %v180_v7, 2 }
  0xa8   : > { %v182_v9 = vadd.f32 %v181_v8, %v180_v7 }
  0xaa   : > { %v183_v10 = vrot.slane %v182_v9, 1 }
  0xac   : > { %v184_v11 = vadd.f32 %v183_v10, %v182_v9 }
  0xae   : > { %289 = vpush %v184_v11 }
  0xdf   : > { %s290_s18 = spop %289 }
  0xe0   : > { %v186_v12 = vstv %s290_s18 }
  0xe1   : > { %v188_v13 = vmul.f32 0.001953125, %v186_v12 }
  0xe3   : > { %v189_v14 = vsub.f32 %v171_v0, %v188_v13  ;;  %v190_v15 = vsub.f32 %v172_v1, %v188_v13 }
  0xe5   : > { %v191_v16 = vmul.f32 %v189_v14, %v189_v14  ;;  %v192_v17 = vmul.f32 %v190_v15, %v190_v15 }
  0xe7   : > { %v193_v18 = vsel %vm173_vm0, %v191_v16, 0.0  ;;  %v194_v19 = vsel %vm173_vm0, %v192_v17, 0.0 }
  0xe8   : > { %v195_v20 = vadd.f32 %v194_v19, %v193_v18 }
  0xea   : > { %196 = vadd.xlane.f32.xlu0 %v195_v20 }
 0x177   : > { %v197_v21 = vpop.xlane.xlu0 %196 }
 0x178   : > { %v198_v22 = vrot.slane %v197_v21, 4 }
 0x17a   : > { %v199_v23 = vadd.f32 %v198_v22, %v197_v21 }
 0x17c   : > { %v200_v24 = vrot.slane %v199_v23, 2 }
 0x17e   : > { %v201_v25 = vadd.f32 %v200_v24, %v199_v23 }
 0x180   : > { %v202_v26 = vrot.slane %v201_v25, 1 }
 0x182   : > { %v203_v27 = vadd.f32 %v202_v26, %v201_v25 }
 0x184   : > { %291 = vpush %v203_v27 }
 0x1b5   : > { %s292_s19 = spop %291 }
 0x1b6   : > { %v205_v28 = vstv %s292_s19 }
 0x1b7   : > { %v206_v29 = vmul.f32 0.001953125, %v205_v28 }
 0x1b9   : > { %v207_v30 = vadd.f32 1e-05, %v206_v29 }
 0x1bb   : > { %301 = vrsqrt.f32 %v207_v30 }
 0x1c5   : > { %v302_v31 = vpop.eup %301 }
 0x1c6   : > { %v209_v34 = vmul.f32 %v302_v31, %v189_v14  ;;  %v210_v35 = vmul.f32 %v302_v31, %v190_v15 }
 0x1c8   : > { %v213_v38 = vmul.f32 %v211_v32, %v209_v34  ;;  %v214_v39 = vmul.f32 %v212_v33, %v210_v35 }
 0x1ca   : > { %v217_v40 = vadd.f32 %v215_v36, %v213_v38  ;;  %v218_v41 = vadd.f32 %v216_v37, %v214_v39 }
 0x1cc   : > { %219 = vst.msk [vmem:[%s170_s30] sm:$0xff] %vm173_vm0, %v217_v40  ;;  %220 = vst.msk [vmem:[%s170_s30 + $0x8] sm:$0xff] %vm173_vm0, %v218_v41 }
 0x1cd PF: > { %s13_s12 = sadd.s32 1, %s309_s12  }
 0x1ce   : > { %p10_p4 = scmp.ge.s32.totalorder %s13_s12, 6  }
 0x1d0   :  { %12 = sbr.rel (!%p10_p4) target bundleno = 1 (0x1), region = 62 }

// kernel: multimodal_forward.70
= control target key start
LH: loop header
LB: loop body
LE: loop exit
PB: predicated region body
PF: predicated region fallthrough
CT: control target
= control target key end

     0   :  { %vm28_vm0 = vcmask 261120   ;;  %v461_v1 = vmov 0.0   ;;  %vm105_vm1 = vcmask 523264   ;;  %s662_s1 = inlined_call_operand.vmem [shape: bf16[64,32], index: 1, kind: input, shape index: {}]   ;;  %s663_s0 = inlined_call_operand.vmem [shape: bf16[64,64], index: 0, kind: input, shape index: {}]   ;;  %s664_s2 = inlined_call_operand.vmem [shape: f32[1,32], index: 2, kind: input, shape index: {}]   ;;  %s665_s3 = inlined_call_operand.vmem [shape: f32[64,32], index: 3, kind: input, shape index: {}]   ;;  %s666_s4 = inlined_call_operand.vmem [shape: f32[1,32], index: 4, kind: input, shape index: {}]   ;;  %s667_s5 = inlined_call_operand.vmem [shape: f32[1,32], index: 5, kind: input, shape index: {}]   ;;  %s668_s6 = inlined_call_operand.vmem [shape: f32[64,32], index: 6, kind: output, shape index: {}]  }
   0x1   :  { %v437_v0 = vld [vmem:[%s662_s1] sm:$0xff]   ;;  %31 = vst.msk [vmem:[#allocation2 + $0x10] sm:$0xff] %vm28_vm0, %v461_v1  ;;  %29 = vst.msk [vmem:[#allocation2] sm:$0xff] %vm28_vm0, %v461_v1  ;;  %v438_v2 = vld [vmem:[%s662_s1 + $0x8] sm:$0xff]  }
   0x2   :  { %30 = vst.msk [vmem:[#allocation2 + $0x8] sm:$0xff] %vm28_vm0, %v461_v1  ;;  %32 = vst.msk [vmem:[#allocation2 + $0x18] sm:$0xff] %vm28_vm0, %v461_v1  ;;  %412 = vmatprep.subr.bf16.mxu0 %v437_v0  ;;  %428 = vmatprep.subr.bf16.mxu1 %v437_v0  ;;  %v439_v3 = vld [vmem:[%s662_s1 + $0x10] sm:$0xff]   ;;  %v441_v4 = vld [vmem:[%s663_s0] sm:$0xff]  }
   0x3   :  { %33 = vst.msk [vmem:[#allocation2 + $0x20] sm:$0xff] %vm28_vm0, %v461_v1  ;;  %34 = vst.msk [vmem:[#allocation2 + $0x28] sm:$0xff] %vm28_vm0, %v461_v1  ;;  %413 = vmatpush3.bf16.msra.mxu0 %v437_v0  ;;  %432 = vmatpush3.bf16.msra.mxu1 %v437_v0  ;;  %v443_v5 = vld [vmem:[%s663_s0 + $0x10] sm:$0xff]   ;;  %v440_v6 = vld [vmem:[%s662_s1 + $0x18] sm:$0xff]  }
   0x4   :  { %35 = vst.msk [vmem:[#allocation2 + $0x30] sm:$0xff] %vm28_vm0, %v461_v1  ;;  %36 = vst.msk [vmem:[#allocation2 + $0x38] sm:$0xff] %vm28_vm0, %v461_v1  ;;  %414 = vmatprep.subr.bf16.mxu0 %v438_v2  ;;  %429 = vmatprep.subr.bf16.mxu1 %v438_v2  ;;  %v442_v7 = vld [vmem:[%s663_s0 + $0x8] sm:$0xff]   ;;  %v444_v8 = vld [vmem:[%s663_s0 + $0x18] sm:$0xff]  }
   0x5   :  { %420 = vmatprep.mubr.msk.bf16.mxu0 %vm105_vm1, %v441_v4  ;;  %424 = vmatprep.mubr.msk.bf16.mxu1 %vm105_vm1, %v443_v5  ;;  %v401_v33 = vld [vmem:[%s664_s2] ss:$0 sm:$0xff]  ;;  %v228_v35 = vld [vmem:[%s665_s3 + $0x10] sm:$0xff]  ;;  %v229_v43 = vld [vmem:[%s665_s3 + $0x18] sm:$0xff] }
   0x6   :  { %v226_v36 = vld [vmem:[%s665_s3] sm:$0xff]  ;;  %v231_v55 = vld [vmem:[%s665_s3 + $0x28] sm:$0xff]  ;;  %v233_v1 = vld [vmem:[%s665_s3 + $0x38] sm:$0xff] }
   0x7   :  { %415 = vmatpush3.bf16.msra.mxu0 %v438_v2  ;;  %433 = vmatpush3.bf16.msra.mxu1 %v438_v2  ;;  %v230_v40 = vld [vmem:[%s665_s3 + $0x20] sm:$0xff]  ;;  %v227_v58 = vld [vmem:[%s665_s3 + $0x8] sm:$0xff] }
   0x8   :  { %416 = vmatprep.subr.bf16.mxu0 %v439_v3  ;;  %430 = vmatprep.subr.bf16.mxu1 %v439_v3  ;;  %v39_v9 = vld [vmem:[#allocation2 + $0x10] sm:$0xff]  ;;  %v37_v11 = vld [vmem:[#allocation2] sm:$0xff] }
   0x9   :  { %v40_v15 = vld [vmem:[#allocation2 + $0x18] sm:$0xff]  ;;  %v38_v21 = vld [vmem:[#allocation2 + $0x8] sm:$0xff] }
   0xa   :  { %v41_v12 = vld [vmem:[#allocation2 + $0x20] sm:$0xff]  ;;  %v42_v22 = vld [vmem:[#allocation2 + $0x28] sm:$0xff] }
   0xb   :  { %417 = vmatpush3.bf16.msra.mxu0 %v439_v3  ;;  %434 = vmatpush3.bf16.msra.mxu1 %v439_v3  ;;  %v43_v10 = vld [vmem:[#allocation2 + $0x30] sm:$0xff]  ;;  %v44_v16 = vld [vmem:[#allocation2 + $0x38] sm:$0xff] }
   0xc   :  { %418 = vmatprep.subr.bf16.mxu0 %v440_v6  ;;  %431 = vmatprep.subr.bf16.mxu1 %v440_v6  ;;  %v232_v3 = vld [vmem:[%s665_s3 + $0x30] sm:$0xff] }
   0xf   :  { %419 = vmatpush3.bf16.msra.mxu0 %v440_v6  ;;  %435 = vmatpush3.bf16.msra.mxu1 %v440_v6 }
  0x12   :  { %421 = vmatmul.mubr.msk.bf16.vlgmr.msra.gmra.mrb[0].mxu0 %vm105_vm1, %v442_v7  ;;  %425 = vmatmul.mubr.msk.bf16.vlgmr.msra.gmra.mrb[0].mxu1 %vm105_vm1, %v444_v8 }
  0xe5   :  { %v422_v13 = vpop.f32.mrb[0].mxu0  ;;  %v426_v14 = vpop.f32.mrb[0].mxu1 }
  0xe6   :  { %v185_v17 = vadd.f32 %v422_v13, %v39_v9  ;;  %v152_v18 = vpop.f32.mrb[1].mxu0  ;;  %v189_v19 = vadd.f32 %v426_v14, %v43_v10  ;;  %v168_v20 = vpop.f32.mrb[1].mxu1 }
  0xe7   :  { %v183_v23 = vadd.f32 %v152_v18, %v37_v11  ;;  %v423_v24 = vpop.f32.mrb[2].mxu0  ;;  %v187_v25 = vadd.f32 %v168_v20, %v41_v12  ;;  %v427_v26 = vpop.f32.mrb[2].mxu1 }
  0xe8   :  { %194 = vst.msk [vmem:[#allocation2 + $0x10] sm:$0xff] %vm28_vm0, %v185_v17  ;;  %198 = vst.msk [vmem:[#allocation2 + $0x30] sm:$0xff] %vm28_vm0, %v189_v19  ;;  %v186_v27 = vadd.f32 %v423_v24, %v40_v15  ;;  %v155_v28 = vpop.f32.mrb[3].mxu0  ;;  %v190_v29 = vadd.f32 %v427_v26, %v44_v16  ;;  %v171_v30 = vpop.f32.mrb[3].mxu1 }
  0xe9   :  { %192 = vst.msk [vmem:[#allocation2] sm:$0xff] %vm28_vm0, %v183_v23  ;;  %196 = vst.msk [vmem:[#allocation2 + $0x20] sm:$0xff] %vm28_vm0, %v187_v25  ;;  %v184_v31 = vadd.f32 %v155_v28, %v38_v21  ;;  %v188_v32 = vadd.f32 %v171_v30, %v42_v22 }
  0xea   :  { %195 = vst.msk [vmem:[#allocation2 + $0x18] sm:$0xff] %vm28_vm0, %v186_v27  ;;  %199 = vst.msk [vmem:[#allocation2 + $0x38] sm:$0xff] %vm28_vm0, %v190_v29 }
  0xeb   :  { %193 = vst.msk [vmem:[#allocation2 + $0x8] sm:$0xff] %vm28_vm0, %v184_v31  ;;  %197 = vst.msk [vmem:[#allocation2 + $0x28] sm:$0xff] %vm28_vm0, %v188_v32 }
  0xef   :  { %v205_v34 = vld [vmem:[#allocation2 + $0x10] sm:$0xff] }
  0xf0   :  { %v220_v37 = vadd.f32 %v401_v33, %v205_v34  ;;  %v203_v38 = vld [vmem:[#allocation2] sm:$0xff]  ;;  %v209_v59 = vld [vmem:[#allocation2 + $0x30] sm:$0xff] }
  0xf1   :  { %v207_v39 = vld [vmem:[#allocation2 + $0x20] sm:$0xff]  ;;  %v218_v41 = vadd.f32 %v401_v33, %v203_v38  ;;  %v206_v42 = vld [vmem:[#allocation2 + $0x18] sm:$0xff]  ;;  %v224_v2 = vadd.f32 %v401_v33, %v209_v59 }
  0xf2   :  { %v222_v44 = vadd.f32 %v401_v33, %v207_v39  ;;  %v236_v45 = vadd.f32 %v228_v35, %v220_v37  ;;  %v221_v46 = vadd.f32 %v401_v33, %v206_v42  ;;  %v208_v47 = vld [vmem:[#allocation2 + $0x28] sm:$0xff]  ;;  %v210_v57 = vld [vmem:[#allocation2 + $0x38] sm:$0xff] }
  0xf3   :  { %v204_v48 = vld [vmem:[#allocation2 + $0x8] sm:$0xff]  ;;  %v234_v49 = vadd.f32 %v226_v36, %v218_v41  ;;  %v223_v53 = vadd.f32 %v401_v33, %v208_v47  ;;  %v225_v63 = vadd.f32 %v401_v33, %v210_v57  ;;  %v240_v7 = vadd.f32 %v232_v3, %v224_v2 }
  0xf4   :  { %v238_v50 = vadd.f32 %v230_v40, %v222_v44  ;;  %v248_v51 = vsel %vm28_vm0, %v236_v45, 0.0  ;;  %v237_v52 = vadd.f32 %v229_v43, %v221_v46  ;;  %v219_v56 = vadd.f32 %v401_v33, %v204_v48 }
  0xf5   :  { %249 = vadd.xlane.f32.xlu1 %v248_v51  ;;  %v242_v54 = vsel %vm28_vm0, %v234_v49, 0.0  ;;  %v239_v62 = vadd.f32 %v231_v55, %v223_v53  ;;  %v241_v5 = vadd.f32 %v233_v1, %v225_v63  ;;  %v260_v9 = vsel %vm28_vm0, %v240_v7, 0.0 }
  0xf6   :  { %243 = vadd.xlane.f32.xlu0 %v242_v54  ;;  %v254_v60 = vsel %vm28_vm0, %v238_v50, 0.0  ;;  %v251_v61 = vsel %vm28_vm0, %v237_v52, 0.0  ;;  %v235_v0 = vadd.f32 %v227_v58, %v219_v56 }
  0xf7   :  { %v257_v4 = vsel %vm28_vm0, %v239_v62, 0.0  ;;  %v263_v8 = vsel %vm28_vm0, %v241_v5, 0.0 }
  0xf8   :  { %v245_v6 = vsel %vm28_vm0, %v235_v0, 0.0 }
  0xf9   :  { %252 = vadd.xlane.f32.xlu1 %v251_v61 }
  0xfa   :  { %255 = vadd.xlane.f32.xlu0 %v254_v60 }
  0xfd   :  { %258 = vadd.xlane.f32.xlu1 %v257_v4 }
  0xfe   :  { %246 = vadd.xlane.f32.xlu0 %v245_v6  ;;  %v402_v6 = vld [vmem:[%s666_s4] ss:$0 sm:$0xff] }
 0x101   :  { %264 = vadd.xlane.f32.xlu1 %v263_v8 }
 0x102   :  { %261 = vadd.xlane.f32.xlu0 %v260_v9 }
 0x182   :  { %v250_v10 = vpop.xlane.xlu1 %249 }
 0x183   :  { %v269_v11 = vmul.f32 0.03125, %v250_v10  ;;  %v244_v12 = vpop.xlane.xlu0 %243  ;;  %v403_v10 = vld [vmem:[%s667_s5] ss:$0 sm:$0xff] }
 0x184   :  { %v267_v13 = vmul.f32 0.03125, %v244_v12 }
 0x185   :  { %v576_v14 = vsub.f32 %v236_v45, %v269_v11 }
 0x186   :  { %v578_v15 = vsub.f32 %v234_v49, %v267_v13  ;;  %v253_v16 = vpop.xlane.xlu1 %252 }
 0x187   :  { %v270_v17 = vmul.f32 0.03125, %v253_v16  ;;  %v256_v18 = vpop.xlane.xlu0 %255  ;;  %v285_v19 = vmul.f32 %v576_v14, %v576_v14 }
 0x188   :  { %v271_v20 = vmul.f32 0.03125, %v256_v18  ;;  %v283_v23 = vmul.f32 %v578_v15, %v578_v15 }
 0x189   :  { %v582_v21 = vsub.f32 %v237_v52, %v270_v17  ;;  %v297_v22 = vsel %vm28_vm0, %v285_v19, 0.0 }
 0x18a   :  { %v587_v24 = vsub.f32 %v238_v50, %v271_v20  ;;  %v259_v25 = vpop.xlane.xlu1 %258  ;;  %298 = vadd.xlane.f32.xlu0 %v297_v22  ;;  %v291_v31 = vsel %vm28_vm0, %v283_v23, 0.0 }
 0x18b   :  { %v272_v26 = vmul.f32 0.03125, %v259_v25  ;;  %v247_v27 = vpop.xlane.xlu0 %246  ;;  %v286_v28 = vmul.f32 %v582_v21, %v582_v21 }
 0x18c   :  { %v268_v29 = vmul.f32 0.03125, %v247_v27  ;;  %v287_v32 = vmul.f32 %v587_v24, %v587_v24 }
 0x18d   :  { %v300_v30 = vsel %vm28_vm0, %v286_v28, 0.0  ;;  %v595_v33 = vsub.f32 %v239_v62, %v272_v26 }
 0x18e   :  { %v597_v34 = vsub.f32 %v235_v0, %v268_v29  ;;  %301 = vadd.xlane.f32.xlu1 %v300_v30  ;;  %v265_v35 = vpop.xlane.xlu1 %264  ;;  %292 = vadd.xlane.f32.xlu0 %v291_v31  ;;  %v303_v40 = vsel %vm28_vm0, %v287_v32, 0.0 }
 0x18f   :  { %v274_v36 = vmul.f32 0.03125, %v265_v35  ;;  %v262_v37 = vpop.xlane.xlu0 %261  ;;  %v288_v44 = vmul.f32 %v595_v33, %v595_v33 }
 0x190   :  { %v273_v38 = vmul.f32 0.03125, %v262_v37  ;;  %v284_v39 = vmul.f32 %v597_v34, %v597_v34 }
 0x191   :  { %v602_v41 = vsub.f32 %v241_v5, %v274_v36  ;;  %v306_v46 = vsel %vm28_vm0, %v288_v44, 0.0 }
 0x192   :  { %v604_v42 = vsub.f32 %v240_v7, %v273_v38  ;;  %304 = vadd.xlane.f32.xlu0 %v303_v40  ;;  %v294_v43 = vsel %vm28_vm0, %v284_v39, 0.0 }
 0x193   :  { %295 = vadd.xlane.f32.xlu1 %v294_v43  ;;  %v290_v48 = vmul.f32 %v602_v41, %v602_v41 }
 0x194   :  { %v289_v45 = vmul.f32 %v604_v42, %v604_v42 }
 0x195   :  { %v312_v49 = vsel %vm28_vm0, %v290_v48, 0.0 }
 0x196   :  { %v309_v47 = vsel %vm28_vm0, %v289_v45, 0.0 }
 0x197   :  { %307 = vadd.xlane.f32.xlu1 %v306_v46  ;;  %310 = vadd.xlane.f32.xlu0 %v309_v47 }
 0x19b   :  { %313 = vadd.xlane.f32.xlu1 %v312_v49 }
 0x217   :  { %v299_v50 = vpop.xlane.xlu0 %298 }
 0x218   :  { %v317_v51 = vmul.f32 0.03125, %v299_v50 }
 0x21a   :  { %v325_v52 = vadd.f32 1e-12, %v317_v51 }
 0x21b   :  { %v302_v53 = vpop.xlane.xlu1 %301  ;;  %v293_v54 = vpop.xlane.xlu0 %292 }
 0x21c   :  { %445 = vrsqrt.f32 %v325_v52  ;;  %v318_v55 = vmul.f32 0.03125, %v302_v53  ;;  %v315_v56 = vmul.f32 0.03125, %v293_v54 }
 0x21e   :  { %v326_v57 = vadd.f32 1e-12, %v318_v55  ;;  %v323_v58 = vadd.f32 1e-12, %v315_v56 }
 0x21f   :  { %v305_v59 = vpop.xlane.xlu0 %304 }
 0x220   :  { %447 = vrsqrt.f32 %v326_v57  ;;  %v319_v60 = vmul.f32 0.03125, %v305_v59  ;;  %v296_v61 = vpop.xlane.xlu1 %295 }
 0x221   :  { %449 = vrsqrt.f32 %v323_v58  ;;  %v316_v62 = vmul.f32 0.03125, %v296_v61 }
 0x222   :  { %v327_v63 = vadd.f32 1e-12, %v319_v60 }
 0x223   :  { %v324_v0 = vadd.f32 1e-12, %v316_v62 }
 0x224   :  { %451 = vrsqrt.f32 %v327_v63  ;;  %v308_v1 = vpop.xlane.xlu1 %307  ;;  %v311_v2 = vpop.xlane.xlu0 %310 }
 0x225   :  { %453 = vrsqrt.f32 %v324_v0  ;;  %v320_v3 = vmul.f32 0.03125, %v308_v1  ;;  %v321_v4 = vmul.f32 0.03125, %v311_v2 }
 0x226   :  { %v446_v5 = vpop.eup %445 }
 0x227   :  { %v341_v7 = vmul.f32 %v446_v5, %v576_v14  ;;  %v328_v8 = vadd.f32 1e-12, %v320_v3  ;;  %v329_v9 = vadd.f32 1e-12, %v321_v4 }
 0x228   :  { %v314_v11 = vpop.xlane.xlu1 %313 }
 0x229   :  { %v356_v12 = vmul.f32 %v402_v6, %v341_v7  ;;  %455 = vrsqrt.f32 %v328_v8  ;;  %v322_v13 = vmul.f32 0.03125, %v314_v11 }
 0x22a   :  { %v448_v16 = vpop.eup %447  ;;  %457 = vrsqrt.f32 %v329_v9 }
 0x22b   :  { %v450_v17 = vpop.eup %449  ;;  %v371_v18 = vadd.f32 %v403_v10, %v356_v12  ;;  %v342_v19 = vmul.f32 %v448_v16, %v582_v21  ;;  %v330_v20 = vadd.f32 1e-12, %v322_v13 }
 0x22c   :  { %v339_v22 = vmul.f32 %v450_v17, %v578_v15 }
 0x22d   :  { %379 = vst.msk [vmem:[%s668_s6 + $0x10] sm:$0xff] %vm28_vm0, %v371_v18  ;;  %v357_v14 = vmul.f32 %v402_v6, %v342_v19  ;;  %459 = vrsqrt.f32 %v330_v20 }
 0x22e   :  { %v452_v23 = vpop.eup %451  ;;  %v354_v25 = vmul.f32 %v402_v6, %v339_v22 }
 0x22f   :  { %v454_v26 = vpop.eup %453  ;;  %v372_v27 = vadd.f32 %v403_v10, %v357_v14  ;;  %v343_v28 = vmul.f32 %v452_v23, %v587_v24 }
 0x230   :  { %v369_v29 = vadd.f32 %v403_v10, %v354_v25  ;;  %v340_v30 = vmul.f32 %v454_v26, %v597_v34 }
 0x231   :  { %380 = vst.msk [vmem:[%s668_s6 + $0x18] sm:$0xff] %vm28_vm0, %v372_v27  ;;  %v358_v15 = vmul.f32 %v402_v6, %v343_v28 }
 0x232   :  { %377 = vst.msk [vmem:[%s668_s6] sm:$0xff] %vm28_vm0, %v369_v29  ;;  %v355_v21 = vmul.f32 %v402_v6, %v340_v30 }
 0x233   :  { %v456_v31 = vpop.eup %455  ;;  %v373_v32 = vadd.f32 %v403_v10, %v358_v15 }
 0x234   :  { %v458_v35 = vpop.eup %457  ;;  %v370_v36 = vadd.f32 %v403_v10, %v355_v21  ;;  %v344_v24 = vmul.f32 %v456_v31, %v595_v33 }
 0x235   :  { %381 = vst.msk [vmem:[%s668_s6 + $0x20] sm:$0xff] %vm28_vm0, %v373_v32  ;;  %v345_v34 = vmul.f32 %v458_v35, %v604_v42 }
 0x236   :  { %378 = vst.msk [vmem:[%s668_s6 + $0x8] sm:$0xff] %vm28_vm0, %v370_v36  ;;  %v359_v37 = vmul.f32 %v402_v6, %v344_v24 }
 0x237   :  { %v460_v38 = vpop.eup %459  ;;  %v360_v39 = vmul.f32 %v402_v6, %v345_v34 }
 0x238   :  { %v374_v40 = vadd.f32 %v403_v10, %v359_v37  ;;  %v346_v43 = vmul.f32 %v460_v38, %v602_v41 }
 0x239   :  { %v375_v44 = vadd.f32 %v403_v10, %v360_v39 }
 0x23a   :  { %382 = vst.msk [vmem:[%s668_s6 + $0x28] sm:$0xff] %vm28_vm0, %v374_v40  ;;  %v361_v33 = vmul.f32 %v402_v6, %v346_v43 }
 0x23b   :  { %383 = vst.msk [vmem:[%s668_s6 + $0x30] sm:$0xff] %vm28_vm0, %v375_v44 }
 0x23c   :  { %v376_v42 = vadd.f32 %v403_v10, %v361_v33 }
 0x23e   :  { %384 = vst.msk [vmem:[%s668_s6 + $0x38] sm:$0xff] %vm28_vm0, %v376_v42 }

// kernel: multimodal_forward.77
= control target key start
LH: loop header
LB: loop body
LE: loop exit
PB: predicated region body
PF: predicated region fallthrough
CT: control target
= control target key end

     0   :  { %vm19_vm0 = vcmask 261120   ;;  %v228_v1 = vmov 0.0   ;;  %s334_s1 = inlined_call_operand.vmem [shape: bf16[32,32], index: 1, kind: input, shape index: {}]   ;;  %s335_s0 = inlined_call_operand.vmem [shape: f32[64,32], index: 0, kind: input, shape index: {}]   ;;  %s336_s2 = inlined_call_operand.vmem [shape: f32[1,32], index: 2, kind: input, shape index: {}]   ;;  %s337_s3 = inlined_call_operand.vmem [shape: f32[64,32], index: 3, kind: output, shape index: {}]  }
   0x1   :  { %v226_v0 = vld [vmem:[%s334_s1] sm:$0xff]   ;;  %22 = vst.msk [vmem:[#allocation2 + $0x10] sm:$0xff] %vm19_vm0, %v228_v1  ;;  %20 = vst.msk [vmem:[#allocation2] sm:$0xff] %vm19_vm0, %v228_v1  ;;  %v227_v2 = vld [vmem:[%s334_s1 + $0x8] sm:$0xff]  }
   0x2   :  { %21 = vst.msk [vmem:[#allocation2 + $0x8] sm:$0xff] %vm19_vm0, %v228_v1  ;;  %23 = vst.msk [vmem:[#allocation2 + $0x18] sm:$0xff] %vm19_vm0, %v228_v1  ;;  %209 = vmatprep.subr.bf16.mxu0 %v226_v0  ;;  %221 = vmatprep.subr.bf16.mxu1 %v226_v0  ;;  %v36_v3 = vld [vmem:[%s335_s0] sm:$0xff]  ;;  %v37_v4 = vld [vmem:[%s335_s0 + $0x8] sm:$0xff] }
   0x3   :  { %24 = vst.msk [vmem:[#allocation2 + $0x20] sm:$0xff] %vm19_vm0, %v228_v1  ;;  %25 = vst.msk [vmem:[#allocation2 + $0x28] sm:$0xff] %vm19_vm0, %v228_v1  ;;  %v40_v5 = vld [vmem:[%s335_s0 + $0x20] sm:$0xff]  ;;  %210 = vmatpush3.bf16.msra.mxu0 %v226_v0  ;;  %223 = vmatpush3.bf16.msra.mxu1 %v226_v0  ;;  %v44_v6 = vpack.c.bf16 %v37_v4, %v36_v3  ;;  %v41_v7 = vld [vmem:[%s335_s0 + $0x28] sm:$0xff] }
   0x4   :  { %26 = vst.msk [vmem:[#allocation2 + $0x30] sm:$0xff] %vm19_vm0, %v228_v1  ;;  %27 = vst.msk [vmem:[#allocation2 + $0x38] sm:$0xff] %vm19_vm0, %v228_v1  ;;  %v38_v8 = vld [vmem:[%s335_s0 + $0x10] sm:$0xff]  ;;  %v39_v9 = vld [vmem:[%s335_s0 + $0x18] sm:$0xff]  ;;  %211 = vmatprep.subr.bf16.mxu0 %v227_v2  ;;  %222 = vmatprep.subr.bf16.mxu1 %v227_v2  ;;  %v46_v10 = vpack.c.bf16 %v41_v7, %v40_v5 }
   0x5   :  { %v42_v11 = vld [vmem:[%s335_s0 + $0x30] sm:$0xff]  ;;  %v43_v12 = vld [vmem:[%s335_s0 + $0x38] sm:$0xff]  ;;  %213 = vmatprep.mubr.msk.bf16.mxu0 %vm19_vm0, %v44_v6  ;;  %v45_v13 = vpack.c.bf16 %v39_v9, %v38_v8  ;;  %v202_v39 = vld [vmem:[%s336_s2] ss:$0 sm:$0xff] }
   0x6   :  { %217 = vmatprep.mubr.msk.bf16.mxu1 %vm19_vm0, %v46_v10  ;;  %v47_v14 = vpack.c.bf16 %v43_v12, %v42_v11 }
   0x7   :  { %212 = vmatpush3.bf16.msra.mxu0 %v227_v2  ;;  %224 = vmatpush3.bf16.msra.mxu1 %v227_v2 }
   0x8   :  { %v30_v15 = vld [vmem:[#allocation2 + $0x10] sm:$0xff]  ;;  %v28_v17 = vld [vmem:[#allocation2] sm:$0xff] }
   0x9   :  { %v31_v21 = vld [vmem:[#allocation2 + $0x18] sm:$0xff]  ;;  %v29_v27 = vld [vmem:[#allocation2 + $0x8] sm:$0xff] }
   0xa   :  { %214 = vmatmul.mubr.msk.bf16.vlgmr.msra.gmra.mrb[0].mxu0 %vm19_vm0, %v45_v13  ;;  %218 = vmatmul.mubr.msk.bf16.vlgmr.msra.gmra.mrb[0].mxu1 %vm19_vm0, %v47_v14  ;;  %v32_v18 = vld [vmem:[#allocation2 + $0x20] sm:$0xff]  ;;  %v33_v28 = vld [vmem:[#allocation2 + $0x28] sm:$0xff] }
   0xb   :  { %v34_v16 = vld [vmem:[#allocation2 + $0x30] sm:$0xff]  ;;  %v35_v22 = vld [vmem:[#allocation2 + $0x38] sm:$0xff] }
  0xdd   :  { %v215_v19 = vpop.f32.mrb[0].mxu0  ;;  %v219_v20 = vpop.f32.mrb[0].mxu1 }
  0xde   :  { %v144_v23 = vadd.f32 %v215_v19, %v30_v15  ;;  %v148_v24 = vadd.f32 %v219_v20, %v34_v16  ;;  %v111_v25 = vpop.f32.mrb[1].mxu0  ;;  %v127_v26 = vpop.f32.mrb[1].mxu1 }
  0xdf   :  { %v142_v29 = vadd.f32 %v111_v25, %v28_v17  ;;  %v146_v30 = vadd.f32 %v127_v26, %v32_v18  ;;  %v216_v31 = vpop.f32.mrb[2].mxu0  ;;  %v220_v32 = vpop.f32.mrb[2].mxu1 }
  0xe0   :  { %152 = vst.msk [vmem:[#allocation2 + $0x10] sm:$0xff] %vm19_vm0, %v144_v23  ;;  %156 = vst.msk [vmem:[#allocation2 + $0x30] sm:$0xff] %vm19_vm0, %v148_v24  ;;  %v145_v33 = vadd.f32 %v216_v31, %v31_v21  ;;  %v149_v34 = vadd.f32 %v220_v32, %v35_v22  ;;  %v114_v35 = vpop.f32.mrb[3].mxu0  ;;  %v130_v36 = vpop.f32.mrb[3].mxu1 }
  0xe1   :  { %150 = vst.msk [vmem:[#allocation2] sm:$0xff] %vm19_vm0, %v142_v29  ;;  %154 = vst.msk [vmem:[#allocation2 + $0x20] sm:$0xff] %vm19_vm0, %v146_v30  ;;  %v143_v37 = vadd.f32 %v114_v35, %v29_v27  ;;  %v147_v38 = vadd.f32 %v130_v36, %v33_v28 }
  0xe2   :  { %153 = vst.msk [vmem:[#allocation2 + $0x18] sm:$0xff] %vm19_vm0, %v145_v33  ;;  %157 = vst.msk [vmem:[#allocation2 + $0x38] sm:$0xff] %vm19_vm0, %v149_v34 }
  0xe3   :  { %151 = vst.msk [vmem:[#allocation2 + $0x8] sm:$0xff] %vm19_vm0, %v143_v37  ;;  %155 = vst.msk [vmem:[#allocation2 + $0x28] sm:$0xff] %vm19_vm0, %v147_v38 }
  0xe7   :  { %v163_v40 = vld [vmem:[#allocation2 + $0x10] sm:$0xff] }
  0xe8   :  { %v167_v41 = vld [vmem:[#allocation2 + $0x30] sm:$0xff]  ;;  %v178_v42 = vadd.f32 %v202_v39, %v163_v40  ;;  %v161_v44 = vld [vmem:[#allocation2] sm:$0xff] }
  0xe9   :  { %v182_v43 = vadd.f32 %v202_v39, %v167_v41  ;;  %v165_v45 = vld [vmem:[#allocation2 + $0x20] sm:$0xff]  ;;  %v176_v46 = vadd.f32 %v202_v39, %v161_v44  ;;  %v164_v48 = vld [vmem:[#allocation2 + $0x18] sm:$0xff] }
  0xea   :  { %v180_v47 = vadd.f32 %v202_v39, %v165_v45  ;;  %v168_v49 = vld [vmem:[#allocation2 + $0x38] sm:$0xff]  ;;  %186 = vst.msk [vmem:[%s337_s3 + $0x10] sm:$0xff] %vm19_vm0, %v178_v42  ;;  %v179_v50 = vadd.f32 %v202_v39, %v164_v48  ;;  %v162_v52 = vld [vmem:[#allocation2 + $0x8] sm:$0xff] }
  0xeb   :  { %190 = vst.msk [vmem:[%s337_s3 + $0x30] sm:$0xff] %vm19_vm0, %v182_v43  ;;  %v183_v51 = vadd.f32 %v202_v39, %v168_v49  ;;  %v166_v53 = vld [vmem:[#allocation2 + $0x28] sm:$0xff]  ;;  %184 = vst.msk [vmem:[%s337_s3] sm:$0xff] %vm19_vm0, %v176_v46  ;;  %v177_v54 = vadd.f32 %v202_v39, %v162_v52 }
  0xec   :  { %188 = vst.msk [vmem:[%s337_s3 + $0x20] sm:$0xff] %vm19_vm0, %v180_v47  ;;  %v181_v55 = vadd.f32 %v202_v39, %v166_v53  ;;  %187 = vst.msk [vmem:[%s337_s3 + $0x18] sm:$0xff] %vm19_vm0, %v179_v50 }
  0xed   :  { %191 = vst.msk [vmem:[%s337_s3 + $0x38] sm:$0xff] %vm19_vm0, %v183_v51  ;;  %185 = vst.msk [vmem:[%s337_s3 + $0x8] sm:$0xff] %vm19_vm0, %v177_v54 }
  0xee   :  { %189 = vst.msk [vmem:[%s337_s3 + $0x28] sm:$0xff] %vm19_vm0, %v181_v55 }

// kernel: multimodal_forward.81
= control target key start
LH: loop header
LB: loop body
LE: loop exit
PB: predicated region body
PF: predicated region fallthrough
CT: control target
= control target key end

     0   :  { %vm19_vm0 = vcmask 261120   ;;  %v277_v1 = vmov 0.0   ;;  %vm216_vm1 = vcmask 257024   ;;  %s383_s1 = inlined_call_operand.vmem [shape: bf16[32,32], index: 1, kind: input, shape index: {}]   ;;  %s384_s0 = inlined_call_operand.vmem [shape: f32[64,32], index: 0, kind: input, shape index: {}]   ;;  %s385_s2 = inlined_call_operand.vmem [shape: f32[1,32], index: 2, kind: input, shape index: {}]   ;;  %s386_s3 = inlined_call_operand.vmem [shape: bf16[64,32], index: 3, kind: output, shape index: {}]  }
   0x1   :  { %v275_v0 = vld [vmem:[%s383_s1] sm:$0xff]   ;;  %22 = vst.msk [vmem:[#allocation2 + $0x10] sm:$0xff] %vm19_vm0, %v277_v1  ;;  %20 = vst.msk [vmem:[#allocation2] sm:$0xff] %vm19_vm0, %v277_v1  ;;  %v276_v2 = vld [vmem:[%s383_s1 + $0x8] sm:$0xff]  }
   0x2   :  { %21 = vst.msk [vmem:[#allocation2 + $0x8] sm:$0xff] %vm19_vm0, %v277_v1  ;;  %23 = vst.msk [vmem:[#allocation2 + $0x18] sm:$0xff] %vm19_vm0, %v277_v1  ;;  %258 = vmatprep.subr.bf16.mxu0 %v275_v0  ;;  %270 = vmatprep.subr.bf16.mxu1 %v275_v0  ;;  %v36_v3 = vld [vmem:[%s384_s0] sm:$0xff]  ;;  %v37_v4 = vld [vmem:[%s384_s0 + $0x8] sm:$0xff] }
   0x3   :  { %24 = vst.msk [vmem:[#allocation2 + $0x20] sm:$0xff] %vm19_vm0, %v277_v1  ;;  %25 = vst.msk [vmem:[#allocation2 + $0x28] sm:$0xff] %vm19_vm0, %v277_v1  ;;  %v40_v5 = vld [vmem:[%s384_s0 + $0x20] sm:$0xff]  ;;  %259 = vmatpush3.bf16.msra.mxu0 %v275_v0  ;;  %272 = vmatpush3.bf16.msra.mxu1 %v275_v0  ;;  %v44_v6 = vpack.c.bf16 %v37_v4, %v36_v3  ;;  %v41_v7 = vld [vmem:[%s384_s0 + $0x28] sm:$0xff] }
   0x4   :  { %26 = vst.msk [vmem:[#allocation2 + $0x30] sm:$0xff] %vm19_vm0, %v277_v1  ;;  %27 = vst.msk [vmem:[#allocation2 + $0x38] sm:$0xff] %vm19_vm0, %v277_v1  ;;  %v38_v8 = vld [vmem:[%s384_s0 + $0x10] sm:$0xff]  ;;  %v39_v9 = vld [vmem:[%s384_s0 + $0x18] sm:$0xff]  ;;  %260 = vmatprep.subr.bf16.mxu0 %v276_v2  ;;  %271 = vmatprep.subr.bf16.mxu1 %v276_v2  ;;  %v46_v10 = vpack.c.bf16 %v41_v7, %v40_v5 }
   0x5   :  { %v42_v11 = vld [vmem:[%s384_s0 + $0x30] sm:$0xff]  ;;  %v43_v12 = vld [vmem:[%s384_s0 + $0x38] sm:$0xff]  ;;  %262 = vmatprep.mubr.msk.bf16.mxu0 %vm19_vm0, %v44_v6  ;;  %v45_v13 = vpack.c.bf16 %v39_v9, %v38_v8  ;;  %v235_v39 = vld [vmem:[%s385_s2] ss:$0 sm:$0xff] }
   0x6   :  { %266 = vmatprep.mubr.msk.bf16.mxu1 %vm19_vm0, %v46_v10  ;;  %v47_v14 = vpack.c.bf16 %v43_v12, %v42_v11 }
   0x7   :  { %261 = vmatpush3.bf16.msra.mxu0 %v276_v2  ;;  %273 = vmatpush3.bf16.msra.mxu1 %v276_v2 }
   0x8   :  { %v30_v15 = vld [vmem:[#allocation2 + $0x10] sm:$0xff]  ;;  %v28_v17 = vld [vmem:[#allocation2] sm:$0xff] }
   0x9   :  { %v31_v21 = vld [vmem:[#allocation2 + $0x18] sm:$0xff]  ;;  %v29_v27 = vld [vmem:[#allocation2 + $0x8] sm:$0xff] }
   0xa   :  { %263 = vmatmul.mubr.msk.bf16.vlgmr.msra.gmra.mrb[0].mxu0 %vm19_vm0, %v45_v13  ;;  %267 = vmatmul.mubr.msk.bf16.vlgmr.msra.gmra.mrb[0].mxu1 %vm19_vm0, %v47_v14  ;;  %v32_v18 = vld [vmem:[#allocation2 + $0x20] sm:$0xff]  ;;  %v33_v28 = vld [vmem:[#allocation2 + $0x28] sm:$0xff] }
   0xb   :  { %v34_v16 = vld [vmem:[#allocation2 + $0x30] sm:$0xff]  ;;  %v35_v22 = vld [vmem:[#allocation2 + $0x38] sm:$0xff] }
  0xdd   :  { %v264_v19 = vpop.f32.mrb[0].mxu0  ;;  %v268_v20 = vpop.f32.mrb[0].mxu1 }
  0xde   :  { %v144_v23 = vadd.f32 %v264_v19, %v30_v15  ;;  %v148_v24 = vadd.f32 %v268_v20, %v34_v16  ;;  %v111_v25 = vpop.f32.mrb[1].mxu0  ;;  %v127_v26 = vpop.f32.mrb[1].mxu1 }
  0xdf   :  { %v142_v29 = vadd.f32 %v111_v25, %v28_v17  ;;  %v146_v30 = vadd.f32 %v127_v26, %v32_v18  ;;  %v265_v31 = vpop.f32.mrb[2].mxu0  ;;  %v269_v32 = vpop.f32.mrb[2].mxu1 }
  0xe0   :  { %152 = vst.msk [vmem:[#allocation2 + $0x10] sm:$0xff] %vm19_vm0, %v144_v23  ;;  %156 = vst.msk [vmem:[#allocation2 + $0x30] sm:$0xff] %vm19_vm0, %v148_v24  ;;  %v145_v33 = vadd.f32 %v265_v31, %v31_v21  ;;  %v149_v34 = vadd.f32 %v269_v32, %v35_v22  ;;  %v114_v35 = vpop.f32.mrb[3].mxu0  ;;  %v130_v36 = vpop.f32.mrb[3].mxu1 }
  0xe1   :  { %150 = vst.msk [vmem:[#allocation2] sm:$0xff] %vm19_vm0, %v142_v29  ;;  %154 = vst.msk [vmem:[#allocation2 + $0x20] sm:$0xff] %vm19_vm0, %v146_v30  ;;  %v143_v37 = vadd.f32 %v114_v35, %v29_v27  ;;  %v147_v38 = vadd.f32 %v130_v36, %v33_v28 }
  0xe2   :  { %153 = vst.msk [vmem:[#allocation2 + $0x18] sm:$0xff] %vm19_vm0, %v145_v33  ;;  %157 = vst.msk [vmem:[#allocation2 + $0x38] sm:$0xff] %vm19_vm0, %v149_v34 }
  0xe3   :  { %151 = vst.msk [vmem:[#allocation2 + $0x8] sm:$0xff] %vm19_vm0, %v143_v37  ;;  %155 = vst.msk [vmem:[#allocation2 + $0x28] sm:$0xff] %vm19_vm0, %v147_v38 }
  0xe7   :  { %v163_v40 = vld [vmem:[#allocation2 + $0x10] sm:$0xff] }
  0xe8   :  { %v167_v41 = vld [vmem:[#allocation2 + $0x30] sm:$0xff]  ;;  %v178_v42 = vadd.f32 %v235_v39, %v163_v40  ;;  %v161_v44 = vld [vmem:[#allocation2] sm:$0xff] }
  0xe9   :  { %v182_v43 = vadd.f32 %v235_v39, %v167_v41  ;;  %v165_v45 = vld [vmem:[#allocation2 + $0x20] sm:$0xff]  ;;  %v176_v46 = vadd.f32 %v235_v39, %v161_v44  ;;  %v164_v48 = vld [vmem:[#allocation2 + $0x18] sm:$0xff] }
  0xea   :  { %v180_v47 = vadd.f32 %v235_v39, %v165_v45  ;;  %v168_v49 = vld [vmem:[#allocation2 + $0x38] sm:$0xff]  ;;  %v246_v50 = vpack.c.bf16 %v178_v42, %v178_v42  ;;  %v179_v52 = vadd.f32 %v235_v39, %v164_v48  ;;  %v162_v54 = vld [vmem:[#allocation2 + $0x8] sm:$0xff] }
  0xeb   :  { %v250_v51 = vpack.c.bf16 %v182_v43, %v182_v43  ;;  %v183_v53 = vadd.f32 %v235_v39, %v168_v49  ;;  %v166_v55 = vld [vmem:[#allocation2 + $0x28] sm:$0xff]  ;;  %v244_v56 = vpack.c.bf16 %v176_v46, %v176_v46  ;;  %v177_v58 = vadd.f32 %v235_v39, %v162_v54 }
  0xec   :  { %v248_v57 = vpack.c.bf16 %v180_v47, %v180_v47  ;;  %v181_v59 = vadd.f32 %v235_v39, %v166_v55  ;;  %219 = vst.msk [vmem:[%s386_s3 + $0x8] sm:$0xf] %vm216_vm1, %v246_v50  ;;  %v247_v60 = vpack.c.bf16 %v179_v52, %v179_v52 }
  0xed   :  { %223 = vst.msk [vmem:[%s386_s3 + $0x18] sm:$0xf] %vm216_vm1, %v250_v51  ;;  %v251_v61 = vpack.c.bf16 %v183_v53, %v183_v53  ;;  %217 = vst.msk [vmem:[%s386_s3] sm:$0xf] %vm216_vm1, %v244_v56  ;;  %v245_v62 = vpack.c.bf16 %v177_v58, %v177_v58 }
  0xee   :  { %221 = vst.msk [vmem:[%s386_s3 + $0x10] sm:$0xf] %vm216_vm1, %v248_v57  ;;  %v249_v63 = vpack.c.bf16 %v181_v59, %v181_v59  ;;  %220 = vst.msk [vmem:[%s386_s3 + $0xc] sm:$0xf] %vm216_vm1, %v247_v60 }
  0xef   :  { %224 = vst.msk [vmem:[%s386_s3 + $0x1c] sm:$0xf] %vm216_vm1, %v251_v61  ;;  %218 = vst.msk [vmem:[%s386_s3 + $0x4] sm:$0xf] %vm216_vm1, %v245_v62 }
  0xf0   :  { %222 = vst.msk [vmem:[%s386_s3 + $0x14] sm:$0xf] %vm216_vm1, %v249_v63 }

// kernel: multimodal_forward.83
= control target key start
LH: loop header
LB: loop body
LE: loop exit
PB: predicated region body
PF: predicated region fallthrough
CT: control target
= control target key end

     0   :  { %vm19_vm0 = vcmask 785408   ;;  %v186_v1 = vmov 0.0   ;;  %vm50_vm1 = vcmask 261120   ;;  %vm149_vm2 = vcmask 781312   ;;  %s248_s1 = inlined_call_operand.vmem [shape: bf16[32,96], index: 1, kind: input, shape index: {}]   ;;  %s249_s0 = inlined_call_operand.vmem [shape: f32[32,32], index: 0, kind: input, shape index: {}]   ;;  %s250_s2 = inlined_call_operand.vmem [shape: f32[1,96], index: 2, kind: input, shape index: {}]   ;;  %s251_s3 = inlined_call_operand.vmem [shape: bf16[32,96], index: 3, kind: output, shape index: {}]  }
   0x1   :  { %v184_v0 = vld [vmem:[%s248_s1] sm:$0xff]   ;;  %22 = vst.msk [vmem:[#allocation2 + $0x10] sm:$0xff] %vm19_vm0, %v186_v1  ;;  %20 = vst.msk [vmem:[#allocation2] sm:$0xff] %vm19_vm0, %v186_v1  ;;  %v185_v2 = vld [vmem:[%s248_s1 + $0x8] sm:$0xff]  }
   0x2   :  { %21 = vst.msk [vmem:[#allocation2 + $0x8] sm:$0xff] %vm19_vm0, %v186_v1  ;;  %23 = vst.msk [vmem:[#allocation2 + $0x18] sm:$0xff] %vm19_vm0, %v186_v1  ;;  %175 = vmatprep.subr.bf16.mxu0 %v184_v0  ;;  %v28_v3 = vld [vmem:[%s249_s0] sm:$0xff]  ;;  %v29_v4 = vld [vmem:[%s249_s0 + $0x8] sm:$0xff] }
   0x3   :  { %176 = vmatpush3.bf16.msra.mxu0 %v184_v0  ;;  %v32_v5 = vpack.c.bf16 %v29_v4, %v28_v3  ;;  %v30_v6 = vld [vmem:[%s249_s0 + $0x10] sm:$0xff]  ;;  %v31_v7 = vld [vmem:[%s249_s0 + $0x18] sm:$0xff]  ;;  %v162_v21 = vld [vmem:[%s250_s2] ss:$0 sm:$0xff] }
   0x4   :  { %177 = vmatprep.subr.bf16.mxu0 %v185_v2  ;;  %v33_v8 = vpack.c.bf16 %v31_v7, %v30_v6 }
   0x5   :  { %179 = vmatprep.mubr.msk.bf16.mxu0 %vm50_vm1, %v32_v5 }
   0x7   :  { %178 = vmatpush3.bf16.msra.mxu0 %v185_v2 }
   0x8   :  { %v26_v9 = vld [vmem:[#allocation2 + $0x10] sm:$0xff]  ;;  %v24_v10 = vld [vmem:[#allocation2] sm:$0xff] }
   0x9   :  { %v27_v12 = vld [vmem:[#allocation2 + $0x18] sm:$0xff]  ;;  %v25_v15 = vld [vmem:[#allocation2 + $0x8] sm:$0xff] }
   0xa   :  { %180 = vmatmul.mubr.msk.bf16.vlgmr.msra.gmra.mrb[0].mxu0 %vm50_vm1, %v33_v8 }
  0xdd   :  { %v181_v11 = vpop.f32.mrb[0].mxu0 }
  0xde   :  { %v108_v13 = vadd.f32 %v181_v11, %v26_v9  ;;  %v91_v14 = vpop.f32.mrb[1].mxu0 }
  0xdf   :  { %v106_v16 = vadd.f32 %v91_v14, %v24_v10  ;;  %v182_v17 = vpop.f32.mrb[2].mxu0 }
  0xe0   :  { %113 = vst.msk [vmem:[#allocation2 + $0x10] sm:$0xff] %vm19_vm0, %v108_v13  ;;  %v109_v18 = vadd.f32 %v182_v17, %v27_v12  ;;  %v94_v19 = vpop.f32.mrb[3].mxu0 }
  0xe1   :  { %111 = vst.msk [vmem:[#allocation2] sm:$0xff] %vm19_vm0, %v106_v16  ;;  %v107_v20 = vadd.f32 %v94_v19, %v25_v15 }
  0xe2   :  { %114 = vst.msk [vmem:[#allocation2 + $0x18] sm:$0xff] %vm19_vm0, %v109_v18 }
  0xe3   :  { %112 = vst.msk [vmem:[#allocation2 + $0x8] sm:$0xff] %vm19_vm0, %v107_v20 }
  0xe7   :  { %v120_v22 = vld [vmem:[#allocation2 + $0x10] sm:$0xff] }
  0xe8   :  { %v131_v23 = vadd.f32 %v162_v21, %v120_v22  ;;  %v118_v24 = vld [vmem:[#allocation2] sm:$0xff] }
  0xe9   :  { %v129_v25 = vadd.f32 %v162_v21, %v118_v24  ;;  %v121_v26 = vld [vmem:[#allocation2 + $0x18] sm:$0xff] }
  0xea   :  { %v169_v27 = vpack.c.bf16 %v131_v23, %v131_v23  ;;  %v132_v28 = vadd.f32 %v162_v21, %v121_v26  ;;  %v119_v29 = vld [vmem:[#allocation2 + $0x8] sm:$0xff] }
  0xeb   :  { %v167_v30 = vpack.c.bf16 %v129_v25, %v129_v25  ;;  %v130_v31 = vadd.f32 %v162_v21, %v119_v29 }
  0xec   :  { %152 = vst.msk [vmem:[%s251_s3 + $0x8] sm:$0xf] %vm149_vm2, %v169_v27  ;;  %v170_v32 = vpack.c.bf16 %v132_v28, %v132_v28 }
  0xed   :  { %150 = vst.msk [vmem:[%s251_s3] sm:$0xf] %vm149_vm2, %v167_v30  ;;  %v168_v33 = vpack.c.bf16 %v130_v31, %v130_v31 }
  0xee   :  { %153 = vst.msk [vmem:[%s251_s3 + $0xc] sm:$0xf] %vm149_vm2, %v170_v32 }
  0xef   :  { %151 = vst.msk [vmem:[%s251_s3 + $0x4] sm:$0xf] %vm149_vm2, %v168_v33 }

// kernel: multimodal_forward.82
= control target key start
LH: loop header
LB: loop body
LE: loop exit
PB: predicated region body
PF: predicated region fallthrough
CT: control target
= control target key end

     0   :  { %s307_s12 = smov 0   ;;  %s340_s0 = inlined_call_operand.vmem [shape: f32[4,8,32], index: 0, kind: input, shape index: {}]   ;;  %s341_s1 = inlined_call_operand.vmem [shape: f32[8,32], index: 1, kind: input, shape index: {}]   ;;  %s342_s2 = inlined_call_operand.vmem [shape: f32[8,32], index: 2, kind: input, shape index: {}]   ;;  %s343_s3 = inlined_call_operand.vmem [shape: f32[4,8,32], index: 3, kind: output, shape index: {}]  }
   0x1 LB: > { %s256_s13 = sadd.s32 4294967295, %s285_s12   ;;  %p260_p0 = scmp.ge.s32.totalorder %s285_s12, 1  ;;  %s285_s12 = sphi %s307_s12, %s13_s12  }
   0x2   : > { %p136_p1 = scmp.lt.s32.totalorder %s285_s12, 5 }
   0x4   : > { %p137_p2 = pnand %p260_p0, %p136_p1 }
   0x5   : > { %p158_p3 = scmp.lt.s32.totalorder (!%p137_p2), %s256_s13, 3  ;;  %vm167_vm0 = vcmask (!%p137_p2), 261120   ;;  %v198_v25 = vld [vmem:[%s341_s1] sm:$0xff] (!%p137_p2) }
   0x6   : > { %140 = sbr.rel (%p137_p2) target bundleno = 457 (0x1c9), region = 32  ;;  %v200_v27 = vld [vmem:[%s342_s2] sm:$0xff] (!%p137_p2) }
   0xd   : > { %s345_s13 = smov (!%p158_p3, %s256_s13), 3 }
   0xe   : > { %s261_s14 = sshll.u32 %s345_s13, 3 }
   0xf   : > { %s161_s17 = scalar_lea.vmem %s340_s0, %s261_s14  ;;  %s165_s26 = scalar_lea.vmem %s343_s3, %s261_s14 }
  0x10   : > { %v166_v0 = vld [vmem:[%s161_s17] sm:$0xff] }
  0x11   : > { %v168_v1 = vsel %vm167_vm0, %v166_v0, 0.0 }
  0x12   : > { %169 = vadd.xlane.f32.xlu0 %v168_v1 }
  0x9f   : > { %v170_v2 = vpop.xlane.xlu0 %169 }
  0xa0   : > { %v171_v3 = vrot.slane %v170_v2, 4 }
  0xa2   : > { %v172_v4 = vadd.f32 %v171_v3, %v170_v2 }
  0xa4   : > { %v173_v5 = vrot.slane %v172_v4, 2 }
  0xa6   : > { %v174_v6 = vadd.f32 %v173_v5, %v172_v4 }
  0xa8   : > { %v175_v7 = vrot.slane %v174_v6, 1 }
  0xaa   : > { %v176_v8 = vadd.f32 %v175_v7, %v174_v6 }
  0xac   : > { %265 = vpush %v176_v8 }
  0xdd   : > { %s266_s18 = spop %265 }
  0xde   : > { %v178_v9 = vstv %s266_s18 }
  0xdf   : > { %v180_v10 = vmul.f32 0.00390625, %v178_v9 }
  0xe1   : > { %v181_v11 = vsub.f32 %v166_v0, %v180_v10 }
  0xe3   : > { %v182_v12 = vmul.f32 %v181_v11, %v181_v11 }
  0xe5   : > { %v183_v13 = vsel %vm167_vm0, %v182_v12, 0.0 }
  0xe6   : > { %184 = vadd.xlane.f32.xlu0 %v183_v13 }
 0x173   : > { %v185_v14 = vpop.xlane.xlu0 %184 }
 0x174   : > { %v186_v15 = vrot.slane %v185_v14, 4 }
 0x176   : > { %v187_v16 = vadd.f32 %v186_v15, %v185_v14 }
 0x178   : > { %v188_v17 = vrot.slane %v187_v16, 2 }
 0x17a   : > { %v189_v18 = vadd.f32 %v188_v17, %v187_v16 }
 0x17c   : > { %v190_v19 = vrot.slane %v189_v18, 1 }
 0x17e   : > { %v191_v20 = vadd.f32 %v190_v19, %v189_v18 }
 0x180   : > { %267 = vpush %v191_v20 }
 0x1b1   : > { %s268_s19 = spop %267 }
 0x1b2   : > { %v193_v21 = vstv %s268_s19 }
 0x1b3   : > { %v194_v22 = vmul.f32 0.00390625, %v193_v21 }
 0x1b5   : > { %v195_v23 = vadd.f32 1e-05, %v194_v22 }
 0x1b7   : > { %277 = vrsqrt.f32 %v195_v23 }
 0x1c1   : > { %v278_v24 = vpop.eup %277 }
 0x1c2   : > { %v197_v26 = vmul.f32 %v278_v24, %v181_v11 }
 0x1c4   : > { %v199_v28 = vmul.f32 %v198_v25, %v197_v26 }
 0x1c6   : > { %v201_v29 = vadd.f32 %v200_v27, %v199_v28 }
 0x1c8   : > { %202 = vst.msk [vmem:[%s165_s26] sm:$0xff] %vm167_vm0, %v201_v29 }
 0x1c9 PF: > { %s13_s12 = sadd.s32 1, %s285_s12  }
 0x1ca   : > { %p10_p4 = scmp.ge.s32.totalorder %s13_s12, 6  }
 0x1cc   :  { %12 = sbr.rel (!%p10_p4) target bundleno = 1 (0x1), region = 62 }

// kernel: multimodal_forward.85
= control target key start
LH: loop header
LB: loop body
LE: loop exit
PB: predicated region body
PF: predicated region fallthrough
CT: control target
= control target key end

     0   :  { %vm28_vm0 = vcmask 261120   ;;  %v274_v1 = vmov 0.0   ;;  %s377_s1 = inlined_call_operand.vmem [shape: bf16[32,32], index: 1, kind: input, shape index: {}]   ;;  %s378_s0 = inlined_call_operand.vmem [shape: bf16[32,32], index: 0, kind: input, shape index: {}]   ;;  %s379_s2 = inlined_call_operand.vmem [shape: f32[1,32], index: 2, kind: input, shape index: {}]   ;;  %s380_s3 = inlined_call_operand.vmem [shape: f32[32,32], index: 3, kind: input, shape index: {}]   ;;  %s381_s4 = inlined_call_operand.vmem [shape: f32[1,32], index: 4, kind: input, shape index: {}]   ;;  %s382_s5 = inlined_call_operand.vmem [shape: f32[1,32], index: 5, kind: input, shape index: {}]   ;;  %s383_s6 = inlined_call_operand.vmem [shape: f32[32,32], index: 6, kind: output, shape index: {}]  }
   0x1   :  { %v262_v0 = vld [vmem:[%s377_s1] sm:$0xff]   ;;  %31 = vst.msk [vmem:[#allocation2 + $0x10] sm:$0xff] %vm28_vm0, %v274_v1  ;;  %29 = vst.msk [vmem:[#allocation2] sm:$0xff] %vm28_vm0, %v274_v1  ;;  %v263_v2 = vld [vmem:[%s377_s1 + $0x8] sm:$0xff]  }
   0x2   :  { %30 = vst.msk [vmem:[#allocation2 + $0x8] sm:$0xff] %vm28_vm0, %v274_v1  ;;  %32 = vst.msk [vmem:[#allocation2 + $0x18] sm:$0xff] %vm28_vm0, %v274_v1  ;;  %253 = vmatprep.subr.bf16.mxu0 %v262_v0  ;;  %v264_v3 = vld [vmem:[%s378_s0] sm:$0xff]   ;;  %v265_v4 = vld [vmem:[%s378_s0 + $0x8] sm:$0xff]  }
   0x3   :  { %254 = vmatpush3.bf16.msra.mxu0 %v262_v0  ;;  %257 = vmatprep.mubr.msk.bf16.mxu0 %vm28_vm0, %v264_v3  ;;  %v246_v17 = vld [vmem:[%s379_s2] ss:$0 sm:$0xff]  ;;  %v151_v19 = vld [vmem:[%s380_s3 + $0x10] sm:$0xff]  ;;  %v152_v25 = vld [vmem:[%s380_s3 + $0x18] sm:$0xff] }
   0x4   :  { %255 = vmatprep.subr.bf16.mxu0 %v263_v2  ;;  %v149_v22 = vld [vmem:[%s380_s3] sm:$0xff]  ;;  %v150_v29 = vld [vmem:[%s380_s3 + $0x8] sm:$0xff] }
   0x7   :  { %256 = vmatpush3.bf16.msra.mxu0 %v263_v2 }
   0x8   :  { %v35_v5 = vld [vmem:[#allocation2 + $0x10] sm:$0xff]  ;;  %v33_v6 = vld [vmem:[#allocation2] sm:$0xff] }
   0x9   :  { %v36_v8 = vld [vmem:[#allocation2 + $0x18] sm:$0xff]  ;;  %v34_v11 = vld [vmem:[#allocation2 + $0x8] sm:$0xff] }
   0xa   :  { %258 = vmatmul.mubr.msk.bf16.vlgmr.msra.gmra.mrb[0].mxu0 %vm28_vm0, %v265_v4 }
  0xdd   :  { %v259_v7 = vpop.f32.mrb[0].mxu0 }
  0xde   :  { %v125_v9 = vadd.f32 %v259_v7, %v35_v5  ;;  %v108_v10 = vpop.f32.mrb[1].mxu0  ;;  %v247_v7 = vld [vmem:[%s381_s4] ss:$0 sm:$0xff] }
  0xdf   :  { %v123_v12 = vadd.f32 %v108_v10, %v33_v6  ;;  %v260_v13 = vpop.f32.mrb[2].mxu0 }
  0xe0   :  { %129 = vst.msk [vmem:[#allocation2 + $0x10] sm:$0xff] %vm28_vm0, %v125_v9  ;;  %v126_v14 = vadd.f32 %v260_v13, %v36_v8  ;;  %v111_v15 = vpop.f32.mrb[3].mxu0  ;;  %v248_v9 = vld [vmem:[%s382_s5] ss:$0 sm:$0xff] }
  0xe1   :  { %127 = vst.msk [vmem:[#allocation2] sm:$0xff] %vm28_vm0, %v123_v12  ;;  %v124_v16 = vadd.f32 %v111_v15, %v34_v11 }
  0xe2   :  { %130 = vst.msk [vmem:[#allocation2 + $0x18] sm:$0xff] %vm28_vm0, %v126_v14 }
  0xe3   :  { %128 = vst.msk [vmem:[#allocation2 + $0x8] sm:$0xff] %vm28_vm0, %v124_v16 }
  0xe7   :  { %v136_v18 = vld [vmem:[#allocation2 + $0x10] sm:$0xff] }
  0xe8   :  { %v147_v20 = vadd.f32 %v246_v17, %v136_v18  ;;  %v134_v21 = vld [vmem:[#allocation2] sm:$0xff] }
  0xe9   :  { %v145_v23 = vadd.f32 %v246_v17, %v134_v21  ;;  %v137_v24 = vld [vmem:[#allocation2 + $0x18] sm:$0xff] }
  0xea   :  { %v155_v26 = vadd.f32 %v151_v19, %v147_v20  ;;  %v148_v27 = vadd.f32 %v246_v17, %v137_v24  ;;  %v135_v28 = vld [vmem:[#allocation2 + $0x8] sm:$0xff] }
  0xeb   :  { %v153_v30 = vadd.f32 %v149_v22, %v145_v23  ;;  %v146_v31 = vadd.f32 %v246_v17, %v135_v28 }
  0xec   :  { %v163_v32 = vsel %vm28_vm0, %v155_v26, 0.0  ;;  %v156_v33 = vadd.f32 %v152_v25, %v148_v27 }
  0xed   :  { %164 = vadd.xlane.f32.xlu1 %v163_v32  ;;  %v157_v34 = vsel %vm28_vm0, %v153_v30, 0.0  ;;  %v154_v35 = vadd.f32 %v150_v29, %v146_v31 }
  0xee   :  { %158 = vadd.xlane.f32.xlu0 %v157_v34  ;;  %v166_v36 = vsel %vm28_vm0, %v156_v33, 0.0 }
  0xef   :  { %v160_v37 = vsel %vm28_vm0, %v154_v35, 0.0 }
  0xf1   :  { %167 = vadd.xlane.f32.xlu1 %v166_v36 }
  0xf2   :  { %161 = vadd.xlane.f32.xlu0 %v160_v37 }
 0x17a   :  { %v165_v38 = vpop.xlane.xlu1 %164 }
 0x17b   :  { %v172_v39 = vmul.f32 0.03125, %v165_v38  ;;  %v159_v40 = vpop.xlane.xlu0 %158 }
 0x17c   :  { %v170_v41 = vmul.f32 0.03125, %v159_v40 }
 0x17d   :  { %v176_v42 = vsub.f32 %v155_v26, %v172_v39 }
 0x17e   :  { %v174_v43 = vsub.f32 %v153_v30, %v170_v41  ;;  %v168_v44 = vpop.xlane.xlu1 %167 }
 0x17f   :  { %v173_v45 = vmul.f32 0.03125, %v168_v44  ;;  %v162_v46 = vpop.xlane.xlu0 %161  ;;  %v180_v52 = vmul.f32 %v176_v42, %v176_v42 }
 0x180   :  { %v171_v47 = vmul.f32 0.03125, %v162_v46  ;;  %v178_v48 = vmul.f32 %v174_v43, %v174_v43 }
 0x181   :  { %v177_v49 = vsub.f32 %v156_v33, %v173_v45  ;;  %v188_v54 = vsel %vm28_vm0, %v180_v52, 0.0 }
 0x182   :  { %v175_v50 = vsub.f32 %v154_v35, %v171_v47  ;;  %v182_v51 = vsel %vm28_vm0, %v178_v48, 0.0 }
 0x183   :  { %183 = vadd.xlane.f32.xlu0 %v182_v51  ;;  %v181_v56 = vmul.f32 %v177_v49, %v177_v49 }
 0x184   :  { %v179_v53 = vmul.f32 %v175_v50, %v175_v50 }
 0x185   :  { %v191_v57 = vsel %vm28_vm0, %v181_v56, 0.0 }
 0x186   :  { %v185_v55 = vsel %vm28_vm0, %v179_v53, 0.0 }
 0x187   :  { %189 = vadd.xlane.f32.xlu0 %v188_v54  ;;  %186 = vadd.xlane.f32.xlu1 %v185_v55 }
 0x18b   :  { %192 = vadd.xlane.f32.xlu1 %v191_v57 }
 0x210   :  { %v184_v58 = vpop.xlane.xlu0 %183 }
 0x211   :  { %v194_v59 = vmul.f32 0.03125, %v184_v58 }
 0x213   :  { %v198_v60 = vadd.f32 1e-05, %v194_v59 }
 0x214   :  { %v187_v61 = vpop.xlane.xlu1 %186  ;;  %v190_v62 = vpop.xlane.xlu0 %189 }
 0x215   :  { %266 = vrsqrt.f32 %v198_v60  ;;  %v195_v63 = vmul.f32 0.03125, %v187_v61  ;;  %v196_v0 = vmul.f32 0.03125, %v190_v62 }
 0x217   :  { %v199_v1 = vadd.f32 1e-05, %v195_v63  ;;  %v200_v2 = vadd.f32 1e-05, %v196_v0 }
 0x218   :  { %v193_v3 = vpop.xlane.xlu1 %192 }
 0x219   :  { %268 = vrsqrt.f32 %v199_v1  ;;  %v197_v4 = vmul.f32 0.03125, %v193_v3 }
 0x21a   :  { %270 = vrsqrt.f32 %v200_v2 }
 0x21b   :  { %v201_v5 = vadd.f32 1e-05, %v197_v4 }
 0x21d   :  { %272 = vrsqrt.f32 %v201_v5 }
 0x21f   :  { %v267_v6 = vpop.eup %266 }
 0x220   :  { %v206_v8 = vmul.f32 %v267_v6, %v174_v43 }
 0x222   :  { %v217_v10 = vmul.f32 %v247_v7, %v206_v8 }
 0x223   :  { %v269_v11 = vpop.eup %268 }
 0x224   :  { %v271_v12 = vpop.eup %270  ;;  %v228_v13 = vadd.f32 %v248_v9, %v217_v10  ;;  %v207_v14 = vmul.f32 %v269_v11, %v175_v50 }
 0x225   :  { %v208_v15 = vmul.f32 %v271_v12, %v176_v42 }
 0x226   :  { %232 = vst.msk [vmem:[%s383_s6] sm:$0xff] %vm28_vm0, %v228_v13  ;;  %v218_v16 = vmul.f32 %v247_v7, %v207_v14 }
 0x227   :  { %v273_v17 = vpop.eup %272  ;;  %v219_v18 = vmul.f32 %v247_v7, %v208_v15 }
 0x228   :  { %v229_v19 = vadd.f32 %v248_v9, %v218_v16  ;;  %v209_v20 = vmul.f32 %v273_v17, %v177_v49 }
 0x229   :  { %v230_v21 = vadd.f32 %v248_v9, %v219_v18 }
 0x22a   :  { %233 = vst.msk [vmem:[%s383_s6 + $0x8] sm:$0xff] %vm28_vm0, %v229_v19  ;;  %v220_v22 = vmul.f32 %v247_v7, %v209_v20 }
 0x22b   :  { %234 = vst.msk [vmem:[%s383_s6 + $0x10] sm:$0xff] %vm28_vm0, %v230_v21 }
 0x22c   :  { %v231_v23 = vadd.f32 %v248_v9, %v220_v22 }
 0x22e   :  { %235 = vst.msk [vmem:[%s383_s6 + $0x18] sm:$0xff] %vm28_vm0, %v231_v23 }

// kernel: multimodal_forward.86
= control target key start
LH: loop header
LB: loop body
LE: loop exit
PB: predicated region body
PF: predicated region fallthrough
CT: control target
= control target key end

     0   :  { %vm19_vm0 = vcmask 523264   ;;  %v190_v1 = vmov 0.0   ;;  %vm50_vm1 = vcmask 261120   ;;  %vm153_vm2 = vcmask 519168   ;;  %s252_s1 = inlined_call_operand.vmem [shape: bf16[32,64], index: 1, kind: input, shape index: {}]   ;;  %s253_s0 = inlined_call_operand.vmem [shape: f32[32,32], index: 0, kind: input, shape index: {}]   ;;  %s254_s2 = inlined_call_operand.vmem [shape: f32[1,64], index: 2, kind: input, shape index: {}]   ;;  %s255_s3 = inlined_call_operand.vmem [shape: bf16[32,64], index: 3, kind: output, shape index: {}]  }
   0x1   :  { %v188_v0 = vld [vmem:[%s252_s1] sm:$0xff]   ;;  %22 = vst.msk [vmem:[#allocation2 + $0x10] sm:$0xff] %vm19_vm0, %v190_v1  ;;  %20 = vst.msk [vmem:[#allocation2] sm:$0xff] %vm19_vm0, %v190_v1  ;;  %v189_v2 = vld [vmem:[%s252_s1 + $0x8] sm:$0xff]  }
   0x2   :  { %21 = vst.msk [vmem:[#allocation2 + $0x8] sm:$0xff] %vm19_vm0, %v190_v1  ;;  %23 = vst.msk [vmem:[#allocation2 + $0x18] sm:$0xff] %vm19_vm0, %v190_v1  ;;  %179 = vmatprep.subr.bf16.mxu0 %v188_v0  ;;  %v28_v3 = vld [vmem:[%s253_s0] sm:$0xff]  ;;  %v29_v4 = vld [vmem:[%s253_s0 + $0x8] sm:$0xff] }
   0x3   :  { %180 = vmatpush3.bf16.msra.mxu0 %v188_v0  ;;  %v32_v5 = vpack.c.bf16 %v29_v4, %v28_v3  ;;  %v30_v6 = vld [vmem:[%s253_s0 + $0x10] sm:$0xff]  ;;  %v31_v7 = vld [vmem:[%s253_s0 + $0x18] sm:$0xff]  ;;  %v166_v21 = vld [vmem:[%s254_s2] ss:$0 sm:$0xff] }
   0x4   :  { %181 = vmatprep.subr.bf16.mxu0 %v189_v2  ;;  %v33_v8 = vpack.c.bf16 %v31_v7, %v30_v6 }
   0x5   :  { %183 = vmatprep.mubr.msk.bf16.mxu0 %vm50_vm1, %v32_v5 }
   0x7   :  { %182 = vmatpush3.bf16.msra.mxu0 %v189_v2 }
   0x8   :  { %v26_v9 = vld [vmem:[#allocation2 + $0x10] sm:$0xff]  ;;  %v24_v10 = vld [vmem:[#allocation2] sm:$0xff] }
   0x9   :  { %v27_v12 = vld [vmem:[#allocation2 + $0x18] sm:$0xff]  ;;  %v25_v15 = vld [vmem:[#allocation2 + $0x8] sm:$0xff] }
   0xa   :  { %184 = vmatmul.mubr.msk.bf16.vlgmr.msra.gmra.mrb[0].mxu0 %vm50_vm1, %v33_v8 }
  0xdd   :  { %v185_v11 = vpop.f32.mrb[0].mxu0 }
  0xde   :  { %v108_v13 = vadd.f32 %v185_v11, %v26_v9  ;;  %v91_v14 = vpop.f32.mrb[1].mxu0 }
  0xdf   :  { %v106_v16 = vadd.f32 %v91_v14, %v24_v10  ;;  %v186_v17 = vpop.f32.mrb[2].mxu0 }
  0xe0   :  { %113 = vst.msk [vmem:[#allocation2 + $0x10] sm:$0xff] %vm19_vm0, %v108_v13  ;;  %v109_v18 = vadd.f32 %v186_v17, %v27_v12  ;;  %v94_v19 = vpop.f32.mrb[3].mxu0 }
  0xe1   :  { %111 = vst.msk [vmem:[#allocation2] sm:$0xff] %vm19_vm0, %v106_v16  ;;  %v107_v20 = vadd.f32 %v94_v19, %v25_v15 }
  0xe2   :  { %114 = vst.msk [vmem:[#allocation2 + $0x18] sm:$0xff] %vm19_vm0, %v109_v18 }
  0xe3   :  { %112 = vst.msk [vmem:[#allocation2 + $0x8] sm:$0xff] %vm19_vm0, %v107_v20 }
  0xe7   :  { %v120_v22 = vld [vmem:[#allocation2 + $0x10] sm:$0xff] }
  0xe8   :  { %v131_v23 = vadd.f32 %v166_v21, %v120_v22  ;;  %v118_v24 = vld [vmem:[#allocation2] sm:$0xff] }
  0xe9   :  { %v129_v25 = vadd.f32 %v166_v21, %v118_v24  ;;  %v121_v26 = vld [vmem:[#allocation2 + $0x18] sm:$0xff] }
  0xea   :  { %v135_v27 = vmax.f32 %v131_v23, 0.0  ;;  %v132_v28 = vadd.f32 %v166_v21, %v121_v26  ;;  %v119_v29 = vld [vmem:[#allocation2 + $0x8] sm:$0xff] }
  0xeb   :  { %v133_v30 = vmax.f32 %v129_v25, 0.0  ;;  %v130_v31 = vadd.f32 %v166_v21, %v119_v29 }
  0xec   :  { %v173_v32 = vpack.c.bf16 %v135_v27, %v135_v27  ;;  %v136_v33 = vmax.f32 %v132_v28, 0.0 }
  0xed   :  { %v171_v34 = vpack.c.bf16 %v133_v30, %v133_v30  ;;  %v134_v35 = vmax.f32 %v130_v31, 0.0 }
  0xee   :  { %156 = vst.msk [vmem:[%s255_s3 + $0x8] sm:$0xf] %vm153_vm2, %v173_v32  ;;  %v174_v36 = vpack.c.bf16 %v136_v33, %v136_v33 }
  0xef   :  { %154 = vst.msk [vmem:[%s255_s3] sm:$0xf] %vm153_vm2, %v171_v34  ;;  %v172_v37 = vpack.c.bf16 %v134_v35, %v134_v35 }
  0xf0   :  { %157 = vst.msk [vmem:[%s255_s3 + $0xc] sm:$0xf] %vm153_vm2, %v174_v36 }
  0xf1   :  { %155 = vst.msk [vmem:[%s255_s3 + $0x4] sm:$0xf] %vm153_vm2, %v172_v37 }

// kernel: multimodal_forward.84
= control target key start
LH: loop header
LB: loop body
LE: loop exit
PB: predicated region body
PF: predicated region fallthrough
CT: control target
= control target key end

     0   :  { %s834_s9 = smov 0   ;;  %s922_s0 = inlined_call_operand.vmem [shape: bf16[4,3,4,8,8], index: 0, kind: input, shape index: {}]   ;;  %s923_s1 = inlined_call_operand.vmem [shape: f32[4,1,8], index: 1, kind: input, shape index: {}]   ;;  %s924_s2 = inlined_call_operand.vmem [shape: bf16[4,8,32], index: 2, kind: output, shape index: {}]  }
   0x1 LB: > { %s686_s10 = sadd.s32 4294967295, %s812_s9   ;;  %p690_p0 = scmp.ge.s32.totalorder %s812_s9, 1  ;;  %s812_s9 = sphi %s834_s9, %s12_s9  }
   0x2   : > { %p120_p1 = scmp.lt.s32.totalorder %s812_s9, 5 }
   0x4   : > { %p121_p2 = pnand %p690_p0, %p120_p1 }
   0x5   : > { %p144_p3 = scmp.lt.s32.totalorder (!%p121_p2), %s686_s10, 3  ;;  %v814_v0 = vmov (!%p121_p2), 0.0   ;;  %vm815_vm0 = vmmov (!%p121_p2), 0   ;;  %vm172_vm1 = vcmask (!%p121_p2), 64512   ;;  %vm422_vm2 = vcmask (!%p121_p2), 1043456   ;;  %s816_s18 = smov (!%p121_p2), 8  }
   0x6   : > { %124 = sbr.rel (%p121_p2) target bundleno = 901 (0x385), region = 28  ;;  %728 = vmatprep.subr.bf16.mxu0 (!%p121_p2), %v814_v0  ;;  %734 = vmatprep.subr.bf16.mxu1 (!%p121_p2), %v814_v0  ;;  %s817_s19 = smov (!%p121_p2), 16   ;;  %vm617_vm3 = vcmask (!%p121_p2), 130048   ;;  %vm619_vm4 = vcmask (!%p121_p2), 195584   ;;  %vm622_vm5 = vcmask (!%p121_p2), 257024  }
   0x7   : > { %730 = vmatprep.mubr.msk.bf16.mxu0 (!%p121_p2), %vm815_vm0, %v814_v0  ;;  %736 = vmatprep.mubr.msk.bf16.mxu1 (!%p121_p2), %vm815_vm0, %v814_v0  ;;  %s818_s20 = smov (!%p121_p2), 24  }
   0xd   : > { %s926_s10 = smov (!%p144_p3, %s686_s10), 3 }
   0xe   : > { %s776_s11 = smul.u32 48, %s926_s10  ;;  %s151_s17 = scalar_lea.vmem %s923_s1, %s926_s10 }
   0xf   : > { %v705_v15 = vld [vmem:[%s151_s17] ss:$0 sm:$0xff]  ;;  %s692_s21 = sshll.u32 %s926_s10, 2 }
  0x10   : > { %s854_s14 = scalar_lea.vmem %s922_s0, %s776_s11  ;;  %s155_s24 = scalar_lea.vmem %s924_s2, %s692_s21 }
  0x11   : > { %v693_v1 = vld [vmem:[%s854_s14 + $0x10] sm:$0xf]  ;;  %v694_v2 = vld [vmem:[%s854_s14 + $0x14] sm:$0xf]  ;;  %v695_v5 = vld [vmem:[%s854_s14 + $0x18] sm:$0xf] }
  0x12   : > { %v177_v3 = vsel %vm172_vm1, %v693_v1, 0  ;;  %v223_v4 = vsel %vm172_vm1, %v694_v2, 0  ;;  %v696_v6 = vld [vmem:[%s854_s14 + $0x1c] sm:$0xf]  ;;  %v157_v7 = vld [vmem:[%s854_s14] sm:$0xf] }
  0x13   : > { %729 = vmatpush3.bf16.xpose.msra.mxu0 %v177_v3  ;;  %735 = vmatpush3.bf16.xpose.msra.mxu1 %v223_v4  ;;  %v158_v8 = vld [vmem:[%s854_s14 + $0x4] sm:$0xf]  ;;  %v269_v9 = vsel %vm172_vm1, %v695_v5, 0  ;;  %v315_v10 = vsel %vm172_vm1, %v696_v6, 0  ;;  %v159_v11 = vld [vmem:[%s854_s14 + $0x8] sm:$0xf] }
  0x14   : > { %740 = vmatprep.subr.bf16.mxu0 %v814_v0  ;;  %746 = vmatprep.subr.bf16.mxu1 %v814_v0  ;;  %v160_v12 = vld [vmem:[%s854_s14 + $0xc] sm:$0xf]  ;;  %v697_v62 = vld [vmem:[%s854_s14 + $0x20] sm:$0xf]  ;;  %v698_v1 = vld [vmem:[%s854_s14 + $0x24] sm:$0xf] }
  0x15   : > { %v424_v63 = vsel %vm422_vm2, %v697_v62, 0  ;;  %v470_v2 = vsel %vm422_vm2, %v698_v1, 0 }
  0x1a   : > { %731 = vmatmul.mubr.msk.bf16.vlgmr.msra.gmra.mrb[0].mxu0 %vm172_vm1, %v157_v7  ;;  %737 = vmatmul.mubr.msk.bf16.vlgmr.msra.gmra.mrb[0].mxu1 %vm172_vm1, %v158_v8  ;;  %v699_v7 = vld [vmem:[%s854_s14 + $0x28] sm:$0xf] }
  0x1b   : > { %741 = vmatpush3.bf16.xpose.msra.mxu0 %v269_v9  ;;  %747 = vmatpush3.bf16.xpose.msra.mxu1 %v315_v10 }
  0x1c   : > { %742 = vmatprep.mubr.msk.bf16.mxu0 %vm815_vm0, %v814_v0  ;;  %748 = vmatprep.mubr.msk.bf16.mxu1 %vm815_vm0, %v814_v0 }
  0x1d   : > { %752 = vmatprep.subr.bf16.mxu0 %v814_v0  ;;  %758 = vmatprep.subr.bf16.mxu1 %v814_v0 }
  0x22   : > { %743 = vmatmul.mubr.msk.bf16.vlgmr.msra.gmra.mrb[4].mxu0 %vm172_vm1, %v159_v11  ;;  %749 = vmatmul.mubr.msk.bf16.vlgmr.msra.gmra.mrb[4].mxu1 %vm172_vm1, %v160_v12  ;;  %v516_v11 = vsel %vm422_vm2, %v699_v7, 0 }
  0x23   : > { %754 = vmatprep.mubr.msk.bf16.mxu0 %vm815_vm0, %v814_v0  ;;  %760 = vmatprep.mubr.msk.bf16.mxu1 %vm815_vm0, %v814_v0 }
  0x24   : > { %753 = vmatpush3.bf16.msra.mxu0 %v424_v63  ;;  %759 = vmatpush3.bf16.msra.mxu1 %v470_v2 }
  0x25   : > { %764 = vmatprep.subr.bf16.mxu0 %v814_v0  ;;  %770 = vmatprep.subr.bf16.mxu1 %v814_v0 }
  0xed   : > { %v213_v13 = vpop.f32.mrb[0].mxu0  ;;  %v259_v14 = vpop.f32.mrb[0].mxu1 }
  0xee   : > { %v357_v16 = vmul.f32 0.35355338, %v213_v13  ;;  %v732_v17 = vpop.f32.mrb[1].mxu0  ;;  %v358_v18 = vmul.f32 0.35355338, %v259_v14  ;;  %v738_v19 = vpop.f32.mrb[1].mxu1 }
  0xef   : > { %v216_v20 = vpop.f32.mrb[2].mxu0  ;;  %v262_v21 = vpop.f32.mrb[2].mxu1  ;;  %v700_v13 = vld [vmem:[%s854_s14 + $0x2c] sm:$0xf] }
  0xf0   : > { %v733_v22 = vpop.f32.mrb[3].mxu0  ;;  %v739_v23 = vpop.f32.mrb[3].mxu1  ;;  %v367_v24 = vadd.f32 %v705_v15, %v357_v16  ;;  %v368_v25 = vadd.f32 %v705_v15, %v358_v18  ;;  %v562_v16 = vsel %vm422_vm2, %v700_v13, 0 }
  0xf2   : > { %v371_v26 = vsel %vm172_vm1, %v367_v24, -inf  ;;  %v374_v27 = vsel %vm172_vm1, %v368_v25, -inf }
  0xf3   : > { %372 = vmax.xlane.f32.xlu0 %v371_v26 }
  0xf5   : > { %v305_v28 = vpop.f32.mrb[4].mxu0  ;;  %v351_v29 = vpop.f32.mrb[4].mxu1 }
  0xf6   : > { %v359_v30 = vmul.f32 0.35355338, %v305_v28  ;;  %v744_v31 = vpop.f32.mrb[5].mxu0  ;;  %v360_v32 = vmul.f32 0.35355338, %v351_v29  ;;  %v750_v33 = vpop.f32.mrb[5].mxu1 }
  0xf7   : > { %375 = vmax.xlane.f32.xlu0 %v374_v27  ;;  %v308_v34 = vpop.f32.mrb[6].mxu0  ;;  %v354_v35 = vpop.f32.mrb[6].mxu1 }
  0xf8   : > { %v745_v36 = vpop.f32.mrb[7].mxu0  ;;  %v751_v37 = vpop.f32.mrb[7].mxu1  ;;  %v369_v38 = vadd.f32 %v705_v15, %v359_v30  ;;  %v370_v39 = vadd.f32 %v705_v15, %v360_v32 }
  0xfa   : > { %v377_v40 = vsel %vm172_vm1, %v369_v38, -inf  ;;  %v380_v41 = vsel %vm172_vm1, %v370_v39, -inf }
  0xfb   : > { %378 = vmax.xlane.f32.xlu1 %v377_v40 }
  0xff   : > { %381 = vmax.xlane.f32.xlu1 %v380_v41 }
 0x180   : > { %v373_v42 = vpop.xlane.xlu0 %372 }
 0x181   : > { %v383_v43 = vsub.f32 %v367_v24, %v373_v42 }
 0x183   : > { %v387_v44 = vmul.f32 1.442695, %v383_v43 }
 0x184   : > { %v376_v45 = vpop.xlane.xlu0 %375 }
 0x185   : > { %790 = vpow2.f32 %v387_v44  ;;  %v384_v46 = vsub.f32 %v368_v25, %v376_v45 }
 0x187   : > { %v389_v47 = vmul.f32 1.442695, %v384_v46 }
 0x188   : > { %v379_v48 = vpop.xlane.xlu1 %378 }
 0x189   : > { %792 = vpow2.f32 %v389_v47  ;;  %v385_v49 = vsub.f32 %v369_v38, %v379_v48 }
 0x18b   : > { %v391_v50 = vmul.f32 1.442695, %v385_v49 }
 0x18c   : > { %v382_v51 = vpop.xlane.xlu1 %381 }
 0x18d   : > { %794 = vpow2.f32 %v391_v50  ;;  %v386_v52 = vsub.f32 %v370_v39, %v382_v51 }
 0x18f   : > { %v791_v53 = vpop.eup %790  ;;  %v393_v54 = vmul.f32 1.442695, %v386_v52 }
 0x190   : > { %v395_v55 = vsel %vm172_vm1, %v791_v53, 0.0 }
 0x191   : > { %796 = vpow2.f32 %v393_v54  ;;  %396 = vadd.xlane.f32.xlu0 %v395_v55 }
 0x193   : > { %v793_v56 = vpop.eup %792 }
 0x194   : > { %v398_v57 = vsel %vm172_vm1, %v793_v56, 0.0 }
 0x195   : > { %399 = vadd.xlane.f32.xlu1 %v398_v57 }
 0x197   : > { %v795_v58 = vpop.eup %794 }
 0x198   : > { %v401_v59 = vsel %vm172_vm1, %v795_v58, 0.0 }
 0x199   : > { %402 = vadd.xlane.f32.xlu0 %v401_v59 }
 0x19b   : > { %v797_v60 = vpop.eup %796 }
 0x19c   : > { %v404_v61 = vsel %vm172_vm1, %v797_v60, 0.0 }
 0x19d   : > { %405 = vadd.xlane.f32.xlu1 %v404_v61 }
 0x21e   : > { %v397_v3 = vpop.xlane.xlu0 %396 }
 0x21f   : > { %798 = vrcp.f32 %v397_v3 }
 0x222   : > { %v400_v4 = vpop.xlane.xlu1 %399 }
 0x223   : > { %800 = vrcp.f32 %v400_v4 }
 0x226   : > { %v403_v5 = vpop.xlane.xlu0 %402 }
 0x227   : > { %802 = vrcp.f32 %v403_v5 }
 0x229   : > { %v799_v6 = vpop.eup %798 }
 0x22a   : > { %v411_v8 = vmul.f32 %v799_v6, %v791_v53  ;;  %v406_v9 = vpop.xlane.xlu1 %405 }
 0x22b   : > { %804 = vrcp.f32 %v406_v9 }
 0x22c   : > { %v415_v10 = vpack.c.bf16 %v411_v8, %v411_v8 }
 0x22d   : > { %v801_v12 = vpop.eup %800 }
 0x22e   : > { %v412_v14 = vmul.f32 %v801_v12, %v793_v56  ;;  %755 = vmatmul.mubr.msk.bf16.vlgmr.msra.gmra.mrb[8].mxu0 %vm172_vm1, %v415_v10 }
 0x22f   : > { %765 = vmatpush3.bf16.msra.mxu0 %v516_v11  ;;  %766 = vmatprep.mubr.msk.bf16.mxu0 %vm815_vm0, %v814_v0 }
 0x230   : > { %v416_v15 = vpack.c.bf16 %v412_v14, %v412_v14 }
 0x231   : > { %v803_v17 = vpop.eup %802 }
 0x232   : > { %v413_v18 = vmul.f32 %v803_v17, %v795_v58  ;;  %761 = vmatmul.mubr.msk.bf16.vlgmr.msra.gmra.mrb[8].mxu1 %vm172_vm1, %v416_v15 }
 0x233   : > { %771 = vmatpush3.bf16.msra.mxu1 %v562_v16  ;;  %772 = vmatprep.mubr.msk.bf16.mxu1 %vm815_vm0, %v814_v0 }
 0x234   : > { %v417_v19 = vpack.c.bf16 %v413_v18, %v413_v18 }
 0x235   : > { %v805_v20 = vpop.eup %804 }
 0x236   : > { %v414_v21 = vmul.f32 %v805_v20, %v797_v60  ;;  %767 = vmatmul.mubr.msk.bf16.vlgmr.msra.gmra.mrb[12].mxu0 %vm172_vm1, %v417_v19 }
 0x238   : > { %v418_v22 = vpack.c.bf16 %v414_v21, %v414_v21 }
 0x23a   : > { %773 = vmatmul.mubr.msk.bf16.vlgmr.msra.gmra.mrb[12].mxu1 %vm172_vm1, %v418_v22 }
 0x301   : > { %v460_v23 = vpop.f32.mrb[8].mxu0 }
 0x302   : > { %v756_v24 = vpop.f32.mrb[9].mxu0 }
 0x303   : > { %v463_v25 = vpop.f32.mrb[10].mxu0 }
 0x304   : > { %v757_v26 = vpop.f32.mrb[11].mxu0 }
 0x305   : > { %v506_v27 = vpop.f32.mrb[8].mxu1 }
 0x306   : > { %605 = vrot.lane.b32.xlu0 %v506_v27, %s816_s18  ;;  %v762_v28 = vpop.f32.mrb[9].mxu1 }
 0x307   : > { %v509_v29 = vpop.f32.mrb[10].mxu1 }
 0x308   : > { %v763_v30 = vpop.f32.mrb[11].mxu1 }
 0x309   : > { %v552_v0 = vpop.f32.mrb[12].mxu0 }
 0x30a   : > { %609 = vrot.lane.b32.xlu1 %v552_v0, %s817_s19  ;;  %v768_v31 = vpop.f32.mrb[13].mxu0 }
 0x30b   : > { %v555_v32 = vpop.f32.mrb[14].mxu0 }
 0x30c   : > { %v769_v33 = vpop.f32.mrb[15].mxu0 }
 0x30d   : > { %v598_v34 = vpop.f32.mrb[12].mxu1 }
 0x30e   : > { %v774_v35 = vpop.f32.mrb[13].mxu1  ;;  %613 = vrot.lane.b32.xlu1 %v598_v34, %s818_s20 }
 0x30f   : > { %v601_v36 = vpop.f32.mrb[14].mxu1 }
 0x310   : > { %v775_v37 = vpop.f32.mrb[15].mxu1 }
 0x378   : > { %v606_v38 = vpop.permute.xlu0 %605 }
 0x379   : > { %v616_v40 = vsel %vm172_vm1, %v460_v23, %v606_v38 }
 0x37c   : > { %v610_v39 = vpop.permute.xlu1 %609 }
 0x37d   : > { %v618_v41 = vsel %vm617_vm3, %v616_v40, %v610_v39 }
 0x380   : > { %v614_v42 = vpop.permute.xlu1 %613 }
 0x381   : > { %v620_v43 = vsel %vm619_vm4, %v618_v41, %v614_v42 }
 0x382   : > { %v621_v44 = vpack.c.bf16 %v620_v43, %v620_v43 }
 0x384   : > { %623 = vst.msk [vmem:[%s155_s24] sm:$0xf] %vm622_vm5, %v621_v44 }
 0x385 PF: > { %s12_s9 = sadd.s32 1, %s812_s9  }
 0x386   : > { %p9_p4 = scmp.ge.s32.totalorder %s12_s9, 6  }
 0x388   :  { %11 = sbr.rel (!%p9_p4) target bundleno = 1 (0x1), region = 63 }

// kernel: multimodal_forward.87
= control target key start
LH: loop header
LB: loop body
LE: loop exit
PB: predicated region body
PF: predicated region fallthrough
CT: control target
= control target key end

     0   :  { %vm28_vm0 = vcmask 261120   ;;  %v301_v1 = vmov 0.0   ;;  %vm83_vm1 = vcmask 523264   ;;  %s408_s1 = inlined_call_operand.vmem [shape: bf16[64,32], index: 1, kind: input, shape index: {}]   ;;  %s409_s0 = inlined_call_operand.vmem [shape: bf16[32,64], index: 0, kind: input, shape index: {}]   ;;  %s410_s2 = inlined_call_operand.vmem [shape: f32[1,32], index: 2, kind: input, shape index: {}]   ;;  %s411_s3 = inlined_call_operand.vmem [shape: f32[32,32], index: 3, kind: input, shape index: {}]   ;;  %s412_s4 = inlined_call_operand.vmem [shape: f32[1,32], index: 4, kind: input, shape index: {}]   ;;  %s413_s5 = inlined_call_operand.vmem [shape: f32[1,32], index: 5, kind: input, shape index: {}]   ;;  %s414_s6 = inlined_call_operand.vmem [shape: f32[32,32], index: 6, kind: output, shape index: {}]  }
   0x1   :  { %v287_v0 = vld [vmem:[%s408_s1] sm:$0xff]   ;;  %31 = vst.msk [vmem:[#allocation2 + $0x10] sm:$0xff] %vm28_vm0, %v301_v1  ;;  %29 = vst.msk [vmem:[#allocation2] sm:$0xff] %vm28_vm0, %v301_v1  ;;  %v288_v2 = vld [vmem:[%s408_s1 + $0x8] sm:$0xff]  }
   0x2   :  { %30 = vst.msk [vmem:[#allocation2 + $0x8] sm:$0xff] %vm28_vm0, %v301_v1  ;;  %32 = vst.msk [vmem:[#allocation2 + $0x18] sm:$0xff] %vm28_vm0, %v301_v1  ;;  %274 = vmatprep.subr.bf16.mxu0 %v287_v0  ;;  %v289_v3 = vld [vmem:[%s408_s1 + $0x10] sm:$0xff]   ;;  %v291_v4 = vld [vmem:[%s409_s0] sm:$0xff]  }
   0x3   :  { %275 = vmatpush3.bf16.msra.mxu0 %v287_v0  ;;  %282 = vmatprep.mubr.msk.bf16.mxu0 %vm83_vm1, %v291_v4  ;;  %v290_v5 = vld [vmem:[%s408_s1 + $0x18] sm:$0xff]   ;;  %v292_v6 = vld [vmem:[%s409_s0 + $0x8] sm:$0xff]   ;;  %v265_v19 = vld [vmem:[%s410_s2] ss:$0 sm:$0xff] }
   0x4   :  { %276 = vmatprep.subr.bf16.mxu0 %v288_v2  ;;  %v168_v21 = vld [vmem:[%s411_s3 + $0x10] sm:$0xff]  ;;  %v166_v24 = vld [vmem:[%s411_s3] sm:$0xff]  ;;  %v169_v27 = vld [vmem:[%s411_s3 + $0x18] sm:$0xff] }
   0x5   :  { %v167_v31 = vld [vmem:[%s411_s3 + $0x8] sm:$0xff] }
   0x7   :  { %277 = vmatpush3.bf16.msra.mxu0 %v288_v2 }
   0x8   :  { %278 = vmatprep.subr.bf16.mxu0 %v289_v3  ;;  %v35_v7 = vld [vmem:[#allocation2 + $0x10] sm:$0xff]  ;;  %v33_v8 = vld [vmem:[#allocation2] sm:$0xff] }
   0x9   :  { %v36_v10 = vld [vmem:[#allocation2 + $0x18] sm:$0xff]  ;;  %v34_v13 = vld [vmem:[#allocation2 + $0x8] sm:$0xff] }
   0xb   :  { %279 = vmatpush3.bf16.msra.mxu0 %v289_v3 }
   0xc   :  { %280 = vmatprep.subr.bf16.mxu0 %v290_v5 }
   0xf   :  { %281 = vmatpush3.bf16.msra.mxu0 %v290_v5 }
  0x12   :  { %283 = vmatmul.mubr.msk.bf16.vlgmr.msra.gmra.mrb[0].mxu0 %vm83_vm1, %v292_v6 }
  0xe5   :  { %v284_v9 = vpop.f32.mrb[0].mxu0 }
  0xe6   :  { %v141_v11 = vadd.f32 %v284_v9, %v35_v7  ;;  %v124_v12 = vpop.f32.mrb[1].mxu0  ;;  %v266_v9 = vld [vmem:[%s412_s4] ss:$0 sm:$0xff] }
  0xe7   :  { %v139_v14 = vadd.f32 %v124_v12, %v33_v8  ;;  %v285_v15 = vpop.f32.mrb[2].mxu0 }
  0xe8   :  { %146 = vst.msk [vmem:[#allocation2 + $0x10] sm:$0xff] %vm28_vm0, %v141_v11  ;;  %v142_v16 = vadd.f32 %v285_v15, %v36_v10  ;;  %v127_v17 = vpop.f32.mrb[3].mxu0  ;;  %v267_v11 = vld [vmem:[%s413_s5] ss:$0 sm:$0xff] }
  0xe9   :  { %144 = vst.msk [vmem:[#allocation2] sm:$0xff] %vm28_vm0, %v139_v14  ;;  %v140_v18 = vadd.f32 %v127_v17, %v34_v13 }
  0xea   :  { %147 = vst.msk [vmem:[#allocation2 + $0x18] sm:$0xff] %vm28_vm0, %v142_v16 }
  0xeb   :  { %145 = vst.msk [vmem:[#allocation2 + $0x8] sm:$0xff] %vm28_vm0, %v140_v18 }
  0xef   :  { %v153_v20 = vld [vmem:[#allocation2 + $0x10] sm:$0xff] }
  0xf0   :  { %v164_v22 = vadd.f32 %v265_v19, %v153_v20  ;;  %v151_v23 = vld [vmem:[#allocation2] sm:$0xff] }
  0xf1   :  { %v162_v25 = vadd.f32 %v265_v19, %v151_v23  ;;  %v154_v26 = vld [vmem:[#allocation2 + $0x18] sm:$0xff] }
  0xf2   :  { %v172_v28 = vadd.f32 %v168_v21, %v164_v22  ;;  %v165_v29 = vadd.f32 %v265_v19, %v154_v26  ;;  %v152_v30 = vld [vmem:[#allocation2 + $0x8] sm:$0xff] }
  0xf3   :  { %v170_v32 = vadd.f32 %v166_v24, %v162_v25  ;;  %v163_v33 = vadd.f32 %v265_v19, %v152_v30 }
  0xf4   :  { %v180_v34 = vsel %vm28_vm0, %v172_v28, 0.0  ;;  %v173_v35 = vadd.f32 %v169_v27, %v165_v29 }
  0xf5   :  { %181 = vadd.xlane.f32.xlu1 %v180_v34  ;;  %v174_v36 = vsel %vm28_vm0, %v170_v32, 0.0  ;;  %v171_v37 = vadd.f32 %v167_v31, %v163_v33 }
  0xf6   :  { %175 = vadd.xlane.f32.xlu0 %v174_v36  ;;  %v183_v38 = vsel %vm28_vm0, %v173_v35, 0.0 }
  0xf7   :  { %v177_v39 = vsel %vm28_vm0, %v171_v37, 0.0 }
  0xf9   :  { %184 = vadd.xlane.f32.xlu1 %v183_v38 }
  0xfa   :  { %178 = vadd.xlane.f32.xlu0 %v177_v39 }
 0x182   :  { %v182_v40 = vpop.xlane.xlu1 %181 }
 0x183   :  { %v189_v41 = vmul.f32 0.03125, %v182_v40  ;;  %v176_v42 = vpop.xlane.xlu0 %175 }
 0x184   :  { %v187_v43 = vmul.f32 0.03125, %v176_v42 }
 0x185   :  { %v193_v44 = vsub.f32 %v172_v28, %v189_v41 }
 0x186   :  { %v191_v45 = vsub.f32 %v170_v32, %v187_v43  ;;  %v185_v46 = vpop.xlane.xlu1 %184 }
 0x187   :  { %v190_v47 = vmul.f32 0.03125, %v185_v46  ;;  %v179_v48 = vpop.xlane.xlu0 %178  ;;  %v197_v54 = vmul.f32 %v193_v44, %v193_v44 }
 0x188   :  { %v188_v49 = vmul.f32 0.03125, %v179_v48  ;;  %v195_v50 = vmul.f32 %v191_v45, %v191_v45 }
 0x189   :  { %v194_v51 = vsub.f32 %v173_v35, %v190_v47  ;;  %v205_v56 = vsel %vm28_vm0, %v197_v54, 0.0 }
 0x18a   :  { %v192_v52 = vsub.f32 %v171_v37, %v188_v49  ;;  %v199_v53 = vsel %vm28_vm0, %v195_v50, 0.0 }
 0x18b   :  { %200 = vadd.xlane.f32.xlu0 %v199_v53  ;;  %v198_v58 = vmul.f32 %v194_v51, %v194_v51 }
 0x18c   :  { %v196_v55 = vmul.f32 %v192_v52, %v192_v52 }
 0x18d   :  { %v208_v59 = vsel %vm28_vm0, %v198_v58, 0.0 }
 0x18e   :  { %v202_v57 = vsel %vm28_vm0, %v196_v55, 0.0 }
 0x18f   :  { %206 = vadd.xlane.f32.xlu0 %v205_v56  ;;  %203 = vadd.xlane.f32.xlu1 %v202_v57 }
 0x193   :  { %209 = vadd.xlane.f32.xlu1 %v208_v59 }
 0x218   :  { %v201_v60 = vpop.xlane.xlu0 %200 }
 0x219   :  { %v211_v61 = vmul.f32 0.03125, %v201_v60 }
 0x21b   :  { %v215_v62 = vadd.f32 1e-05, %v211_v61 }
 0x21c   :  { %v204_v63 = vpop.xlane.xlu1 %203  ;;  %v207_v0 = vpop.xlane.xlu0 %206 }
 0x21d   :  { %293 = vrsqrt.f32 %v215_v62  ;;  %v212_v1 = vmul.f32 0.03125, %v204_v63  ;;  %v213_v2 = vmul.f32 0.03125, %v207_v0 }
 0x21f   :  { %v216_v3 = vadd.f32 1e-05, %v212_v1  ;;  %v217_v4 = vadd.f32 1e-05, %v213_v2 }
 0x220   :  { %v210_v5 = vpop.xlane.xlu1 %209 }
 0x221   :  { %295 = vrsqrt.f32 %v216_v3  ;;  %v214_v6 = vmul.f32 0.03125, %v210_v5 }
 0x222   :  { %297 = vrsqrt.f32 %v217_v4 }
 0x223   :  { %v218_v7 = vadd.f32 1e-05, %v214_v6 }
 0x225   :  { %299 = vrsqrt.f32 %v218_v7 }
 0x227   :  { %v294_v8 = vpop.eup %293 }
 0x228   :  { %v223_v10 = vmul.f32 %v294_v8, %v191_v45 }
 0x22a   :  { %v234_v12 = vmul.f32 %v266_v9, %v223_v10 }
 0x22b   :  { %v296_v13 = vpop.eup %295 }
 0x22c   :  { %v298_v14 = vpop.eup %297  ;;  %v245_v15 = vadd.f32 %v267_v11, %v234_v12  ;;  %v224_v16 = vmul.f32 %v296_v13, %v192_v52 }
 0x22d   :  { %v225_v17 = vmul.f32 %v298_v14, %v193_v44 }
 0x22e   :  { %249 = vst.msk [vmem:[%s414_s6] sm:$0xff] %vm28_vm0, %v245_v15  ;;  %v235_v18 = vmul.f32 %v266_v9, %v224_v16 }
 0x22f   :  { %v300_v19 = vpop.eup %299  ;;  %v236_v20 = vmul.f32 %v266_v9, %v225_v17 }
 0x230   :  { %v246_v21 = vadd.f32 %v267_v11, %v235_v18  ;;  %v226_v22 = vmul.f32 %v300_v19, %v194_v51 }
 0x231   :  { %v247_v23 = vadd.f32 %v267_v11, %v236_v20 }
 0x232   :  { %250 = vst.msk [vmem:[%s414_s6 + $0x8] sm:$0xff] %vm28_vm0, %v246_v21  ;;  %v237_v24 = vmul.f32 %v266_v9, %v226_v22 }
 0x233   :  { %251 = vst.msk [vmem:[%s414_s6 + $0x10] sm:$0xff] %vm28_vm0, %v247_v23 }
 0x234   :  { %v248_v25 = vadd.f32 %v267_v11, %v237_v24 }
 0x236   :  { %252 = vst.msk [vmem:[%s414_s6 + $0x18] sm:$0xff] %vm28_vm0, %v248_v25 }

// kernel: multimodal_forward.93
= control target key start
LH: loop header
LB: loop body
LE: loop exit
PB: predicated region body
PF: predicated region fallthrough
CT: control target
= control target key end

     0   :  { %vm19_vm0 = vcmask 261120   ;;  %v160_v1 = vmov 0.0   ;;  %s228_s1 = inlined_call_operand.vmem [shape: bf16[32,32], index: 1, kind: input, shape index: {}]   ;;  %s229_s0 = inlined_call_operand.vmem [shape: f32[32,32], index: 0, kind: input, shape index: {}]   ;;  %s230_s2 = inlined_call_operand.vmem [shape: f32[1,32], index: 2, kind: input, shape index: {}]   ;;  %s231_s3 = inlined_call_operand.vmem [shape: f32[32,32], index: 3, kind: output, shape index: {}]  }
   0x1   :  { %v158_v0 = vld [vmem:[%s228_s1] sm:$0xff]   ;;  %22 = vst.msk [vmem:[#allocation2 + $0x10] sm:$0xff] %vm19_vm0, %v160_v1  ;;  %20 = vst.msk [vmem:[#allocation2] sm:$0xff] %vm19_vm0, %v160_v1  ;;  %v159_v2 = vld [vmem:[%s228_s1 + $0x8] sm:$0xff]  }
   0x2   :  { %21 = vst.msk [vmem:[#allocation2 + $0x8] sm:$0xff] %vm19_vm0, %v160_v1  ;;  %23 = vst.msk [vmem:[#allocation2 + $0x18] sm:$0xff] %vm19_vm0, %v160_v1  ;;  %149 = vmatprep.subr.bf16.mxu0 %v158_v0  ;;  %v28_v3 = vld [vmem:[%s229_s0] sm:$0xff]  ;;  %v29_v4 = vld [vmem:[%s229_s0 + $0x8] sm:$0xff] }
   0x3   :  { %150 = vmatpush3.bf16.msra.mxu0 %v158_v0  ;;  %v32_v5 = vpack.c.bf16 %v29_v4, %v28_v3  ;;  %v30_v6 = vld [vmem:[%s229_s0 + $0x10] sm:$0xff]  ;;  %v31_v7 = vld [vmem:[%s229_s0 + $0x18] sm:$0xff]  ;;  %v144_v21 = vld [vmem:[%s230_s2] ss:$0 sm:$0xff] }
   0x4   :  { %151 = vmatprep.subr.bf16.mxu0 %v159_v2  ;;  %v33_v8 = vpack.c.bf16 %v31_v7, %v30_v6 }
   0x5   :  { %153 = vmatprep.mubr.msk.bf16.mxu0 %vm19_vm0, %v32_v5 }
   0x7   :  { %152 = vmatpush3.bf16.msra.mxu0 %v159_v2 }
   0x8   :  { %v26_v9 = vld [vmem:[#allocation2 + $0x10] sm:$0xff]  ;;  %v24_v10 = vld [vmem:[#allocation2] sm:$0xff] }
   0x9   :  { %v27_v12 = vld [vmem:[#allocation2 + $0x18] sm:$0xff]  ;;  %v25_v15 = vld [vmem:[#allocation2 + $0x8] sm:$0xff] }
   0xa   :  { %154 = vmatmul.mubr.msk.bf16.vlgmr.msra.gmra.mrb[0].mxu0 %vm19_vm0, %v33_v8 }
  0xdd   :  { %v155_v11 = vpop.f32.mrb[0].mxu0 }
  0xde   :  { %v108_v13 = vadd.f32 %v155_v11, %v26_v9  ;;  %v91_v14 = vpop.f32.mrb[1].mxu0 }
  0xdf   :  { %v106_v16 = vadd.f32 %v91_v14, %v24_v10  ;;  %v156_v17 = vpop.f32.mrb[2].mxu0 }
  0xe0   :  { %112 = vst.msk [vmem:[#allocation2 + $0x10] sm:$0xff] %vm19_vm0, %v108_v13  ;;  %v109_v18 = vadd.f32 %v156_v17, %v27_v12  ;;  %v94_v19 = vpop.f32.mrb[3].mxu0 }
  0xe1   :  { %110 = vst.msk [vmem:[#allocation2] sm:$0xff] %vm19_vm0, %v106_v16  ;;  %v107_v20 = vadd.f32 %v94_v19, %v25_v15 }
  0xe2   :  { %113 = vst.msk [vmem:[#allocation2 + $0x18] sm:$0xff] %vm19_vm0, %v109_v18 }
  0xe3   :  { %111 = vst.msk [vmem:[#allocation2 + $0x8] sm:$0xff] %vm19_vm0, %v107_v20 }
  0xe7   :  { %v119_v22 = vld [vmem:[#allocation2 + $0x10] sm:$0xff] }
  0xe8   :  { %v130_v23 = vadd.f32 %v144_v21, %v119_v22  ;;  %v117_v24 = vld [vmem:[#allocation2] sm:$0xff] }
  0xe9   :  { %v128_v25 = vadd.f32 %v144_v21, %v117_v24  ;;  %v120_v26 = vld [vmem:[#allocation2 + $0x18] sm:$0xff] }
  0xea   :  { %134 = vst.msk [vmem:[%s231_s3 + $0x10] sm:$0xff] %vm19_vm0, %v130_v23  ;;  %v131_v27 = vadd.f32 %v144_v21, %v120_v26  ;;  %v118_v28 = vld [vmem:[#allocation2 + $0x8] sm:$0xff] }
  0xeb   :  { %132 = vst.msk [vmem:[%s231_s3] sm:$0xff] %vm19_vm0, %v128_v25  ;;  %v129_v29 = vadd.f32 %v144_v21, %v118_v28 }
  0xec   :  { %135 = vst.msk [vmem:[%s231_s3 + $0x18] sm:$0xff] %vm19_vm0, %v131_v27 }
  0xed   :  { %133 = vst.msk [vmem:[%s231_s3 + $0x8] sm:$0xff] %vm19_vm0, %v129_v29 }

// kernel: multimodal_forward.94
= control target key start
LH: loop header
LB: loop body
LE: loop exit
PB: predicated region body
PF: predicated region fallthrough
CT: control target
= control target key end

     0   :  { %vm19_vm0 = vcmask 523264   ;;  %v186_v1 = vmov 0.0   ;;  %vm50_vm1 = vcmask 261120   ;;  %vm149_vm2 = vcmask 519168   ;;  %s248_s1 = inlined_call_operand.vmem [shape: bf16[32,64], index: 1, kind: input, shape index: {}]   ;;  %s249_s0 = inlined_call_operand.vmem [shape: f32[32,32], index: 0, kind: input, shape index: {}]   ;;  %s250_s2 = inlined_call_operand.vmem [shape: f32[1,64], index: 2, kind: input, shape index: {}]   ;;  %s251_s3 = inlined_call_operand.vmem [shape: bf16[32,64], index: 3, kind: output, shape index: {}]  }
   0x1   :  { %v184_v0 = vld [vmem:[%s248_s1] sm:$0xff]   ;;  %22 = vst.msk [vmem:[#allocation2 + $0x10] sm:$0xff] %vm19_vm0, %v186_v1  ;;  %20 = vst.msk [vmem:[#allocation2] sm:$0xff] %vm19_vm0, %v186_v1  ;;  %v185_v2 = vld [vmem:[%s248_s1 + $0x8] sm:$0xff]  }
   0x2   :  { %21 = vst.msk [vmem:[#allocation2 + $0x8] sm:$0xff] %vm19_vm0, %v186_v1  ;;  %23 = vst.msk [vmem:[#allocation2 + $0x18] sm:$0xff] %vm19_vm0, %v186_v1  ;;  %175 = vmatprep.subr.bf16.mxu0 %v184_v0  ;;  %v28_v3 = vld [vmem:[%s249_s0] sm:$0xff]  ;;  %v29_v4 = vld [vmem:[%s249_s0 + $0x8] sm:$0xff] }
   0x3   :  { %176 = vmatpush3.bf16.msra.mxu0 %v184_v0  ;;  %v32_v5 = vpack.c.bf16 %v29_v4, %v28_v3  ;;  %v30_v6 = vld [vmem:[%s249_s0 + $0x10] sm:$0xff]  ;;  %v31_v7 = vld [vmem:[%s249_s0 + $0x18] sm:$0xff]  ;;  %v162_v21 = vld [vmem:[%s250_s2] ss:$0 sm:$0xff] }
   0x4   :  { %177 = vmatprep.subr.bf16.mxu0 %v185_v2  ;;  %v33_v8 = vpack.c.bf16 %v31_v7, %v30_v6 }
   0x5   :  { %179 = vmatprep.mubr.msk.bf16.mxu0 %vm50_vm1, %v32_v5 }
   0x7   :  { %178 = vmatpush3.bf16.msra.mxu0 %v185_v2 }
   0x8   :  { %v26_v9 = vld [vmem:[#allocation2 + $0x10] sm:$0xff]  ;;  %v24_v10 = vld [vmem:[#allocation2] sm:$0xff] }
   0x9   :  { %v27_v12 = vld [vmem:[#allocation2 + $0x18] sm:$0xff]  ;;  %v25_v15 = vld [vmem:[#allocation2 + $0x8] sm:$0xff] }
   0xa   :  { %180 = vmatmul.mubr.msk.bf16.vlgmr.msra.gmra.mrb[0].mxu0 %vm50_vm1, %v33_v8 }
  0xdd   :  { %v181_v11 = vpop.f32.mrb[0].mxu0 }
  0xde   :  { %v108_v13 = vadd.f32 %v181_v11, %v26_v9  ;;  %v91_v14 = vpop.f32.mrb[1].mxu0 }
  0xdf   :  { %v106_v16 = vadd.f32 %v91_v14, %v24_v10  ;;  %v182_v17 = vpop.f32.mrb[2].mxu0 }
  0xe0   :  { %113 = vst.msk [vmem:[#allocation2 + $0x10] sm:$0xff] %vm19_vm0, %v108_v13  ;;  %v109_v18 = vadd.f32 %v182_v17, %v27_v12  ;;  %v94_v19 = vpop.f32.mrb[3].mxu0 }
  0xe1   :  { %111 = vst.msk [vmem:[#allocation2] sm:$0xff] %vm19_vm0, %v106_v16  ;;  %v107_v20 = vadd.f32 %v94_v19, %v25_v15 }
  0xe2   :  { %114 = vst.msk [vmem:[#allocation2 + $0x18] sm:$0xff] %vm19_vm0, %v109_v18 }
  0xe3   :  { %112 = vst.msk [vmem:[#allocation2 + $0x8] sm:$0xff] %vm19_vm0, %v107_v20 }
  0xe7   :  { %v120_v22 = vld [vmem:[#allocation2 + $0x10] sm:$0xff] }
  0xe8   :  { %v131_v23 = vadd.f32 %v162_v21, %v120_v22  ;;  %v118_v24 = vld [vmem:[#allocation2] sm:$0xff] }
  0xe9   :  { %v129_v25 = vadd.f32 %v162_v21, %v118_v24  ;;  %v121_v26 = vld [vmem:[#allocation2 + $0x18] sm:$0xff] }
  0xea   :  { %v169_v27 = vpack.c.bf16 %v131_v23, %v131_v23  ;;  %v132_v28 = vadd.f32 %v162_v21, %v121_v26  ;;  %v119_v29 = vld [vmem:[#allocation2 + $0x8] sm:$0xff] }
  0xeb   :  { %v167_v30 = vpack.c.bf16 %v129_v25, %v129_v25  ;;  %v130_v31 = vadd.f32 %v162_v21, %v119_v29 }
  0xec   :  { %152 = vst.msk [vmem:[%s251_s3 + $0x8] sm:$0xf] %vm149_vm2, %v169_v27  ;;  %v170_v32 = vpack.c.bf16 %v132_v28, %v132_v28 }
  0xed   :  { %150 = vst.msk [vmem:[%s251_s3] sm:$0xf] %vm149_vm2, %v167_v30  ;;  %v168_v33 = vpack.c.bf16 %v130_v31, %v130_v31 }
  0xee   :  { %153 = vst.msk [vmem:[%s251_s3 + $0xc] sm:$0xf] %vm149_vm2, %v170_v32 }
  0xef   :  { %151 = vst.msk [vmem:[%s251_s3 + $0x4] sm:$0xf] %vm149_vm2, %v168_v33 }

// kernel: multimodal_forward.105
= control target key start
LH: loop header
LB: loop body
LE: loop exit
PB: predicated region body
PF: predicated region fallthrough
CT: control target
= control target key end

     0   :  { %vm28_vm0 = vcmask 261120   ;;  %v274_v1 = vmov 0.0   ;;  %s377_s1 = inlined_call_operand.vmem [shape: bf16[32,32], index: 1, kind: input, shape index: {}]   ;;  %s378_s0 = inlined_call_operand.vmem [shape: bf16[32,32], index: 0, kind: input, shape index: {}]   ;;  %s379_s2 = inlined_call_operand.vmem [shape: f32[1,32], index: 2, kind: input, shape index: {}]   ;;  %s380_s3 = inlined_call_operand.vmem [shape: f32[32,32], index: 3, kind: input, shape index: {}]   ;;  %s381_s4 = inlined_call_operand.vmem [shape: f32[1,32], index: 4, kind: input, shape index: {}]   ;;  %s382_s5 = inlined_call_operand.vmem [shape: f32[1,32], index: 5, kind: input, shape index: {}]   ;;  %s383_s6 = inlined_call_operand.vmem [shape: f32[32,32], index: 6, kind: output, shape index: {}]  }
   0x1   :  { %v262_v0 = vld [vmem:[%s377_s1] sm:$0xff]   ;;  %31 = vst.msk [vmem:[#allocation2 + $0x10] sm:$0xff] %vm28_vm0, %v274_v1  ;;  %29 = vst.msk [vmem:[#allocation2] sm:$0xff] %vm28_vm0, %v274_v1  ;;  %v263_v2 = vld [vmem:[%s377_s1 + $0x8] sm:$0xff]  }
   0x2   :  { %30 = vst.msk [vmem:[#allocation2 + $0x8] sm:$0xff] %vm28_vm0, %v274_v1  ;;  %32 = vst.msk [vmem:[#allocation2 + $0x18] sm:$0xff] %vm28_vm0, %v274_v1  ;;  %253 = vmatprep.subr.bf16.mxu0 %v262_v0  ;;  %v264_v3 = vld [vmem:[%s378_s0] sm:$0xff]   ;;  %v265_v4 = vld [vmem:[%s378_s0 + $0x8] sm:$0xff]  }
   0x3   :  { %254 = vmatpush3.bf16.msra.mxu0 %v262_v0  ;;  %257 = vmatprep.mubr.msk.bf16.mxu0 %vm28_vm0, %v264_v3  ;;  %v246_v17 = vld [vmem:[%s379_s2] ss:$0 sm:$0xff]  ;;  %v151_v19 = vld [vmem:[%s380_s3 + $0x10] sm:$0xff]  ;;  %v152_v25 = vld [vmem:[%s380_s3 + $0x18] sm:$0xff] }
   0x4   :  { %255 = vmatprep.subr.bf16.mxu0 %v263_v2  ;;  %v149_v22 = vld [vmem:[%s380_s3] sm:$0xff]  ;;  %v150_v29 = vld [vmem:[%s380_s3 + $0x8] sm:$0xff] }
   0x7   :  { %256 = vmatpush3.bf16.msra.mxu0 %v263_v2 }
   0x8   :  { %v35_v5 = vld [vmem:[#allocation2 + $0x10] sm:$0xff]  ;;  %v33_v6 = vld [vmem:[#allocation2] sm:$0xff] }
   0x9   :  { %v36_v8 = vld [vmem:[#allocation2 + $0x18] sm:$0xff]  ;;  %v34_v11 = vld [vmem:[#allocation2 + $0x8] sm:$0xff] }
   0xa   :  { %258 = vmatmul.mubr.msk.bf16.vlgmr.msra.gmra.mrb[0].mxu0 %vm28_vm0, %v265_v4 }
  0xdd   :  { %v259_v7 = vpop.f32.mrb[0].mxu0 }
  0xde   :  { %v125_v9 = vadd.f32 %v259_v7, %v35_v5  ;;  %v108_v10 = vpop.f32.mrb[1].mxu0  ;;  %v247_v7 = vld [vmem:[%s381_s4] ss:$0 sm:$0xff] }
  0xdf   :  { %v123_v12 = vadd.f32 %v108_v10, %v33_v6  ;;  %v260_v13 = vpop.f32.mrb[2].mxu0 }
  0xe0   :  { %129 = vst.msk [vmem:[#allocation2 + $0x10] sm:$0xff] %vm28_vm0, %v125_v9  ;;  %v126_v14 = vadd.f32 %v260_v13, %v36_v8  ;;  %v111_v15 = vpop.f32.mrb[3].mxu0  ;;  %v248_v9 = vld [vmem:[%s382_s5] ss:$0 sm:$0xff] }
  0xe1   :  { %127 = vst.msk [vmem:[#allocation2] sm:$0xff] %vm28_vm0, %v123_v12  ;;  %v124_v16 = vadd.f32 %v111_v15, %v34_v11 }
  0xe2   :  { %130 = vst.msk [vmem:[#allocation2 + $0x18] sm:$0xff] %vm28_vm0, %v126_v14 }
  0xe3   :  { %128 = vst.msk [vmem:[#allocation2 + $0x8] sm:$0xff] %vm28_vm0, %v124_v16 }
  0xe7   :  { %v136_v18 = vld [vmem:[#allocation2 + $0x10] sm:$0xff] }
  0xe8   :  { %v147_v20 = vadd.f32 %v246_v17, %v136_v18  ;;  %v134_v21 = vld [vmem:[#allocation2] sm:$0xff] }
  0xe9   :  { %v145_v23 = vadd.f32 %v246_v17, %v134_v21  ;;  %v137_v24 = vld [vmem:[#allocation2 + $0x18] sm:$0xff] }
  0xea   :  { %v155_v26 = vadd.f32 %v151_v19, %v147_v20  ;;  %v148_v27 = vadd.f32 %v246_v17, %v137_v24  ;;  %v135_v28 = vld [vmem:[#allocation2 + $0x8] sm:$0xff] }
  0xeb   :  { %v153_v30 = vadd.f32 %v149_v22, %v145_v23  ;;  %v146_v31 = vadd.f32 %v246_v17, %v135_v28 }
  0xec   :  { %v163_v32 = vsel %vm28_vm0, %v155_v26, 0.0  ;;  %v156_v33 = vadd.f32 %v152_v25, %v148_v27 }
  0xed   :  { %164 = vadd.xlane.f32.xlu1 %v163_v32  ;;  %v157_v34 = vsel %vm28_vm0, %v153_v30, 0.0  ;;  %v154_v35 = vadd.f32 %v150_v29, %v146_v31 }
  0xee   :  { %158 = vadd.xlane.f32.xlu0 %v157_v34  ;;  %v166_v36 = vsel %vm28_vm0, %v156_v33, 0.0 }
  0xef   :  { %v160_v37 = vsel %vm28_vm0, %v154_v35, 0.0 }
  0xf1   :  { %167 = vadd.xlane.f32.xlu1 %v166_v36 }
  0xf2   :  { %161 = vadd.xlane.f32.xlu0 %v160_v37 }
 0x17a   :  { %v165_v38 = vpop.xlane.xlu1 %164 }
 0x17b   :  { %v172_v39 = vmul.f32 0.03125, %v165_v38  ;;  %v159_v40 = vpop.xlane.xlu0 %158 }
 0x17c   :  { %v170_v41 = vmul.f32 0.03125, %v159_v40 }
 0x17d   :  { %v176_v42 = vsub.f32 %v155_v26, %v172_v39 }
 0x17e   :  { %v174_v43 = vsub.f32 %v153_v30, %v170_v41  ;;  %v168_v44 = vpop.xlane.xlu1 %167 }
 0x17f   :  { %v173_v45 = vmul.f32 0.03125, %v168_v44  ;;  %v162_v46 = vpop.xlane.xlu0 %161  ;;  %v180_v52 = vmul.f32 %v176_v42, %v176_v42 }
 0x180   :  { %v171_v47 = vmul.f32 0.03125, %v162_v46  ;;  %v178_v48 = vmul.f32 %v174_v43, %v174_v43 }
 0x181   :  { %v177_v49 = vsub.f32 %v156_v33, %v173_v45  ;;  %v188_v54 = vsel %vm28_vm0, %v180_v52, 0.0 }
 0x182   :  { %v175_v50 = vsub.f32 %v154_v35, %v171_v47  ;;  %v182_v51 = vsel %vm28_vm0, %v178_v48, 0.0 }
 0x183   :  { %183 = vadd.xlane.f32.xlu0 %v182_v51  ;;  %v181_v56 = vmul.f32 %v177_v49, %v177_v49 }
 0x184   :  { %v179_v53 = vmul.f32 %v175_v50, %v175_v50 }
 0x185   :  { %v191_v57 = vsel %vm28_vm0, %v181_v56, 0.0 }
 0x186   :  { %v185_v55 = vsel %vm28_vm0, %v179_v53, 0.0 }
 0x187   :  { %189 = vadd.xlane.f32.xlu0 %v188_v54  ;;  %186 = vadd.xlane.f32.xlu1 %v185_v55 }
 0x18b   :  { %192 = vadd.xlane.f32.xlu1 %v191_v57 }
 0x210   :  { %v184_v58 = vpop.xlane.xlu0 %183 }
 0x211   :  { %v194_v59 = vmul.f32 0.03125, %v184_v58 }
 0x213   :  { %v198_v60 = vadd.f32 1e-12, %v194_v59 }
 0x214   :  { %v187_v61 = vpop.xlane.xlu1 %186  ;;  %v190_v62 = vpop.xlane.xlu0 %189 }
 0x215   :  { %266 = vrsqrt.f32 %v198_v60  ;;  %v195_v63 = vmul.f32 0.03125, %v187_v61  ;;  %v196_v0 = vmul.f32 0.03125, %v190_v62 }
 0x217   :  { %v199_v1 = vadd.f32 1e-12, %v195_v63  ;;  %v200_v2 = vadd.f32 1e-12, %v196_v0 }
 0x218   :  { %v193_v3 = vpop.xlane.xlu1 %192 }
 0x219   :  { %268 = vrsqrt.f32 %v199_v1  ;;  %v197_v4 = vmul.f32 0.03125, %v193_v3 }
 0x21a   :  { %270 = vrsqrt.f32 %v200_v2 }
 0x21b   :  { %v201_v5 = vadd.f32 1e-12, %v197_v4 }
 0x21d   :  { %272 = vrsqrt.f32 %v201_v5 }
 0x21f   :  { %v267_v6 = vpop.eup %266 }
 0x220   :  { %v206_v8 = vmul.f32 %v267_v6, %v174_v43 }
 0x222   :  { %v217_v10 = vmul.f32 %v247_v7, %v206_v8 }
 0x223   :  { %v269_v11 = vpop.eup %268 }
 0x224   :  { %v271_v12 = vpop.eup %270  ;;  %v228_v13 = vadd.f32 %v248_v9, %v217_v10  ;;  %v207_v14 = vmul.f32 %v269_v11, %v175_v50 }
 0x225   :  { %v208_v15 = vmul.f32 %v271_v12, %v176_v42 }
 0x226   :  { %232 = vst.msk [vmem:[%s383_s6] sm:$0xff] %vm28_vm0, %v228_v13  ;;  %v218_v16 = vmul.f32 %v247_v7, %v207_v14 }
 0x227   :  { %v273_v17 = vpop.eup %272  ;;  %v219_v18 = vmul.f32 %v247_v7, %v208_v15 }
 0x228   :  { %v229_v19 = vadd.f32 %v248_v9, %v218_v16  ;;  %v209_v20 = vmul.f32 %v273_v17, %v177_v49 }
 0x229   :  { %v230_v21 = vadd.f32 %v248_v9, %v219_v18 }
 0x22a   :  { %233 = vst.msk [vmem:[%s383_s6 + $0x8] sm:$0xff] %vm28_vm0, %v229_v19  ;;  %v220_v22 = vmul.f32 %v247_v7, %v209_v20 }
 0x22b   :  { %234 = vst.msk [vmem:[%s383_s6 + $0x10] sm:$0xff] %vm28_vm0, %v230_v21 }
 0x22c   :  { %v231_v23 = vadd.f32 %v248_v9, %v220_v22 }
 0x22e   :  { %235 = vst.msk [vmem:[%s383_s6 + $0x18] sm:$0xff] %vm28_vm0, %v231_v23 }

// kernel: multimodal_forward.106
= control target key start
LH: loop header
LB: loop body
LE: loop exit
PB: predicated region body
PF: predicated region fallthrough
CT: control target
= control target key end

     0   :  { %vm19_vm0 = vcmask 261120   ;;  %v185_v1 = vmov 0.0   ;;  %vm148_vm1 = vcmask 257024   ;;  %s249_s1 = inlined_call_operand.vmem [shape: bf16[32,32], index: 1, kind: input, shape index: {}]   ;;  %s250_s0 = inlined_call_operand.vmem [shape: f32[32,32], index: 0, kind: input, shape index: {}]   ;;  %s251_s2 = inlined_call_operand.vmem [shape: f32[1,32], index: 2, kind: input, shape index: {}]   ;;  %s252_s3 = inlined_call_operand.vmem [shape: bf16[32,32], index: 3, kind: output, shape index: {}]  }
   0x1   :  { %v183_v0 = vld [vmem:[%s249_s1] sm:$0xff]   ;;  %22 = vst.msk [vmem:[#allocation2 + $0x10] sm:$0xff] %vm19_vm0, %v185_v1  ;;  %20 = vst.msk [vmem:[#allocation2] sm:$0xff] %vm19_vm0, %v185_v1  ;;  %v184_v2 = vld [vmem:[%s249_s1 + $0x8] sm:$0xff]  }
   0x2   :  { %21 = vst.msk [vmem:[#allocation2 + $0x8] sm:$0xff] %vm19_vm0, %v185_v1  ;;  %23 = vst.msk [vmem:[#allocation2 + $0x18] sm:$0xff] %vm19_vm0, %v185_v1  ;;  %174 = vmatprep.subr.bf16.mxu0 %v183_v0  ;;  %v28_v3 = vld [vmem:[%s250_s0] sm:$0xff]  ;;  %v29_v4 = vld [vmem:[%s250_s0 + $0x8] sm:$0xff] }
   0x3   :  { %175 = vmatpush3.bf16.msra.mxu0 %v183_v0  ;;  %v32_v5 = vpack.c.bf16 %v29_v4, %v28_v3  ;;  %v30_v6 = vld [vmem:[%s250_s0 + $0x10] sm:$0xff]  ;;  %v31_v7 = vld [vmem:[%s250_s0 + $0x18] sm:$0xff]  ;;  %v161_v21 = vld [vmem:[%s251_s2] ss:$0 sm:$0xff] }
   0x4   :  { %176 = vmatprep.subr.bf16.mxu0 %v184_v2  ;;  %v33_v8 = vpack.c.bf16 %v31_v7, %v30_v6 }
   0x5   :  { %178 = vmatprep.mubr.msk.bf16.mxu0 %vm19_vm0, %v32_v5 }
   0x7   :  { %177 = vmatpush3.bf16.msra.mxu0 %v184_v2 }
   0x8   :  { %v26_v9 = vld [vmem:[#allocation2 + $0x10] sm:$0xff]  ;;  %v24_v10 = vld [vmem:[#allocation2] sm:$0xff] }
   0x9   :  { %v27_v12 = vld [vmem:[#allocation2 + $0x18] sm:$0xff]  ;;  %v25_v15 = vld [vmem:[#allocation2 + $0x8] sm:$0xff] }
   0xa   :  { %179 = vmatmul.mubr.msk.bf16.vlgmr.msra.gmra.mrb[0].mxu0 %vm19_vm0, %v33_v8 }
  0xdd   :  { %v180_v11 = vpop.f32.mrb[0].mxu0 }
  0xde   :  { %v108_v13 = vadd.f32 %v180_v11, %v26_v9  ;;  %v91_v14 = vpop.f32.mrb[1].mxu0 }
  0xdf   :  { %v106_v16 = vadd.f32 %v91_v14, %v24_v10  ;;  %v181_v17 = vpop.f32.mrb[2].mxu0 }
  0xe0   :  { %112 = vst.msk [vmem:[#allocation2 + $0x10] sm:$0xff] %vm19_vm0, %v108_v13  ;;  %v109_v18 = vadd.f32 %v181_v17, %v27_v12  ;;  %v94_v19 = vpop.f32.mrb[3].mxu0 }
  0xe1   :  { %110 = vst.msk [vmem:[#allocation2] sm:$0xff] %vm19_vm0, %v106_v16  ;;  %v107_v20 = vadd.f32 %v94_v19, %v25_v15 }
  0xe2   :  { %113 = vst.msk [vmem:[#allocation2 + $0x18] sm:$0xff] %vm19_vm0, %v109_v18 }
  0xe3   :  { %111 = vst.msk [vmem:[#allocation2 + $0x8] sm:$0xff] %vm19_vm0, %v107_v20 }
  0xe7   :  { %v119_v22 = vld [vmem:[#allocation2 + $0x10] sm:$0xff] }
  0xe8   :  { %v130_v23 = vadd.f32 %v161_v21, %v119_v22  ;;  %v117_v24 = vld [vmem:[#allocation2] sm:$0xff] }
  0xe9   :  { %v128_v25 = vadd.f32 %v161_v21, %v117_v24  ;;  %v120_v26 = vld [vmem:[#allocation2 + $0x18] sm:$0xff] }
  0xea   :  { %v168_v27 = vpack.c.bf16 %v130_v23, %v130_v23  ;;  %v131_v28 = vadd.f32 %v161_v21, %v120_v26  ;;  %v118_v29 = vld [vmem:[#allocation2 + $0x8] sm:$0xff] }
  0xeb   :  { %v166_v30 = vpack.c.bf16 %v128_v25, %v128_v25  ;;  %v129_v31 = vadd.f32 %v161_v21, %v118_v29 }
  0xec   :  { %151 = vst.msk [vmem:[%s252_s3 + $0x8] sm:$0xf] %vm148_vm1, %v168_v27  ;;  %v169_v32 = vpack.c.bf16 %v131_v28, %v131_v28 }
  0xed   :  { %149 = vst.msk [vmem:[%s252_s3] sm:$0xf] %vm148_vm1, %v166_v30  ;;  %v167_v33 = vpack.c.bf16 %v129_v31, %v129_v31 }
  0xee   :  { %152 = vst.msk [vmem:[%s252_s3 + $0xc] sm:$0xf] %vm148_vm1, %v169_v32 }
  0xef   :  { %150 = vst.msk [vmem:[%s252_s3 + $0x4] sm:$0xf] %vm148_vm1, %v167_v33 }

// kernel: multimodal_forward.95
= control target key start
LH: loop header
LB: loop body
LE: loop exit
PB: predicated region body
PF: predicated region fallthrough
CT: control target
= control target key end

     0   :  { %s1053_s12 = smov 0   ;;  %s1149_s0 = inlined_call_operand.vmem [shape: bf16[4,4,16,8], index: 0, kind: input, shape index: {}]   ;;  %s1150_s1 = inlined_call_operand.vmem [shape: bf16[4,2,4,8,8], index: 1, kind: input, shape index: {}]   ;;  %s1151_s2 = inlined_call_operand.vmem [shape: f32[4,1,8], index: 2, kind: input, shape index: {}]   ;;  %s1152_s3 = inlined_call_operand.vmem [shape: bf16[4,16,32], index: 3, kind: output, shape index: {}]  }
   0x1 LB: > { %s855_s13 = sadd.s32 4294967295, %s1026_s12   ;;  %p859_p0 = scmp.ge.s32.totalorder %s1026_s12, 1  ;;  %s1026_s12 = sphi %s1053_s12, %s13_s12  }
   0x2   : > { %p155_p1 = scmp.lt.s32.totalorder %s1026_s12, 5 }
   0x4   : > { %p156_p2 = pnand %p859_p0, %p155_p1 }
   0x5   : > { %p187_p3 = scmp.lt.s32.totalorder (!%p156_p2), %s855_s13, 3  ;;  %v1028_v0 = vmov (!%p156_p2), 0.0   ;;  %vm1029_vm0 = vmmov (!%p156_p2), 0   ;;  %vm229_vm1 = vcmask (!%p156_p2), 64512   ;;  %vm550_vm2 = vcmask (!%p156_p2), 1043456   ;;  %s1030_s24 = smov (!%p156_p2), 8  }
   0x6   : > { %159 = sbr.rel (%p156_p2) target bundleno = 910 (0x38e), region = 32  ;;  %908 = vmatprep.subr.bf16.mxu0 (!%p156_p2), %v1028_v0  ;;  %914 = vmatprep.subr.bf16.mxu1 (!%p156_p2), %v1028_v0  ;;  %s1031_s25 = smov (!%p156_p2), 16   ;;  %vm762_vm3 = vcmask (!%p156_p2), 130048   ;;  %vm765_vm4 = vcmask (!%p156_p2), 195584   ;;  %vm776_vm5 = vcmask (!%p156_p2), 257024  }
   0x7   : > { %910 = vmatprep.mubr.msk.bf16.mxu0 (!%p156_p2), %vm1029_vm0, %v1028_v0  ;;  %916 = vmatprep.mubr.msk.bf16.mxu1 (!%p156_p2), %vm1029_vm0, %v1028_v0  ;;  %s1032_s26 = smov (!%p156_p2), 24  }
   0xd   : > { %s1154_s13 = smov (!%p187_p3, %s855_s13), 3 }
   0xe   : > { %s887_s14 = sshll.u32 %s1154_s13, 5  ;;  %s199_s23 = scalar_lea.vmem %s1151_s2, %s1154_s13 }
   0xf   : > { %s191_s17 = scalar_lea.vmem %s1149_s0, %s887_s14  ;;  %s1076_s20 = scalar_lea.vmem %s1150_s1, %s887_s14  ;;  %v878_v15 = vld [vmem:[%s199_s23] ss:$0 sm:$0xff] }
  0x10   : > { %v214_v1 = vld [vmem:[%s1076_s20] sm:$0xf]  ;;  %v215_v2 = vld [vmem:[%s1076_s20 + $0x4] sm:$0xf]  ;;  %v216_v5 = vld [vmem:[%s1076_s20 + $0x8] sm:$0xf] }
  0x11   : > { %v234_v3 = vsel %vm229_vm1, %v214_v1, 0  ;;  %v286_v4 = vsel %vm229_vm1, %v215_v2, 0  ;;  %v217_v6 = vld [vmem:[%s1076_s20 + $0xc] sm:$0xf]  ;;  %v984_v7 = vld [vmem:[%s191_s17] sm:$0xff]   ;;  %v338_v9 = vsel %vm229_vm1, %v216_v5, 0 }
  0x12   : > { %909 = vmatpush3.bf16.xpose.msra.mxu0 %v234_v3  ;;  %915 = vmatpush3.bf16.xpose.msra.mxu1 %v286_v4  ;;  %v985_v8 = vld [vmem:[%s191_s17 + $0x8] sm:$0xff]   ;;  %v390_v10 = vsel %vm229_vm1, %v217_v6, 0  ;;  %v986_v11 = vld [vmem:[%s191_s17 + $0x10] sm:$0xff]   ;;  %v987_v12 = vld [vmem:[%s191_s17 + $0x18] sm:$0xff]   ;;  %s889_s27 = sshll.u32 %s1154_s13, 3 }
  0x13   : > { %920 = vmatprep.subr.bf16.mxu0 %v1028_v0  ;;  %926 = vmatprep.subr.bf16.mxu1 %v1028_v0  ;;  %s204_s30 = scalar_lea.vmem %s1152_s3, %s889_s27 }
  0x19   : > { %911 = vmatmul.mubr.msk.bf16.vlgmr.msra.gmra.mrb[0].mxu0 %vm229_vm1, %v984_v7  ;;  %917 = vmatmul.mubr.msk.bf16.vlgmr.msra.gmra.mrb[0].mxu1 %vm229_vm1, %v985_v8 }
  0x1a   : > { %921 = vmatpush3.bf16.xpose.msra.mxu0 %v338_v9  ;;  %927 = vmatpush3.bf16.xpose.msra.mxu1 %v390_v10 }
  0x1b   : > { %922 = vmatprep.mubr.msk.bf16.mxu0 %vm1029_vm0, %v1028_v0  ;;  %928 = vmatprep.mubr.msk.bf16.mxu1 %vm1029_vm0, %v1028_v0 }
  0x1c   : > { %932 = vmatprep.subr.bf16.mxu0 %v1028_v0  ;;  %938 = vmatprep.subr.bf16.mxu1 %v1028_v0 }
  0x21   : > { %923 = vmatmul.mubr.msk.bf16.vlgmr.msra.gmra.mrb[4].mxu0 %vm229_vm1, %v986_v11  ;;  %929 = vmatmul.mubr.msk.bf16.vlgmr.msra.gmra.mrb[4].mxu1 %vm229_vm1, %v987_v12 }
  0x22   : > { %934 = vmatprep.mubr.msk.bf16.mxu0 %vm1029_vm0, %v1028_v0  ;;  %940 = vmatprep.mubr.msk.bf16.mxu1 %vm1029_vm0, %v1028_v0 }
  0xec   : > { %v270_v13 = vpop.f32.mrb[0].mxu0  ;;  %v322_v14 = vpop.f32.mrb[0].mxu1 }
  0xed   : > { %v433_v16 = vmul.f32 0.35355338, %v270_v13  ;;  %v435_v17 = vmul.f32 0.35355338, %v322_v14  ;;  %v912_v18 = vpop.f32.mrb[1].mxu0  ;;  %v918_v19 = vpop.f32.mrb[1].mxu1 }
  0xee   : > { %v273_v20 = vpop.f32.mrb[2].mxu0  ;;  %v325_v21 = vpop.f32.mrb[2].mxu1 }
  0xef   : > { %v434_v22 = vmul.f32 0.35355338, %v273_v20  ;;  %v913_v23 = vpop.f32.mrb[3].mxu0  ;;  %v436_v24 = vmul.f32 0.35355338, %v325_v21  ;;  %v919_v25 = vpop.f32.mrb[3].mxu1  ;;  %v449_v26 = vadd.f32 %v878_v15, %v435_v17  ;;  %v447_v27 = vadd.f32 %v878_v15, %v433_v16 }
  0xf1   : > { %v461_v28 = vsel %vm229_vm1, %v449_v26, -inf  ;;  %v455_v29 = vsel %vm229_vm1, %v447_v27, -inf  ;;  %v450_v30 = vadd.f32 %v878_v15, %v436_v24  ;;  %v448_v31 = vadd.f32 %v878_v15, %v434_v22 }
  0xf2   : > { %462 = vmax.xlane.f32.xlu1 %v461_v28  ;;  %456 = vmax.xlane.f32.xlu0 %v455_v29 }
  0xf3   : > { %v464_v32 = vsel %vm229_vm1, %v450_v30, -inf  ;;  %v458_v34 = vsel %vm229_vm1, %v448_v31, -inf }
  0xf4   : > { %v374_v33 = vpop.f32.mrb[4].mxu0  ;;  %v426_v35 = vpop.f32.mrb[4].mxu1 }
  0xf5   : > { %v437_v36 = vmul.f32 0.35355338, %v374_v33  ;;  %v924_v37 = vpop.f32.mrb[5].mxu0  ;;  %v439_v38 = vmul.f32 0.35355338, %v426_v35  ;;  %v930_v39 = vpop.f32.mrb[5].mxu1 }
  0xf6   : > { %465 = vmax.xlane.f32.xlu1 %v464_v32  ;;  %459 = vmax.xlane.f32.xlu0 %v458_v34  ;;  %v377_v40 = vpop.f32.mrb[6].mxu0  ;;  %v429_v41 = vpop.f32.mrb[6].mxu1  ;;  %v867_v33 = vld [vmem:[%s1076_s20 + $0x14] sm:$0xf] }
  0xf7   : > { %v438_v42 = vmul.f32 0.35355338, %v377_v40  ;;  %v925_v43 = vpop.f32.mrb[7].mxu0  ;;  %v440_v44 = vmul.f32 0.35355338, %v429_v41  ;;  %v931_v45 = vpop.f32.mrb[7].mxu1  ;;  %v451_v46 = vadd.f32 %v878_v15, %v437_v36  ;;  %v453_v47 = vadd.f32 %v878_v15, %v439_v38 }
  0xf8   : > { %v599_v34 = vsel %vm550_vm2, %v867_v33, 0  ;;  %v868_v45 = vld [vmem:[%s1076_s20 + $0x18] sm:$0xf] }
  0xf9   : > { %v467_v48 = vsel %vm229_vm1, %v451_v46, -inf  ;;  %v452_v49 = vadd.f32 %v878_v15, %v438_v42  ;;  %v454_v50 = vadd.f32 %v878_v15, %v440_v44  ;;  %v473_v52 = vsel %vm229_vm1, %v453_v47, -inf  ;;  %939 = vmatpush3.bf16.msra.mxu1 %v599_v34 }
  0xfa   : > { %468 = vmax.xlane.f32.xlu0 %v467_v48  ;;  %950 = vmatprep.subr.bf16.mxu1 %v1028_v0 }
  0xfb   : > { %v470_v51 = vsel %vm229_vm1, %v452_v49, -inf  ;;  %v476_v53 = vsel %vm229_vm1, %v454_v50, -inf }
  0xfc   : > { %471 = vmax.xlane.f32.xlu1 %v470_v51 }
  0xfe   : > { %474 = vmax.xlane.f32.xlu0 %v473_v52  ;;  %v869_v52 = vld [vmem:[%s1076_s20 + $0x1c] sm:$0xf] }
 0x100   : > { %477 = vmax.xlane.f32.xlu1 %v476_v53 }
 0x17f   : > { %v463_v54 = vpop.xlane.xlu1 %462  ;;  %v457_v55 = vpop.xlane.xlu0 %456 }
 0x180   : > { %v481_v56 = vsub.f32 %v449_v26, %v463_v54  ;;  %v479_v57 = vsub.f32 %v447_v27, %v457_v55 }
 0x182   : > { %v487_v58 = vmul.f32 1.442695, %v479_v57  ;;  %v491_v59 = vmul.f32 1.442695, %v481_v56  ;;  %v693_v57 = vsel %vm550_vm2, %v869_v52, 0 }
 0x183   : > { %v466_v60 = vpop.xlane.xlu1 %465  ;;  %v460_v61 = vpop.xlane.xlu0 %459 }
 0x184   : > { %v482_v62 = vsub.f32 %v450_v30, %v466_v60  ;;  %v480_v63 = vsub.f32 %v448_v31, %v460_v61  ;;  %988 = vpow2.f32 %v487_v58  ;;  %v866_v31 = vld [vmem:[%s1076_s20 + $0x10] sm:$0xf] }
 0x185   : > { %990 = vpow2.f32 %v491_v59  ;;  %v552_v32 = vsel %vm550_vm2, %v866_v31, 0 }
 0x186   : > { %v489_v1 = vmul.f32 1.442695, %v480_v63  ;;  %v493_v2 = vmul.f32 1.442695, %v482_v62  ;;  %933 = vmatpush3.bf16.msra.mxu0 %v552_v32 }
 0x187   : > { %v469_v3 = vpop.xlane.xlu0 %468  ;;  %944 = vmatprep.subr.bf16.mxu0 %v1028_v0 }
 0x188   : > { %v483_v4 = vsub.f32 %v451_v46, %v469_v3  ;;  %992 = vpow2.f32 %v489_v1 }
 0x189   : > { %v472_v5 = vpop.xlane.xlu1 %471  ;;  %994 = vpow2.f32 %v493_v2 }
 0x18a   : > { %v495_v6 = vmul.f32 1.442695, %v483_v4  ;;  %v484_v7 = vsub.f32 %v452_v49, %v472_v5 }
 0x18b   : > { %v475_v8 = vpop.xlane.xlu0 %474 }
 0x18c   : > { %996 = vpow2.f32 %v495_v6  ;;  %v497_v9 = vmul.f32 1.442695, %v484_v7  ;;  %v485_v10 = vsub.f32 %v453_v47, %v475_v8 }
 0x18d   : > { %v478_v11 = vpop.xlane.xlu1 %477 }
 0x18e   : > { %v499_v12 = vmul.f32 1.442695, %v485_v10  ;;  %v486_v13 = vsub.f32 %v454_v50, %v478_v11  ;;  %v989_v14 = vpop.eup %988  ;;  %998 = vpow2.f32 %v497_v9  ;;  %v646_v50 = vsel %vm550_vm2, %v868_v45, 0 }
 0x18f   : > { %v503_v16 = vsel %vm229_vm1, %v989_v14, 0.0  ;;  %v991_v17 = vpop.eup %990 }
 0x190   : > { %1000 = vpow2.f32 %v499_v12  ;;  %v501_v15 = vmul.f32 1.442695, %v486_v13  ;;  %504 = vadd.xlane.f32.xlu0 %v503_v16  ;;  %v509_v19 = vsel %vm229_vm1, %v991_v17, 0.0 }
 0x192   : > { %v993_v18 = vpop.eup %992  ;;  %1002 = vpow2.f32 %v501_v15 }
 0x193   : > { %v506_v20 = vsel %vm229_vm1, %v993_v18, 0.0  ;;  %v995_v21 = vpop.eup %994 }
 0x194   : > { %510 = vadd.xlane.f32.xlu0 %v509_v19  ;;  %507 = vadd.xlane.f32.xlu1 %v506_v20  ;;  %v512_v24 = vsel %vm229_vm1, %v995_v21, 0.0 }
 0x196   : > { %v997_v22 = vpop.eup %996 }
 0x197   : > { %v515_v23 = vsel %vm229_vm1, %v997_v22, 0.0 }
 0x198   : > { %v999_v25 = vpop.eup %998  ;;  %516 = vadd.xlane.f32.xlu0 %v515_v23  ;;  %513 = vadd.xlane.f32.xlu1 %v512_v24 }
 0x199   : > { %v518_v28 = vsel %vm229_vm1, %v999_v25, 0.0 }
 0x19a   : > { %v1001_v26 = vpop.eup %1000 }
 0x19b   : > { %v521_v27 = vsel %vm229_vm1, %v1001_v26, 0.0 }
 0x19c   : > { %v1003_v29 = vpop.eup %1002  ;;  %522 = vadd.xlane.f32.xlu0 %v521_v27  ;;  %519 = vadd.xlane.f32.xlu1 %v518_v28 }
 0x19d   : > { %v524_v30 = vsel %vm229_vm1, %v1003_v29, 0.0 }
 0x1a0   : > { %525 = vadd.xlane.f32.xlu1 %v524_v30 }
 0x21d   : > { %v505_v35 = vpop.xlane.xlu0 %504 }
 0x21e   : > { %1004 = vrcp.f32 %v505_v35 }
 0x221   : > { %v511_v36 = vpop.xlane.xlu0 %510  ;;  %v508_v37 = vpop.xlane.xlu1 %507 }
 0x222   : > { %1006 = vrcp.f32 %v508_v37 }
 0x223   : > { %1008 = vrcp.f32 %v511_v36 }
 0x225   : > { %v517_v38 = vpop.xlane.xlu0 %516  ;;  %v514_v39 = vpop.xlane.xlu1 %513 }
 0x226   : > { %1010 = vrcp.f32 %v514_v39 }
 0x227   : > { %1012 = vrcp.f32 %v517_v38 }
 0x228   : > { %v1005_v42 = vpop.eup %1004 }
 0x229   : > { %v523_v40 = vpop.xlane.xlu0 %522  ;;  %v520_v41 = vpop.xlane.xlu1 %519  ;;  %v535_v46 = vmul.f32 %v1005_v42, %v989_v14 }
 0x22a   : > { %1014 = vrcp.f32 %v520_v41 }
 0x22b   : > { %1016 = vrcp.f32 %v523_v40 }
 0x22c   : > { %v1007_v43 = vpop.eup %1006 }
 0x22d   : > { %v526_v44 = vpop.xlane.xlu1 %525  ;;  %v536_v47 = vmul.f32 %v1007_v43, %v993_v18  ;;  %v1009_v48 = vpop.eup %1008 }
 0x22e   : > { %1018 = vrcp.f32 %v526_v44  ;;  %v537_v53 = vmul.f32 %v1009_v48, %v991_v17 }
 0x22f   : > { %v543_v49 = vpack.c.bf16 %v536_v47, %v535_v46 }
 0x230   : > { %v1011_v51 = vpop.eup %1010 }
 0x231   : > { %v538_v54 = vmul.f32 %v1011_v51, %v995_v21  ;;  %935 = vmatmul.mubr.msk.bf16.vlgmr.msra.gmra.mrb[8].mxu0 %vm229_vm1, %v543_v49  ;;  %v1013_v55 = vpop.eup %1012 }
 0x232   : > { %945 = vmatpush3.bf16.msra.mxu0 %v646_v50  ;;  %946 = vmatprep.mubr.msk.bf16.mxu0 %vm1029_vm0, %v1028_v0  ;;  %v539_v60 = vmul.f32 %v1013_v55, %v997_v22 }
 0x233   : > { %v544_v56 = vpack.c.bf16 %v538_v54, %v537_v53 }
 0x234   : > { %v1015_v58 = vpop.eup %1014 }
 0x235   : > { %v1017_v59 = vpop.eup %1016  ;;  %v540_v61 = vmul.f32 %v1015_v58, %v999_v25  ;;  %941 = vmatmul.mubr.msk.bf16.vlgmr.msra.gmra.mrb[8].mxu1 %vm229_vm1, %v544_v56 }
 0x236   : > { %951 = vmatpush3.bf16.msra.mxu1 %v693_v57  ;;  %952 = vmatprep.mubr.msk.bf16.mxu1 %vm1029_vm0, %v1028_v0  ;;  %v541_v1 = vmul.f32 %v1017_v59, %v1001_v26 }
 0x237   : > { %v545_v63 = vpack.c.bf16 %v540_v61, %v539_v60 }
 0x238   : > { %v1019_v62 = vpop.eup %1018 }
 0x239   : > { %v542_v2 = vmul.f32 %v1019_v62, %v1003_v29  ;;  %947 = vmatmul.mubr.msk.bf16.vlgmr.msra.gmra.mrb[12].mxu0 %vm229_vm1, %v545_v63 }
 0x23b   : > { %v546_v3 = vpack.c.bf16 %v542_v2, %v541_v1 }
 0x23d   : > { %953 = vmatmul.mubr.msk.bf16.vlgmr.msra.gmra.mrb[12].mxu1 %vm229_vm1, %v546_v3 }
 0x304   : > { %v588_v4 = vpop.f32.mrb[8].mxu0 }
 0x305   : > { %v936_v5 = vpop.f32.mrb[9].mxu0 }
 0x306   : > { %v591_v6 = vpop.f32.mrb[10].mxu0 }
 0x307   : > { %v937_v7 = vpop.f32.mrb[11].mxu0 }
 0x308   : > { %v635_v8 = vpop.f32.mrb[8].mxu1 }
 0x309   : > { %v942_v9 = vpop.f32.mrb[9].mxu1 }
 0x30a   : > { %v638_v10 = vpop.f32.mrb[10].mxu1 }
 0x30b   : > { %v969_v11 = vpack.i.bf16 %v638_v10, %v635_v8  ;;  %v943_v12 = vpop.f32.mrb[11].mxu1 }
 0x30c   : > { %v682_v13 = vpop.f32.mrb[12].mxu0 }
 0x30d   : > { %970 = vrot.lane.b32.xlu0 %v969_v11, %s1030_s24  ;;  %v948_v0 = vpop.f32.mrb[13].mxu0 }
 0x30e   : > { %v685_v14 = vpop.f32.mrb[14].mxu0 }
 0x30f   : > { %v974_v15 = vpack.i.bf16 %v685_v14, %v682_v13  ;;  %v949_v16 = vpop.f32.mrb[15].mxu0 }
 0x310   : > { %v729_v17 = vpop.f32.mrb[12].mxu1 }
 0x311   : > { %v954_v18 = vpop.f32.mrb[13].mxu1  ;;  %975 = vrot.lane.b32.xlu1 %v974_v15, %s1031_s25 }
 0x312   : > { %v732_v19 = vpop.f32.mrb[14].mxu1 }
 0x313   : > { %v979_v20 = vpack.i.bf16 %v732_v19, %v729_v17  ;;  %v955_v21 = vpop.f32.mrb[15].mxu1 }
 0x315   : > { %980 = vrot.lane.b32.xlu1 %v979_v20, %s1032_s26 }
 0x37f   : > { %v971_v22 = vpop.permute.xlu0 %970 }
 0x380   : > { %v973_v24 = vunpack.i.h.bf16 %v971_v22  ;;  %v972_v25 = vunpack.i.l.bf16 %v971_v22 }
 0x382   : > { %v760_v29 = vsel %vm229_vm1, %v588_v4, %v972_v25  ;;  %v761_v30 = vsel %vm229_vm1, %v591_v6, %v973_v24 }
 0x383   : > { %v976_v23 = vpop.permute.xlu1 %975 }
 0x384   : > { %v978_v26 = vunpack.i.h.bf16 %v976_v23  ;;  %v977_v27 = vunpack.i.l.bf16 %v976_v23 }
 0x386   : > { %v764_v33 = vsel %vm762_vm3, %v761_v30, %v978_v26  ;;  %v763_v34 = vsel %vm762_vm3, %v760_v29, %v977_v27 }
 0x387   : > { %v981_v28 = vpop.permute.xlu1 %980 }
 0x388   : > { %v983_v31 = vunpack.i.h.bf16 %v981_v28  ;;  %v982_v32 = vunpack.i.l.bf16 %v981_v28 }
 0x38a   : > { %v766_v35 = vsel %vm765_vm4, %v763_v34, %v982_v32  ;;  %v767_v36 = vsel %vm765_vm4, %v764_v33, %v983_v31 }
 0x38b   : > { %v890_v37 = vpack.c.bf16 %v766_v35, %v766_v35  ;;  %v891_v38 = vpack.c.bf16 %v767_v36, %v767_v36 }
 0x38d   : > { %777 = vst.msk [vmem:[%s204_s30] sm:$0xf] %vm776_vm5, %v890_v37  ;;  %778 = vst.msk [vmem:[%s204_s30 + $0x4] sm:$0xf] %vm776_vm5, %v891_v38 }
 0x38e PF: > { %s13_s12 = sadd.s32 1, %s1026_s12  }
 0x38f   : > { %p10_p4 = scmp.ge.s32.totalorder %s13_s12, 6  }
 0x391   :  { %12 = sbr.rel (!%p10_p4) target bundleno = 1 (0x1), region = 69 }

// kernel: multimodal_forward.107
= control target key start
LH: loop header
LB: loop body
LE: loop exit
PB: predicated region body
PF: predicated region fallthrough
CT: control target
= control target key end

     0   :  { %vm19_vm0 = vcmask 523264   ;;  %v278_v1 = vmov 0.0   ;;  %vm64_vm1 = vcmask 261120   ;;  %vm217_vm2 = vcmask 519168   ;;  %s384_s1 = inlined_call_operand.vmem [shape: bf16[32,64], index: 1, kind: input, shape index: {}]   ;;  %s385_s0 = inlined_call_operand.vmem [shape: f32[64,32], index: 0, kind: input, shape index: {}]   ;;  %s386_s2 = inlined_call_operand.vmem [shape: f32[1,64], index: 2, kind: input, shape index: {}]   ;;  %s387_s3 = inlined_call_operand.vmem [shape: bf16[64,64], index: 3, kind: output, shape index: {}]  }
   0x1   :  { %v276_v0 = vld [vmem:[%s384_s1] sm:$0xff]   ;;  %22 = vst.msk [vmem:[#allocation2 + $0x10] sm:$0xff] %vm19_vm0, %v278_v1  ;;  %20 = vst.msk [vmem:[#allocation2] sm:$0xff] %vm19_vm0, %v278_v1  ;;  %v277_v2 = vld [vmem:[%s384_s1 + $0x8] sm:$0xff]  }
   0x2   :  { %21 = vst.msk [vmem:[#allocation2 + $0x8] sm:$0xff] %vm19_vm0, %v278_v1  ;;  %23 = vst.msk [vmem:[#allocation2 + $0x18] sm:$0xff] %vm19_vm0, %v278_v1  ;;  %259 = vmatprep.subr.bf16.mxu0 %v276_v0  ;;  %271 = vmatprep.subr.bf16.mxu1 %v276_v0  ;;  %v36_v3 = vld [vmem:[%s385_s0] sm:$0xff]  ;;  %v37_v4 = vld [vmem:[%s385_s0 + $0x8] sm:$0xff] }
   0x3   :  { %24 = vst.msk [vmem:[#allocation2 + $0x20] sm:$0xff] %vm19_vm0, %v278_v1  ;;  %25 = vst.msk [vmem:[#allocation2 + $0x28] sm:$0xff] %vm19_vm0, %v278_v1  ;;  %v40_v5 = vld [vmem:[%s385_s0 + $0x20] sm:$0xff]  ;;  %260 = vmatpush3.bf16.msra.mxu0 %v276_v0  ;;  %273 = vmatpush3.bf16.msra.mxu1 %v276_v0  ;;  %v44_v6 = vpack.c.bf16 %v37_v4, %v36_v3  ;;  %v41_v7 = vld [vmem:[%s385_s0 + $0x28] sm:$0xff] }
   0x4   :  { %26 = vst.msk [vmem:[#allocation2 + $0x30] sm:$0xff] %vm19_vm0, %v278_v1  ;;  %27 = vst.msk [vmem:[#allocation2 + $0x38] sm:$0xff] %vm19_vm0, %v278_v1  ;;  %v38_v8 = vld [vmem:[%s385_s0 + $0x10] sm:$0xff]  ;;  %v39_v9 = vld [vmem:[%s385_s0 + $0x18] sm:$0xff]  ;;  %261 = vmatprep.subr.bf16.mxu0 %v277_v2  ;;  %272 = vmatprep.subr.bf16.mxu1 %v277_v2  ;;  %v46_v10 = vpack.c.bf16 %v41_v7, %v40_v5 }
   0x5   :  { %v42_v11 = vld [vmem:[%s385_s0 + $0x30] sm:$0xff]  ;;  %v43_v12 = vld [vmem:[%s385_s0 + $0x38] sm:$0xff]  ;;  %263 = vmatprep.mubr.msk.bf16.mxu0 %vm64_vm1, %v44_v6  ;;  %v45_v13 = vpack.c.bf16 %v39_v9, %v38_v8  ;;  %v236_v39 = vld [vmem:[%s386_s2] ss:$0 sm:$0xff] }
   0x6   :  { %267 = vmatprep.mubr.msk.bf16.mxu1 %vm64_vm1, %v46_v10  ;;  %v47_v14 = vpack.c.bf16 %v43_v12, %v42_v11 }
   0x7   :  { %262 = vmatpush3.bf16.msra.mxu0 %v277_v2  ;;  %274 = vmatpush3.bf16.msra.mxu1 %v277_v2 }
   0x8   :  { %v30_v15 = vld [vmem:[#allocation2 + $0x10] sm:$0xff]  ;;  %v28_v17 = vld [vmem:[#allocation2] sm:$0xff] }
   0x9   :  { %v31_v21 = vld [vmem:[#allocation2 + $0x18] sm:$0xff]  ;;  %v29_v27 = vld [vmem:[#allocation2 + $0x8] sm:$0xff] }
   0xa   :  { %264 = vmatmul.mubr.msk.bf16.vlgmr.msra.gmra.mrb[0].mxu0 %vm64_vm1, %v45_v13  ;;  %268 = vmatmul.mubr.msk.bf16.vlgmr.msra.gmra.mrb[0].mxu1 %vm64_vm1, %v47_v14  ;;  %v32_v18 = vld [vmem:[#allocation2 + $0x20] sm:$0xff]  ;;  %v33_v28 = vld [vmem:[#allocation2 + $0x28] sm:$0xff] }
   0xb   :  { %v34_v16 = vld [vmem:[#allocation2 + $0x30] sm:$0xff]  ;;  %v35_v22 = vld [vmem:[#allocation2 + $0x38] sm:$0xff] }
  0xdd   :  { %v265_v19 = vpop.f32.mrb[0].mxu0  ;;  %v269_v20 = vpop.f32.mrb[0].mxu1 }
  0xde   :  { %v144_v23 = vadd.f32 %v265_v19, %v30_v15  ;;  %v148_v24 = vadd.f32 %v269_v20, %v34_v16  ;;  %v111_v25 = vpop.f32.mrb[1].mxu0  ;;  %v127_v26 = vpop.f32.mrb[1].mxu1 }
  0xdf   :  { %v142_v29 = vadd.f32 %v111_v25, %v28_v17  ;;  %v146_v30 = vadd.f32 %v127_v26, %v32_v18  ;;  %v266_v31 = vpop.f32.mrb[2].mxu0  ;;  %v270_v32 = vpop.f32.mrb[2].mxu1 }
  0xe0   :  { %153 = vst.msk [vmem:[#allocation2 + $0x10] sm:$0xff] %vm19_vm0, %v144_v23  ;;  %157 = vst.msk [vmem:[#allocation2 + $0x30] sm:$0xff] %vm19_vm0, %v148_v24  ;;  %v145_v33 = vadd.f32 %v266_v31, %v31_v21  ;;  %v149_v34 = vadd.f32 %v270_v32, %v35_v22  ;;  %v114_v35 = vpop.f32.mrb[3].mxu0  ;;  %v130_v36 = vpop.f32.mrb[3].mxu1 }
  0xe1   :  { %151 = vst.msk [vmem:[#allocation2] sm:$0xff] %vm19_vm0, %v142_v29  ;;  %155 = vst.msk [vmem:[#allocation2 + $0x20] sm:$0xff] %vm19_vm0, %v146_v30  ;;  %v143_v37 = vadd.f32 %v114_v35, %v29_v27  ;;  %v147_v38 = vadd.f32 %v130_v36, %v33_v28 }
  0xe2   :  { %154 = vst.msk [vmem:[#allocation2 + $0x18] sm:$0xff] %vm19_vm0, %v145_v33  ;;  %158 = vst.msk [vmem:[#allocation2 + $0x38] sm:$0xff] %vm19_vm0, %v149_v34 }
  0xe3   :  { %152 = vst.msk [vmem:[#allocation2 + $0x8] sm:$0xff] %vm19_vm0, %v143_v37  ;;  %156 = vst.msk [vmem:[#allocation2 + $0x28] sm:$0xff] %vm19_vm0, %v147_v38 }
  0xe7   :  { %v164_v40 = vld [vmem:[#allocation2 + $0x10] sm:$0xff] }
  0xe8   :  { %v168_v41 = vld [vmem:[#allocation2 + $0x30] sm:$0xff]  ;;  %v179_v42 = vadd.f32 %v236_v39, %v164_v40  ;;  %v162_v44 = vld [vmem:[#allocation2] sm:$0xff] }
  0xe9   :  { %v183_v43 = vadd.f32 %v236_v39, %v168_v41  ;;  %v166_v45 = vld [vmem:[#allocation2 + $0x20] sm:$0xff]  ;;  %v177_v46 = vadd.f32 %v236_v39, %v162_v44  ;;  %v165_v48 = vld [vmem:[#allocation2 + $0x18] sm:$0xff] }
  0xea   :  { %v181_v47 = vadd.f32 %v236_v39, %v166_v45  ;;  %v169_v49 = vld [vmem:[#allocation2 + $0x38] sm:$0xff]  ;;  %v247_v50 = vpack.c.bf16 %v179_v42, %v179_v42  ;;  %v180_v52 = vadd.f32 %v236_v39, %v165_v48  ;;  %v163_v54 = vld [vmem:[#allocation2 + $0x8] sm:$0xff] }
  0xeb   :  { %v251_v51 = vpack.c.bf16 %v183_v43, %v183_v43  ;;  %v184_v53 = vadd.f32 %v236_v39, %v169_v49  ;;  %v167_v55 = vld [vmem:[#allocation2 + $0x28] sm:$0xff]  ;;  %v245_v56 = vpack.c.bf16 %v177_v46, %v177_v46  ;;  %v178_v58 = vadd.f32 %v236_v39, %v163_v54 }
  0xec   :  { %v249_v57 = vpack.c.bf16 %v181_v47, %v181_v47  ;;  %v182_v59 = vadd.f32 %v236_v39, %v167_v55  ;;  %220 = vst.msk [vmem:[%s387_s3 + $0x8] sm:$0xf] %vm217_vm2, %v247_v50  ;;  %v248_v60 = vpack.c.bf16 %v180_v52, %v180_v52 }
  0xed   :  { %224 = vst.msk [vmem:[%s387_s3 + $0x18] sm:$0xf] %vm217_vm2, %v251_v51  ;;  %v252_v61 = vpack.c.bf16 %v184_v53, %v184_v53  ;;  %218 = vst.msk [vmem:[%s387_s3] sm:$0xf] %vm217_vm2, %v245_v56  ;;  %v246_v62 = vpack.c.bf16 %v178_v58, %v178_v58 }
  0xee   :  { %222 = vst.msk [vmem:[%s387_s3 + $0x10] sm:$0xf] %vm217_vm2, %v249_v57  ;;  %v250_v63 = vpack.c.bf16 %v182_v59, %v182_v59  ;;  %221 = vst.msk [vmem:[%s387_s3 + $0xc] sm:$0xf] %vm217_vm2, %v248_v60 }
  0xef   :  { %225 = vst.msk [vmem:[%s387_s3 + $0x1c] sm:$0xf] %vm217_vm2, %v252_v61  ;;  %219 = vst.msk [vmem:[%s387_s3 + $0x4] sm:$0xf] %vm217_vm2, %v246_v62 }
  0xf0   :  { %223 = vst.msk [vmem:[%s387_s3 + $0x14] sm:$0xf] %vm217_vm2, %v250_v63 }

// kernel: multimodal_forward.108
= control target key start
LH: loop header
LB: loop body
LE: loop exit
PB: predicated region body
PF: predicated region fallthrough
CT: control target
= control target key end

     0   :  { %s956_s12 = smov 0   ;;  %s1041_s0 = inlined_call_operand.vmem [shape: bf16[4,4,8,8], index: 0, kind: input, shape index: {}]   ;;  %s1042_s1 = inlined_call_operand.vmem [shape: bf16[4,2,4,16,8], index: 1, kind: input, shape index: {}]   ;;  %s1043_s2 = inlined_call_operand.vmem [shape: f32[4,1,16], index: 2, kind: input, shape index: {}]   ;;  %s1044_s3 = inlined_call_operand.vmem [shape: bf16[4,8,32], index: 3, kind: output, shape index: {}]  }
   0x1 LB: > { %s783_s13 = sadd.s32 4294967295, %s929_s12   ;;  %p787_p0 = scmp.ge.s32.totalorder %s929_s12, 1  ;;  %s929_s12 = sphi %s956_s12, %s13_s12  }
   0x2   : > { %p155_p1 = scmp.lt.s32.totalorder %s929_s12, 5 }
   0x4   : > { %p156_p2 = pnand %p787_p0, %p155_p1 }
   0x5   : > { %p186_p3 = scmp.lt.s32.totalorder (!%p156_p2), %s783_s13, 3  ;;  %v931_v0 = vmov (!%p156_p2), 0.0   ;;  %vm932_vm0 = vmmov (!%p156_p2), 0   ;;  %vm231_vm1 = vcmask (!%p156_p2), 64512   ;;  %vm445_vm2 = vcmask (!%p156_p2), 130048   ;;  %s933_s25 = smov (!%p156_p2), 8  }
   0x6   : > { %159 = sbr.rel (%p156_p2) target bundleno = 900 (0x384), region = 32  ;;  %838 = vmatprep.subr.bf16.mxu0 (!%p156_p2), %v931_v0  ;;  %844 = vmatprep.subr.bf16.mxu1 (!%p156_p2), %v931_v0  ;;  %s934_s26 = smov (!%p156_p2), 16   ;;  %vm704_vm3 = vcmask (!%p156_p2), 195584   ;;  %vm707_vm4 = vcmask (!%p156_p2), 257024  }
   0x7   : > { %840 = vmatprep.mubr.msk.bf16.mxu0 (!%p156_p2), %vm932_vm0, %v931_v0  ;;  %846 = vmatprep.mubr.msk.bf16.mxu1 (!%p156_p2), %vm932_vm0, %v931_v0  ;;  %s935_s27 = smov (!%p156_p2), 24  }
   0xd   : > { %s1046_s13 = smov (!%p186_p3, %s783_s13), 3 }
   0xe   : > { %s821_s14 = sshll.u32 %s1046_s13, 6  ;;  %s820_s18 = sshll.u32 %s1046_s13, 4 }
   0xf   : > { %s976_s17 = scalar_lea.vmem %s1042_s1, %s821_s14  ;;  %s190_s21 = scalar_lea.vmem %s1041_s0, %s820_s18 }
  0x10   : > { %v899_v1 = vld [vmem:[%s976_s17] sm:$0xff]   ;;  %v900_v2 = vld [vmem:[%s976_s17 + $0x8] sm:$0xff]   ;;  %v901_v5 = vld [vmem:[%s976_s17 + $0x10] sm:$0xff]   ;;  %s198_s24 = scalar_lea.vmem %s1043_s2, %s1046_s13  ;;  %s792_s28 = sshll.u32 %s1046_s13, 2 }
  0x11   : > { %v236_v3 = vsel %vm231_vm1, %v899_v1, 0  ;;  %v287_v4 = vsel %vm231_vm1, %v900_v2, 0  ;;  %v204_v6 = vld [vmem:[%s190_s21] sm:$0xf]  ;;  %v902_v7 = vld [vmem:[%s976_s17 + $0x18] sm:$0xff]   ;;  %v338_v9 = vsel %vm231_vm1, %v901_v5, 0  ;;  %s202_s4 = scalar_lea.vmem %s1044_s3, %s792_s28 }
  0x12   : > { %839 = vmatpush3.bf16.xpose.msra.mxu0 %v236_v3  ;;  %845 = vmatpush3.bf16.xpose.msra.mxu1 %v287_v4  ;;  %v205_v8 = vld [vmem:[%s190_s21 + $0x4] sm:$0xf]  ;;  %v389_v10 = vsel %vm231_vm1, %v902_v7, 0  ;;  %v206_v11 = vld [vmem:[%s190_s21 + $0x8] sm:$0xf]  ;;  %v905_v7 = vld [vmem:[%s976_s17 + $0x30] sm:$0xff]  }
  0x13   : > { %850 = vmatprep.subr.bf16.mxu0 %v931_v0  ;;  %856 = vmatprep.subr.bf16.mxu1 %v931_v0  ;;  %v207_v12 = vld [vmem:[%s190_s21 + $0xc] sm:$0xf]  ;;  %v809_v14 = vld [vmem:[%s198_s24] ss:$0 sm:$0xff] }
  0x14   : > { %v903_v62 = vld [vmem:[%s976_s17 + $0x20] sm:$0xff]   ;;  %v904_v63 = vld [vmem:[%s976_s17 + $0x28] sm:$0xff]  }
  0x19   : > { %841 = vmatmul.mubr.msk.bf16.vlgmr.msra.gmra.mrb[0].mxu0 %vm231_vm1, %v204_v6  ;;  %847 = vmatmul.mubr.msk.bf16.vlgmr.msra.gmra.mrb[0].mxu1 %vm231_vm1, %v205_v8 }
  0x1a   : > { %851 = vmatpush3.bf16.xpose.msra.mxu0 %v338_v9  ;;  %857 = vmatpush3.bf16.xpose.msra.mxu1 %v389_v10 }
  0x1b   : > { %852 = vmatprep.mubr.msk.bf16.mxu0 %vm932_vm0, %v931_v0  ;;  %858 = vmatprep.mubr.msk.bf16.mxu1 %vm932_vm0, %v931_v0 }
  0x1c   : > { %862 = vmatprep.subr.bf16.mxu0 %v931_v0  ;;  %868 = vmatprep.subr.bf16.mxu1 %v931_v0 }
  0x21   : > { %853 = vmatmul.mubr.msk.bf16.vlgmr.msra.gmra.mrb[4].mxu0 %vm231_vm1, %v206_v11  ;;  %859 = vmatmul.mubr.msk.bf16.vlgmr.msra.gmra.mrb[4].mxu1 %vm231_vm1, %v207_v12  ;;  %v906_v11 = vld [vmem:[%s976_s17 + $0x38] sm:$0xff]  }
  0x22   : > { %864 = vmatprep.mubr.msk.bf16.mxu0 %vm932_vm0, %v931_v0  ;;  %870 = vmatprep.mubr.msk.bf16.mxu1 %vm932_vm0, %v931_v0 }
  0x23   : > { %863 = vmatpush3.bf16.msra.mxu0 %v903_v62  ;;  %869 = vmatpush3.bf16.msra.mxu1 %v904_v63 }
  0x24   : > { %874 = vmatprep.subr.bf16.mxu0 %v931_v0  ;;  %880 = vmatprep.subr.bf16.mxu1 %v931_v0 }
  0xec   : > { %v272_v13 = vpop.f32.mrb[0].mxu0  ;;  %v323_v17 = vpop.f32.mrb[0].mxu1 }
  0xed   : > { %v431_v15 = vmul.f32 0.35355338, %v272_v13  ;;  %v842_v16 = vpop.f32.mrb[1].mxu0  ;;  %v432_v19 = vmul.f32 0.35355338, %v323_v17  ;;  %v848_v20 = vpop.f32.mrb[1].mxu1 }
  0xee   : > { %v275_v18 = vpop.f32.mrb[2].mxu0  ;;  %v326_v22 = vpop.f32.mrb[2].mxu1 }
  0xef   : > { %v843_v21 = vpop.f32.mrb[3].mxu0  ;;  %v441_v23 = vadd.f32 %v809_v14, %v431_v15  ;;  %v849_v24 = vpop.f32.mrb[3].mxu1  ;;  %v442_v25 = vadd.f32 %v809_v14, %v432_v19 }
  0xf1   : > { %v446_v26 = vsel %vm445_vm2, %v441_v23, -inf  ;;  %v449_v27 = vsel %vm445_vm2, %v442_v25, -inf }
  0xf2   : > { %447 = vmax.xlane.f32.xlu0 %v446_v26 }
  0xf4   : > { %v374_v28 = vpop.f32.mrb[4].mxu0  ;;  %v425_v31 = vpop.f32.mrb[4].mxu1 }
  0xf5   : > { %v433_v29 = vmul.f32 0.35355338, %v374_v28  ;;  %v854_v30 = vpop.f32.mrb[5].mxu0  ;;  %v434_v32 = vmul.f32 0.35355338, %v425_v31  ;;  %v860_v34 = vpop.f32.mrb[5].mxu1 }
  0xf6   : > { %450 = vmax.xlane.f32.xlu0 %v449_v27  ;;  %v377_v33 = vpop.f32.mrb[6].mxu0  ;;  %v428_v36 = vpop.f32.mrb[6].mxu1 }
  0xf7   : > { %v855_v35 = vpop.f32.mrb[7].mxu0  ;;  %v443_v37 = vadd.f32 %v809_v14, %v433_v29  ;;  %v861_v38 = vpop.f32.mrb[7].mxu1  ;;  %v444_v39 = vadd.f32 %v809_v14, %v434_v32 }
  0xf9   : > { %v452_v40 = vsel %vm445_vm2, %v443_v37, -inf  ;;  %v455_v41 = vsel %vm445_vm2, %v444_v39, -inf }
  0xfa   : > { %453 = vmax.xlane.f32.xlu1 %v452_v40 }
  0xfe   : > { %456 = vmax.xlane.f32.xlu1 %v455_v41 }
 0x17f   : > { %v448_v42 = vpop.xlane.xlu0 %447 }
 0x180   : > { %v458_v43 = vsub.f32 %v441_v23, %v448_v42 }
 0x182   : > { %v462_v44 = vmul.f32 1.442695, %v458_v43 }
 0x183   : > { %v451_v45 = vpop.xlane.xlu0 %450 }
 0x184   : > { %907 = vpow2.f32 %v462_v44  ;;  %v459_v46 = vsub.f32 %v442_v25, %v451_v45 }
 0x186   : > { %v464_v47 = vmul.f32 1.442695, %v459_v46 }
 0x187   : > { %v454_v48 = vpop.xlane.xlu1 %453 }
 0x188   : > { %909 = vpow2.f32 %v464_v47  ;;  %v460_v49 = vsub.f32 %v443_v37, %v454_v48 }
 0x18a   : > { %v466_v50 = vmul.f32 1.442695, %v460_v49 }
 0x18b   : > { %v457_v51 = vpop.xlane.xlu1 %456 }
 0x18c   : > { %911 = vpow2.f32 %v466_v50  ;;  %v461_v52 = vsub.f32 %v444_v39, %v457_v51 }
 0x18e   : > { %v908_v53 = vpop.eup %907  ;;  %v468_v54 = vmul.f32 1.442695, %v461_v52 }
 0x18f   : > { %v470_v55 = vsel %vm445_vm2, %v908_v53, 0.0 }
 0x190   : > { %913 = vpow2.f32 %v468_v54  ;;  %471 = vadd.xlane.f32.xlu0 %v470_v55 }
 0x192   : > { %v910_v56 = vpop.eup %909 }
 0x193   : > { %v473_v57 = vsel %vm445_vm2, %v910_v56, 0.0 }
 0x194   : > { %474 = vadd.xlane.f32.xlu1 %v473_v57 }
 0x196   : > { %v912_v58 = vpop.eup %911 }
 0x197   : > { %v476_v59 = vsel %vm445_vm2, %v912_v58, 0.0 }
 0x198   : > { %477 = vadd.xlane.f32.xlu0 %v476_v59 }
 0x19a   : > { %v914_v60 = vpop.eup %913 }
 0x19b   : > { %v479_v61 = vsel %vm445_vm2, %v914_v60, 0.0 }
 0x19c   : > { %480 = vadd.xlane.f32.xlu1 %v479_v61 }
 0x21d   : > { %v472_v1 = vpop.xlane.xlu0 %471 }
 0x21e   : > { %915 = vrcp.f32 %v472_v1 }
 0x221   : > { %v475_v2 = vpop.xlane.xlu1 %474 }
 0x222   : > { %917 = vrcp.f32 %v475_v2 }
 0x225   : > { %v478_v3 = vpop.xlane.xlu0 %477 }
 0x226   : > { %919 = vrcp.f32 %v478_v3 }
 0x228   : > { %v916_v4 = vpop.eup %915 }
 0x229   : > { %v486_v5 = vmul.f32 %v916_v4, %v908_v53  ;;  %v481_v6 = vpop.xlane.xlu1 %480 }
 0x22a   : > { %921 = vrcp.f32 %v481_v6 }
 0x22b   : > { %v490_v8 = vpack.c.bf16 %v486_v5, %v486_v5 }
 0x22c   : > { %v918_v9 = vpop.eup %917 }
 0x22d   : > { %v487_v10 = vmul.f32 %v918_v9, %v910_v56  ;;  %865 = vmatmul.mubr.msk.bf16.vlgmr.msra.gmra.mrb[8].mxu0 %vm445_vm2, %v490_v8 }
 0x22e   : > { %875 = vmatpush3.bf16.msra.mxu0 %v905_v7  ;;  %876 = vmatprep.mubr.msk.bf16.mxu0 %vm932_vm0, %v931_v0 }
 0x22f   : > { %v491_v12 = vpack.c.bf16 %v487_v10, %v487_v10 }
 0x230   : > { %v920_v13 = vpop.eup %919 }
 0x231   : > { %v488_v14 = vmul.f32 %v920_v13, %v912_v58  ;;  %871 = vmatmul.mubr.msk.bf16.vlgmr.msra.gmra.mrb[8].mxu1 %vm445_vm2, %v491_v12 }
 0x232   : > { %881 = vmatpush3.bf16.msra.mxu1 %v906_v11  ;;  %882 = vmatprep.mubr.msk.bf16.mxu1 %vm932_vm0, %v931_v0 }
 0x233   : > { %v492_v15 = vpack.c.bf16 %v488_v14, %v488_v14 }
 0x234   : > { %v922_v16 = vpop.eup %921 }
 0x235   : > { %v489_v17 = vmul.f32 %v922_v16, %v914_v60  ;;  %877 = vmatmul.mubr.msk.bf16.vlgmr.msra.gmra.mrb[12].mxu0 %vm445_vm2, %v492_v15 }
 0x237   : > { %v493_v18 = vpack.c.bf16 %v489_v17, %v489_v17 }
 0x239   : > { %883 = vmatmul.mubr.msk.bf16.vlgmr.msra.gmra.mrb[12].mxu1 %vm445_vm2, %v493_v18 }
 0x300   : > { %v537_v19 = vpop.f32.mrb[8].mxu0 }
 0x301   : > { %v866_v20 = vpop.f32.mrb[9].mxu0 }
 0x302   : > { %v540_v21 = vpop.f32.mrb[10].mxu0 }
 0x303   : > { %v867_v22 = vpop.f32.mrb[11].mxu0 }
 0x304   : > { %v586_v23 = vpop.f32.mrb[8].mxu1 }
 0x305   : > { %691 = vrot.lane.b32.xlu0 %v586_v23, %s933_s25  ;;  %v872_v24 = vpop.f32.mrb[9].mxu1 }
 0x306   : > { %v589_v25 = vpop.f32.mrb[10].mxu1 }
 0x307   : > { %v873_v26 = vpop.f32.mrb[11].mxu1 }
 0x308   : > { %v635_v0 = vpop.f32.mrb[12].mxu0 }
 0x309   : > { %695 = vrot.lane.b32.xlu1 %v635_v0, %s934_s26  ;;  %v878_v27 = vpop.f32.mrb[13].mxu0 }
 0x30a   : > { %v638_v28 = vpop.f32.mrb[14].mxu0 }
 0x30b   : > { %v879_v29 = vpop.f32.mrb[15].mxu0 }
 0x30c   : > { %v684_v30 = vpop.f32.mrb[12].mxu1 }
 0x30d   : > { %v884_v31 = vpop.f32.mrb[13].mxu1  ;;  %699 = vrot.lane.b32.xlu1 %v684_v30, %s935_s27 }
 0x30e   : > { %v687_v32 = vpop.f32.mrb[14].mxu1 }
 0x30f   : > { %v885_v33 = vpop.f32.mrb[15].mxu1 }
 0x377   : > { %v692_v34 = vpop.permute.xlu0 %691 }
 0x378   : > { %v702_v36 = vsel %vm231_vm1, %v537_v19, %v692_v34 }
 0x37b   : > { %v696_v35 = vpop.permute.xlu1 %695 }
 0x37c   : > { %v703_v37 = vsel %vm445_vm2, %v702_v36, %v696_v35 }
 0x37f   : > { %v700_v38 = vpop.permute.xlu1 %699 }
 0x380   : > { %v705_v39 = vsel %vm704_vm3, %v703_v37, %v700_v38 }
 0x381   : > { %v706_v40 = vpack.c.bf16 %v705_v39, %v705_v39 }
 0x383   : > { %708 = vst.msk [vmem:[%s202_s4] sm:$0xf] %vm707_vm4, %v706_v40 }
 0x384 PF: > { %s13_s12 = sadd.s32 1, %s929_s12  }
 0x385   : > { %p10_p4 = scmp.ge.s32.totalorder %s13_s12, 6  }
 0x387   :  { %12 = sbr.rel (!%p10_p4) target bundleno = 1 (0x1), region = 69 }

// kernel: multimodal_forward.110
= control target key start
LH: loop header
LB: loop body
LE: loop exit
PB: predicated region body
PF: predicated region fallthrough
CT: control target
= control target key end

     0   :  { %vm19_vm0 = vcmask 523264   ;;  %v230_v1 = vmov 0.0   ;;  %vm50_vm1 = vcmask 261120   ;;  %vm185_vm2 = vcmask 519168   ;;  %s292_s1 = inlined_call_operand.vmem [shape: bf16[32,64], index: 1, kind: input, shape index: {}]   ;;  %s293_s0 = inlined_call_operand.vmem [shape: f32[32,32], index: 0, kind: input, shape index: {}]   ;;  %s294_s2 = inlined_call_operand.vmem [shape: f32[1,64], index: 2, kind: input, shape index: {}]   ;;  %s295_s3 = inlined_call_operand.vmem [shape: bf16[32,64], index: 3, kind: output, shape index: {}]  }
   0x1   :  { %v220_v0 = vld [vmem:[%s292_s1] sm:$0xff]   ;;  %22 = vst.msk [vmem:[#allocation2 + $0x10] sm:$0xff] %vm19_vm0, %v230_v1  ;;  %20 = vst.msk [vmem:[#allocation2] sm:$0xff] %vm19_vm0, %v230_v1  ;;  %v221_v2 = vld [vmem:[%s292_s1 + $0x8] sm:$0xff]  }
   0x2   :  { %21 = vst.msk [vmem:[#allocation2 + $0x8] sm:$0xff] %vm19_vm0, %v230_v1  ;;  %23 = vst.msk [vmem:[#allocation2 + $0x18] sm:$0xff] %vm19_vm0, %v230_v1  ;;  %211 = vmatprep.subr.bf16.mxu0 %v220_v0  ;;  %v28_v3 = vld [vmem:[%s293_s0] sm:$0xff]  ;;  %v29_v4 = vld [vmem:[%s293_s0 + $0x8] sm:$0xff] }
   0x3   :  { %212 = vmatpush3.bf16.msra.mxu0 %v220_v0  ;;  %v32_v5 = vpack.c.bf16 %v29_v4, %v28_v3  ;;  %v30_v6 = vld [vmem:[%s293_s0 + $0x10] sm:$0xff]  ;;  %v31_v7 = vld [vmem:[%s293_s0 + $0x18] sm:$0xff]  ;;  %v198_v21 = vld [vmem:[%s294_s2] ss:$0 sm:$0xff] }
   0x4   :  { %213 = vmatprep.subr.bf16.mxu0 %v221_v2  ;;  %v33_v8 = vpack.c.bf16 %v31_v7, %v30_v6 }
   0x5   :  { %215 = vmatprep.mubr.msk.bf16.mxu0 %vm50_vm1, %v32_v5 }
   0x7   :  { %214 = vmatpush3.bf16.msra.mxu0 %v221_v2 }
   0x8   :  { %v26_v9 = vld [vmem:[#allocation2 + $0x10] sm:$0xff]  ;;  %v24_v10 = vld [vmem:[#allocation2] sm:$0xff] }
   0x9   :  { %v27_v12 = vld [vmem:[#allocation2 + $0x18] sm:$0xff]  ;;  %v25_v15 = vld [vmem:[#allocation2 + $0x8] sm:$0xff] }
   0xa   :  { %216 = vmatmul.mubr.msk.bf16.vlgmr.msra.gmra.mrb[0].mxu0 %vm50_vm1, %v33_v8 }
  0xdd   :  { %v217_v11 = vpop.f32.mrb[0].mxu0 }
  0xde   :  { %v108_v13 = vadd.f32 %v217_v11, %v26_v9  ;;  %v91_v14 = vpop.f32.mrb[1].mxu0 }
  0xdf   :  { %v106_v16 = vadd.f32 %v91_v14, %v24_v10  ;;  %v218_v17 = vpop.f32.mrb[2].mxu0 }
  0xe0   :  { %113 = vst.msk [vmem:[#allocation2 + $0x10] sm:$0xff] %vm19_vm0, %v108_v13  ;;  %v109_v18 = vadd.f32 %v218_v17, %v27_v12  ;;  %v94_v19 = vpop.f32.mrb[3].mxu0 }
  0xe1   :  { %111 = vst.msk [vmem:[#allocation2] sm:$0xff] %vm19_vm0, %v106_v16  ;;  %v107_v20 = vadd.f32 %v94_v19, %v25_v15 }
  0xe2   :  { %114 = vst.msk [vmem:[#allocation2 + $0x18] sm:$0xff] %vm19_vm0, %v109_v18 }
  0xe3   :  { %112 = vst.msk [vmem:[#allocation2 + $0x8] sm:$0xff] %vm19_vm0, %v107_v20 }
  0xe7   :  { %v120_v22 = vld [vmem:[#allocation2 + $0x10] sm:$0xff] }
  0xe8   :  { %v131_v23 = vadd.f32 %v198_v21, %v120_v22  ;;  %v118_v24 = vld [vmem:[#allocation2] sm:$0xff] }
  0xe9   :  { %v129_v25 = vadd.f32 %v198_v21, %v118_v24  ;;  %v121_v26 = vld [vmem:[#allocation2 + $0x18] sm:$0xff] }
  0xea   :  { %v139_v27 = vmul.f32 0.044715, %v131_v23  ;;  %v132_v28 = vadd.f32 %v198_v21, %v121_v26  ;;  %v119_v29 = vld [vmem:[#allocation2 + $0x8] sm:$0xff]  ;;  %v135_v52 = vmul.f32 0.5, %v131_v23 }
  0xeb   :  { %v137_v30 = vmul.f32 0.044715, %v129_v25  ;;  %v130_v31 = vadd.f32 %v198_v21, %v119_v29  ;;  %v133_v55 = vmul.f32 0.5, %v129_v25 }
  0xec   :  { %v143_v32 = vmul.f32 %v139_v27, %v131_v23  ;;  %v140_v33 = vmul.f32 0.044715, %v132_v28  ;;  %v136_v59 = vmul.f32 0.5, %v132_v28 }
  0xed   :  { %v141_v34 = vmul.f32 %v137_v30, %v129_v25  ;;  %v138_v35 = vmul.f32 0.044715, %v130_v31  ;;  %v134_v62 = vmul.f32 0.5, %v130_v31 }
  0xee   :  { %v147_v36 = vmul.f32 %v143_v32, %v131_v23  ;;  %v144_v37 = vmul.f32 %v140_v33, %v132_v28 }
  0xef   :  { %v145_v38 = vmul.f32 %v141_v34, %v129_v25  ;;  %v142_v39 = vmul.f32 %v138_v35, %v130_v31 }
  0xf0   :  { %v151_v40 = vadd.f32 %v147_v36, %v131_v23  ;;  %v148_v41 = vmul.f32 %v144_v37, %v132_v28 }
  0xf1   :  { %v149_v42 = vadd.f32 %v145_v38, %v129_v25  ;;  %v146_v43 = vmul.f32 %v142_v39, %v130_v31 }
  0xf2   :  { %v155_v44 = vmul.f32 0.7978846, %v151_v40  ;;  %v152_v45 = vadd.f32 %v148_v41, %v132_v28 }
  0xf3   :  { %v153_v46 = vmul.f32 0.7978846, %v149_v42  ;;  %v150_v47 = vadd.f32 %v146_v43, %v130_v31 }
  0xf4   :  { %222 = vtanh.f32 %v155_v44  ;;  %v156_v48 = vmul.f32 0.7978846, %v152_v45 }
  0xf5   :  { %224 = vtanh.f32 %v153_v46  ;;  %v154_v49 = vmul.f32 0.7978846, %v150_v47 }
  0xf6   :  { %226 = vtanh.f32 %v156_v48 }
  0xf7   :  { %228 = vtanh.f32 %v154_v49 }
  0xfe   :  { %v223_v50 = vpop.eup %222 }
  0xff   :  { %v225_v51 = vpop.eup %224  ;;  %v163_v53 = vadd.f32 1.0, %v223_v50 }
 0x100   :  { %v227_v54 = vpop.eup %226  ;;  %v161_v56 = vadd.f32 1.0, %v225_v51 }
 0x101   :  { %v229_v57 = vpop.eup %228  ;;  %v167_v58 = vmul.f32 %v163_v53, %v135_v52  ;;  %v164_v60 = vadd.f32 1.0, %v227_v54 }
 0x102   :  { %v165_v61 = vmul.f32 %v161_v56, %v133_v55  ;;  %v162_v63 = vadd.f32 1.0, %v229_v57 }
 0x103   :  { %v205_v0 = vpack.c.bf16 %v167_v58, %v167_v58  ;;  %v168_v1 = vmul.f32 %v164_v60, %v136_v59 }
 0x104   :  { %v203_v2 = vpack.c.bf16 %v165_v61, %v165_v61  ;;  %v166_v3 = vmul.f32 %v162_v63, %v134_v62 }
 0x105   :  { %188 = vst.msk [vmem:[%s295_s3 + $0x8] sm:$0xf] %vm185_vm2, %v205_v0  ;;  %v206_v4 = vpack.c.bf16 %v168_v1, %v168_v1 }
 0x106   :  { %186 = vst.msk [vmem:[%s295_s3] sm:$0xf] %vm185_vm2, %v203_v2  ;;  %v204_v5 = vpack.c.bf16 %v166_v3, %v166_v3 }
 0x107   :  { %189 = vst.msk [vmem:[%s295_s3 + $0xc] sm:$0xf] %vm185_vm2, %v206_v4 }
 0x108   :  { %187 = vst.msk [vmem:[%s295_s3 + $0x4] sm:$0xf] %vm185_vm2, %v204_v5 }

// kernel: multimodal_forward.111
= control target key start
LH: loop header
LB: loop body
LE: loop exit
PB: predicated region body
PF: predicated region fallthrough
CT: control target
= control target key end

     0   :  { %vm28_vm0 = vcmask 261120   ;;  %v301_v1 = vmov 0.0   ;;  %vm83_vm1 = vcmask 523264   ;;  %s408_s1 = inlined_call_operand.vmem [shape: bf16[64,32], index: 1, kind: input, shape index: {}]   ;;  %s409_s0 = inlined_call_operand.vmem [shape: bf16[32,64], index: 0, kind: input, shape index: {}]   ;;  %s410_s2 = inlined_call_operand.vmem [shape: f32[1,32], index: 2, kind: input, shape index: {}]   ;;  %s411_s3 = inlined_call_operand.vmem [shape: f32[32,32], index: 3, kind: input, shape index: {}]   ;;  %s412_s4 = inlined_call_operand.vmem [shape: f32[1,32], index: 4, kind: input, shape index: {}]   ;;  %s413_s5 = inlined_call_operand.vmem [shape: f32[1,32], index: 5, kind: input, shape index: {}]   ;;  %s414_s6 = inlined_call_operand.vmem [shape: f32[32,32], index: 6, kind: output, shape index: {}]  }
   0x1   :  { %v287_v0 = vld [vmem:[%s408_s1] sm:$0xff]   ;;  %31 = vst.msk [vmem:[#allocation2 + $0x10] sm:$0xff] %vm28_vm0, %v301_v1  ;;  %29 = vst.msk [vmem:[#allocation2] sm:$0xff] %vm28_vm0, %v301_v1  ;;  %v288_v2 = vld [vmem:[%s408_s1 + $0x8] sm:$0xff]  }
   0x2   :  { %30 = vst.msk [vmem:[#allocation2 + $0x8] sm:$0xff] %vm28_vm0, %v301_v1  ;;  %32 = vst.msk [vmem:[#allocation2 + $0x18] sm:$0xff] %vm28_vm0, %v301_v1  ;;  %274 = vmatprep.subr.bf16.mxu0 %v287_v0  ;;  %v289_v3 = vld [vmem:[%s408_s1 + $0x10] sm:$0xff]   ;;  %v291_v4 = vld [vmem:[%s409_s0] sm:$0xff]  }
   0x3   :  { %275 = vmatpush3.bf16.msra.mxu0 %v287_v0  ;;  %282 = vmatprep.mubr.msk.bf16.mxu0 %vm83_vm1, %v291_v4  ;;  %v290_v5 = vld [vmem:[%s408_s1 + $0x18] sm:$0xff]   ;;  %v292_v6 = vld [vmem:[%s409_s0 + $0x8] sm:$0xff]   ;;  %v265_v19 = vld [vmem:[%s410_s2] ss:$0 sm:$0xff] }
   0x4   :  { %276 = vmatprep.subr.bf16.mxu0 %v288_v2  ;;  %v168_v21 = vld [vmem:[%s411_s3 + $0x10] sm:$0xff]  ;;  %v166_v24 = vld [vmem:[%s411_s3] sm:$0xff]  ;;  %v169_v27 = vld [vmem:[%s411_s3 + $0x18] sm:$0xff] }
   0x5   :  { %v167_v31 = vld [vmem:[%s411_s3 + $0x8] sm:$0xff] }
   0x7   :  { %277 = vmatpush3.bf16.msra.mxu0 %v288_v2 }
   0x8   :  { %278 = vmatprep.subr.bf16.mxu0 %v289_v3  ;;  %v35_v7 = vld [vmem:[#allocation2 + $0x10] sm:$0xff]  ;;  %v33_v8 = vld [vmem:[#allocation2] sm:$0xff] }
   0x9   :  { %v36_v10 = vld [vmem:[#allocation2 + $0x18] sm:$0xff]  ;;  %v34_v13 = vld [vmem:[#allocation2 + $0x8] sm:$0xff] }
   0xb   :  { %279 = vmatpush3.bf16.msra.mxu0 %v289_v3 }
   0xc   :  { %280 = vmatprep.subr.bf16.mxu0 %v290_v5 }
   0xf   :  { %281 = vmatpush3.bf16.msra.mxu0 %v290_v5 }
  0x12   :  { %283 = vmatmul.mubr.msk.bf16.vlgmr.msra.gmra.mrb[0].mxu0 %vm83_vm1, %v292_v6 }
  0xe5   :  { %v284_v9 = vpop.f32.mrb[0].mxu0 }
  0xe6   :  { %v141_v11 = vadd.f32 %v284_v9, %v35_v7  ;;  %v124_v12 = vpop.f32.mrb[1].mxu0  ;;  %v266_v9 = vld [vmem:[%s412_s4] ss:$0 sm:$0xff] }
  0xe7   :  { %v139_v14 = vadd.f32 %v124_v12, %v33_v8  ;;  %v285_v15 = vpop.f32.mrb[2].mxu0 }
  0xe8   :  { %146 = vst.msk [vmem:[#allocation2 + $0x10] sm:$0xff] %vm28_vm0, %v141_v11  ;;  %v142_v16 = vadd.f32 %v285_v15, %v36_v10  ;;  %v127_v17 = vpop.f32.mrb[3].mxu0  ;;  %v267_v11 = vld [vmem:[%s413_s5] ss:$0 sm:$0xff] }
  0xe9   :  { %144 = vst.msk [vmem:[#allocation2] sm:$0xff] %vm28_vm0, %v139_v14  ;;  %v140_v18 = vadd.f32 %v127_v17, %v34_v13 }
  0xea   :  { %147 = vst.msk [vmem:[#allocation2 + $0x18] sm:$0xff] %vm28_vm0, %v142_v16 }
  0xeb   :  { %145 = vst.msk [vmem:[#allocation2 + $0x8] sm:$0xff] %vm28_vm0, %v140_v18 }
  0xef   :  { %v153_v20 = vld [vmem:[#allocation2 + $0x10] sm:$0xff] }
  0xf0   :  { %v164_v22 = vadd.f32 %v265_v19, %v153_v20  ;;  %v151_v23 = vld [vmem:[#allocation2] sm:$0xff] }
  0xf1   :  { %v162_v25 = vadd.f32 %v265_v19, %v151_v23  ;;  %v154_v26 = vld [vmem:[#allocation2 + $0x18] sm:$0xff] }
  0xf2   :  { %v172_v28 = vadd.f32 %v168_v21, %v164_v22  ;;  %v165_v29 = vadd.f32 %v265_v19, %v154_v26  ;;  %v152_v30 = vld [vmem:[#allocation2 + $0x8] sm:$0xff] }
  0xf3   :  { %v170_v32 = vadd.f32 %v166_v24, %v162_v25  ;;  %v163_v33 = vadd.f32 %v265_v19, %v152_v30 }
  0xf4   :  { %v180_v34 = vsel %vm28_vm0, %v172_v28, 0.0  ;;  %v173_v35 = vadd.f32 %v169_v27, %v165_v29 }
  0xf5   :  { %181 = vadd.xlane.f32.xlu1 %v180_v34  ;;  %v174_v36 = vsel %vm28_vm0, %v170_v32, 0.0  ;;  %v171_v37 = vadd.f32 %v167_v31, %v163_v33 }
  0xf6   :  { %175 = vadd.xlane.f32.xlu0 %v174_v36  ;;  %v183_v38 = vsel %vm28_vm0, %v173_v35, 0.0 }
  0xf7   :  { %v177_v39 = vsel %vm28_vm0, %v171_v37, 0.0 }
  0xf9   :  { %184 = vadd.xlane.f32.xlu1 %v183_v38 }
  0xfa   :  { %178 = vadd.xlane.f32.xlu0 %v177_v39 }
 0x182   :  { %v182_v40 = vpop.xlane.xlu1 %181 }
 0x183   :  { %v189_v41 = vmul.f32 0.03125, %v182_v40  ;;  %v176_v42 = vpop.xlane.xlu0 %175 }
 0x184   :  { %v187_v43 = vmul.f32 0.03125, %v176_v42 }
 0x185   :  { %v193_v44 = vsub.f32 %v172_v28, %v189_v41 }
 0x186   :  { %v191_v45 = vsub.f32 %v170_v32, %v187_v43  ;;  %v185_v46 = vpop.xlane.xlu1 %184 }
 0x187   :  { %v190_v47 = vmul.f32 0.03125, %v185_v46  ;;  %v179_v48 = vpop.xlane.xlu0 %178  ;;  %v197_v54 = vmul.f32 %v193_v44, %v193_v44 }
 0x188   :  { %v188_v49 = vmul.f32 0.03125, %v179_v48  ;;  %v195_v50 = vmul.f32 %v191_v45, %v191_v45 }
 0x189   :  { %v194_v51 = vsub.f32 %v173_v35, %v190_v47  ;;  %v205_v56 = vsel %vm28_vm0, %v197_v54, 0.0 }
 0x18a   :  { %v192_v52 = vsub.f32 %v171_v37, %v188_v49  ;;  %v199_v53 = vsel %vm28_vm0, %v195_v50, 0.0 }
 0x18b   :  { %200 = vadd.xlane.f32.xlu0 %v199_v53  ;;  %v198_v58 = vmul.f32 %v194_v51, %v194_v51 }
 0x18c   :  { %v196_v55 = vmul.f32 %v192_v52, %v192_v52 }
 0x18d   :  { %v208_v59 = vsel %vm28_vm0, %v198_v58, 0.0 }
 0x18e   :  { %v202_v57 = vsel %vm28_vm0, %v196_v55, 0.0 }
 0x18f   :  { %206 = vadd.xlane.f32.xlu0 %v205_v56  ;;  %203 = vadd.xlane.f32.xlu1 %v202_v57 }
 0x193   :  { %209 = vadd.xlane.f32.xlu1 %v208_v59 }
 0x218   :  { %v201_v60 = vpop.xlane.xlu0 %200 }
 0x219   :  { %v211_v61 = vmul.f32 0.03125, %v201_v60 }
 0x21b   :  { %v215_v62 = vadd.f32 1e-12, %v211_v61 }
 0x21c   :  { %v204_v63 = vpop.xlane.xlu1 %203  ;;  %v207_v0 = vpop.xlane.xlu0 %206 }
 0x21d   :  { %293 = vrsqrt.f32 %v215_v62  ;;  %v212_v1 = vmul.f32 0.03125, %v204_v63  ;;  %v213_v2 = vmul.f32 0.03125, %v207_v0 }
 0x21f   :  { %v216_v3 = vadd.f32 1e-12, %v212_v1  ;;  %v217_v4 = vadd.f32 1e-12, %v213_v2 }
 0x220   :  { %v210_v5 = vpop.xlane.xlu1 %209 }
 0x221   :  { %295 = vrsqrt.f32 %v216_v3  ;;  %v214_v6 = vmul.f32 0.03125, %v210_v5 }
 0x222   :  { %297 = vrsqrt.f32 %v217_v4 }
 0x223   :  { %v218_v7 = vadd.f32 1e-12, %v214_v6 }
 0x225   :  { %299 = vrsqrt.f32 %v218_v7 }
 0x227   :  { %v294_v8 = vpop.eup %293 }
 0x228   :  { %v223_v10 = vmul.f32 %v294_v8, %v191_v45 }
 0x22a   :  { %v234_v12 = vmul.f32 %v266_v9, %v223_v10 }
 0x22b   :  { %v296_v13 = vpop.eup %295 }
 0x22c   :  { %v298_v14 = vpop.eup %297  ;;  %v245_v15 = vadd.f32 %v267_v11, %v234_v12  ;;  %v224_v16 = vmul.f32 %v296_v13, %v192_v52 }
 0x22d   :  { %v225_v17 = vmul.f32 %v298_v14, %v193_v44 }
 0x22e   :  { %249 = vst.msk [vmem:[%s414_s6] sm:$0xff] %vm28_vm0, %v245_v15  ;;  %v235_v18 = vmul.f32 %v266_v9, %v224_v16 }
 0x22f   :  { %v300_v19 = vpop.eup %299  ;;  %v236_v20 = vmul.f32 %v266_v9, %v225_v17 }
 0x230   :  { %v246_v21 = vadd.f32 %v267_v11, %v235_v18  ;;  %v226_v22 = vmul.f32 %v300_v19, %v194_v51 }
 0x231   :  { %v247_v23 = vadd.f32 %v267_v11, %v236_v20 }
 0x232   :  { %250 = vst.msk [vmem:[%s414_s6 + $0x8] sm:$0xff] %vm28_vm0, %v246_v21  ;;  %v237_v24 = vmul.f32 %v266_v9, %v226_v22 }
 0x233   :  { %251 = vst.msk [vmem:[%s414_s6 + $0x10] sm:$0xff] %vm28_vm0, %v247_v23 }
 0x234   :  { %v248_v25 = vadd.f32 %v267_v11, %v237_v24 }
 0x236   :  { %252 = vst.msk [vmem:[%s414_s6 + $0x18] sm:$0xff] %vm28_vm0, %v248_v25 }

// kernel: multimodal_forward.117
= control target key start
LH: loop header
LB: loop body
LE: loop exit
PB: predicated region body
PF: predicated region fallthrough
CT: control target
= control target key end

     0   :  { %vm25_vm0 = vcmask 261120   ;;  %v524_v1 = vmov 0.0   ;;  %vm429_vm1 = vcmask 257024   ;;  %s758_s1 = inlined_call_operand.vmem [shape: bf16[32,32], index: 1, kind: input, shape index: {}]   ;;  %s759_s0 = inlined_call_operand.vmem [shape: f32[64,32], index: 0, kind: input, shape index: {}]   ;;  %s760_s2 = inlined_call_operand.vmem [shape: f32[1,32], index: 2, kind: input, shape index: {}]   ;;  %s761_s3 = inlined_call_operand.vmem [shape: f32[1,32], index: 3, kind: input, shape index: {}]   ;;  %s762_s4 = inlined_call_operand.vmem [shape: f32[1,32], index: 4, kind: input, shape index: {}]   ;;  %s763_s5 = inlined_call_operand.vmem [shape: bf16[64,32], index: 5, kind: output, shape index: {}]  }
   0x1   :  { %v490_v0 = vld [vmem:[%s758_s1] sm:$0xff]   ;;  %28 = vst.msk [vmem:[#allocation2 + $0x10] sm:$0xff] %vm25_vm0, %v524_v1  ;;  %26 = vst.msk [vmem:[#allocation2] sm:$0xff] %vm25_vm0, %v524_v1  ;;  %v491_v2 = vld [vmem:[%s758_s1 + $0x8] sm:$0xff]  }
   0x2   :  { %27 = vst.msk [vmem:[#allocation2 + $0x8] sm:$0xff] %vm25_vm0, %v524_v1  ;;  %29 = vst.msk [vmem:[#allocation2 + $0x18] sm:$0xff] %vm25_vm0, %v524_v1  ;;  %473 = vmatprep.subr.bf16.mxu0 %v490_v0  ;;  %485 = vmatprep.subr.bf16.mxu1 %v490_v0  ;;  %v42_v3 = vld [vmem:[%s759_s0] sm:$0xff]  ;;  %v43_v4 = vld [vmem:[%s759_s0 + $0x8] sm:$0xff] }
   0x3   :  { %30 = vst.msk [vmem:[#allocation2 + $0x20] sm:$0xff] %vm25_vm0, %v524_v1  ;;  %31 = vst.msk [vmem:[#allocation2 + $0x28] sm:$0xff] %vm25_vm0, %v524_v1  ;;  %v46_v5 = vld [vmem:[%s759_s0 + $0x20] sm:$0xff]  ;;  %474 = vmatpush3.bf16.msra.mxu0 %v490_v0  ;;  %487 = vmatpush3.bf16.msra.mxu1 %v490_v0  ;;  %v50_v6 = vpack.c.bf16 %v43_v4, %v42_v3  ;;  %v47_v7 = vld [vmem:[%s759_s0 + $0x28] sm:$0xff] }
   0x4   :  { %32 = vst.msk [vmem:[#allocation2 + $0x30] sm:$0xff] %vm25_vm0, %v524_v1  ;;  %33 = vst.msk [vmem:[#allocation2 + $0x38] sm:$0xff] %vm25_vm0, %v524_v1  ;;  %v44_v8 = vld [vmem:[%s759_s0 + $0x10] sm:$0xff]  ;;  %v45_v9 = vld [vmem:[%s759_s0 + $0x18] sm:$0xff]  ;;  %475 = vmatprep.subr.bf16.mxu0 %v491_v2  ;;  %486 = vmatprep.subr.bf16.mxu1 %v491_v2  ;;  %v52_v10 = vpack.c.bf16 %v47_v7, %v46_v5 }
   0x5   :  { %v48_v11 = vld [vmem:[%s759_s0 + $0x30] sm:$0xff]  ;;  %v49_v12 = vld [vmem:[%s759_s0 + $0x38] sm:$0xff]  ;;  %477 = vmatprep.mubr.msk.bf16.mxu0 %vm25_vm0, %v50_v6  ;;  %v51_v13 = vpack.c.bf16 %v45_v9, %v44_v8  ;;  %v448_v39 = vld [vmem:[%s760_s2] ss:$0 sm:$0xff] }
   0x6   :  { %481 = vmatprep.mubr.msk.bf16.mxu1 %vm25_vm0, %v52_v10  ;;  %v53_v14 = vpack.c.bf16 %v49_v12, %v48_v11 }
   0x7   :  { %476 = vmatpush3.bf16.msra.mxu0 %v491_v2  ;;  %488 = vmatpush3.bf16.msra.mxu1 %v491_v2 }
   0x8   :  { %v36_v15 = vld [vmem:[#allocation2 + $0x10] sm:$0xff]  ;;  %v34_v17 = vld [vmem:[#allocation2] sm:$0xff] }
   0x9   :  { %v37_v21 = vld [vmem:[#allocation2 + $0x18] sm:$0xff]  ;;  %v35_v27 = vld [vmem:[#allocation2 + $0x8] sm:$0xff] }
   0xa   :  { %478 = vmatmul.mubr.msk.bf16.vlgmr.msra.gmra.mrb[0].mxu0 %vm25_vm0, %v51_v13  ;;  %482 = vmatmul.mubr.msk.bf16.vlgmr.msra.gmra.mrb[0].mxu1 %vm25_vm0, %v53_v14  ;;  %v38_v18 = vld [vmem:[#allocation2 + $0x20] sm:$0xff]  ;;  %v39_v28 = vld [vmem:[#allocation2 + $0x28] sm:$0xff] }
   0xb   :  { %v40_v16 = vld [vmem:[#allocation2 + $0x30] sm:$0xff]  ;;  %v41_v22 = vld [vmem:[#allocation2 + $0x38] sm:$0xff] }
  0xdd   :  { %v479_v19 = vpop.f32.mrb[0].mxu0  ;;  %v483_v20 = vpop.f32.mrb[0].mxu1 }
  0xde   :  { %v150_v23 = vadd.f32 %v479_v19, %v36_v15  ;;  %v154_v24 = vadd.f32 %v483_v20, %v40_v16  ;;  %v117_v25 = vpop.f32.mrb[1].mxu0  ;;  %v133_v26 = vpop.f32.mrb[1].mxu1 }
  0xdf   :  { %v148_v29 = vadd.f32 %v117_v25, %v34_v17  ;;  %v152_v30 = vadd.f32 %v133_v26, %v38_v18  ;;  %v480_v31 = vpop.f32.mrb[2].mxu0  ;;  %v484_v32 = vpop.f32.mrb[2].mxu1 }
  0xe0   :  { %158 = vst.msk [vmem:[#allocation2 + $0x10] sm:$0xff] %vm25_vm0, %v150_v23  ;;  %162 = vst.msk [vmem:[#allocation2 + $0x30] sm:$0xff] %vm25_vm0, %v154_v24  ;;  %v151_v33 = vadd.f32 %v480_v31, %v37_v21  ;;  %v155_v34 = vadd.f32 %v484_v32, %v41_v22  ;;  %v120_v35 = vpop.f32.mrb[3].mxu0  ;;  %v136_v36 = vpop.f32.mrb[3].mxu1 }
  0xe1   :  { %156 = vst.msk [vmem:[#allocation2] sm:$0xff] %vm25_vm0, %v148_v29  ;;  %160 = vst.msk [vmem:[#allocation2 + $0x20] sm:$0xff] %vm25_vm0, %v152_v30  ;;  %v149_v37 = vadd.f32 %v120_v35, %v35_v27  ;;  %v153_v38 = vadd.f32 %v136_v36, %v39_v28 }
  0xe2   :  { %159 = vst.msk [vmem:[#allocation2 + $0x18] sm:$0xff] %vm25_vm0, %v151_v33  ;;  %163 = vst.msk [vmem:[#allocation2 + $0x38] sm:$0xff] %vm25_vm0, %v155_v34 }
  0xe3   :  { %157 = vst.msk [vmem:[#allocation2 + $0x8] sm:$0xff] %vm25_vm0, %v149_v37  ;;  %161 = vst.msk [vmem:[#allocation2 + $0x28] sm:$0xff] %vm25_vm0, %v153_v38 }
  0xe7   :  { %v169_v40 = vld [vmem:[#allocation2 + $0x10] sm:$0xff] }
  0xe8   :  { %v608_v41 = vadd.f32 %v448_v39, %v169_v40  ;;  %v167_v42 = vld [vmem:[#allocation2] sm:$0xff]  ;;  %v173_v58 = vld [vmem:[#allocation2 + $0x30] sm:$0xff] }
  0xe9   :  { %v171_v43 = vld [vmem:[#allocation2 + $0x20] sm:$0xff]  ;;  %v610_v44 = vadd.f32 %v448_v39, %v167_v42  ;;  %v170_v45 = vld [vmem:[#allocation2 + $0x18] sm:$0xff]  ;;  %v635_v4 = vadd.f32 %v448_v39, %v173_v58 }
  0xea   :  { %v612_v46 = vadd.f32 %v448_v39, %v171_v43  ;;  %v174_v47 = vld [vmem:[#allocation2 + $0x38] sm:$0xff]  ;;  %v200_v48 = vmul.f32 0.044715, %v608_v41  ;;  %v615_v49 = vadd.f32 %v448_v39, %v170_v45  ;;  %v172_v50 = vld [vmem:[#allocation2 + $0x28] sm:$0xff]  ;;  %v192_v34 = vmul.f32 0.5, %v608_v41 }
  0xeb   :  { %v168_v51 = vld [vmem:[#allocation2 + $0x8] sm:$0xff]  ;;  %v198_v52 = vmul.f32 0.044715, %v610_v44  ;;  %v621_v56 = vadd.f32 %v448_v39, %v172_v50  ;;  %v623_v57 = vadd.f32 %v448_v39, %v174_v47  ;;  %v204_v19 = vmul.f32 0.044715, %v635_v4 }
  0xec   :  { %v202_v53 = vmul.f32 0.044715, %v612_v46  ;;  %v208_v54 = vmul.f32 %v200_v48, %v608_v41  ;;  %v201_v55 = vmul.f32 0.044715, %v615_v49  ;;  %v627_v61 = vadd.f32 %v448_v39, %v168_v51 }
  0xed   :  { %v206_v59 = vmul.f32 %v198_v52, %v610_v44  ;;  %v203_v0 = vmul.f32 0.044715, %v621_v56  ;;  %v205_v8 = vmul.f32 0.044715, %v623_v57  ;;  %v212_v24 = vmul.f32 %v204_v19, %v635_v4 }
  0xee   :  { %v210_v60 = vmul.f32 %v202_v53, %v612_v46  ;;  %v216_v62 = vmul.f32 %v208_v54, %v608_v41  ;;  %v209_v63 = vmul.f32 %v201_v55, %v615_v49  ;;  %v199_v3 = vmul.f32 0.044715, %v627_v61 }
  0xef   :  { %v214_v1 = vmul.f32 %v206_v59, %v610_v44  ;;  %v211_v7 = vmul.f32 %v203_v0, %v621_v56  ;;  %v213_v15 = vmul.f32 %v205_v8, %v623_v57  ;;  %v220_v28 = vmul.f32 %v212_v24, %v635_v4 }
  0xf0   :  { %v218_v2 = vmul.f32 %v210_v60, %v612_v46  ;;  %v224_v5 = vadd.f32 %v216_v62, %v608_v41  ;;  %v217_v6 = vmul.f32 %v209_v63, %v615_v49  ;;  %v207_v11 = vmul.f32 %v199_v3, %v627_v61 }
  0xf1   :  { %v222_v9 = vadd.f32 %v214_v1, %v610_v44  ;;  %v219_v14 = vmul.f32 %v211_v7, %v621_v56  ;;  %v221_v22 = vmul.f32 %v213_v15, %v623_v57  ;;  %v228_v30 = vadd.f32 %v220_v28, %v635_v4 }
  0xf2   :  { %v226_v10 = vadd.f32 %v218_v2, %v612_v46  ;;  %v232_v12 = vmul.f32 0.7978846, %v224_v5  ;;  %v225_v13 = vadd.f32 %v217_v6, %v615_v49  ;;  %v215_v18 = vmul.f32 %v207_v11, %v627_v61 }
  0xf3   :  { %v230_v16 = vmul.f32 0.7978846, %v222_v9  ;;  %v227_v21 = vadd.f32 %v219_v14, %v621_v56  ;;  %v229_v26 = vadd.f32 %v221_v22, %v623_v57  ;;  %v236_v31 = vmul.f32 0.7978846, %v228_v30 }
  0xf4   :  { %v234_v17 = vmul.f32 0.7978846, %v226_v10  ;;  %492 = vtanh.f32 %v232_v12  ;;  %v233_v20 = vmul.f32 0.7978846, %v225_v13  ;;  %v223_v23 = vadd.f32 %v215_v18, %v627_v61 }
  0xf5   :  { %494 = vtanh.f32 %v230_v16  ;;  %v235_v25 = vmul.f32 0.7978846, %v227_v21  ;;  %v237_v29 = vmul.f32 0.7978846, %v229_v26  ;;  %v190_v37 = vmul.f32 0.5, %v610_v44 }
  0xf6   :  { %496 = vtanh.f32 %v233_v20  ;;  %v231_v27 = vmul.f32 0.7978846, %v223_v23  ;;  %v193_v42 = vmul.f32 0.5, %v615_v49  ;;  %v194_v48 = vmul.f32 0.5, %v612_v46 }
  0xf7   :  { %498 = vtanh.f32 %v234_v17  ;;  %v195_v49 = vmul.f32 0.5, %v621_v56  ;;  %v191_v59 = vmul.f32 0.5, %v627_v61  ;;  %v197_v3 = vmul.f32 0.5, %v623_v57 }
  0xf8   :  { %500 = vtanh.f32 %v235_v25  ;;  %v196_v5 = vmul.f32 0.5, %v635_v4 }
  0xf9   :  { %502 = vtanh.f32 %v231_v27 }
  0xfa   :  { %504 = vtanh.f32 %v237_v29 }
  0xfb   :  { %506 = vtanh.f32 %v236_v31 }
  0xfe   :  { %v493_v32 = vpop.eup %492 }
  0xff   :  { %v495_v33 = vpop.eup %494  ;;  %v248_v35 = vadd.f32 1.0, %v493_v32 }
 0x100   :  { %v497_v36 = vpop.eup %496  ;;  %v246_v38 = vadd.f32 1.0, %v495_v33 }
 0x101   :  { %v499_v39 = vpop.eup %498  ;;  %v256_v40 = vmul.f32 %v248_v35, %v192_v34  ;;  %v249_v43 = vadd.f32 1.0, %v497_v36 }
 0x102   :  { %v501_v45 = vpop.eup %500  ;;  %v254_v47 = vmul.f32 %v246_v38, %v190_v37  ;;  %v250_v50 = vadd.f32 1.0, %v499_v39 }
 0x103   :  { %v503_v51 = vpop.eup %502  ;;  %v268_v52 = vsel %vm25_vm0, %v256_v40, 0.0  ;;  %v257_v53 = vmul.f32 %v249_v43, %v193_v42  ;;  %v251_v41 = vadd.f32 1.0, %v501_v45 }
 0x104   :  { %v505_v54 = vpop.eup %504  ;;  %269 = vadd.xlane.f32.xlu1 %v268_v52  ;;  %v262_v44 = vsel %vm25_vm0, %v254_v47, 0.0  ;;  %v258_v55 = vmul.f32 %v250_v50, %v194_v48  ;;  %v247_v58 = vadd.f32 1.0, %v503_v51 }
 0x105   :  { %263 = vadd.xlane.f32.xlu0 %v262_v44  ;;  %v507_v60 = vpop.eup %506  ;;  %v271_v46 = vsel %vm25_vm0, %v257_v53, 0.0  ;;  %v259_v62 = vmul.f32 %v251_v41, %v195_v49  ;;  %v253_v63 = vadd.f32 1.0, %v505_v54 }
 0x106   :  { %v274_v0 = vsel %vm25_vm0, %v258_v55, 0.0  ;;  %v255_v1 = vmul.f32 %v247_v58, %v191_v59  ;;  %v252_v2 = vadd.f32 1.0, %v507_v60 }
 0x107   :  { %v277_v6 = vsel %vm25_vm0, %v259_v62, 0.0  ;;  %v261_v56 = vmul.f32 %v253_v63, %v197_v3 }
 0x108   :  { %272 = vadd.xlane.f32.xlu1 %v271_v46  ;;  %v265_v61 = vsel %vm25_vm0, %v255_v1, 0.0  ;;  %v260_v7 = vmul.f32 %v252_v2, %v196_v5 }
 0x109   :  { %275 = vadd.xlane.f32.xlu0 %v274_v0  ;;  %v283_v8 = vsel %vm25_vm0, %v261_v56, 0.0 }
 0x10a   :  { %v280_v9 = vsel %vm25_vm0, %v260_v7, 0.0 }
 0x10c   :  { %278 = vadd.xlane.f32.xlu1 %v277_v6 }
 0x10d   :  { %266 = vadd.xlane.f32.xlu0 %v265_v61  ;;  %v449_v61 = vld [vmem:[%s761_s3] ss:$0 sm:$0xff] }
 0x110   :  { %284 = vadd.xlane.f32.xlu1 %v283_v8 }
 0x111   :  { %281 = vadd.xlane.f32.xlu0 %v280_v9 }
 0x191   :  { %v270_v10 = vpop.xlane.xlu1 %269 }
 0x192   :  { %v289_v11 = vmul.f32 0.03125, %v270_v10  ;;  %v264_v12 = vpop.xlane.xlu0 %263  ;;  %v450_v10 = vld [vmem:[%s762_s4] ss:$0 sm:$0xff] }
 0x193   :  { %v287_v57 = vmul.f32 0.03125, %v264_v12 }
 0x194   :  { %v672_v13 = vsub.f32 %v256_v40, %v289_v11 }
 0x195   :  { %v674_v4 = vsub.f32 %v254_v47, %v287_v57  ;;  %v273_v14 = vpop.xlane.xlu1 %272 }
 0x196   :  { %v290_v15 = vmul.f32 0.03125, %v273_v14  ;;  %v276_v16 = vpop.xlane.xlu0 %275  ;;  %v305_v17 = vmul.f32 %v672_v13, %v672_v13 }
 0x197   :  { %v291_v18 = vmul.f32 0.03125, %v276_v16  ;;  %v303_v21 = vmul.f32 %v674_v4, %v674_v4 }
 0x198   :  { %v678_v19 = vsub.f32 %v257_v53, %v290_v15  ;;  %v317_v20 = vsel %vm25_vm0, %v305_v17, 0.0 }
 0x199   :  { %v683_v22 = vsub.f32 %v258_v55, %v291_v18  ;;  %v279_v23 = vpop.xlane.xlu1 %278  ;;  %318 = vadd.xlane.f32.xlu0 %v317_v20  ;;  %v311_v29 = vsel %vm25_vm0, %v303_v21, 0.0 }
 0x19a   :  { %v292_v24 = vmul.f32 0.03125, %v279_v23  ;;  %v267_v25 = vpop.xlane.xlu0 %266  ;;  %v306_v26 = vmul.f32 %v678_v19, %v678_v19 }
 0x19b   :  { %v288_v27 = vmul.f32 0.03125, %v267_v25  ;;  %v307_v30 = vmul.f32 %v683_v22, %v683_v22 }
 0x19c   :  { %v320_v28 = vsel %vm25_vm0, %v306_v26, 0.0  ;;  %v691_v31 = vsub.f32 %v259_v62, %v292_v24 }
 0x19d   :  { %v693_v32 = vsub.f32 %v255_v1, %v288_v27  ;;  %321 = vadd.xlane.f32.xlu1 %v320_v28  ;;  %v285_v33 = vpop.xlane.xlu1 %284  ;;  %312 = vadd.xlane.f32.xlu0 %v311_v29  ;;  %v323_v38 = vsel %vm25_vm0, %v307_v30, 0.0 }
 0x19e   :  { %v294_v34 = vmul.f32 0.03125, %v285_v33  ;;  %v282_v35 = vpop.xlane.xlu0 %281  ;;  %v308_v43 = vmul.f32 %v691_v31, %v691_v31 }
 0x19f   :  { %v293_v36 = vmul.f32 0.03125, %v282_v35  ;;  %v304_v37 = vmul.f32 %v693_v32, %v693_v32 }
 0x1a0   :  { %v698_v39 = vsub.f32 %v261_v56, %v294_v34  ;;  %v326_v47 = vsel %vm25_vm0, %v308_v43, 0.0 }
 0x1a1   :  { %v700_v40 = vsub.f32 %v260_v7, %v293_v36  ;;  %324 = vadd.xlane.f32.xlu0 %v323_v38  ;;  %v314_v42 = vsel %vm25_vm0, %v304_v37, 0.0 }
 0x1a2   :  { %315 = vadd.xlane.f32.xlu1 %v314_v42  ;;  %v310_v50 = vmul.f32 %v698_v39, %v698_v39 }
 0x1a3   :  { %v309_v45 = vmul.f32 %v700_v40, %v700_v40 }
 0x1a4   :  { %v332_v51 = vsel %vm25_vm0, %v310_v50, 0.0 }
 0x1a5   :  { %v329_v48 = vsel %vm25_vm0, %v309_v45, 0.0 }
 0x1a6   :  { %327 = vadd.xlane.f32.xlu1 %v326_v47  ;;  %330 = vadd.xlane.f32.xlu0 %v329_v48 }
 0x1aa   :  { %333 = vadd.xlane.f32.xlu1 %v332_v51 }
 0x226   :  { %v319_v52 = vpop.xlane.xlu0 %318 }
 0x227   :  { %v337_v53 = vmul.f32 0.03125, %v319_v52 }
 0x229   :  { %v345_v41 = vadd.f32 1e-12, %v337_v53 }
 0x22a   :  { %v322_v54 = vpop.xlane.xlu1 %321  ;;  %v313_v44 = vpop.xlane.xlu0 %312 }
 0x22b   :  { %508 = vrsqrt.f32 %v345_v41  ;;  %v338_v55 = vmul.f32 0.03125, %v322_v54  ;;  %v335_v58 = vmul.f32 0.03125, %v313_v44 }
 0x22d   :  { %v346_v49 = vadd.f32 1e-12, %v338_v55  ;;  %v343_v59 = vadd.f32 1e-12, %v335_v58 }
 0x22e   :  { %v325_v60 = vpop.xlane.xlu0 %324 }
 0x22f   :  { %510 = vrsqrt.f32 %v346_v49  ;;  %v339_v46 = vmul.f32 0.03125, %v325_v60  ;;  %v316_v62 = vpop.xlane.xlu1 %315 }
 0x230   :  { %512 = vrsqrt.f32 %v343_v59  ;;  %v336_v63 = vmul.f32 0.03125, %v316_v62 }
 0x231   :  { %v347_v0 = vadd.f32 1e-12, %v339_v46 }
 0x232   :  { %v344_v1 = vadd.f32 1e-12, %v336_v63 }
 0x233   :  { %514 = vrsqrt.f32 %v347_v0  ;;  %v328_v2 = vpop.xlane.xlu1 %327  ;;  %v331_v3 = vpop.xlane.xlu0 %330 }
 0x234   :  { %516 = vrsqrt.f32 %v344_v1  ;;  %v340_v5 = vmul.f32 0.03125, %v328_v2  ;;  %v341_v6 = vmul.f32 0.03125, %v331_v3 }
 0x235   :  { %v509_v56 = vpop.eup %508 }
 0x236   :  { %v361_v7 = vmul.f32 %v509_v56, %v672_v13  ;;  %v348_v8 = vadd.f32 1e-12, %v340_v5  ;;  %v349_v9 = vadd.f32 1e-12, %v341_v6 }
 0x237   :  { %v334_v11 = vpop.xlane.xlu1 %333 }
 0x238   :  { %v376_v12 = vmul.f32 %v449_v61, %v361_v7  ;;  %518 = vrsqrt.f32 %v348_v8  ;;  %v342_v57 = vmul.f32 0.03125, %v334_v11 }
 0x239   :  { %v511_v14 = vpop.eup %510  ;;  %520 = vrsqrt.f32 %v349_v9 }
 0x23a   :  { %v513_v15 = vpop.eup %512  ;;  %v391_v16 = vadd.f32 %v450_v10, %v376_v12  ;;  %v362_v17 = vmul.f32 %v511_v14, %v678_v19  ;;  %v350_v18 = vadd.f32 1e-12, %v342_v57 }
 0x23b   :  { %v359_v13 = vmul.f32 %v513_v15, %v674_v4 }
 0x23c   :  { %v461_v20 = vpack.c.bf16 %v391_v16, %v391_v16  ;;  %v377_v21 = vmul.f32 %v449_v61, %v362_v17  ;;  %522 = vrsqrt.f32 %v350_v18 }
 0x23d   :  { %v515_v23 = vpop.eup %514  ;;  %v374_v24 = vmul.f32 %v449_v61, %v359_v13 }
 0x23e   :  { %v517_v25 = vpop.eup %516  ;;  %432 = vst.msk [vmem:[%s763_s5 + $0x8] sm:$0xf] %vm429_vm1, %v461_v20  ;;  %v392_v26 = vadd.f32 %v450_v10, %v377_v21  ;;  %v363_v27 = vmul.f32 %v515_v23, %v683_v22 }
 0x23f   :  { %v389_v28 = vadd.f32 %v450_v10, %v374_v24  ;;  %v360_v19 = vmul.f32 %v517_v25, %v693_v32 }
 0x240   :  { %v462_v29 = vpack.c.bf16 %v392_v26, %v392_v26  ;;  %v378_v30 = vmul.f32 %v449_v61, %v363_v27 }
 0x241   :  { %v459_v4 = vpack.c.bf16 %v389_v28, %v389_v28  ;;  %v375_v33 = vmul.f32 %v449_v61, %v360_v19 }
 0x242   :  { %v519_v34 = vpop.eup %518  ;;  %433 = vst.msk [vmem:[%s763_s5 + $0xc] sm:$0xf] %vm429_vm1, %v462_v29  ;;  %v393_v35 = vadd.f32 %v450_v10, %v378_v30 }
 0x243   :  { %v521_v36 = vpop.eup %520  ;;  %430 = vst.msk [vmem:[%s763_s5] sm:$0xf] %vm429_vm1, %v459_v4  ;;  %v390_v22 = vadd.f32 %v450_v10, %v375_v33  ;;  %v364_v32 = vmul.f32 %v519_v34, %v691_v31 }
 0x244   :  { %v463_v37 = vpack.c.bf16 %v393_v35, %v393_v35  ;;  %v365_v38 = vmul.f32 %v521_v36, %v700_v40 }
 0x245   :  { %v460_v42 = vpack.c.bf16 %v390_v22, %v390_v22  ;;  %v379_v43 = vmul.f32 %v449_v61, %v364_v32 }
 0x246   :  { %v523_v45 = vpop.eup %522  ;;  %434 = vst.msk [vmem:[%s763_s5 + $0x10] sm:$0xf] %vm429_vm1, %v463_v37  ;;  %v380_v47 = vmul.f32 %v449_v61, %v365_v38 }
 0x247   :  { %431 = vst.msk [vmem:[%s763_s5 + $0x4] sm:$0xf] %vm429_vm1, %v460_v42  ;;  %v394_v48 = vadd.f32 %v450_v10, %v379_v43  ;;  %v366_v31 = vmul.f32 %v523_v45, %v698_v39 }
 0x248   :  { %v395_v50 = vadd.f32 %v450_v10, %v380_v47 }
 0x249   :  { %v464_v51 = vpack.c.bf16 %v394_v48, %v394_v48  ;;  %v381_v40 = vmul.f32 %v449_v61, %v366_v31 }
 0x24a   :  { %v465_v52 = vpack.c.bf16 %v395_v50, %v395_v50 }
 0x24b   :  { %435 = vst.msk [vmem:[%s763_s5 + $0x14] sm:$0xf] %vm429_vm1, %v464_v51  ;;  %v396_v53 = vadd.f32 %v450_v10, %v381_v40 }
 0x24c   :  { %436 = vst.msk [vmem:[%s763_s5 + $0x18] sm:$0xf] %vm429_vm1, %v465_v52 }
 0x24d   :  { %v466_v41 = vpack.c.bf16 %v396_v53, %v396_v53 }
 0x24f   :  { %437 = vst.msk [vmem:[%s763_s5 + $0x1c] sm:$0xf] %vm429_vm1, %v466_v41 }

// kernel: multimodal_forward.118
= control target key start
LH: loop header
LB: loop body
LE: loop exit
PB: predicated region body
PF: predicated region fallthrough
CT: control target
= control target key end

     0   :  { %vm19_vm0 = vcmask 523264   ;;  %v253_v1 = vmov 0.0   ;;  %vm80_vm1 = vcmask 261120   ;;  %s343_s1 = inlined_call_operand.vmem [shape: bf16[32,64], index: 1, kind: input, shape index: {}]   ;;  %s344_s0 = inlined_call_operand.vmem [shape: bf16[64,32], index: 0, kind: input, shape index: {}]   ;;  %s345_s2 = inlined_call_operand.vmem [shape: f32[1,64], index: 2, kind: input, shape index: {}]   ;;  %s346_s3 = inlined_call_operand.vmem [shape: f32[64,64], index: 3, kind: output, shape index: {}]  }
   0x1   :  { %v247_v0 = vld [vmem:[%s343_s1] sm:$0xff]   ;;  %22 = vst.msk [vmem:[#allocation2 + $0x10] sm:$0xff] %vm19_vm0, %v253_v1  ;;  %20 = vst.msk [vmem:[#allocation2] sm:$0xff] %vm19_vm0, %v253_v1  ;;  %v248_v2 = vld [vmem:[%s343_s1 + $0x8] sm:$0xff]  }
   0x2   :  { %21 = vst.msk [vmem:[#allocation2 + $0x8] sm:$0xff] %vm19_vm0, %v253_v1  ;;  %23 = vst.msk [vmem:[#allocation2 + $0x18] sm:$0xff] %vm19_vm0, %v253_v1  ;;  %230 = vmatprep.subr.bf16.mxu0 %v247_v0  ;;  %242 = vmatprep.subr.bf16.mxu1 %v247_v0  ;;  %v249_v3 = vld [vmem:[%s344_s0] sm:$0xff]   ;;  %v250_v4 = vld [vmem:[%s344_s0 + $0x10] sm:$0xff]  }
   0x3   :  { %24 = vst.msk [vmem:[#allocation2 + $0x20] sm:$0xff] %vm19_vm0, %v253_v1  ;;  %25 = vst.msk [vmem:[#allocation2 + $0x28] sm:$0xff] %vm19_vm0, %v253_v1  ;;  %231 = vmatpush3.bf16.msra.mxu0 %v247_v0  ;;  %244 = vmatpush3.bf16.msra.mxu1 %v247_v0  ;;  %v251_v5 = vld [vmem:[%s344_s0 + $0x8] sm:$0xff]   ;;  %v252_v6 = vld [vmem:[%s344_s0 + $0x18] sm:$0xff]  }
   0x4   :  { %26 = vst.msk [vmem:[#allocation2 + $0x30] sm:$0xff] %vm19_vm0, %v253_v1  ;;  %27 = vst.msk [vmem:[#allocation2 + $0x38] sm:$0xff] %vm19_vm0, %v253_v1  ;;  %232 = vmatprep.subr.bf16.mxu0 %v248_v2  ;;  %243 = vmatprep.subr.bf16.mxu1 %v248_v2  ;;  %v223_v31 = vld [vmem:[%s345_s2] ss:$0 sm:$0xff] }
   0x5   :  { %234 = vmatprep.mubr.msk.bf16.mxu0 %vm80_vm1, %v249_v3  ;;  %238 = vmatprep.mubr.msk.bf16.mxu1 %vm80_vm1, %v250_v4 }
   0x7   :  { %233 = vmatpush3.bf16.msra.mxu0 %v248_v2  ;;  %245 = vmatpush3.bf16.msra.mxu1 %v248_v2 }
   0x8   :  { %v30_v7 = vld [vmem:[#allocation2 + $0x10] sm:$0xff]  ;;  %v28_v9 = vld [vmem:[#allocation2] sm:$0xff] }
   0x9   :  { %v31_v13 = vld [vmem:[#allocation2 + $0x18] sm:$0xff]  ;;  %v29_v19 = vld [vmem:[#allocation2 + $0x8] sm:$0xff] }
   0xa   :  { %235 = vmatmul.mubr.msk.bf16.vlgmr.msra.gmra.mrb[0].mxu0 %vm80_vm1, %v251_v5  ;;  %239 = vmatmul.mubr.msk.bf16.vlgmr.msra.gmra.mrb[0].mxu1 %vm80_vm1, %v252_v6  ;;  %v32_v10 = vld [vmem:[#allocation2 + $0x20] sm:$0xff]  ;;  %v33_v20 = vld [vmem:[#allocation2 + $0x28] sm:$0xff] }
   0xb   :  { %v34_v8 = vld [vmem:[#allocation2 + $0x30] sm:$0xff]  ;;  %v35_v14 = vld [vmem:[#allocation2 + $0x38] sm:$0xff] }
  0xdd   :  { %v236_v11 = vpop.f32.mrb[0].mxu0  ;;  %v240_v12 = vpop.f32.mrb[0].mxu1 }
  0xde   :  { %v160_v15 = vadd.f32 %v236_v11, %v30_v7  ;;  %v164_v16 = vadd.f32 %v240_v12, %v34_v8  ;;  %v127_v17 = vpop.f32.mrb[1].mxu0  ;;  %v143_v18 = vpop.f32.mrb[1].mxu1 }
  0xdf   :  { %v158_v21 = vadd.f32 %v127_v17, %v28_v9  ;;  %v162_v22 = vadd.f32 %v143_v18, %v32_v10  ;;  %v237_v23 = vpop.f32.mrb[2].mxu0  ;;  %v241_v24 = vpop.f32.mrb[2].mxu1 }
  0xe0   :  { %169 = vst.msk [vmem:[#allocation2 + $0x10] sm:$0xff] %vm19_vm0, %v160_v15  ;;  %173 = vst.msk [vmem:[#allocation2 + $0x30] sm:$0xff] %vm19_vm0, %v164_v16  ;;  %v161_v25 = vadd.f32 %v237_v23, %v31_v13  ;;  %v165_v26 = vadd.f32 %v241_v24, %v35_v14  ;;  %v130_v27 = vpop.f32.mrb[3].mxu0  ;;  %v146_v28 = vpop.f32.mrb[3].mxu1 }
  0xe1   :  { %167 = vst.msk [vmem:[#allocation2] sm:$0xff] %vm19_vm0, %v158_v21  ;;  %171 = vst.msk [vmem:[#allocation2 + $0x20] sm:$0xff] %vm19_vm0, %v162_v22  ;;  %v159_v29 = vadd.f32 %v130_v27, %v29_v19  ;;  %v163_v30 = vadd.f32 %v146_v28, %v33_v20 }
  0xe2   :  { %170 = vst.msk [vmem:[#allocation2 + $0x18] sm:$0xff] %vm19_vm0, %v161_v25  ;;  %174 = vst.msk [vmem:[#allocation2 + $0x38] sm:$0xff] %vm19_vm0, %v165_v26 }
  0xe3   :  { %168 = vst.msk [vmem:[#allocation2 + $0x8] sm:$0xff] %vm19_vm0, %v159_v29  ;;  %172 = vst.msk [vmem:[#allocation2 + $0x28] sm:$0xff] %vm19_vm0, %v163_v30 }
  0xe7   :  { %v180_v32 = vld [vmem:[#allocation2 + $0x10] sm:$0xff] }
  0xe8   :  { %v184_v33 = vld [vmem:[#allocation2 + $0x30] sm:$0xff]  ;;  %v195_v34 = vadd.f32 %v223_v31, %v180_v32  ;;  %v178_v36 = vld [vmem:[#allocation2] sm:$0xff] }
  0xe9   :  { %v199_v35 = vadd.f32 %v223_v31, %v184_v33  ;;  %v182_v37 = vld [vmem:[#allocation2 + $0x20] sm:$0xff]  ;;  %v193_v38 = vadd.f32 %v223_v31, %v178_v36  ;;  %v181_v40 = vld [vmem:[#allocation2 + $0x18] sm:$0xff] }
  0xea   :  { %v197_v39 = vadd.f32 %v223_v31, %v182_v37  ;;  %v185_v41 = vld [vmem:[#allocation2 + $0x38] sm:$0xff]  ;;  %203 = vst.msk [vmem:[%s346_s3 + $0x10] sm:$0xff] %vm19_vm0, %v195_v34  ;;  %v196_v42 = vadd.f32 %v223_v31, %v181_v40  ;;  %v179_v44 = vld [vmem:[#allocation2 + $0x8] sm:$0xff] }
  0xeb   :  { %207 = vst.msk [vmem:[%s346_s3 + $0x30] sm:$0xff] %vm19_vm0, %v199_v35  ;;  %v200_v43 = vadd.f32 %v223_v31, %v185_v41  ;;  %v183_v45 = vld [vmem:[#allocation2 + $0x28] sm:$0xff]  ;;  %201 = vst.msk [vmem:[%s346_s3] sm:$0xff] %vm19_vm0, %v193_v38  ;;  %v194_v46 = vadd.f32 %v223_v31, %v179_v44 }
  0xec   :  { %205 = vst.msk [vmem:[%s346_s3 + $0x20] sm:$0xff] %vm19_vm0, %v197_v39  ;;  %v198_v47 = vadd.f32 %v223_v31, %v183_v45  ;;  %204 = vst.msk [vmem:[%s346_s3 + $0x18] sm:$0xff] %vm19_vm0, %v196_v42 }
  0xed   :  { %208 = vst.msk [vmem:[%s346_s3 + $0x38] sm:$0xff] %vm19_vm0, %v200_v43  ;;  %202 = vst.msk [vmem:[%s346_s3 + $0x8] sm:$0xff] %vm19_vm0, %v194_v46 }
  0xee   :  { %206 = vst.msk [vmem:[%s346_s3 + $0x28] sm:$0xff] %vm19_vm0, %v198_v47 }

</bundles_post_ra>
